<compile_context>
chip_gen: v6e
topology: v6e:2x2x1
jax: 0.10.0
libtpu: 0.0.40
codegen_flags: <defaults>
</compile_context>

<pallas_src>
import numpy as np
import jax
import jax.numpy as jnp
from jax.experimental import pallas as pl
from jax.experimental.pallas import tpu as pltpu

NEG_SLOPE = 0.01  # F.leaky_relu default negative_slope


def _lrelu(v):
    # leaky_relu(v) == max(v, slope*v) for 0 < slope < 1 (no compare+select).
    return jnp.maximum(v, NEG_SLOPE * v)


def _round_up(x, m):
    return (x + m - 1) // m * m


def _pick_block(n, cap=8):
    """Largest divisor b of n with b <= cap and n // b >= 2 (keeps >=2 grid
    steps so both v7x TensorCores receive work); falls back to 1."""
    for b in (8, 4, 2, 1):
        if b <= cap and n % b == 0 and n // b >= 2:
            return b
    return 1


# ---------------------------------------------------------------------------
# Kernel 1: conv1 (reflect pad 2, k=5, s=2) as one MXU matmul + bias + lrelu.
# ---------------------------------------------------------------------------
def _conv1_kernel(a_ref, w_ref, b_ref, o_ref):
    y = jnp.dot(a_ref[...], w_ref[...], preferred_element_type=jnp.float32)
    o_ref[...] = _lrelu(y + b_ref[...])


# ---------------------------------------------------------------------------
# Kernel 2: fused conv2 + conv3 + (upsample + reflect-pad + conv4 folded into
#           Wfold) + conv4 bias + residual.
# ---------------------------------------------------------------------------
def _tail_kernel(h1_ref, res_ref, w2_ref, b2_ref, w3_ref, b3_ref, wf_ref, o_ref):
    # conv2: k=gfs over the whole gfs x gfs map -> one matmul.  Kept in f32
    # for the K=2048 contraction (correctness review).
    h2 = jnp.dot(h1_ref[...], w2_ref[...], preferred_element_type=jnp.float32)
    h2 = _lrelu(h2 + b2_ref[...]).astype(jnp.bfloat16)            # (B, HID)
    # conv3: ConvTranspose2d(k=gfs) acting on a 1x1 map -> one matmul.
    h3 = jnp.dot(h2, w3_ref[...], preferred_element_type=jnp.float32)
    h3 = _lrelu(h3 + b3_ref[...]).astype(jnp.bfloat16)            # (B, gfs*gfs*HID)
    # conv4 with x2-nearest-upsample + reflect-pad folded into wf at trace
    # time; columns ordered (cout, y, x) -> lane-dense NCHW store.  conv4 bias
    # and the residual x_init are pre-added into res_ref.
    y = jnp.dot(h3, wf_ref[...], preferred_element_type=jnp.float32)
    o_ref[...] = y + res_ref[...]


# ---------------------------------------------------------------------------
# Res_Global forward (Pallas)
# ---------------------------------------------------------------------------
def res_global_forward(x_nchw, params, gfs):
    w1, b1, w2, b2, w3, b3, w4, b4 = params
    N, Cin, H, W = x_nchw.shape
    HID = w1.shape[0]
    k = w1.shape[2]                      # 5
    pad = (k - 1) // 2                   # 2
    stride = 2

    # ---- trace-time glue: reflect pad + im2col for conv1 (NCHW, (ci,ky,kx)) ----
    xpad = jnp.pad(x_nchw, ((0, 0), (0, 0), (pad, pad), (pad, pad)), mode="reflect")
    ho1 = (H + 2 * pad - k) // stride + 1
    wo1 = (W + 2 * pad - k) // stride + 1
    cols = []
    for ky in range(k):
        for kx in range(k):
            cols.append(xpad[:, :, ky:ky + stride * ho1:stride,
                             kx:kx + stride * wo1:stride])        # (N, Cin, ho1, wo1)
    pat = jnp.stack(cols, axis=2)                                  # (N, Cin, k*k, ho1, wo1)
    a1 = jnp.transpose(pat, (0, 3, 4, 1, 2)).reshape(N, ho1 * wo1, Cin * k * k)
    Kc = Cin * k * k
    Kp = _round_up(Kc, 128)                                        # lane-align contraction
    a1 = jnp.pad(a1, ((0, 0), (0, 0), (0, Kp - Kc))).astype(jnp.bfloat16)
    w1m = jnp.pad(w1.reshape(HID, Kc).T, ((0, Kp - Kc), (0, 0))).astype(jnp.bfloat16)
    P = ho1 * wo1                                                  # 64

    assert ho1 == gfs and wo1 == gfs, (
        "conv2/conv3 collapse requires a gfs x gfs post-conv1 map "
        f"(got gfs={gfs}, map={ho1}x{wo1})")
    assert stride * gfs == H and stride * gfs == W, (
        "residual add requires conv4 output spatial == input spatial")

    # ---------------- Kernel 1: conv1 ----------------------------------------
    B1 = _pick_block(N)
    G1 = N // B1
    h1 = pl.pallas_call(
        _conv1_kernel,
        out_shape=jax.ShapeDtypeStruct((G1, B1 * P, HID), jnp.float32),
        grid=(G1,),
        in_specs=[pl.BlockSpec((None, B1 * P, Kp), lambda n: (n, 0, 0)),
                  pl.BlockSpec((Kp, HID), lambda n: (0, 0)),
                  pl.BlockSpec((1, HID), lambda n: (0, 0))],
        out_specs=pl.BlockSpec((None, B1 * P, HID), lambda n: (n, 0, 0)),
        compiler_params=pltpu.CompilerParams(dimension_semantics=("parallel",)),
    )(a1.reshape(G1, B1 * P, Kp), w1m, b1.reshape(1, HID))

    # TODO(synk): fully fusing conv1 into the tail kernel needs an in-kernel
    # (P, HID) -> (1, P*HID) lane relayout of h1; done here as a free XLA
    # reshape between the two pallas_calls for lowering robustness.
    h1f = h1.reshape(N, P * HID)                                   # (N, 2048), (y,x,c) flat

    # ---------------- trace-time weight prep for the fused tail ----------------
    D = gfs * gfs * HID
    # conv2 weight -> (D, HID), rows ordered (ky, kx, cin): matches h1f layout.
    w2m = jnp.transpose(w2, (2, 3, 1, 0)).reshape(D, HID)          # kept f32
    # ConvTranspose2d on a 1x1 map: h3[y,x,co] = sum_ci h2[ci] * w3[ci,co,y,x]
    w3m = jnp.transpose(w3, (0, 2, 3, 1)).reshape(HID, D).astype(jnp.bfloat16)
    b3t = jnp.tile(b3, gfs * gfs).reshape(1, D)

    # Fold x2-nearest-upsample + reflect-pad(2) + conv4 into one matrix Wfold.
    #   padded-upsampled map: hp[u, v, ci] = h3[g(u), g(v), ci]
    Hp = stride * gfs + 2 * pad
    u = np.arange(Hp)
    v = np.abs(u - pad)                                  # reflect at the low edge
    v = np.where(v > H - 1, 2 * (H - 1) - v, v)          # reflect at the high edge
    g = v // stride                                      # nearest-upsample source index
    Gmat = (g[:, None] == np.arange(gfs)[None, :]).astype(np.float32)   # (Hp, gfs)
    A = np.stack([Gmat[y:y + k] for y in range(H)], axis=0)             # (H, k, gfs)
    A = jnp.asarray(A, jnp.float32)
    # Wfold[ay,ax,ci,co,y,x] = sum_{dy,dx} w4[co,ci,dy,dx] * G[y+dy,ay] * G[x+dx,ax]
    wfold = jnp.einsum("oipq,ypa,xqb->abioyx", w4, A, A,
                       precision=jax.lax.Precision.HIGHEST)
    Mout = Cin * H * W
    wfold = wfold.reshape(D, Mout).astype(jnp.bfloat16)            # cols (co, y, x) = NCHW

    # conv4 bias + residual, NCHW-flat, pre-added (one lane-dense add in-kernel).
    resb = (x_nchw + b4[None, :, None, None]).reshape(N, Mout).astype(jnp.float32)

    # ---------------- Kernel 2: fused conv2+conv3+upsample/pad/conv4+residual --
    B2 = _pick_block(N)
    G2 = N // B2
    out = pl.pallas_call(
        _tail_kernel,
        out_shape=jax.ShapeDtypeStruct((G2, B2, Mout), jnp.float32),
        grid=(G2,),
        in_specs=[pl.BlockSpec((None, B2, D), lambda n: (n, 0, 0)),
                  pl.BlockSpec((None, B2, Mout), lambda n: (n, 0, 0)),
                  pl.BlockSpec((D, HID), lambda n: (0, 0)),
                  pl.BlockSpec((1, HID), lambda n: (0, 0)),
                  pl.BlockSpec((HID, D), lambda n: (0, 0)),
                  pl.BlockSpec((1, D), lambda n: (0, 0)),
                  pl.BlockSpec((D, Mout), lambda n: (0, 0))],
        out_specs=pl.BlockSpec((None, B2, Mout), lambda n: (n, 0, 0)),
        compiler_params=pltpu.CompilerParams(
            dimension_semantics=("parallel",),
            vmem_limit_bytes=32 * 1024 * 1024),
    )(h1f.reshape(G2, B2, D), resb.reshape(G2, B2, Mout),
      w2m, b2.reshape(1, HID), w3m, b3t, wfold)

    return out.reshape(N, Cin, H, W)                               # already NCHW


# ---------------------------------------------------------------------------
# Pure-JAX reference (lax.conv, HIGHEST precision) for correctness checking
# ---------------------------------------------------------------------------
def ref_forward(x, params, gfs):
    w1, b1, w2, b2, w3, b3, w4, b4 = params
    pad = lambda v: jnp.pad(v, ((0, 0), (0, 0), (2, 2), (2, 2)), mode="reflect")

    def conv(v, w, b, s):
        y = jax.lax.conv_general_dilated(
            v, w, (s, s), "VALID",
            dimension_numbers=("NCHW", "OIHW", "NCHW"),
            precision=jax.lax.Precision.HIGHEST)
        return y + b[None, :, None, None]

    xi = x
    h = _lrelu(conv(pad(x), w1, b1, 2))
    h = _lrelu(conv(h, w2, b2, 1))
    # ConvTranspose2d(k, s=1, p=0) == full-pad conv with flipped/swapped kernel
    w3c = jnp.transpose(jnp.flip(w3, axis=(2, 3)), (1, 0, 2, 3))
    hp = jnp.pad(h, ((0, 0), (0, 0), (gfs - 1, gfs - 1), (gfs - 1, gfs - 1)))
    h = _lrelu(conv(hp, w3c, b3, 1))
    h = jnp.repeat(jnp.repeat(h, 2, axis=2), 2, axis=3)
    h = conv(pad(h), w4, b4, 1)
    return xi + h


# ---------------------------------------------------------------------------
if __name__ == "__main__":
    # Shapes consistent with the module:
    #   in_channels=4, hidden_channels=32, global_filter_size=8, spatial 16x16, batch 2.
    N, Cin, H, W = 2, 4, 16, 16
    HID, GFS = 32, 8

    key = jax.random.PRNGKey(0)
    ks = jax.random.split(key, 9)
    x = jax.random.normal(ks[0], (N, Cin, H, W), jnp.float32)

    s = 0.05
    params = (
        jax.random.normal(ks[1], (HID, Cin, 5, 5), jnp.float32) * s,      # conv1 W
        jax.random.normal(ks[2], (HID,), jnp.float32) * s,                # conv1 b
        jax.random.normal(ks[3], (HID, HID, GFS, GFS), jnp.float32) * s,  # conv2 W
        jax.random.normal(ks[4], (HID,), jnp.float32) * s,                # conv2 b
        jax.random.normal(ks[5], (HID, HID, GFS, GFS), jnp.float32) * s,  # conv3 W (ConvTranspose: in,out,kh,kw)
        jax.random.normal(ks[6], (HID,), jnp.float32) * s,                # conv3 b
        jax.random.normal(ks[7], (Cin, HID, 5, 5), jnp.float32) * s,      # conv4 W
        jax.random.normal(ks[8], (Cin,), jnp.float32) * s,                # conv4 b
    )

    fwd = jax.jit(res_global_forward, static_argnums=(2,))
    out = jax.block_until_ready(fwd(x, params, GFS))

    ref = jax.block_until_ready(ref_forward(x, params, GFS))
    assert out.shape == (N, Cin, H, W)
    # conv1 / conv3 / folded conv4 use single-pass bf16 MXU (f32 accumulation);
    # the reference is f32 HIGHEST, so allow a bf16-sized tolerance.
    max_err = float(jnp.max(jnp.abs(out - ref)))
    assert max_err < 2e-2, f"mismatch vs reference: {max_err}"

    print("KERNEL_OK")
</pallas_src>

<mosaic_0001>
module attributes {stable_mosaic.version = 11 : i64} {
  func.func @_conv1_kernel(%arg0: i32, %arg1: memref<1x64x128xbf16, #tpu.memory_space<vmem>>, %arg2: memref<128x32xbf16, #tpu.memory_space<vmem>>, %arg3: memref<1x32xf32, #tpu.memory_space<vmem>>, %arg4: memref<1x64x32xf32, #tpu.memory_space<vmem>>) attributes {dimension_semantics = [#tpu.dimension_semantics<parallel>], iteration_bounds = array<i64: 2>, scalar_prefetch = 0 : i64, scratch_operands = 0 : i64, tpu.core_type = #tpu.core_type<tc>, window_params = [{transform_indices = @transform_0, window_bounds = array<i64: 1, 64, 128>}, {pipeline_mode = #tpu.pipeline_mode<synchronous>, transform_indices = @transform_1, window_bounds = array<i64: 128, 32>}, {pipeline_mode = #tpu.pipeline_mode<synchronous>, transform_indices = @transform_2, window_bounds = array<i64: 1, 32>}, {transform_indices = @transform_3, window_bounds = array<i64: 1, 64, 32>}]} {
    %c0 = arith.constant 0 : index
    %c0_0 = arith.constant 0 : index
    %c0_1 = arith.constant 0 : index
    %0 = vector.load %arg1[%c0, %c0_0, %c0_1] : memref<1x64x128xbf16, #tpu.memory_space<vmem>>, vector<1x64x128xbf16>
    %1 = vector.shape_cast %0 : vector<1x64x128xbf16> to vector<64x128xbf16>
    %c0_2 = arith.constant 0 : index
    %c0_3 = arith.constant 0 : index
    %2 = vector.load %arg2[%c0_2, %c0_3] : memref<128x32xbf16, #tpu.memory_space<vmem>>, vector<128x32xbf16>
    %cst = arith.constant dense<0.000000e+00> : vector<64x32xf32>
    %3 = tpu.matmul %1, %2, %cst {dimension_numbers = #tpu.dot_dimension_numbers<[1], [0], [0], [1], [0, 0, 1, 1], [], []>} : vector<64x128xbf16>, vector<128x32xbf16>, vector<64x32xf32> -> vector<64x32xf32>
    %c0_4 = arith.constant 0 : index
    %c0_5 = arith.constant 0 : index
    %4 = vector.load %arg3[%c0_4, %c0_5] : memref<1x32xf32, #tpu.memory_space<vmem>>, vector<1x32xf32>
    %5 = vector.broadcast %4 : vector<1x32xf32> to vector<64x32xf32>
    %6 = arith.addf %3, %5 : vector<64x32xf32>
    %cst_6 = arith.constant 0.00999999977 : f32
    %7 = vector.broadcast %cst_6 : f32 to vector<64x32xf32>
    %8 = arith.mulf %7, %6 : vector<64x32xf32>
    %9 = arith.maximumf %6, %8 : vector<64x32xf32>
    %c0_7 = arith.constant 0 : index
    %c0_8 = arith.constant 0 : index
    %c0_9 = arith.constant 0 : index
    %10 = vector.load %arg4[%c0_7, %c0_8, %c0_9] : memref<1x64x32xf32, #tpu.memory_space<vmem>>, vector<1x64x32xf32>
    %11 = vector.shape_cast %10 : vector<1x64x32xf32> to vector<64x32xf32>
    %12 = vector.shape_cast %9 : vector<64x32xf32> to vector<1x64x32xf32>
    tpu.vector_store %arg4[%c0_7, %c0_8, %c0_9], %12 {strides = array<i32>} : memref<1x64x32xf32, #tpu.memory_space<vmem>>, vector<1x64x32xf32>,
    return
  }
  func.func @transform_0(%arg0: i32) -> (i32, i32, i32) {
    %c0_i32 = arith.constant 0 : i32
    %c0_i32_0 = arith.constant 0 : i32
    %c0_i32_1 = arith.constant 0 : i32
    return %arg0, %c0_i32, %c0_i32_0 : i32, i32, i32
  }
  func.func @transform_1(%arg0: i32) -> (i32, i32) {
    %c0_i32 = arith.constant 0 : i32
    %c0_i32_0 = arith.constant 0 : i32
    %c0_i32_1 = arith.constant 0 : i32
    return %c0_i32, %c0_i32_0 : i32, i32
  }
  func.func @transform_2(%arg0: i32) -> (i32, i32) {
    %c0_i32 = arith.constant 0 : i32
    %c0_i32_0 = arith.constant 0 : i32
    %c0_i32_1 = arith.constant 0 : i32
    return %c0_i32, %c0_i32_0 : i32, i32
  }
  func.func @transform_3(%arg0: i32) -> (i32, i32, i32) {
    %c0_i32 = arith.constant 0 : i32
    %c0_i32_0 = arith.constant 0 : i32
    %c0_i32_1 = arith.constant 0 : i32
    return %arg0, %c0_i32, %c0_i32_0 : i32, i32, i32
  }
}

module attributes {stable_mosaic.version = 11 : i64} {
  func.func @_tail_kernel(%arg0: i32, %arg1: memref<1x1x2048xf32, #tpu.memory_space<vmem>>, %arg2: memref<1x1x1024xf32, #tpu.memory_space<vmem>>, %arg3: memref<2048x32xf32, #tpu.memory_space<vmem>>, %arg4: memref<1x32xf32, #tpu.memory_space<vmem>>, %arg5: memref<32x2048xbf16, #tpu.memory_space<vmem>>, %arg6: memref<1x2048xf32, #tpu.memory_space<vmem>>, %arg7: memref<2048x1024xbf16, #tpu.memory_space<vmem>>, %arg8: memref<1x1x1024xf32, #tpu.memory_space<vmem>>) attributes {dimension_semantics = [#tpu.dimension_semantics<parallel>], iteration_bounds = array<i64: 2>, scalar_prefetch = 0 : i64, scratch_operands = 0 : i64, tpu.core_type = #tpu.core_type<tc>, window_params = [{transform_indices = @transform_0, window_bounds = array<i64: 1, 1, 2048>}, {transform_indices = @transform_1, window_bounds = array<i64: 1, 1, 1024>}, {pipeline_mode = #tpu.pipeline_mode<synchronous>, transform_indices = @transform_2, window_bounds = array<i64: 2048, 32>}, {pipeline_mode = #tpu.pipeline_mode<synchronous>, transform_indices = @transform_3, window_bounds = array<i64: 1, 32>}, {pipeline_mode = #tpu.pipeline_mode<synchronous>, transform_indices = @transform_4, window_bounds = array<i64: 32, 2048>}, {pipeline_mode = #tpu.pipeline_mode<synchronous>, transform_indices = @transform_5, window_bounds = array<i64: 1, 2048>}, {pipeline_mode = #tpu.pipeline_mode<synchronous>, transform_indices = @transform_6, window_bounds = array<i64: 2048, 1024>}, {transform_indices = @transform_7, window_bounds = array<i64: 1, 1, 1024>}]} {
    %c0 = arith.constant 0 : index
    %c0_0 = arith.constant 0 : index
    %c0_1 = arith.constant 0 : index
    %0 = vector.load %arg1[%c0, %c0_0, %c0_1] : memref<1x1x2048xf32, #tpu.memory_space<vmem>>, vector<1x1x2048xf32>
    %1 = vector.shape_cast %0 : vector<1x1x2048xf32> to vector<1x2048xf32>
    %c0_2 = arith.constant 0 : index
    %c0_3 = arith.constant 0 : index
    %2 = vector.load %arg3[%c0_2, %c0_3] : memref<2048x32xf32, #tpu.memory_space<vmem>>, vector<2048x32xf32>
    %cst = arith.constant dense<0.000000e+00> : vector<1x32xf32>
    %3 = tpu.matmul %1, %2, %cst {dimension_numbers = #tpu.dot_dimension_numbers<[1], [0], [0], [1], [0, 0, 1, 1], [], []>} : vector<1x2048xf32>, vector<2048x32xf32>, vector<1x32xf32> -> vector<1x32xf32>
    %c0_4 = arith.constant 0 : index
    %c0_5 = arith.constant 0 : index
    %4 = vector.load %arg4[%c0_4, %c0_5] : memref<1x32xf32, #tpu.memory_space<vmem>>, vector<1x32xf32>
    %5 = arith.addf %3, %4 : vector<1x32xf32>
    %cst_6 = arith.constant 0.00999999977 : f32
    %6 = vector.broadcast %cst_6 : f32 to vector<1x32xf32>
    %7 = arith.mulf %6, %5 : vector<1x32xf32>
    %8 = arith.maximumf %5, %7 : vector<1x32xf32>
    %9 = arith.truncf %8 : vector<1x32xf32> to vector<1x32xbf16>
    %c0_7 = arith.constant 0 : index
    %c0_8 = arith.constant 0 : index
    %10 = vector.load %arg5[%c0_7, %c0_8] : memref<32x2048xbf16, #tpu.memory_space<vmem>>, vector<32x2048xbf16>
    %cst_9 = arith.constant dense<0.000000e+00> : vector<1x2048xf32>
    %11 = tpu.matmul %9, %10, %cst_9 {dimension_numbers = #tpu.dot_dimension_numbers<[1], [0], [0], [1], [0, 0, 1, 1], [], []>} : vector<1x32xbf16>, vector<32x2048xbf16>, vector<1x2048xf32> -> vector<1x2048xf32>
    %c0_10 = arith.constant 0 : index
    %c0_11 = arith.constant 0 : index
    %12 = vector.load %arg6[%c0_10, %c0_11] : memref<1x2048xf32, #tpu.memory_space<vmem>>, vector<1x2048xf32>
    %13 = arith.addf %11, %12 : vector<1x2048xf32>
    %cst_12 = arith.constant 0.00999999977 : f32
    %14 = vector.broadcast %cst_12 : f32 to vector<1x2048xf32>
    %15 = arith.mulf %14, %13 : vector<1x2048xf32>
    %16 = arith.maximumf %13, %15 : vector<1x2048xf32>
    %17 = arith.truncf %16 : vector<1x2048xf32> to vector<1x2048xbf16>
    %c0_13 = arith.constant 0 : index
    %c0_14 = arith.constant 0 : index
    %18 = vector.load %arg7[%c0_13, %c0_14] : memref<2048x1024xbf16, #tpu.memory_space<vmem>>, vector<2048x1024xbf16>
    %cst_15 = arith.constant dense<0.000000e+00> : vector<1x1024xf32>
    %19 = tpu.matmul %17, %18, %cst_15 {dimension_numbers = #tpu.dot_dimension_numbers<[1], [0], [0], [1], [0, 0, 1, 1], [], []>} : vector<1x2048xbf16>, vector<2048x1024xbf16>, vector<1x1024xf32> -> vector<1x1024xf32>
    %c0_16 = arith.constant 0 : index
    %c0_17 = arith.constant 0 : index
    %c0_18 = arith.constant 0 : index
    %20 = vector.load %arg2[%c0_16, %c0_17, %c0_18] : memref<1x1x1024xf32, #tpu.memory_space<vmem>>, vector<1x1x1024xf32>
    %21 = vector.shape_cast %20 : vector<1x1x1024xf32> to vector<1x1024xf32>
    %22 = arith.addf %19, %21 : vector<1x1024xf32>
    %c0_19 = arith.constant 0 : index
    %c0_20 = arith.constant 0 : index
    %c0_21 = arith.constant 0 : index
    %23 = vector.load %arg8[%c0_19, %c0_20, %c0_21] : memref<1x1x1024xf32, #tpu.memory_space<vmem>>, vector<1x1x1024xf32>
    %24 = vector.shape_cast %23 : vector<1x1x1024xf32> to vector<1x1024xf32>
    %25 = vector.shape_cast %22 : vector<1x1024xf32> to vector<1x1x1024xf32>
    tpu.vector_store %arg8[%c0_19, %c0_20, %c0_21], %25 {strides = array<i32>} : memref<1x1x1024xf32, #tpu.memory_space<vmem>>, vector<1x1x1024xf32>,
    return
  }
  func.func @transform_0(%arg0: i32) -> (i32, i32, i32) {
    %c0_i32 = arith.constant 0 : i32
    %c0_i32_0 = arith.constant 0 : i32
    %c0_i32_1 = arith.constant 0 : i32
    return %arg0, %c0_i32, %c0_i32_0 : i32, i32, i32
  }
  func.func @transform_1(%arg0: i32) -> (i32, i32, i32) {
    %c0_i32 = arith.constant 0 : i32
    %c0_i32_0 = arith.constant 0 : i32
    %c0_i32_1 = arith.constant 0 : i32
    return %arg0, %c0_i32, %c0_i32_0 : i32, i32, i32
  }
  func.func @transform_2(%arg0: i32) -> (i32, i32) {
    %c0_i32 = arith.constant 0 : i32
    %c0_i32_0 = arith.constant 0 : i32
    %c0_i32_1 = arith.constant 0 : i32
    return %c0_i32, %c0_i32_0 : i32, i32
  }
  func.func @transform_3(%arg0: i32) -> (i32, i32) {
    %c0_i32 = arith.constant 0 : i32
    %c0_i32_0 = arith.constant 0 : i32
    %c0_i32_1 = arith.constant 0 : i32
    return %c0_i32, %c0_i32_0 : i32, i32
  }
  func.func @transform_4(%arg0: i32) -> (i32, i32) {
    %c0_i32 = arith.constant 0 : i32
    %c0_i32_0 = arith.constant 0 : i32
    %c0_i32_1 = arith.constant 0 : i32
    return %c0_i32, %c0_i32_0 : i32, i32
  }
  func.func @transform_5(%arg0: i32) -> (i32, i32) {
    %c0_i32 = arith.constant 0 : i32
    %c0_i32_0 = arith.constant 0 : i32
    %c0_i32_1 = arith.constant 0 : i32
    return %c0_i32, %c0_i32_0 : i32, i32
  }
  func.func @transform_6(%arg0: i32) -> (i32, i32) {
    %c0_i32 = arith.constant 0 : i32
    %c0_i32_0 = arith.constant 0 : i32
    %c0_i32_1 = arith.constant 0 : i32
    return %c0_i32, %c0_i32_0 : i32, i32
  }
  func.func @transform_7(%arg0: i32) -> (i32, i32, i32) {
    %c0_i32 = arith.constant 0 : i32
    %c0_i32_0 = arith.constant 0 : i32
    %c0_i32_1 = arith.constant 0 : i32
    return %arg0, %c0_i32, %c0_i32_0 : i32, i32, i32
  }
}

</mosaic_0001>

<bundles_post_ra>
// kernel: res_global_forward.2
= control target key start
LH: loop header
LB: loop body
LE: loop exit
PB: predicated region body
PF: predicated region fallthrough
CT: control target
= control target key end

     0   :  { %s546_s12 = smov 0   ;;  %s618_s0 = inlined_call_operand.vmem [shape: bf16[2,64,128], index: 0, kind: input, shape index: {}]   ;;  %s619_s1 = inlined_call_operand.vmem [shape: bf16[128,32], index: 1, kind: input, shape index: {}]   ;;  %s620_s2 = inlined_call_operand.vmem [shape: f32[1,32], index: 2, kind: input, shape index: {}]   ;;  %s621_s3 = inlined_call_operand.vmem [shape: f32[2,64,32], index: 3, kind: output, shape index: {}]  }
   0x1 LB: > { %s420_s13 = sadd.s32 4294967295, %s524_s12   ;;  %p424_p0 = scmp.ge.s32.totalorder %s524_s12, 1  ;;  %s524_s12 = sphi %s546_s12, %s13_s12  }
   0x2   : > { %p137_p1 = scmp.lt.s32.totalorder %s524_s12, 3 }
   0x4   : > { %p138_p2 = pnand %p424_p0, %p137_p1 }
   0x5   : > { %p161_p3 = scmp.lt.s32.totalorder (!%p138_p2), %s420_s13, 1 }
   0x6   : > { %141 = sbr.rel (%p138_p2) target bundleno = 251 (0xfb), region = 32 }
   0xb   : > { %v506_v0 = vld [vmem:[%s619_s1 + $0x38] sm:$0xff]   ;;  %v507_v1 = vld [vmem:[%s619_s1 + $0x30] sm:$0xff]   ;;  %s623_s13 = smov (!%p161_p3, %s420_s13), 1  ;;  %v508_v2 = vld [vmem:[%s619_s1 + $0x28] sm:$0xff]   ;;  %vm356_vm0 = vcmask 261120  }
   0xc   : > { %458 = vmatprep.subr.bf16.mxu0 %v506_v0  ;;  %482 = vmatprep.subr.bf16.mxu1 %v506_v0  ;;  %s444_s20 = sshll.u32 %s623_s13, 5  ;;  %v509_v3 = vld [vmem:[%s619_s1 + $0x20] sm:$0xff]   ;;  %v510_v6 = vld [vmem:[%s619_s1 + $0x18] sm:$0xff]   ;;  %v511_v7 = vld [vmem:[%s619_s1 + $0x10] sm:$0xff]   ;;  %s445_s9 = sshll.u32 %s623_s13, 6 }
   0xd   : > { %459 = vmatpush3.bf16.msra.mxu0 %v506_v0  ;;  %490 = vmatpush3.bf16.msra.mxu1 %v506_v0  ;;  %s569_s23 = scalar_lea.vmem %s618_s0, %s444_s20  ;;  %v512_v8 = vld [vmem:[%s619_s1 + $0x8] sm:$0xff]   ;;  %v513_v9 = vld [vmem:[%s619_s1] sm:$0xff]   ;;  %s597_s14 = scalar_lea.vmem %s621_s3, %s445_s9 }
   0xe   : > { %460 = vmatprep.subr.bf16.mxu0 %v507_v1  ;;  %483 = vmatprep.subr.bf16.mxu1 %v507_v1  ;;  %v514_v4 = vld [vmem:[%s569_s23] sm:$0xff]   ;;  %v515_v5 = vld [vmem:[%s569_s23 + $0x10] sm:$0xff]   ;;  %v516_v10 = vld [vmem:[%s569_s23 + $0x8] sm:$0xff]  }
   0xf   : > { %474 = vmatprep.mubr.bf16.mxu0 %v514_v4  ;;  %478 = vmatprep.mubr.bf16.mxu1 %v515_v5  ;;  %v517_v11 = vld [vmem:[%s569_s23 + $0x18] sm:$0xff]   ;;  %v429_v12 = vld [vmem:[%s620_s2] ss:$0 sm:$0xff] }
  0x11   : > { %461 = vmatpush3.bf16.msra.mxu0 %v507_v1  ;;  %491 = vmatpush3.bf16.msra.mxu1 %v507_v1 }
  0x12   : > { %462 = vmatprep.subr.bf16.mxu0 %v508_v2  ;;  %484 = vmatprep.subr.bf16.mxu1 %v508_v2 }
  0x15   : > { %463 = vmatpush3.bf16.msra.mxu0 %v508_v2  ;;  %492 = vmatpush3.bf16.msra.mxu1 %v508_v2 }
  0x16   : > { %464 = vmatprep.subr.bf16.mxu0 %v509_v3  ;;  %485 = vmatprep.subr.bf16.mxu1 %v509_v3 }
  0x19   : > { %465 = vmatpush3.bf16.msra.mxu0 %v509_v3  ;;  %493 = vmatpush3.bf16.msra.mxu1 %v509_v3 }
  0x1a   : > { %466 = vmatprep.subr.bf16.mxu0 %v510_v6  ;;  %486 = vmatprep.subr.bf16.mxu1 %v510_v6 }
  0x1d   : > { %467 = vmatpush3.bf16.msra.mxu0 %v510_v6  ;;  %494 = vmatpush3.bf16.msra.mxu1 %v510_v6 }
  0x1e   : > { %468 = vmatprep.subr.bf16.mxu0 %v511_v7  ;;  %487 = vmatprep.subr.bf16.mxu1 %v511_v7 }
  0x21   : > { %469 = vmatpush3.bf16.msra.mxu0 %v511_v7  ;;  %495 = vmatpush3.bf16.msra.mxu1 %v511_v7 }
  0x22   : > { %470 = vmatprep.subr.bf16.mxu0 %v512_v8  ;;  %488 = vmatprep.subr.bf16.mxu1 %v512_v8 }
  0x25   : > { %471 = vmatpush3.bf16.msra.mxu0 %v512_v8  ;;  %496 = vmatpush3.bf16.msra.mxu1 %v512_v8 }
  0x26   : > { %472 = vmatprep.subr.bf16.mxu0 %v513_v9  ;;  %489 = vmatprep.subr.bf16.mxu1 %v513_v9 }
  0x29   : > { %473 = vmatpush3.bf16.msra.mxu0 %v513_v9  ;;  %497 = vmatpush3.bf16.msra.mxu1 %v513_v9 }
  0x2c   : > { %475 = vmatmul.mubr.bf16.vlgmr.msra.gmra.mxu0 %v516_v10  ;;  %479 = vmatmul.mubr.bf16.vlgmr.msra.gmra.mxu1 %v517_v11 }
  0xec   : > { %v476_v13 = vpop.f32.mrf.mxu0  ;;  %v480_v14 = vpop.f32.mrf.mxu1 }
  0xed   : > { %v318_v15 = vadd.f32 %v476_v13, %v429_v12  ;;  %v334_v16 = vadd.f32 %v480_v14, %v429_v12 }
  0xee   : > { %v309_v17 = vpop.f32.mrf.mxu0  ;;  %v325_v18 = vpop.f32.mrf.mxu1 }
  0xef   : > { %v342_v19 = vmul.f32 0.01, %v318_v15  ;;  %v346_v20 = vmul.f32 0.01, %v334_v16  ;;  %v310_v21 = vadd.f32 %v429_v12, %v309_v17  ;;  %v326_v22 = vadd.f32 %v429_v12, %v325_v18 }
  0xf0   : > { %v477_v23 = vpop.f32.mrf.mxu0  ;;  %v481_v24 = vpop.f32.mrf.mxu1 }
  0xf1   : > { %v350_v25 = vmax.f32 %v318_v15, %v342_v19  ;;  %v354_v26 = vmax.f32 %v334_v16, %v346_v20  ;;  %v340_v27 = vmul.f32 0.01, %v310_v21  ;;  %v344_v28 = vmul.f32 0.01, %v326_v22 }
  0xf2   : > { %v321_v29 = vadd.f32 %v477_v23, %v429_v12  ;;  %v337_v30 = vadd.f32 %v481_v24, %v429_v12  ;;  %v312_v31 = vpop.f32.mrf.mxu0  ;;  %v328_v32 = vpop.f32.mrf.mxu1 }
  0xf3   : > { %359 = vst.msk [vmem:[%s597_s14 + $0x10] sm:$0xff] %vm356_vm0, %v350_v25  ;;  %363 = vst.msk [vmem:[%s597_s14 + $0x30] sm:$0xff] %vm356_vm0, %v354_v26  ;;  %v348_v33 = vmax.f32 %v310_v21, %v340_v27  ;;  %v352_v34 = vmax.f32 %v326_v22, %v344_v28  ;;  %v313_v35 = vadd.f32 %v429_v12, %v312_v31 }
  0xf4   : > { %v329_v36 = vadd.f32 %v429_v12, %v328_v32  ;;  %v343_v37 = vmul.f32 0.01, %v321_v29  ;;  %v347_v38 = vmul.f32 0.01, %v337_v30 }
  0xf5   : > { %357 = vst.msk [vmem:[%s597_s14] sm:$0xff] %vm356_vm0, %v348_v33  ;;  %361 = vst.msk [vmem:[%s597_s14 + $0x20] sm:$0xff] %vm356_vm0, %v352_v34  ;;  %v341_v39 = vmul.f32 0.01, %v313_v35 }
  0xf6   : > { %v345_v40 = vmul.f32 0.01, %v329_v36  ;;  %v351_v41 = vmax.f32 %v321_v29, %v343_v37  ;;  %v355_v42 = vmax.f32 %v337_v30, %v347_v38 }
  0xf7   : > { %v349_v43 = vmax.f32 %v313_v35, %v341_v39 }
  0xf8   : > { %v353_v44 = vmax.f32 %v329_v36, %v345_v40  ;;  %360 = vst.msk [vmem:[%s597_s14 + $0x18] sm:$0xff] %vm356_vm0, %v351_v41  ;;  %364 = vst.msk [vmem:[%s597_s14 + $0x38] sm:$0xff] %vm356_vm0, %v355_v42 }
  0xf9   : > { %358 = vst.msk [vmem:[%s597_s14 + $0x8] sm:$0xff] %vm356_vm0, %v349_v43 }
  0xfa   : > { %362 = vst.msk [vmem:[%s597_s14 + $0x28] sm:$0xff] %vm356_vm0, %v353_v44 }
  0xfb PF: > { %s13_s12 = sadd.s32 1, %s524_s12  }
  0xfc   : > { %p10_p4 = scmp.ge.s32.totalorder %s13_s12, 4  }
  0xfe   :  { %12 = sbr.rel (!%p10_p4) target bundleno = 1 (0x1), region = 62 }

// kernel: tile.8
= control target key start
LH: loop header
LB: loop body
LE: loop exit
PB: predicated region body
PF: predicated region fallthrough
CT: control target
= control target key end

     0   :  { %s64_s0 = inlined_call_operand.vmem [shape: f32[32], index: 0, kind: input, shape index: {}]   ;;  %s65_s1 = inlined_call_operand.vmem [shape: f32[64,32], index: 1, kind: output, shape index: {}]  }
   0x1   :  { %v4_v0 = vld [vmem:[%s64_s0] ss:$0 sm:$0xff] }
   0x2   :  { %5 = vst [vmem:[%s65_s1] sm:$0xff] %v4_v0  ;;  %20 = vst [vmem:[%s65_s1 + $0x8] sm:$0xff] %v4_v0 }
   0x3   :  { %21 = vst [vmem:[%s65_s1 + $0x10] sm:$0xff] %v4_v0  ;;  %22 = vst [vmem:[%s65_s1 + $0x18] sm:$0xff] %v4_v0 }
   0x4   :  { %23 = vst [vmem:[%s65_s1 + $0x20] sm:$0xff] %v4_v0  ;;  %24 = vst [vmem:[%s65_s1 + $0x28] sm:$0xff] %v4_v0 }
   0x5   :  { %25 = vst [vmem:[%s65_s1 + $0x30] sm:$0xff] %v4_v0  ;;  %26 = vst [vmem:[%s65_s1 + $0x38] sm:$0xff] %v4_v0 }

// kernel: tile.9
= control target key start
LH: loop header
LB: loop body
LE: loop exit
PB: predicated region body
PF: predicated region fallthrough
CT: control target
= control target key end

     0   :  { %s212_s10 = smov 64   ;;  %s213_s11 = smov 96   ;;  %vm3_vm0 = vcmask 261120   ;;  %vm17_vm1 = vcmask 1048320   ;;  %vm33_vm2 = vcmask 785920   ;;  %vm49_vm3 = vcmask 523520   ;;  %s297_s0 = inlined_call_operand.vmem [shape: f32[64,32], index: 0, kind: input, shape index: {}]   ;;  %s298_s1 = inlined_call_operand.vmem [shape: f32[1,2048], index: 1, kind: output, shape index: {}]  }
   0x1   :  { %v190_v0 = vld [vmem:[%s297_s0 + $0x2] ss:$4 sm:$0xff]   ;;  %v188_v1 = vld [vmem:[%s297_s0 + $0x3] ss:$4 sm:$0xff]   ;;  %v2_v4 = vld [vmem:[%s297_s0] ss:$4 sm:$0xff]  }
   0x2   :  { %31 = vrot.lane.b32.xlu1 %v190_v0, %s212_s10  ;;  %15 = vrot.lane.b32.xlu0 %v188_v1, %s213_s11  ;;  %v191_v2 = vld [vmem:[%s297_s0 + $0x22] ss:$4 sm:$0xff]   ;;  %v189_v3 = vld [vmem:[%s297_s0 + $0x23] ss:$4 sm:$0xff]  }
   0x3   :  { %v187_v5 = vld [vmem:[%s297_s0 + $0x20] ss:$4 sm:$0xff]   ;;  %4 = vst.msk [vmem:[#allocation0] ss:$8 sm:$0xf] %vm3_vm0, %v2_v4  }
   0x4   :  { %5 = vst.msk [vmem:[#allocation0] ss:$8 sm:$0xf0] %vm3_vm0, %v2_v4   ;;  %10 = vst.msk [vmem:[#allocation0 + $0x40] ss:$8 sm:$0xf] %vm3_vm0, %v187_v5  }
   0x5   :  { %12 = vst.msk [vmem:[#allocation0 + $0x40] ss:$8 sm:$0xf0] %vm3_vm0, %v187_v5   ;;  %v193_v6 = vld [vmem:[%s297_s0 + $0x21] ss:$4 sm:$0xff]  }
   0x6   :  { %38 = vrot.lane.b32.xlu1 %v191_v2, %s212_s10  ;;  %22 = vrot.lane.b32.xlu0 %v189_v3, %s213_s11  ;;  %v192_v7 = vld [vmem:[%s297_s0 + $0x1] ss:$4 sm:$0xff]   ;;  %s214_s0 = smov 32  }
   0xa   :  { %54 = vrot.lane.b32.xlu1 %v193_v6, %s214_s0  ;;  %47 = vrot.lane.b32.xlu0 %v192_v7, %s214_s0 }
  0x74   :  { %v32_v8 = vpop.permute.xlu1 %31   ;;  %v16_v9 = vpop.permute.xlu0 %15  }
  0x75   :  { %18 = vst.msk [vmem:[#allocation0] ss:$8 sm:$0xf] %vm17_vm1, %v16_v9   ;;  %19 = vst.msk [vmem:[#allocation0] ss:$8 sm:$0xf0] %vm17_vm1, %v16_v9  }
  0x76   :  { %34 = vst.msk [vmem:[#allocation0] ss:$8 sm:$0xf] %vm33_vm2, %v32_v8   ;;  %35 = vst.msk [vmem:[#allocation0] ss:$8 sm:$0xf0] %vm33_vm2, %v32_v8  }
  0x78   :  { %v39_v10 = vpop.permute.xlu1 %38   ;;  %v23_v11 = vpop.permute.xlu0 %22  }
  0x79   :  { %26 = vst.msk [vmem:[#allocation0 + $0x40] ss:$8 sm:$0xf] %vm17_vm1, %v23_v11   ;;  %28 = vst.msk [vmem:[#allocation0 + $0x40] ss:$8 sm:$0xf0] %vm17_vm1, %v23_v11  }
  0x7a   :  { %42 = vst.msk [vmem:[#allocation0 + $0x40] ss:$8 sm:$0xf] %vm33_vm2, %v39_v10   ;;  %44 = vst.msk [vmem:[#allocation0 + $0x40] ss:$8 sm:$0xf0] %vm33_vm2, %v39_v10  }
  0x7c   :  { %v55_v12 = vpop.permute.xlu1 %54   ;;  %v48_v13 = vpop.permute.xlu0 %47  }
  0x7d   :  { %58 = vst.msk [vmem:[#allocation0 + $0x40] ss:$8 sm:$0xf] %vm49_vm3, %v55_v12   ;;  %60 = vst.msk [vmem:[#allocation0 + $0x40] ss:$8 sm:$0xf0] %vm49_vm3, %v55_v12  }
  0x7e   :  { %50 = vst.msk [vmem:[#allocation0] ss:$8 sm:$0xf] %vm49_vm3, %v48_v13   ;;  %51 = vst.msk [vmem:[#allocation0] ss:$8 sm:$0xf0] %vm49_vm3, %v48_v13  }
  0x84   :  { %v118_v14 = vld [vmem:[#allocation0 + $0x40] sm:$0x1]  ;;  %v125_v15 = vld [vmem:[#allocation0 + $0x48] sm:$0x1]  ;;  %v132_v16 = vld [vmem:[#allocation0 + $0x50] sm:$0x1] }
  0x85   :  { %201 = vst [vmem:[%s298_s1 + $0x8] sm:$0x1] %v118_v14  ;;  %202 = vst [vmem:[%s298_s1 + $0x9] sm:$0x1] %v125_v15  ;;  %v139_v17 = vld [vmem:[#allocation0 + $0x58] sm:$0x1] }
  0x86   :  { %203 = vst [vmem:[%s298_s1 + $0xa] sm:$0x1] %v132_v16  ;;  %v146_v18 = vld [vmem:[#allocation0 + $0x60] sm:$0x1]  ;;  %v153_v19 = vld [vmem:[#allocation0 + $0x68] sm:$0x1] }
  0x87   :  { %204 = vst [vmem:[%s298_s1 + $0xb] sm:$0x1] %v139_v17  ;;  %205 = vst [vmem:[%s298_s1 + $0xc] sm:$0x1] %v146_v18  ;;  %v160_v20 = vld [vmem:[#allocation0 + $0x70] sm:$0x1] }
  0x88   :  { %206 = vst [vmem:[%s298_s1 + $0xd] sm:$0x1] %v153_v19  ;;  %v167_v21 = vld [vmem:[#allocation0 + $0x78] sm:$0x1]  ;;  %v65_v22 = vld [vmem:[#allocation0] sm:$0x1] }
  0x89   :  { %207 = vst [vmem:[%s298_s1 + $0xe] sm:$0x1] %v160_v20  ;;  %208 = vst [vmem:[%s298_s1 + $0xf] sm:$0x1] %v167_v21  ;;  %v70_v23 = vld [vmem:[#allocation0 + $0x8] sm:$0x1] }
  0x8a   :  { %68 = vst [vmem:[%s298_s1] sm:$0x1] %v65_v22  ;;  %v76_v24 = vld [vmem:[#allocation0 + $0x10] sm:$0x1]  ;;  %v83_v25 = vld [vmem:[#allocation0 + $0x18] sm:$0x1] }
  0x8b   :  { %194 = vst [vmem:[%s298_s1 + $0x1] sm:$0x1] %v70_v23  ;;  %195 = vst [vmem:[%s298_s1 + $0x2] sm:$0x1] %v76_v24  ;;  %v90_v26 = vld [vmem:[#allocation0 + $0x20] sm:$0x1] }
  0x8c   :  { %196 = vst [vmem:[%s298_s1 + $0x3] sm:$0x1] %v83_v25  ;;  %v97_v27 = vld [vmem:[#allocation0 + $0x28] sm:$0x1]  ;;  %v104_v28 = vld [vmem:[#allocation0 + $0x30] sm:$0x1] }
  0x8d   :  { %197 = vst [vmem:[%s298_s1 + $0x4] sm:$0x1] %v90_v26  ;;  %198 = vst [vmem:[%s298_s1 + $0x5] sm:$0x1] %v97_v27  ;;  %v111_v29 = vld [vmem:[#allocation0 + $0x38] sm:$0x1] }
  0x8e   :  { %199 = vst [vmem:[%s298_s1 + $0x6] sm:$0x1] %v104_v28  ;;  %200 = vst [vmem:[%s298_s1 + $0x7] sm:$0x1] %v111_v29 }

// kernel: res_global_forward.3
= control target key start
LH: loop header
LB: loop body
LE: loop exit
PB: predicated region body
PF: predicated region fallthrough
CT: control target
= control target key end

     0   :  { %s10891_s24 = smov 0   ;;  %s15262_s0 = inlined_call_operand.vmem [shape: f32[2,1,2048], index: 0, kind: input, shape index: {}]   ;;  %s15263_s1 = inlined_call_operand.vmem [shape: f32[2,1,1024], index: 1, kind: input, shape index: {}]   ;;  %s15264_s2 = inlined_call_operand.vmem [shape: f32[2048,32], index: 2, kind: input, shape index: {}]   ;;  %s15265_s3 = inlined_call_operand.vmem [shape: f32[1,32], index: 3, kind: input, shape index: {}]   ;;  %s15266_s4 = inlined_call_operand.vmem [shape: bf16[32,2048], index: 4, kind: input, shape index: {}]   ;;  %s15267_s5 = inlined_call_operand.vmem [shape: f32[1,2048], index: 5, kind: input, shape index: {}]   ;;  %s15268_s6 = inlined_call_operand.vmem [shape: bf16[2048,1024], index: 6, kind: input, shape index: {}]   ;;  %s15269_s7 = inlined_call_operand.vmem [shape: f32[2,1,1024], index: 7, kind: output, shape index: {}]  }
   0x1 LB: > { %s9474_s25 = sadd.s32 4294967295, %s10847_s24   ;;  %p9478_p0 = scmp.ge.s32.totalorder %s10847_s24, 1  ;;  %s10847_s24 = sphi %s10891_s24, %s17_s24  }
   0x2   : > { %p245_p1 = scmp.lt.s32.totalorder %s10847_s24, 3 }
   0x4   : > { %p246_p2 = pnand %p9478_p0, %p245_p1 }
   0x5   : > { %p10985_p3 = scmp.lt.s32.totalorder (!%p246_p2), %s9474_s25, 1 }
   0x6   : > { %249 = sbr.rel (%p246_p2) target bundleno = 1729 (0x6c1), region = 48 }
   0xb   : > { %v325_v0 = vld [vmem:[%s15264_s2 + $0xf8] sm:$0xff]  ;;  %v324_v4 = vld [vmem:[%s15264_s2 + $0xf0] sm:$0xff]  ;;  %v323_v8 = vld [vmem:[%s15264_s2 + $0xe8] sm:$0xff]  ;;  %s15272_s25 = smov (!%p10985_p3, %s9474_s25), 1  ;;  %v553_v38 = vlaneseq  ;;  %vm1472_vm0 = vcmask 261120  }
   0xc   : > { %v357_v1 = vld [vmem:[%s15264_s2 + $0x1f8] sm:$0xff]  ;;  %10548 = vmatprep.subr.mxu0 %v325_v0  ;;  %v356_v5 = vld [vmem:[%s15264_s2 + $0x1f0] sm:$0xff]  ;;  %v355_v9 = vld [vmem:[%s15264_s2 + $0x1e8] sm:$0xff]  ;;  %s9479_s8 = sshll.u32 %s15272_s25, 4  ;;  %s9480_s22 = sshll.u32 %s15272_s25, 3 }
   0xd   : > { %v309_v2 = vld [vmem:[%s15264_s2 + $0x78] sm:$0xff]  ;;  %10583 = vmatprep.subr.mxu1 %v357_v1  ;;  %v308_v6 = vld [vmem:[%s15264_s2 + $0x70] sm:$0xff]  ;;  %v307_v10 = vld [vmem:[%s15264_s2 + $0x68] sm:$0xff]  ;;  %v11050_v47 = vshrl.u32 %v553_v38, 7  ;;  %s11067_s23 = scalar_lea.vmem %s15262_s0, %s9479_s8  ;;  %s12796_s10 = scalar_lea.vmem %s15263_s1, %s9480_s22 }
   0xe   : > { %v341_v3 = vld [vmem:[%s15264_s2 + $0x178] sm:$0xff]  ;;  %10549 = vmatpush3.msra.mxu0 %v309_v2  ;;  %v340_v7 = vld [vmem:[%s15264_s2 + $0x170] sm:$0xff]  ;;  %v339_v11 = vld [vmem:[%s15264_s2 + $0x168] sm:$0xff]  ;;  %s290_s26 = scalar_lea.vmem %s15269_s7, %s9480_s22 }
   0xf   : > { %10584 = vmatpush3.msra.mxu1 %v341_v3  ;;  %10550 = vmatprep.subr.mxu0 %v324_v4  ;;  %v322_v12 = vld [vmem:[%s15264_s2 + $0xe0] sm:$0xff]  ;;  %v321_v16 = vld [vmem:[%s15264_s2 + $0xd8] sm:$0xff]  ;;  %v320_v20 = vld [vmem:[%s15264_s2 + $0xd0] sm:$0xff]  ;;  %v11082_v56 = vsub.s32 1, %v11050_v47  ;;  %v11094_v60 = vsub.s32 0, %v11050_v47  ;;  %v11103_v63 = vsub.s32 3, %v11050_v47 }
  0x10   : > { %10585 = vmatprep.subr.mxu1 %v356_v5  ;;  %10551 = vmatpush3.msra.mxu0 %v308_v6  ;;  %v354_v13 = vld [vmem:[%s15264_s2 + $0x1e0] sm:$0xff]  ;;  %v353_v17 = vld [vmem:[%s15264_s2 + $0x1d8] sm:$0xff]  ;;  %v352_v21 = vld [vmem:[%s15264_s2 + $0x1d0] sm:$0xff]  ;;  %v11112_v2 = vsub.s32 2, %v11050_v47 }
  0x11   : > { %10586 = vmatpush3.msra.mxu1 %v340_v7  ;;  %10552 = vmatprep.subr.mxu0 %v323_v8  ;;  %v306_v14 = vld [vmem:[%s15264_s2 + $0x60] sm:$0xff]  ;;  %v305_v18 = vld [vmem:[%s15264_s2 + $0x58] sm:$0xff]  ;;  %v304_v22 = vld [vmem:[%s15264_s2 + $0x50] sm:$0xff] }
  0x12   : > { %10587 = vmatprep.subr.mxu1 %v355_v9  ;;  %v338_v15 = vld [vmem:[%s15264_s2 + $0x160] sm:$0xff]  ;;  %10553 = vmatpush3.msra.mxu0 %v307_v10  ;;  %v337_v19 = vld [vmem:[%s15264_s2 + $0x158] sm:$0xff]  ;;  %v336_v23 = vld [vmem:[%s15264_s2 + $0x150] sm:$0xff] }
  0x13   : > { %10588 = vmatpush3.msra.mxu1 %v339_v11  ;;  %10554 = vmatprep.subr.mxu0 %v322_v12  ;;  %v319_v24 = vld [vmem:[%s15264_s2 + $0xc8] sm:$0xff]  ;;  %v318_v28 = vld [vmem:[%s15264_s2 + $0xc0] sm:$0xff]  ;;  %v317_v32 = vld [vmem:[%s15264_s2 + $0xb8] sm:$0xff] }
  0x14   : > { %10589 = vmatprep.subr.mxu1 %v354_v13  ;;  %10555 = vmatpush3.msra.mxu0 %v306_v14  ;;  %v351_v25 = vld [vmem:[%s15264_s2 + $0x1c8] sm:$0xff]  ;;  %v350_v29 = vld [vmem:[%s15264_s2 + $0x1c0] sm:$0xff]  ;;  %v349_v33 = vld [vmem:[%s15264_s2 + $0x1b8] sm:$0xff] }
  0x15   : > { %10590 = vmatpush3.msra.mxu1 %v338_v15  ;;  %10556 = vmatprep.subr.mxu0 %v321_v16  ;;  %v303_v26 = vld [vmem:[%s15264_s2 + $0x48] sm:$0xff]  ;;  %v302_v30 = vld [vmem:[%s15264_s2 + $0x40] sm:$0xff]  ;;  %v301_v34 = vld [vmem:[%s15264_s2 + $0x38] sm:$0xff] }
  0x16   : > { %10591 = vmatprep.subr.mxu1 %v353_v17  ;;  %10557 = vmatpush3.msra.mxu0 %v305_v18  ;;  %v335_v27 = vld [vmem:[%s15264_s2 + $0x148] sm:$0xff]  ;;  %v334_v31 = vld [vmem:[%s15264_s2 + $0x140] sm:$0xff]  ;;  %v333_v35 = vld [vmem:[%s15264_s2 + $0x138] sm:$0xff] }
  0x17   : > { %10592 = vmatpush3.msra.mxu1 %v337_v19  ;;  %10558 = vmatprep.subr.mxu0 %v320_v20  ;;  %v316_v36 = vld [vmem:[%s15264_s2 + $0xb0] sm:$0xff]  ;;  %v315_v41 = vld [vmem:[%s15264_s2 + $0xa8] sm:$0xff]  ;;  %v314_v45 = vld [vmem:[%s15264_s2 + $0xa0] sm:$0xff] }
  0x18   : > { %10593 = vmatprep.subr.mxu1 %v352_v21  ;;  %10559 = vmatpush3.msra.mxu0 %v304_v22  ;;  %v348_v37 = vld [vmem:[%s15264_s2 + $0x1b0] sm:$0xff]  ;;  %v347_v42 = vld [vmem:[%s15264_s2 + $0x1a8] sm:$0xff]  ;;  %v346_v46 = vld [vmem:[%s15264_s2 + $0x1a0] sm:$0xff] }
  0x19   : > { %10594 = vmatpush3.msra.mxu1 %v336_v23  ;;  %10560 = vmatprep.subr.mxu0 %v319_v24  ;;  %v300_v39 = vld [vmem:[%s15264_s2 + $0x30] sm:$0xff]  ;;  %v299_v43 = vld [vmem:[%s15264_s2 + $0x28] sm:$0xff]  ;;  %v298_v48 = vld [vmem:[%s15264_s2 + $0x20] sm:$0xff] }
  0x1a   : > { %10595 = vmatprep.subr.mxu1 %v351_v25  ;;  %10561 = vmatpush3.msra.mxu0 %v303_v26  ;;  %v332_v40 = vld [vmem:[%s15264_s2 + $0x130] sm:$0xff]  ;;  %v331_v44 = vld [vmem:[%s15264_s2 + $0x128] sm:$0xff]  ;;  %v330_v49 = vld [vmem:[%s15264_s2 + $0x120] sm:$0xff] }
  0x1b   : > { %10596 = vmatpush3.msra.mxu1 %v335_v27  ;;  %10562 = vmatprep.subr.mxu0 %v318_v28  ;;  %v313_v50 = vld [vmem:[%s15264_s2 + $0x98] sm:$0xff]  ;;  %v312_v54 = vld [vmem:[%s15264_s2 + $0x90] sm:$0xff]  ;;  %v11091_v59 = vld [vmem:[%s11067_s23] sm:$0xff] }
  0x1c   : > { %10597 = vmatprep.subr.mxu1 %v350_v29  ;;  %10563 = vmatpush3.msra.mxu0 %v302_v30  ;;  %v345_v51 = vld [vmem:[%s15264_s2 + $0x198] sm:$0xff]  ;;  %v344_v55 = vld [vmem:[%s15264_s2 + $0x190] sm:$0xff]  ;;  %v311_v61 = vld [vmem:[%s15264_s2 + $0x88] sm:$0xff]  ;;  %v560_v5 = vrot.slane %v11091_v59, %v11082_v56  ;;  %v556_v7 = vrot.slane %v11091_v59, %v11094_v60  ;;  %v568_v9 = vrot.slane %v11091_v59, %v11103_v63 }
  0x1d   : > { %10598 = vmatpush3.msra.mxu1 %v334_v31  ;;  %10564 = vmatprep.subr.mxu0 %v317_v32  ;;  %v297_v52 = vld [vmem:[%s15264_s2 + $0x18] sm:$0xff]  ;;  %v296_v57 = vld [vmem:[%s15264_s2 + $0x10] sm:$0xff]  ;;  %v343_v62 = vld [vmem:[%s15264_s2 + $0x188] sm:$0xff]  ;;  %v564_v11 = vrot.slane %v11091_v59, %v11112_v2 }
  0x1e   : > { %10599 = vmatprep.subr.mxu1 %v349_v33  ;;  %10565 = vmatpush3.msra.mxu0 %v301_v34  ;;  %v329_v53 = vld [vmem:[%s15264_s2 + $0x118] sm:$0xff]  ;;  %v328_v58 = vld [vmem:[%s15264_s2 + $0x110] sm:$0xff]  ;;  %v295_v0 = vld [vmem:[%s15264_s2 + $0x8] sm:$0xff] }
  0x1f   : > { %10600 = vmatpush3.msra.mxu1 %v333_v35  ;;  %10566 = vmatprep.subr.mxu0 %v316_v36  ;;  %v327_v1 = vld [vmem:[%s15264_s2 + $0x108] sm:$0xff]  ;;  %v310_v3 = vld [vmem:[%s15264_s2 + $0x80] sm:$0xff]  ;;  %v389_v10 = vld [vmem:[%s15264_s2 + $0x2f8] sm:$0xff] }
  0x20   : > { %10601 = vmatprep.subr.mxu1 %v348_v37  ;;  %10567 = vmatpush3.msra.mxu0 %v300_v39  ;;  %v342_v4 = vld [vmem:[%s15264_s2 + $0x180] sm:$0xff]  ;;  %v421_v12 = vld [vmem:[%s15264_s2 + $0x3f8] sm:$0xff]  ;;  %v388_v15 = vld [vmem:[%s15264_s2 + $0x2f0] sm:$0xff] }
  0x21   : > { %10602 = vmatpush3.msra.mxu1 %v332_v40  ;;  %10568 = vmatprep.subr.mxu0 %v315_v41  ;;  %v294_v6 = vld [vmem:[%s15264_s2] sm:$0xff]  ;;  %v373_v13 = vld [vmem:[%s15264_s2 + $0x278] sm:$0xff]  ;;  %v420_v16 = vld [vmem:[%s15264_s2 + $0x3f0] sm:$0xff] }
  0x22   : > { %10603 = vmatprep.subr.mxu1 %v347_v42  ;;  %10569 = vmatpush3.msra.mxu0 %v299_v43  ;;  %v326_v8 = vld [vmem:[%s15264_s2 + $0x100] sm:$0xff]  ;;  %v405_v14 = vld [vmem:[%s15264_s2 + $0x378] sm:$0xff]  ;;  %v372_v17 = vld [vmem:[%s15264_s2 + $0x270] sm:$0xff] }
  0x23   : > { %10604 = vmatpush3.msra.mxu1 %v331_v44  ;;  %10570 = vmatprep.subr.mxu0 %v314_v45  ;;  %v404_v18 = vld [vmem:[%s15264_s2 + $0x370] sm:$0xff]  ;;  %v387_v19 = vld [vmem:[%s15264_s2 + $0x2e8] sm:$0xff]  ;;  %v386_v23 = vld [vmem:[%s15264_s2 + $0x2e0] sm:$0xff] }
  0x24   : > { %10605 = vmatprep.subr.mxu1 %v346_v46  ;;  %10571 = vmatpush3.msra.mxu0 %v298_v48  ;;  %v419_v20 = vld [vmem:[%s15264_s2 + $0x3e8] sm:$0xff]  ;;  %v418_v24 = vld [vmem:[%s15264_s2 + $0x3e0] sm:$0xff]  ;;  %v385_v27 = vld [vmem:[%s15264_s2 + $0x2d8] sm:$0xff] }
  0x25   : > { %10606 = vmatpush3.msra.mxu1 %v330_v49  ;;  %10572 = vmatprep.subr.mxu0 %v313_v50  ;;  %v371_v21 = vld [vmem:[%s15264_s2 + $0x268] sm:$0xff]  ;;  %v370_v25 = vld [vmem:[%s15264_s2 + $0x260] sm:$0xff]  ;;  %v417_v28 = vld [vmem:[%s15264_s2 + $0x3d8] sm:$0xff] }
  0x26   : > { %10607 = vmatprep.subr.mxu1 %v345_v51  ;;  %10573 = vmatpush3.msra.mxu0 %v297_v52  ;;  %v403_v22 = vld [vmem:[%s15264_s2 + $0x368] sm:$0xff]  ;;  %v402_v26 = vld [vmem:[%s15264_s2 + $0x360] sm:$0xff]  ;;  %v369_v29 = vld [vmem:[%s15264_s2 + $0x258] sm:$0xff] }
  0x27   : > { %10608 = vmatpush3.msra.mxu1 %v329_v53  ;;  %10574 = vmatprep.subr.mxu0 %v312_v54  ;;  %v401_v30 = vld [vmem:[%s15264_s2 + $0x358] sm:$0xff]  ;;  %v384_v31 = vld [vmem:[%s15264_s2 + $0x2d0] sm:$0xff]  ;;  %v383_v35 = vld [vmem:[%s15264_s2 + $0x2c8] sm:$0xff] }
  0x28   : > { %10609 = vmatprep.subr.mxu1 %v344_v55  ;;  %10575 = vmatpush3.msra.mxu0 %v296_v57  ;;  %v416_v32 = vld [vmem:[%s15264_s2 + $0x3d0] sm:$0xff]  ;;  %v415_v36 = vld [vmem:[%s15264_s2 + $0x3c8] sm:$0xff]  ;;  %v382_v39 = vld [vmem:[%s15264_s2 + $0x2c0] sm:$0xff] }
  0x29   : > { %10610 = vmatpush3.msra.mxu1 %v328_v58  ;;  %10576 = vmatprep.subr.mxu0 %v311_v61  ;;  %v368_v33 = vld [vmem:[%s15264_s2 + $0x250] sm:$0xff]  ;;  %v367_v37 = vld [vmem:[%s15264_s2 + $0x248] sm:$0xff]  ;;  %v414_v40 = vld [vmem:[%s15264_s2 + $0x3c0] sm:$0xff] }
  0x2a   : > { %10611 = vmatprep.subr.mxu1 %v343_v62  ;;  %10577 = vmatpush3.msra.mxu0 %v295_v0  ;;  %v400_v34 = vld [vmem:[%s15264_s2 + $0x350] sm:$0xff]  ;;  %v399_v38 = vld [vmem:[%s15264_s2 + $0x348] sm:$0xff]  ;;  %v366_v41 = vld [vmem:[%s15264_s2 + $0x240] sm:$0xff] }
  0x2b   : > { %10612 = vmatpush3.msra.mxu1 %v327_v1  ;;  %10578 = vmatprep.subr.mxu0 %v310_v3  ;;  %v398_v42 = vld [vmem:[%s15264_s2 + $0x340] sm:$0xff]  ;;  %v381_v43 = vld [vmem:[%s15264_s2 + $0x2b8] sm:$0xff]  ;;  %v380_v48 = vld [vmem:[%s15264_s2 + $0x2b0] sm:$0xff] }
  0x2c   : > { %10613 = vmatprep.subr.mxu1 %v342_v4  ;;  %10579 = vmatpush3.msra.mxu0 %v294_v6  ;;  %v413_v44 = vld [vmem:[%s15264_s2 + $0x3b8] sm:$0xff]  ;;  %v412_v49 = vld [vmem:[%s15264_s2 + $0x3b0] sm:$0xff]  ;;  %v379_v52 = vld [vmem:[%s15264_s2 + $0x2a8] sm:$0xff] }
  0x2d   : > { %697 = vmatprep.mubr.f32.mxu0 %v560_v5  ;;  %10614 = vmatpush3.msra.mxu1 %v326_v8  ;;  %v365_v45 = vld [vmem:[%s15264_s2 + $0x238] sm:$0xff]  ;;  %v364_v50 = vld [vmem:[%s15264_s2 + $0x230] sm:$0xff]  ;;  %v411_v53 = vld [vmem:[%s15264_s2 + $0x3a8] sm:$0xff] }
  0x2e   : > { %698 = vmatmul.mubr.f32.vlgmr.msra.gmra.mxu0 %v556_v7  ;;  %767 = vmatprep.mubr.f32.mxu1 %v568_v9  ;;  %v397_v46 = vld [vmem:[%s15264_s2 + $0x338] sm:$0xff]  ;;  %v396_v51 = vld [vmem:[%s15264_s2 + $0x330] sm:$0xff]  ;;  %v363_v54 = vld [vmem:[%s15264_s2 + $0x228] sm:$0xff]  ;;  %v11297_v7 = vsub.s32 5, %v11050_v47 }
  0x2f   : > { %10618 = vmatprep.subr.mxu0 %v389_v10  ;;  %10653 = vmatprep.subr.mxu1 %v421_v12  ;;  %v395_v55 = vld [vmem:[%s15264_s2 + $0x328] sm:$0xff]  ;;  %v378_v57 = vld [vmem:[%s15264_s2 + $0x2a0] sm:$0xff]  ;;  %v377_v0 = vld [vmem:[%s15264_s2 + $0x298] sm:$0xff]  ;;  %v11306_v10 = vsub.s32 4, %v11050_v47 }
  0x30   : > { %768 = vmatmul.mubr.f32.vlgmr.msra.gmra.mxu1 %v564_v11  ;;  %10619 = vmatpush3.msra.mxu0 %v373_v13  ;;  %v410_v58 = vld [vmem:[%s15264_s2 + $0x3a0] sm:$0xff]  ;;  %v409_v1 = vld [vmem:[%s15264_s2 + $0x398] sm:$0xff]  ;;  %v376_v5 = vld [vmem:[%s15264_s2 + $0x290] sm:$0xff]  ;;  %v11315_v13 = vsub.s32 7, %v11050_v47 }
  0x31   : > { %10654 = vmatpush3.msra.mxu1 %v405_v14  ;;  %10620 = vmatprep.subr.mxu0 %v388_v15  ;;  %v362_v61 = vld [vmem:[%s15264_s2 + $0x220] sm:$0xff]  ;;  %v361_v3 = vld [vmem:[%s15264_s2 + $0x218] sm:$0xff]  ;;  %v408_v6 = vld [vmem:[%s15264_s2 + $0x390] sm:$0xff] }
  0x32   : > { %10655 = vmatprep.subr.mxu1 %v420_v16  ;;  %10621 = vmatpush3.msra.mxu0 %v372_v17  ;;  %v394_v62 = vld [vmem:[%s15264_s2 + $0x320] sm:$0xff]  ;;  %v393_v4 = vld [vmem:[%s15264_s2 + $0x318] sm:$0xff]  ;;  %v360_v8 = vld [vmem:[%s15264_s2 + $0x210] sm:$0xff]  ;;  %v11324_v16 = vsub.s32 6, %v11050_v47 }
  0x33   : > { %10656 = vmatpush3.msra.mxu1 %v404_v18  ;;  %10622 = vmatprep.subr.mxu0 %v387_v19  ;;  %v392_v9 = vld [vmem:[%s15264_s2 + $0x310] sm:$0xff]  ;;  %v375_v11 = vld [vmem:[%s15264_s2 + $0x288] sm:$0xff]  ;;  %v374_v17 = vld [vmem:[%s15264_s2 + $0x280] sm:$0xff]  ;;  %v576_v19 = vrot.slane %v11091_v59, %v11297_v7 }
  0x34   : > { %10657 = vmatprep.subr.mxu1 %v419_v20  ;;  %10623 = vmatpush3.msra.mxu0 %v371_v21  ;;  %v407_v12 = vld [vmem:[%s15264_s2 + $0x388] sm:$0xff]  ;;  %v406_v18 = vld [vmem:[%s15264_s2 + $0x380] sm:$0xff]  ;;  %v572_v21 = vrot.slane %v11091_v59, %v11306_v10 }
  0x35   : > { %10658 = vmatpush3.msra.mxu1 %v403_v22  ;;  %10624 = vmatprep.subr.mxu0 %v386_v23  ;;  %v359_v14 = vld [vmem:[%s15264_s2 + $0x208] sm:$0xff]  ;;  %v358_v20 = vld [vmem:[%s15264_s2 + $0x200] sm:$0xff]  ;;  %v584_v23 = vrot.slane %v11091_v59, %v11315_v13 }
  0x36   : > { %10659 = vmatprep.subr.mxu1 %v418_v24  ;;  %10625 = vmatpush3.msra.mxu0 %v370_v25  ;;  %v391_v15 = vld [vmem:[%s15264_s2 + $0x308] sm:$0xff]  ;;  %v390_v22 = vld [vmem:[%s15264_s2 + $0x300] sm:$0xff]  ;;  %v453_v24 = vld [vmem:[%s15264_s2 + $0x4f8] sm:$0xff]  ;;  %v580_v25 = vrot.slane %v11091_v59, %v11324_v16 }
  0x37   : > { %10660 = vmatpush3.msra.mxu1 %v402_v26  ;;  %10626 = vmatprep.subr.mxu0 %v385_v27  ;;  %v485_v26 = vld [vmem:[%s15264_s2 + $0x5f8] sm:$0xff]  ;;  %v452_v59 = vld [vmem:[%s15264_s2 + $0x4f0] sm:$0xff] }
  0x38   : > { %10661 = vmatprep.subr.mxu1 %v417_v28  ;;  %10627 = vmatpush3.msra.mxu0 %v369_v29  ;;  %v437_v27 = vld [vmem:[%s15264_s2 + $0x478] sm:$0xff]  ;;  %v484_v29 = vld [vmem:[%s15264_s2 + $0x5f0] sm:$0xff] }
  0x39   : > { %10662 = vmatpush3.msra.mxu1 %v401_v30  ;;  %10628 = vmatprep.subr.mxu0 %v384_v31  ;;  %v469_v28 = vld [vmem:[%s15264_s2 + $0x578] sm:$0xff]  ;;  %v436_v30 = vld [vmem:[%s15264_s2 + $0x470] sm:$0xff] }
  0x3a   : > { %10663 = vmatprep.subr.mxu1 %v416_v32  ;;  %10629 = vmatpush3.msra.mxu0 %v368_v33  ;;  %v468_v31 = vld [vmem:[%s15264_s2 + $0x570] sm:$0xff]  ;;  %v451_v32 = vld [vmem:[%s15264_s2 + $0x4e8] sm:$0xff] }
  0x3b   : > { %10664 = vmatpush3.msra.mxu1 %v400_v34  ;;  %10630 = vmatprep.subr.mxu0 %v383_v35  ;;  %v483_v33 = vld [vmem:[%s15264_s2 + $0x5e8] sm:$0xff] }
  0x3c   : > { %10665 = vmatprep.subr.mxu1 %v415_v36  ;;  %10631 = vmatpush3.msra.mxu0 %v367_v37  ;;  %v435_v34 = vld [vmem:[%s15264_s2 + $0x468] sm:$0xff]  ;;  %v450_v36 = vld [vmem:[%s15264_s2 + $0x4e0] sm:$0xff] }
  0x3d   : > { %10666 = vmatpush3.msra.mxu1 %v399_v38  ;;  %10632 = vmatprep.subr.mxu0 %v382_v39  ;;  %v467_v35 = vld [vmem:[%s15264_s2 + $0x568] sm:$0xff]  ;;  %v482_v37 = vld [vmem:[%s15264_s2 + $0x5e0] sm:$0xff] }
  0x3e   : > { %10667 = vmatprep.subr.mxu1 %v414_v40  ;;  %10633 = vmatpush3.msra.mxu0 %v366_v41  ;;  %v434_v38 = vld [vmem:[%s15264_s2 + $0x460] sm:$0xff]  ;;  %v449_v40 = vld [vmem:[%s15264_s2 + $0x4d8] sm:$0xff] }
  0x3f   : > { %10668 = vmatpush3.msra.mxu1 %v398_v42  ;;  %10634 = vmatprep.subr.mxu0 %v381_v43  ;;  %v466_v39 = vld [vmem:[%s15264_s2 + $0x560] sm:$0xff]  ;;  %v481_v41 = vld [vmem:[%s15264_s2 + $0x5d8] sm:$0xff] }
  0x40   : > { %10669 = vmatprep.subr.mxu1 %v413_v44  ;;  %10635 = vmatpush3.msra.mxu0 %v365_v45  ;;  %v433_v42 = vld [vmem:[%s15264_s2 + $0x458] sm:$0xff]  ;;  %v448_v44 = vld [vmem:[%s15264_s2 + $0x4d0] sm:$0xff] }
  0x41   : > { %10670 = vmatpush3.msra.mxu1 %v397_v46  ;;  %10636 = vmatprep.subr.mxu0 %v380_v48  ;;  %v465_v43 = vld [vmem:[%s15264_s2 + $0x558] sm:$0xff]  ;;  %v480_v45 = vld [vmem:[%s15264_s2 + $0x5d0] sm:$0xff] }
  0x42   : > { %10671 = vmatprep.subr.mxu1 %v412_v49  ;;  %10637 = vmatpush3.msra.mxu0 %v364_v50  ;;  %v432_v46 = vld [vmem:[%s15264_s2 + $0x450] sm:$0xff]  ;;  %v447_v49 = vld [vmem:[%s15264_s2 + $0x4c8] sm:$0xff] }
  0x43   : > { %10672 = vmatpush3.msra.mxu1 %v396_v51  ;;  %10638 = vmatprep.subr.mxu0 %v379_v52  ;;  %v464_v48 = vld [vmem:[%s15264_s2 + $0x550] sm:$0xff]  ;;  %v479_v50 = vld [vmem:[%s15264_s2 + $0x5c8] sm:$0xff] }
  0x44   : > { %10673 = vmatprep.subr.mxu1 %v411_v53  ;;  %10639 = vmatpush3.msra.mxu0 %v363_v54  ;;  %v431_v51 = vld [vmem:[%s15264_s2 + $0x448] sm:$0xff]  ;;  %v446_v53 = vld [vmem:[%s15264_s2 + $0x4c0] sm:$0xff] }
  0x45   : > { %10674 = vmatpush3.msra.mxu1 %v395_v55  ;;  %10640 = vmatprep.subr.mxu0 %v378_v57  ;;  %v463_v52 = vld [vmem:[%s15264_s2 + $0x548] sm:$0xff]  ;;  %v478_v54 = vld [vmem:[%s15264_s2 + $0x5c0] sm:$0xff] }
  0x46   : > { %10675 = vmatprep.subr.mxu1 %v410_v58  ;;  %10641 = vmatpush3.msra.mxu0 %v362_v61  ;;  %v430_v55 = vld [vmem:[%s15264_s2 + $0x440] sm:$0xff]  ;;  %v445_v58 = vld [vmem:[%s15264_s2 + $0x4b8] sm:$0xff] }
  0x47   : > { %10676 = vmatpush3.msra.mxu1 %v394_v62  ;;  %10642 = vmatprep.subr.mxu0 %v377_v0  ;;  %v462_v57 = vld [vmem:[%s15264_s2 + $0x540] sm:$0xff]  ;;  %v477_v61 = vld [vmem:[%s15264_s2 + $0x5b8] sm:$0xff] }
  0x48   : > { %10677 = vmatprep.subr.mxu1 %v409_v1  ;;  %10643 = vmatpush3.msra.mxu0 %v361_v3  ;;  %v429_v62 = vld [vmem:[%s15264_s2 + $0x438] sm:$0xff]  ;;  %v444_v1 = vld [vmem:[%s15264_s2 + $0x4b0] sm:$0xff] }
  0x49   : > { %10678 = vmatpush3.msra.mxu1 %v393_v4  ;;  %10644 = vmatprep.subr.mxu0 %v376_v5  ;;  %v461_v0 = vld [vmem:[%s15264_s2 + $0x538] sm:$0xff]  ;;  %v476_v3 = vld [vmem:[%s15264_s2 + $0x5b0] sm:$0xff] }
  0x4a   : > { %10679 = vmatprep.subr.mxu1 %v408_v6  ;;  %10645 = vmatpush3.msra.mxu0 %v360_v8  ;;  %v428_v4 = vld [vmem:[%s15264_s2 + $0x430] sm:$0xff]  ;;  %v443_v6 = vld [vmem:[%s15264_s2 + $0x4a8] sm:$0xff] }
  0x4b   : > { %10680 = vmatpush3.msra.mxu1 %v392_v9  ;;  %10646 = vmatprep.subr.mxu0 %v375_v11  ;;  %v460_v5 = vld [vmem:[%s15264_s2 + $0x530] sm:$0xff]  ;;  %v475_v8 = vld [vmem:[%s15264_s2 + $0x5a8] sm:$0xff] }
  0x4c   : > { %10681 = vmatprep.subr.mxu1 %v407_v12  ;;  %10647 = vmatpush3.msra.mxu0 %v359_v14  ;;  %v427_v9 = vld [vmem:[%s15264_s2 + $0x428] sm:$0xff]  ;;  %v442_v12 = vld [vmem:[%s15264_s2 + $0x4a0] sm:$0xff] }
  0x4d   : > { %10682 = vmatpush3.msra.mxu1 %v391_v15  ;;  %10648 = vmatprep.subr.mxu0 %v374_v17  ;;  %v459_v11 = vld [vmem:[%s15264_s2 + $0x528] sm:$0xff]  ;;  %v474_v14 = vld [vmem:[%s15264_s2 + $0x5a0] sm:$0xff] }
  0x4e   : > { %10683 = vmatprep.subr.mxu1 %v406_v18  ;;  %10649 = vmatpush3.msra.mxu0 %v358_v20  ;;  %v426_v15 = vld [vmem:[%s15264_s2 + $0x420] sm:$0xff]  ;;  %v441_v18 = vld [vmem:[%s15264_s2 + $0x498] sm:$0xff] }
  0x4f   : > { %837 = vmatprep.mubr.f32.mxu0 %v576_v19  ;;  %10684 = vmatpush3.msra.mxu1 %v390_v22  ;;  %v458_v17 = vld [vmem:[%s15264_s2 + $0x520] sm:$0xff]  ;;  %v473_v19 = vld [vmem:[%s15264_s2 + $0x598] sm:$0xff]  ;;  %v440_v22 = vld [vmem:[%s15264_s2 + $0x490] sm:$0xff] }
  0x50   : > { %838 = vmatmul.mubr.f32.vlgmr.msra.gmra.mxu0 %v572_v21  ;;  %907 = vmatprep.mubr.f32.mxu1 %v584_v23  ;;  %v425_v20 = vld [vmem:[%s15264_s2 + $0x418] sm:$0xff]  ;;  %v472_v23 = vld [vmem:[%s15264_s2 + $0x590] sm:$0xff] }
  0x51   : > { %10688 = vmatprep.subr.mxu0 %v453_v24  ;;  %10723 = vmatprep.subr.mxu1 %v485_v26  ;;  %v457_v21 = vld [vmem:[%s15264_s2 + $0x518] sm:$0xff]  ;;  %v11509_v24 = vld [vmem:[%s11067_s23 + $0x8] sm:$0xff]  ;;  %v456_v26 = vld [vmem:[%s15264_s2 + $0x510] sm:$0xff] }
  0x52   : > { %908 = vmatmul.mubr.f32.vlgmr.msra.gmra.mxu1 %v580_v25  ;;  %10689 = vmatpush3.msra.mxu0 %v437_v27  ;;  %v424_v25 = vld [vmem:[%s15264_s2 + $0x410] sm:$0xff]  ;;  %v439_v27 = vld [vmem:[%s15264_s2 + $0x488] sm:$0xff] }
  0x53   : > { %10724 = vmatpush3.msra.mxu1 %v469_v28  ;;  %10690 = vmatprep.subr.mxu0 %v452_v59  ;;  %v471_v28 = vld [vmem:[%s15264_s2 + $0x588] sm:$0xff] }
  0x54   : > { %10725 = vmatprep.subr.mxu1 %v484_v29  ;;  %10691 = vmatpush3.msra.mxu0 %v436_v30  ;;  %v423_v59 = vld [vmem:[%s15264_s2 + $0x408] sm:$0xff]  ;;  %v438_v30 = vld [vmem:[%s15264_s2 + $0x480] sm:$0xff] }
  0x55   : > { %10726 = vmatpush3.msra.mxu1 %v468_v31  ;;  %10692 = vmatprep.subr.mxu0 %v451_v32  ;;  %v455_v29 = vld [vmem:[%s15264_s2 + $0x508] sm:$0xff]  ;;  %v470_v31 = vld [vmem:[%s15264_s2 + $0x580] sm:$0xff]  ;;  %v592_v32 = vrot.slane %v11509_v24, %v11082_v56 }
  0x56   : > { %10727 = vmatprep.subr.mxu1 %v483_v33  ;;  %10693 = vmatpush3.msra.mxu0 %v435_v34  ;;  %v422_v33 = vld [vmem:[%s15264_s2 + $0x400] sm:$0xff]  ;;  %v588_v34 = vrot.slane %v11509_v24, %v11094_v60 }
  0x57   : > { %10728 = vmatpush3.msra.mxu1 %v467_v35  ;;  %10694 = vmatprep.subr.mxu0 %v450_v36  ;;  %v454_v35 = vld [vmem:[%s15264_s2 + $0x500] sm:$0xff]  ;;  %v600_v36 = vrot.slane %v11509_v24, %v11103_v63 }
  0x58   : > { %10729 = vmatprep.subr.mxu1 %v482_v37  ;;  %10695 = vmatpush3.msra.mxu0 %v434_v38  ;;  %v517_v37 = vld [vmem:[%s15264_s2 + $0x6f8] sm:$0xff]  ;;  %v596_v38 = vrot.slane %v11509_v24, %v11112_v2 }
  0x59   : > { %10730 = vmatpush3.msra.mxu1 %v466_v39  ;;  %10696 = vmatprep.subr.mxu0 %v449_v40  ;;  %v549_v39 = vld [vmem:[%s15264_s2 + $0x7f8] sm:$0xff] }
  0x5a   : > { %10731 = vmatprep.subr.mxu1 %v481_v41  ;;  %10697 = vmatpush3.msra.mxu0 %v433_v42  ;;  %v501_v40 = vld [vmem:[%s15264_s2 + $0x678] sm:$0xff]  ;;  %v516_v42 = vld [vmem:[%s15264_s2 + $0x6f0] sm:$0xff] }
  0x5b   : > { %10732 = vmatpush3.msra.mxu1 %v465_v43  ;;  %10698 = vmatprep.subr.mxu0 %v448_v44  ;;  %v533_v41 = vld [vmem:[%s15264_s2 + $0x778] sm:$0xff]  ;;  %v548_v43 = vld [vmem:[%s15264_s2 + $0x7f0] sm:$0xff] }
  0x5c   : > { %10733 = vmatprep.subr.mxu1 %v480_v45  ;;  %10699 = vmatpush3.msra.mxu0 %v432_v46  ;;  %v500_v44 = vld [vmem:[%s15264_s2 + $0x670] sm:$0xff]  ;;  %v515_v46 = vld [vmem:[%s15264_s2 + $0x6e8] sm:$0xff] }
  0x5d   : > { %10734 = vmatpush3.msra.mxu1 %v464_v48  ;;  %10700 = vmatprep.subr.mxu0 %v447_v49  ;;  %v532_v45 = vld [vmem:[%s15264_s2 + $0x770] sm:$0xff]  ;;  %v547_v48 = vld [vmem:[%s15264_s2 + $0x7e8] sm:$0xff] }
  0x5e   : > { %10735 = vmatprep.subr.mxu1 %v479_v50  ;;  %10701 = vmatpush3.msra.mxu0 %v431_v51  ;;  %v499_v49 = vld [vmem:[%s15264_s2 + $0x668] sm:$0xff]  ;;  %v514_v51 = vld [vmem:[%s15264_s2 + $0x6e0] sm:$0xff] }
  0x5f   : > { %10736 = vmatpush3.msra.mxu1 %v463_v52  ;;  %10702 = vmatprep.subr.mxu0 %v446_v53  ;;  %v531_v50 = vld [vmem:[%s15264_s2 + $0x768] sm:$0xff]  ;;  %v546_v52 = vld [vmem:[%s15264_s2 + $0x7e0] sm:$0xff] }
  0x60   : > { %10737 = vmatprep.subr.mxu1 %v478_v54  ;;  %10703 = vmatpush3.msra.mxu0 %v430_v55  ;;  %v498_v53 = vld [vmem:[%s15264_s2 + $0x660] sm:$0xff]  ;;  %v513_v55 = vld [vmem:[%s15264_s2 + $0x6d8] sm:$0xff] }
  0x61   : > { %10738 = vmatpush3.msra.mxu1 %v462_v57  ;;  %10704 = vmatprep.subr.mxu0 %v445_v58  ;;  %v530_v54 = vld [vmem:[%s15264_s2 + $0x760] sm:$0xff]  ;;  %v545_v57 = vld [vmem:[%s15264_s2 + $0x7d8] sm:$0xff] }
  0x62   : > { %10739 = vmatprep.subr.mxu1 %v477_v61  ;;  %10705 = vmatpush3.msra.mxu0 %v429_v62  ;;  %v497_v58 = vld [vmem:[%s15264_s2 + $0x658] sm:$0xff]  ;;  %v512_v62 = vld [vmem:[%s15264_s2 + $0x6d0] sm:$0xff] }
  0x63   : > { %10740 = vmatpush3.msra.mxu1 %v461_v0  ;;  %10706 = vmatprep.subr.mxu0 %v444_v1  ;;  %v529_v61 = vld [vmem:[%s15264_s2 + $0x758] sm:$0xff]  ;;  %v544_v0 = vld [vmem:[%s15264_s2 + $0x7d0] sm:$0xff] }
  0x64   : > { %10741 = vmatprep.subr.mxu1 %v476_v3  ;;  %10707 = vmatpush3.msra.mxu0 %v428_v4  ;;  %v496_v1 = vld [vmem:[%s15264_s2 + $0x650] sm:$0xff]  ;;  %v511_v4 = vld [vmem:[%s15264_s2 + $0x6c8] sm:$0xff] }
  0x65   : > { %10742 = vmatpush3.msra.mxu1 %v460_v5  ;;  %10708 = vmatprep.subr.mxu0 %v443_v6  ;;  %v528_v3 = vld [vmem:[%s15264_s2 + $0x750] sm:$0xff]  ;;  %v543_v5 = vld [vmem:[%s15264_s2 + $0x7c8] sm:$0xff] }
  0x66   : > { %10743 = vmatprep.subr.mxu1 %v475_v8  ;;  %10709 = vmatpush3.msra.mxu0 %v427_v9  ;;  %v495_v6 = vld [vmem:[%s15264_s2 + $0x648] sm:$0xff]  ;;  %v510_v9 = vld [vmem:[%s15264_s2 + $0x6c0] sm:$0xff] }
  0x67   : > { %10744 = vmatpush3.msra.mxu1 %v459_v11  ;;  %10710 = vmatprep.subr.mxu0 %v442_v12  ;;  %v527_v8 = vld [vmem:[%s15264_s2 + $0x748] sm:$0xff]  ;;  %v542_v11 = vld [vmem:[%s15264_s2 + $0x7c0] sm:$0xff] }
  0x68   : > { %10745 = vmatprep.subr.mxu1 %v474_v14  ;;  %10711 = vmatpush3.msra.mxu0 %v426_v15  ;;  %v494_v12 = vld [vmem:[%s15264_s2 + $0x640] sm:$0xff]  ;;  %v509_v15 = vld [vmem:[%s15264_s2 + $0x6b8] sm:$0xff] }
  0x69   : > { %10746 = vmatpush3.msra.mxu1 %v458_v17  ;;  %10712 = vmatprep.subr.mxu0 %v441_v18  ;;  %v526_v14 = vld [vmem:[%s15264_s2 + $0x740] sm:$0xff]  ;;  %v541_v17 = vld [vmem:[%s15264_s2 + $0x7b8] sm:$0xff] }
  0x6a   : > { %10747 = vmatprep.subr.mxu1 %v473_v19  ;;  %10713 = vmatpush3.msra.mxu0 %v425_v20  ;;  %v493_v18 = vld [vmem:[%s15264_s2 + $0x638] sm:$0xff]  ;;  %v508_v20 = vld [vmem:[%s15264_s2 + $0x6b0] sm:$0xff] }
  0x6b   : > { %10748 = vmatpush3.msra.mxu1 %v457_v21  ;;  %10714 = vmatprep.subr.mxu0 %v440_v22  ;;  %v525_v19 = vld [vmem:[%s15264_s2 + $0x738] sm:$0xff]  ;;  %v540_v21 = vld [vmem:[%s15264_s2 + $0x7b0] sm:$0xff] }
  0x6c   : > { %10749 = vmatprep.subr.mxu1 %v472_v23  ;;  %10715 = vmatpush3.msra.mxu0 %v424_v25  ;;  %v492_v22 = vld [vmem:[%s15264_s2 + $0x630] sm:$0xff]  ;;  %v507_v25 = vld [vmem:[%s15264_s2 + $0x6a8] sm:$0xff] }
  0x6d   : > { %10750 = vmatpush3.msra.mxu1 %v456_v26  ;;  %10716 = vmatprep.subr.mxu0 %v439_v27  ;;  %v524_v23 = vld [vmem:[%s15264_s2 + $0x730] sm:$0xff]  ;;  %v539_v26 = vld [vmem:[%s15264_s2 + $0x7a8] sm:$0xff] }
  0x6e   : > { %10751 = vmatprep.subr.mxu1 %v471_v28  ;;  %10717 = vmatpush3.msra.mxu0 %v423_v59  ;;  %v491_v27 = vld [vmem:[%s15264_s2 + $0x628] sm:$0xff]  ;;  %v506_v59 = vld [vmem:[%s15264_s2 + $0x6a0] sm:$0xff] }
  0x6f   : > { %10752 = vmatpush3.msra.mxu1 %v455_v29  ;;  %10718 = vmatprep.subr.mxu0 %v438_v30  ;;  %v523_v28 = vld [vmem:[%s15264_s2 + $0x728] sm:$0xff]  ;;  %v538_v29 = vld [vmem:[%s15264_s2 + $0x7a0] sm:$0xff] }
  0x70   : > { %10753 = vmatprep.subr.mxu1 %v470_v31  ;;  %10719 = vmatpush3.msra.mxu0 %v422_v33  ;;  %v490_v30 = vld [vmem:[%s15264_s2 + $0x620] sm:$0xff]  ;;  %v537_v33 = vld [vmem:[%s15264_s2 + $0x798] sm:$0xff] }
  0x71   : > { %977 = vmatprep.mubr.f32.mxu0 %v592_v32  ;;  %10754 = vmatpush3.msra.mxu1 %v454_v35  ;;  %v522_v31 = vld [vmem:[%s15264_s2 + $0x720] sm:$0xff]  ;;  %v505_v32 = vld [vmem:[%s15264_s2 + $0x698] sm:$0xff] }
  0x72   : > { %978 = vmatmul.mubr.f32.vlgmr.msra.gmra.mxu0 %v588_v34  ;;  %1047 = vmatprep.mubr.f32.mxu1 %v600_v36  ;;  %v489_v34 = vld [vmem:[%s15264_s2 + $0x618] sm:$0xff]  ;;  %v504_v36 = vld [vmem:[%s15264_s2 + $0x690] sm:$0xff] }
  0x73   : > { %10758 = vmatprep.subr.mxu0 %v517_v37  ;;  %10793 = vmatprep.subr.mxu1 %v549_v39  ;;  %v521_v35 = vld [vmem:[%s15264_s2 + $0x718] sm:$0xff]  ;;  %v536_v37 = vld [vmem:[%s15264_s2 + $0x790] sm:$0xff] }
  0x74   : > { %1048 = vmatmul.mubr.f32.vlgmr.msra.gmra.mxu1 %v596_v38  ;;  %10759 = vmatpush3.msra.mxu0 %v501_v40  ;;  %v488_v38 = vld [vmem:[%s15264_s2 + $0x610] sm:$0xff]  ;;  %v503_v40 = vld [vmem:[%s15264_s2 + $0x688] sm:$0xff] }
  0x75   : > { %10794 = vmatpush3.msra.mxu1 %v533_v41  ;;  %10760 = vmatprep.subr.mxu0 %v516_v42  ;;  %v520_v39 = vld [vmem:[%s15264_s2 + $0x710] sm:$0xff]  ;;  %v535_v41 = vld [vmem:[%s15264_s2 + $0x788] sm:$0xff] }
  0x76   : > { %10795 = vmatprep.subr.mxu1 %v548_v43  ;;  %10761 = vmatpush3.msra.mxu0 %v500_v44  ;;  %v487_v42 = vld [vmem:[%s15264_s2 + $0x608] sm:$0xff]  ;;  %v502_v44 = vld [vmem:[%s15264_s2 + $0x680] sm:$0xff] }
  0x77   : > { %10796 = vmatpush3.msra.mxu1 %v532_v45  ;;  %10762 = vmatprep.subr.mxu0 %v515_v46  ;;  %v519_v43 = vld [vmem:[%s15264_s2 + $0x708] sm:$0xff]  ;;  %v534_v45 = vld [vmem:[%s15264_s2 + $0x780] sm:$0xff]  ;;  %v608_v46 = vrot.slane %v11509_v24, %v11297_v7 }
  0x78   : > { %10797 = vmatprep.subr.mxu1 %v547_v48  ;;  %10763 = vmatpush3.msra.mxu0 %v499_v49  ;;  %v486_v48 = vld [vmem:[%s15264_s2 + $0x600] sm:$0xff]  ;;  %v616_v49 = vrot.slane %v11509_v24, %v11315_v13 }
  0x79   : > { %10798 = vmatpush3.msra.mxu1 %v531_v50  ;;  %10764 = vmatprep.subr.mxu0 %v514_v51  ;;  %v518_v50 = vld [vmem:[%s15264_s2 + $0x700] sm:$0xff]  ;;  %v604_v51 = vrot.slane %v11509_v24, %v11306_v10 }
  0x7a   : > { %10799 = vmatprep.subr.mxu1 %v546_v52  ;;  %10765 = vmatpush3.msra.mxu0 %v498_v53  ;;  %v612_v52 = vrot.slane %v11509_v24, %v11324_v16  ;;  %v1212_v53 = vld [vmem:[%s15266_s4 + $0x80] sm:$0xff]  ;;  %v1213_v24 = vld [vmem:[%s15266_s4 + $0x88] sm:$0xff] }
  0x7b   : > { %10800 = vmatpush3.msra.mxu1 %v530_v54  ;;  %10766 = vmatprep.subr.mxu0 %v513_v55  ;;  %v1220_v54 = vld [vmem:[%s15266_s4 + $0xc0] sm:$0xff] }
  0x7c   : > { %10801 = vmatprep.subr.mxu1 %v545_v57  ;;  %10767 = vmatpush3.msra.mxu0 %v497_v58  ;;  %v9499_v55 = vcombine.high %v1212_v53, %v1220_v54  ;;  %v1221_v57 = vld [vmem:[%s15266_s4 + $0xc8] sm:$0xff]  ;;  %v9498_v58 = vcombine.low %v1212_v53, %v1220_v54 }
  0x7d   : > { %10802 = vmatpush3.msra.mxu1 %v529_v61  ;;  %10768 = vmatprep.subr.mxu0 %v512_v62  ;;  %v9500_v61 = vcombine.low %v1213_v24, %v1221_v57  ;;  %v9501_v62 = vcombine.high %v1213_v24, %v1221_v57  ;;  %v1198_v57 = vld [vmem:[%s15266_s4 + $0x10] sm:$0xff] }
  0x7e   : > { %10803 = vmatprep.subr.mxu1 %v544_v0  ;;  %10769 = vmatpush3.msra.mxu0 %v496_v1  ;;  %v1196_v0 = vld [vmem:[%s15266_s4] sm:$0xff] }
  0x7f   : > { %10804 = vmatpush3.msra.mxu1 %v528_v3  ;;  %10770 = vmatprep.subr.mxu0 %v511_v4  ;;  %v1204_v1 = vld [vmem:[%s15266_s4 + $0x40] sm:$0xff]  ;;  %v1197_v3 = vld [vmem:[%s15266_s4 + $0x8] sm:$0xff] }
  0x80   : > { %10805 = vmatprep.subr.mxu1 %v543_v5  ;;  %10771 = vmatpush3.msra.mxu0 %v495_v6  ;;  %v9483_v4 = vcombine.high %v1196_v0, %v1204_v1  ;;  %v1205_v5 = vld [vmem:[%s15266_s4 + $0x48] sm:$0xff]  ;;  %v9482_v6 = vcombine.low %v1196_v0, %v1204_v1 }
  0x81   : > { %10806 = vmatpush3.msra.mxu1 %v527_v8  ;;  %10772 = vmatprep.subr.mxu0 %v510_v9  ;;  %v9484_v8 = vcombine.low %v1197_v3, %v1205_v5  ;;  %v9485_v9 = vcombine.high %v1197_v3, %v1205_v5  ;;  %v1216_v5 = vld [vmem:[%s15266_s4 + $0xa0] sm:$0xff] }
  0x82   : > { %10807 = vmatprep.subr.mxu1 %v542_v11  ;;  %10773 = vmatpush3.msra.mxu0 %v494_v12  ;;  %v11776_v11 = vld [vmem:[%s15266_s4 + $0x90] sm:$0xff] }
  0x83   : > { %10808 = vmatpush3.msra.mxu1 %v526_v14  ;;  %10774 = vmatprep.subr.mxu0 %v509_v15  ;;  %v1222_v12 = vld [vmem:[%s15266_s4 + $0xd0] sm:$0xff]  ;;  %v1215_v14 = vld [vmem:[%s15266_s4 + $0x98] sm:$0xff] }
  0x84   : > { %10809 = vmatprep.subr.mxu1 %v541_v17  ;;  %10775 = vmatpush3.msra.mxu0 %v493_v18  ;;  %v9503_v15 = vcombine.high %v11776_v11, %v1222_v12  ;;  %v1223_v17 = vld [vmem:[%s15266_s4 + $0xd8] sm:$0xff]  ;;  %v10849_v18 = vmov 0  }
  0x85   : > { %10810 = vmatpush3.msra.mxu1 %v525_v19  ;;  %10776 = vmatprep.subr.mxu0 %v508_v20  ;;  %v9502_v19 = vcombine.low %v11776_v11, %v1222_v12  ;;  %v9504_v20 = vcombine.low %v1215_v14, %v1223_v17 }
  0x86   : > { %10811 = vmatprep.subr.mxu1 %v540_v21  ;;  %10777 = vmatpush3.msra.mxu0 %v492_v22  ;;  %v9505_v21 = vcombine.high %v1215_v14, %v1223_v17  ;;  %v1200_v17 = vld [vmem:[%s15266_s4 + $0x20] sm:$0xff] }
  0x87   : > { %10812 = vmatpush3.msra.mxu1 %v524_v23  ;;  %10778 = vmatprep.subr.mxu0 %v507_v25 }
  0x88   : > { %10813 = vmatprep.subr.mxu1 %v539_v26  ;;  %10779 = vmatpush3.msra.mxu0 %v491_v27 }
  0x89   : > { %10814 = vmatpush3.msra.mxu1 %v523_v28  ;;  %10780 = vmatprep.subr.mxu0 %v506_v59  ;;  %v550_v28 = vld [vmem:[%s15265_s3] sm:$0x1] }
  0x8a   : > { %10815 = vmatprep.subr.mxu1 %v538_v29  ;;  %10781 = vmatpush3.msra.mxu0 %v490_v30 }
  0x8b   : > { %10816 = vmatpush3.msra.mxu1 %v522_v31  ;;  %10782 = vmatprep.subr.mxu0 %v505_v32 }
  0x8c   : > { %10817 = vmatprep.subr.mxu1 %v537_v33  ;;  %10783 = vmatpush3.msra.mxu0 %v489_v34 }
  0x8d   : > { %10818 = vmatpush3.msra.mxu1 %v521_v35  ;;  %10784 = vmatprep.subr.mxu0 %v504_v36 }
  0x8e   : > { %10819 = vmatprep.subr.mxu1 %v536_v37  ;;  %10785 = vmatpush3.msra.mxu0 %v488_v38 }
  0x8f   : > { %10820 = vmatpush3.msra.mxu1 %v520_v39  ;;  %10786 = vmatprep.subr.mxu0 %v503_v40 }
  0x90   : > { %10821 = vmatprep.subr.mxu1 %v535_v41  ;;  %10787 = vmatpush3.msra.mxu0 %v487_v42 }
  0x91   : > { %10822 = vmatpush3.msra.mxu1 %v519_v43  ;;  %10788 = vmatprep.subr.mxu0 %v502_v44 }
  0x92   : > { %10823 = vmatprep.subr.mxu1 %v534_v45  ;;  %10789 = vmatpush3.msra.mxu0 %v486_v48 }
  0x93   : > { %1117 = vmatprep.mubr.f32.mxu0 %v608_v46  ;;  %10824 = vmatpush3.msra.mxu1 %v518_v50 }
  0x94   : > { %1187 = vmatprep.mubr.f32.mxu1 %v616_v49  ;;  %1118 = vmatmul.mubr.f32.vlgmr.msra.gmra.mxu0 %v604_v51 }
  0x95   : > { %1188 = vmatmul.mubr.f32.vlgmr.msra.gmra.mxu1 %v612_v52  ;;  %1488 = vmatprep.subr.bf16.mxu0 %v9499_v55 }
  0x96   : > { %1529 = vmatprep.subr.bf16.mxu1 %v9501_v62  ;;  %1489 = vmatpush1.bf16.msra.mxu0 %v9498_v58  ;;  %v1206_v58 = vld [vmem:[%s15266_s4 + $0x50] sm:$0xff]  ;;  %v1207_v62 = vld [vmem:[%s15266_s4 + $0x58] sm:$0xff] }
  0x97   : > { %1530 = vmatpush1.bf16.msra.mxu1 %v9500_v61  ;;  %1490 = vmatprep.subr.bf16.mxu0 %v9483_v4  ;;  %v1199_v61 = vld [vmem:[%s15266_s4 + $0x18] sm:$0xff]  ;;  %v9487_v3 = vcombine.high %v1198_v57, %v1206_v58  ;;  %v9486_v11 = vcombine.low %v1198_v57, %v1206_v58  ;;  %v1892_v58 = vld [vmem:[%s15268_s6 + $0x140] sm:$0xff] }
  0x98   : > { %1531 = vmatprep.subr.bf16.mxu1 %v9485_v9  ;;  %1508 = vmatprep.mubr.bf16.mxu0 %v10849_v18  ;;  %v9489_v4 = vcombine.high %v1199_v61, %v1207_v62  ;;  %v1225_v9 = vld [vmem:[%s15266_s4 + $0xe8] sm:$0xff]  ;;  %v9488_v12 = vcombine.low %v1199_v61, %v1207_v62  ;;  %v1896_v61 = vld [vmem:[%s15268_s6 + $0x160] sm:$0xff] }
  0x99   : > { %1549 = vmatprep.mubr.bf16.mxu1 %v10849_v18  ;;  %v2020_v62 = vld [vmem:[%s15268_s6 + $0x540] sm:$0xff] }
  0x9a   : > { %1491 = vmatpush1.bf16.msra.mxu0 %v9482_v6  ;;  %v1224_v6 = vld [vmem:[%s15266_s4 + $0xe0] sm:$0xff] }
  0x9b   : > { %1532 = vmatpush1.bf16.msra.mxu1 %v9484_v8  ;;  %1570 = vmatprep.subr.bf16.mxu0 %v9503_v15  ;;  %v1217_v8 = vld [vmem:[%s15266_s4 + $0xa8] sm:$0xff]  ;;  %v9507_v14 = vcombine.high %v1216_v5, %v1224_v6 }
  0x9c   : > { %1611 = vmatprep.subr.bf16.mxu1 %v9505_v21  ;;  %v9509_v15 = vcombine.high %v1217_v8, %v1225_v9  ;;  %v1208_v21 = vld [vmem:[%s15266_s4 + $0x60] sm:$0xff] }
  0xee   : > { %v10580_v22 = vpop.f32.mrf.mxu0 }
  0xf0   : > { %v10615_v23 = vpop.f32.mrf.mxu1  ;;  %v10581_v25 = vpop.f32.mrf.mxu0 }
  0xf1   : > { %v10582_v27 = vadd.f32 %v10581_v25, %v10580_v22  ;;  %v9506_v22 = vcombine.low %v1216_v5, %v1224_v6  ;;  %v9491_v25 = vcombine.high %v1200_v17, %v1208_v21  ;;  %v9563_v5 = vcombine.high %v1892_v58, %v1896_v61 }
  0xf2   : > { %v10616_v59 = vpop.f32.mrf.mxu1 }
  0xf3   : > { %v700_v31 = vadd.f32 %v10582_v27, %v550_v28  ;;  %v10617_v32 = vadd.f32 %v10616_v59, %v10615_v23  ;;  %v9508_v23 = vcombine.low %v1217_v8, %v1225_v9  ;;  %v1218_v27 = vld [vmem:[%s15266_s4 + $0xb0] sm:$0xff]  ;;  %v1219_v59 = vld [vmem:[%s15266_s4 + $0xb8] sm:$0xff]  ;;  %v1884_v8 = vld [vmem:[%s15268_s6 + $0x100] sm:$0xff] }
  0xf4   : > { %v1226_v28 = vld [vmem:[%s15266_s4 + $0xf0] sm:$0xff]  ;;  %v1888_v9 = vld [vmem:[%s15268_s6 + $0x120] sm:$0xff] }
  0xf5   : > { %v770_v36 = vadd.f32 %v10617_v32, %v700_v31  ;;  %v9511_v32 = vcombine.high %v1218_v27, %v1226_v28 }
 0x110   : > { %v10650_v26 = vpop.f32.mrf.mxu0 }
 0x112   : > { %v10685_v29 = vpop.f32.mrf.mxu1  ;;  %v10651_v30 = vpop.f32.mrf.mxu0 }
 0x113   : > { %v10652_v34 = vadd.f32 %v10651_v30, %v10650_v26  ;;  %v9490_v30 = vcombine.low %v1200_v17, %v1208_v21  ;;  %v1876_v21 = vld [vmem:[%s15268_s6 + $0xc0] sm:$0xff] }
 0x114   : > { %v10686_v35 = vpop.f32.mrf.mxu1 }
 0x115   : > { %v840_v39 = vadd.f32 %v10652_v34, %v770_v36  ;;  %v10687_v40 = vadd.f32 %v10686_v35, %v10685_v29  ;;  %v1227_v29 = vld [vmem:[%s15266_s4 + $0xf8] sm:$0xff]  ;;  %v1202_v34 = vld [vmem:[%s15266_s4 + $0x30] sm:$0xff] }
 0x116   : > { %v1210_v35 = vld [vmem:[%s15266_s4 + $0x70] sm:$0xff]  ;;  %v1203_v36 = vld [vmem:[%s15266_s4 + $0x38] sm:$0xff] }
 0x117   : > { %v910_v43 = vadd.f32 %v10687_v40, %v840_v39  ;;  %v9512_v39 = vcombine.low %v1219_v59, %v1227_v29  ;;  %v9495_v40 = vcombine.high %v1202_v34, %v1210_v35 }
 0x132   : > { %v10720_v33 = vpop.f32.mrf.mxu0 }
 0x134   : > { %v10755_v37 = vpop.f32.mrf.mxu1  ;;  %v10721_v38 = vpop.f32.mrf.mxu0 }
 0x135   : > { %v10722_v41 = vadd.f32 %v10721_v38, %v10720_v33  ;;  %v9513_v33 = vcombine.high %v1219_v59, %v1227_v29  ;;  %v9510_v38 = vcombine.low %v1218_v27, %v1226_v28  ;;  %v1868_v28 = vld [vmem:[%s15268_s6 + $0x80] sm:$0xff] }
 0x136   : > { %v10756_v42 = vpop.f32.mrf.mxu1  ;;  %v1872_v59 = vld [vmem:[%s15268_s6 + $0xa0] sm:$0xff] }
 0x137   : > { %v980_v44 = vadd.f32 %v10722_v41, %v910_v43  ;;  %v10757_v45 = vadd.f32 %v10756_v42, %v10755_v37  ;;  %v1211_v37 = vld [vmem:[%s15266_s4 + $0x78] sm:$0xff]  ;;  %v1908_v42 = vld [vmem:[%s15268_s6 + $0x1c0] sm:$0xff] }
 0x138   : > { %v9497_v41 = vcombine.high %v1203_v36, %v1211_v37  ;;  %v1912_v43 = vld [vmem:[%s15268_s6 + $0x1e0] sm:$0xff] }
 0x139   : > { %v1050_v51 = vadd.f32 %v10757_v45, %v980_v44  ;;  %v2036_v44 = vld [vmem:[%s15268_s6 + $0x5c0] sm:$0xff] }
 0x13a   : > { %v2040_v45 = vld [vmem:[%s15268_s6 + $0x5e0] sm:$0xff] }
 0x13b   : > { %v1996_v29 = vld [vmem:[%s15268_s6 + $0x480] sm:$0xff] }
 0x154   : > { %v10790_v46 = vpop.f32.mrf.mxu0 }
 0x155   : > { %v10825_v48 = vpop.f32.mrf.mxu1 }
 0x156   : > { %v10791_v49 = vpop.f32.mrf.mxu0 }
 0x157   : > { %v10826_v50 = vpop.f32.mrf.mxu1  ;;  %v10792_v52 = vadd.f32 %v10791_v49, %v10790_v46  ;;  %v9494_v46 = vcombine.low %v1202_v34, %v1210_v35  ;;  %v9579_v49 = vcombine.high %v1908_v42, %v1912_v43  ;;  %v1860_v35 = vld [vmem:[%s15268_s6 + $0x40] sm:$0xff] }
 0x158   : > { %v10827_v54 = vadd.f32 %v10826_v50, %v10825_v48  ;;  %v9496_v48 = vcombine.low %v1203_v36, %v1211_v37  ;;  %v9707_v50 = vcombine.high %v2036_v44, %v2040_v45  ;;  %v1864_v36 = vld [vmem:[%s15268_s6 + $0x60] sm:$0xff] }
 0x159   : > { %v1120_v53 = vadd.f32 %v10792_v52, %v1050_v51  ;;  %v1900_v51 = vld [vmem:[%s15268_s6 + $0x180] sm:$0xff] }
 0x15a   : > { %v1904_v52 = vld [vmem:[%s15268_s6 + $0x1a0] sm:$0xff] }
 0x15b   : > { %v1190_v24 = vadd.f32 %v10827_v54, %v1120_v53  ;;  %v2028_v53 = vld [vmem:[%s15268_s6 + $0x580] sm:$0xff]  ;;  %v9571_v57 = vcombine.high %v1900_v51, %v1904_v52 }
 0x15c   : > { %v2032_v54 = vld [vmem:[%s15268_s6 + $0x5a0] sm:$0xff] }
 0x15d   : > { %v1193_v55 = vmul.f32 0.01, %v1190_v24  ;;  %v1988_v37 = vld [vmem:[%s15268_s6 + $0x440] sm:$0xff] }
 0x15f   : > { %v1194_v0 = vmax.f32 %v1190_v24, %v1193_v55  ;;  %v9578_v24 = vcombine.low %v1908_v42, %v1912_v43  ;;  %v9706_v55 = vcombine.low %v2036_v44, %v2040_v45  ;;  %v1852_v43 = vld [vmem:[%s15268_s6] sm:$0xff] }
 0x160   : > { %v1856_v44 = vld [vmem:[%s15268_s6 + $0x20] sm:$0xff] }
 0x161   : > { %v11806_v1 = vpack.c.bf16 %v1194_v0, %v1194_v0  ;;  %v2024_v0 = vld [vmem:[%s15268_s6 + $0x560] sm:$0xff] }
 0x162   : > { %v9691_v6 = vcombine.high %v2020_v62, %v2024_v0  ;;  %v1980_v45 = vld [vmem:[%s15268_s6 + $0x400] sm:$0xff] }
 0x163   : > { %9514 = vmatmul.mubr.msk.bf16.vlgmr.msra.gmra.mxu0 %vm1472_vm0, %v11806_v1  ;;  %9515 = vmatmul.mubr.msk.bf16.vlgmr.msra.gmra.mxu1 %vm1472_vm0, %v11806_v1 }
 0x164   : > { %1571 = vmatpush1.bf16.msra.mxu0 %v9502_v19  ;;  %1612 = vmatpush1.bf16.msra.mxu1 %v9504_v20  ;;  %v1201_v19 = vld [vmem:[%s15266_s4 + $0x28] sm:$0xff] }
 0x165   : > { %1572 = vmatprep.subr.bf16.mxu0 %v9487_v3  ;;  %1613 = vmatprep.subr.bf16.mxu1 %v9489_v4  ;;  %v1209_v20 = vld [vmem:[%s15266_s4 + $0x68] sm:$0xff]  ;;  %v9570_v3 = vcombine.low %v1900_v51, %v1904_v52  ;;  %v9698_v4 = vcombine.low %v2028_v53, %v2032_v54  ;;  %v1972_v52 = vld [vmem:[%s15268_s6 + $0x3c0] sm:$0xff] }
 0x166   : > { %1590 = vmatprep.mubr.bf16.mxu0 %v10849_v18  ;;  %1631 = vmatprep.mubr.bf16.mxu1 %v10849_v18  ;;  %v9493_v26 = vcombine.high %v1201_v19, %v1209_v20  ;;  %v9492_v31 = vcombine.low %v1201_v19, %v1209_v20  ;;  %v1880_v19 = vld [vmem:[%s15268_s6 + $0xe0] sm:$0xff] }
 0x167   : > { %v2004_v20 = vld [vmem:[%s15268_s6 + $0x4c0] sm:$0xff] }
 0x168   : > { %1573 = vmatpush1.bf16.msra.mxu0 %v9486_v11  ;;  %1614 = vmatpush1.bf16.msra.mxu1 %v9488_v12  ;;  %v2016_v11 = vld [vmem:[%s15268_s6 + $0x520] sm:$0xff]  ;;  %v9562_v12 = vcombine.low %v1892_v58, %v1896_v61 }
 0x169   : > { %1652 = vmatprep.subr.bf16.mxu0 %v9507_v14  ;;  %1693 = vmatprep.subr.bf16.mxu1 %v9509_v15  ;;  %v9690_v14 = vcombine.low %v2020_v62, %v2024_v0  ;;  %v9555_v15 = vcombine.high %v1884_v8, %v1888_v9  ;;  %v1964_v61 = vld [vmem:[%s15268_s6 + $0x380] sm:$0xff] }
 0x16a   : > { %v1968_v62 = vld [vmem:[%s15268_s6 + $0x3a0] sm:$0xff] }
 0x16b   : > { %9516 = vmatmul.mubr.msk.bf16.vlgmr.msra.gmra.mxu0 %vm1472_vm0, %v11806_v1  ;;  %9517 = vmatmul.mubr.msk.bf16.vlgmr.msra.gmra.mxu1 %vm1472_vm0, %v11806_v1  ;;  %v2092_v0 = vld [vmem:[%s15268_s6 + $0x780] sm:$0xff] }
 0x16c   : > { %1653 = vmatpush1.bf16.msra.mxu0 %v9506_v22  ;;  %1694 = vmatpush1.bf16.msra.mxu1 %v9508_v23  ;;  %v2008_v22 = vld [vmem:[%s15268_s6 + $0x4e0] sm:$0xff]  ;;  %v9554_v23 = vcombine.low %v1884_v8, %v1888_v9 }
 0x16d   : > { %1654 = vmatprep.subr.bf16.mxu0 %v9491_v25  ;;  %1695 = vmatprep.subr.bf16.mxu1 %v9493_v26  ;;  %v9547_v26 = vcombine.high %v1876_v21, %v1880_v19  ;;  %v9675_v27 = vcombine.high %v2004_v20, %v2008_v22  ;;  %v1956_v9 = vld [vmem:[%s15268_s6 + $0x340] sm:$0xff] }
 0x16e   : > { %1672 = vmatprep.mubr.bf16.mxu0 %v10849_v18  ;;  %1713 = vmatprep.mubr.bf16.mxu1 %v10849_v18 }
 0x170   : > { %1655 = vmatpush1.bf16.msra.mxu0 %v9490_v30  ;;  %1696 = vmatpush1.bf16.msra.mxu1 %v9492_v31  ;;  %v2000_v30 = vld [vmem:[%s15268_s6 + $0x4a0] sm:$0xff]  ;;  %v9546_v31 = vcombine.low %v1876_v21, %v1880_v19 }
 0x171   : > { %1734 = vmatprep.subr.bf16.mxu0 %v9511_v32  ;;  %1775 = vmatprep.subr.bf16.mxu1 %v9513_v33  ;;  %v9674_v32 = vcombine.low %v2004_v20, %v2008_v22  ;;  %v9539_v33 = vcombine.high %v1868_v28, %v1872_v59  ;;  %v9667_v34 = vcombine.high %v1996_v29, %v2000_v30  ;;  %v1948_v19 = vld [vmem:[%s15268_s6 + $0x300] sm:$0xff] }
 0x172   : > { %v1952_v20 = vld [vmem:[%s15268_s6 + $0x320] sm:$0xff] }
 0x173   : > { %9518 = vmatmul.mubr.msk.bf16.vlgmr.msra.gmra.mxu0 %vm1472_vm0, %v11806_v1  ;;  %9519 = vmatmul.mubr.msk.bf16.vlgmr.msra.gmra.mxu1 %vm1472_vm0, %v11806_v1  ;;  %v2076_v22 = vld [vmem:[%s15268_s6 + $0x700] sm:$0xff] }
 0x174   : > { %1735 = vmatpush1.bf16.msra.mxu0 %v9510_v38  ;;  %1776 = vmatpush1.bf16.msra.mxu1 %v9512_v39  ;;  %v1992_v38 = vld [vmem:[%s15268_s6 + $0x460] sm:$0xff]  ;;  %v9538_v39 = vcombine.low %v1868_v28, %v1872_v59 }
 0x175   : > { %1736 = vmatprep.subr.bf16.mxu0 %v9495_v40  ;;  %1777 = vmatprep.subr.bf16.mxu1 %v9497_v41  ;;  %v9666_v40 = vcombine.low %v1996_v29, %v2000_v30  ;;  %v9531_v41 = vcombine.high %v1860_v35, %v1864_v36  ;;  %v9659_v42 = vcombine.high %v1988_v37, %v1992_v38  ;;  %v1940_v59 = vld [vmem:[%s15268_s6 + $0x2c0] sm:$0xff] }
 0x176   : > { %1754 = vmatprep.mubr.bf16.mxu0 %v10849_v18  ;;  %1795 = vmatprep.mubr.bf16.mxu1 %v10849_v18  ;;  %v9699_v18 = vcombine.high %v2028_v53, %v2032_v54  ;;  %v1976_v53 = vld [vmem:[%s15268_s6 + $0x3e0] sm:$0xff] }
 0x177   : > { %v2100_v54 = vld [vmem:[%s15268_s6 + $0x7c0] sm:$0xff] }
 0x178   : > { %1737 = vmatpush1.bf16.msra.mxu0 %v9494_v46  ;;  %1778 = vmatpush1.bf16.msra.mxu1 %v9496_v48  ;;  %v1984_v46 = vld [vmem:[%s15268_s6 + $0x420] sm:$0xff]  ;;  %v9530_v48 = vcombine.low %v1860_v35, %v1864_v36 }
 0x179   : > { %8038 = vmatprep.subr.bf16.mxu0 %v9579_v49  ;;  %8079 = vmatprep.subr.bf16.mxu1 %v9707_v50  ;;  %v9658_v49 = vcombine.low %v1988_v37, %v1992_v38  ;;  %v9523_v50 = vcombine.high %v1852_v43, %v1856_v44  ;;  %v9651_v51 = vcombine.high %v1980_v45, %v1984_v46  ;;  %v1944_v29 = vld [vmem:[%s15268_s6 + $0x2e0] sm:$0xff] }
 0x17a   : > { %v2068_v30 = vld [vmem:[%s15268_s6 + $0x6c0] sm:$0xff] }
 0x17b   : > { %9520 = vmatmul.mubr.msk.bf16.vlgmr.msra.gmra.mxu0 %vm1472_vm0, %v11806_v1  ;;  %9521 = vmatmul.mubr.msk.bf16.vlgmr.msra.gmra.mxu1 %vm1472_vm0, %v11806_v1  ;;  %v2012_v1 = vld [vmem:[%s15268_s6 + $0x500] sm:$0xff] }
 0x17c   : > { %8039 = vmatpush1.bf16.msra.mxu0 %v9578_v24  ;;  %8080 = vmatpush1.bf16.msra.mxu1 %v9706_v55  ;;  %v9683_v17 = vcombine.high %v2012_v1, %v2016_v11  ;;  %v9682_v25 = vcombine.low %v2012_v1, %v2016_v11  ;;  %v2104_v24 = vld [vmem:[%s15268_s6 + $0x7e0] sm:$0xff]  ;;  %v9522_v55 = vcombine.low %v1852_v43, %v1856_v44 }
 0x17d   : > { %8040 = vmatprep.subr.bf16.mxu0 %v9571_v57  ;;  %8081 = vmatprep.subr.bf16.mxu1 %v9699_v18  ;;  %v9650_v57 = vcombine.low %v1980_v45, %v1984_v46  ;;  %v9643_v18 = vcombine.high %v1972_v52, %v1976_v53  ;;  %v9771_v58 = vcombine.high %v2100_v54, %v2104_v24  ;;  %v1960_v1 = vld [vmem:[%s15268_s6 + $0x360] sm:$0xff] }
 0x17e   : > { %v2084_v11 = vld [vmem:[%s15268_s6 + $0x740] sm:$0xff] }
 0x17f   : > { %v1932_v36 = vld [vmem:[%s15268_s6 + $0x280] sm:$0xff] }
 0x180   : > { %8041 = vmatpush1.bf16.msra.mxu0 %v9570_v3  ;;  %8082 = vmatpush1.bf16.msra.mxu1 %v9698_v4  ;;  %v2096_v3 = vld [vmem:[%s15268_s6 + $0x7a0] sm:$0xff]  ;;  %v9642_v4 = vcombine.low %v1972_v52, %v1976_v53 }
 0x181   : > { %8042 = vmatprep.subr.bf16.mxu0 %v9563_v5  ;;  %8083 = vmatprep.subr.bf16.mxu1 %v9691_v6  ;;  %v9770_v5 = vcombine.low %v2100_v54, %v2104_v24  ;;  %v9635_v6 = vcombine.high %v1964_v61, %v1968_v62  ;;  %v9763_v8 = vcombine.high %v2092_v0, %v2096_v3  ;;  %v1936_v37 = vld [vmem:[%s15268_s6 + $0x2a0] sm:$0xff] }
 0x182   : > { %v2060_v38 = vld [vmem:[%s15268_s6 + $0x680] sm:$0xff]  ;;  %v9602_v52 = vcombine.low %v1932_v36, %v1936_v37 }
 0x183   : > { %v1924_v44 = vld [vmem:[%s15268_s6 + $0x240] sm:$0xff] }
 0x184   : > { %8043 = vmatpush1.bf16.msra.mxu0 %v9562_v12  ;;  %8084 = vmatpush1.bf16.msra.mxu1 %v9690_v14  ;;  %v2088_v12 = vld [vmem:[%s15268_s6 + $0x760] sm:$0xff]  ;;  %v9634_v14 = vcombine.low %v1964_v61, %v1968_v62 }
 0x185   : > { %8044 = vmatprep.subr.bf16.mxu0 %v9555_v15  ;;  %8085 = vmatprep.subr.bf16.mxu1 %v9683_v17  ;;  %v9762_v15 = vcombine.low %v2092_v0, %v2096_v3  ;;  %v9627_v17 = vcombine.high %v1956_v9, %v1960_v1  ;;  %v9755_v21 = vcombine.high %v2084_v11, %v2088_v12  ;;  %v1928_v45 = vld [vmem:[%s15268_s6 + $0x260] sm:$0xff] }
 0x186   : > { %v2052_v46 = vld [vmem:[%s15268_s6 + $0x640] sm:$0xff]  ;;  %v9595_v54 = vcombine.high %v1924_v44, %v1928_v45  ;;  %v9594_v3 = vcombine.low %v1924_v44, %v1928_v45 }
 0x187   : > { %v12076_v24 = vld [vmem:[%s15268_s6 + $0xde0] sm:$0xff] }
 0x188   : > { %8045 = vmatpush1.bf16.msra.mxu0 %v9554_v23  ;;  %8086 = vmatpush1.bf16.msra.mxu1 %v9682_v25  ;;  %v2080_v23 = vld [vmem:[%s15268_s6 + $0x720] sm:$0xff]  ;;  %v9626_v25 = vcombine.low %v1956_v9, %v1960_v1 }
 0x189   : > { %8046 = vmatprep.subr.bf16.mxu0 %v9547_v26  ;;  %8087 = vmatprep.subr.bf16.mxu1 %v9675_v27  ;;  %v9754_v26 = vcombine.low %v2084_v11, %v2088_v12  ;;  %v9619_v27 = vcombine.high %v1948_v19, %v1952_v20  ;;  %v9747_v28 = vcombine.high %v2076_v22, %v2080_v23  ;;  %v1920_v61 = vld [vmem:[%s15268_s6 + $0x220] sm:$0xff] }
 0x18a   : > { %v2044_v62 = vld [vmem:[%s15268_s6 + $0x600] sm:$0xff] }
 0x18b   : > { %v2048_v0 = vld [vmem:[%s15268_s6 + $0x620] sm:$0xff] }
 0x18c   : > { %8047 = vmatpush1.bf16.msra.mxu0 %v9546_v31  ;;  %8088 = vmatpush1.bf16.msra.mxu1 %v9674_v32  ;;  %v2072_v31 = vld [vmem:[%s15268_s6 + $0x6e0] sm:$0xff]  ;;  %v9618_v32 = vcombine.low %v1948_v19, %v1952_v20  ;;  %v9714_v9 = vcombine.low %v2044_v62, %v2048_v0 }
 0x18d   : > { %8048 = vmatprep.subr.bf16.mxu0 %v9539_v33  ;;  %8089 = vmatprep.subr.bf16.mxu1 %v9667_v34  ;;  %v9746_v33 = vcombine.low %v2076_v22, %v2080_v23  ;;  %v9611_v34 = vcombine.high %v1940_v59, %v1944_v29  ;;  %v9739_v35 = vcombine.high %v2068_v30, %v2072_v31  ;;  %v12101_v12 = vld [vmem:[%s15267_s5] sm:$0xff] }
 0x18e   : > { %v2284_v44 = vld [vmem:[%s15268_s6 + $0xd80] sm:$0xff] }
 0x18f   : > { %v2288_v45 = vld [vmem:[%s15268_s6 + $0xda0] sm:$0xff] }
 0x190   : > { %8049 = vmatpush1.bf16.msra.mxu0 %v9538_v39  ;;  %8090 = vmatpush1.bf16.msra.mxu1 %v9666_v40  ;;  %v2064_v39 = vld [vmem:[%s15268_s6 + $0x6a0] sm:$0xff]  ;;  %v9610_v40 = vcombine.low %v1940_v59, %v1944_v29 }
 0x191   : > { %8050 = vmatprep.subr.bf16.mxu0 %v9531_v41  ;;  %8091 = vmatprep.subr.bf16.mxu1 %v9659_v42  ;;  %v9738_v41 = vcombine.low %v2068_v30, %v2072_v31  ;;  %v9603_v42 = vcombine.high %v1932_v36, %v1936_v37  ;;  %v9731_v43 = vcombine.high %v2060_v38, %v2064_v39 }
 0x192   : > { %v9730_v53 = vcombine.low %v2060_v38, %v2064_v39  ;;  %v2156_v38 = vld [vmem:[%s15268_s6 + $0x980] sm:$0xff] }
 0x194   : > { %8051 = vmatpush1.bf16.msra.mxu0 %v9530_v48  ;;  %8092 = vmatpush1.bf16.msra.mxu1 %v9658_v49  ;;  %v2056_v48 = vld [vmem:[%s15268_s6 + $0x660] sm:$0xff] }
 0x195   : > { %8052 = vmatprep.subr.bf16.mxu0 %v9523_v50  ;;  %8093 = vmatprep.subr.bf16.mxu1 %v9651_v51  ;;  %v12061_v49 = vld [vmem:[%s15268_s6 + $0x9c0] sm:$0xff] }
 0x196   : > { %v12066_v50 = vld [vmem:[%s15268_s6 + $0x9e0] sm:$0xff] }
 0x197   : > { %v12071_v51 = vld [vmem:[%s15268_s6 + $0xdc0] sm:$0xff]  ;;  %v9835_v1 = vcombine.high %v12061_v49, %v12066_v50 }
 0x198   : > { %8053 = vmatpush1.bf16.msra.mxu0 %v9522_v55  ;;  %8094 = vmatpush1.bf16.msra.mxu1 %v9650_v57  ;;  %v9723_v55 = vcombine.high %v2052_v46, %v2056_v48  ;;  %v1916_v57 = vld [vmem:[%s15268_s6 + $0x200] sm:$0xff]  ;;  %v9963_v11 = vcombine.high %v12071_v51, %v12076_v24 }
 0x199   : > { %8054 = vmatprep.subr.bf16.mxu0 %v9643_v18  ;;  %8095 = vmatprep.subr.bf16.mxu1 %v9771_v58  ;;  %v9834_v18 = vcombine.low %v12061_v49, %v12066_v50  ;;  %v9962_v58 = vcombine.low %v12071_v51, %v12076_v24  ;;  %v2144_v49 = vld [vmem:[%s15268_s6 + $0x920] sm:$0xff] }
 0x19a   : > { %v2268_v24 = vld [vmem:[%s15268_s6 + $0xd00] sm:$0xff] }
 0x19c   : > { %8055 = vmatpush2.bf16.msra.mxu0 %v9642_v4  ;;  %8096 = vmatpush2.bf16.msra.mxu1 %v9770_v5  ;;  %v9722_v4 = vcombine.low %v2052_v46, %v2056_v48  ;;  %v9587_v5 = vcombine.high %v1916_v57, %v1920_v61 }
 0x19d   : > { %8056 = vmatprep.subr.bf16.mxu0 %v9635_v6  ;;  %8097 = vmatprep.subr.bf16.mxu1 %v9763_v8  ;;  %v9715_v6 = vcombine.high %v2044_v62, %v2048_v0  ;;  %v9586_v8 = vcombine.low %v1916_v57, %v1920_v61  ;;  %v9955_v0 = vcombine.high %v2284_v44, %v2288_v45 }
 0x1a0   : > { %8057 = vmatpush2.bf16.msra.mxu0 %v9634_v14  ;;  %8098 = vmatpush2.bf16.msra.mxu1 %v9762_v15  ;;  %v1395_v14 = vrot.slane %v12101_v12, %v11094_v60  ;;  %v1403_v15 = vrot.slane %v12101_v12, %v11112_v2 }
 0x1a1   : > { %8058 = vmatprep.subr.bf16.mxu0 %v9627_v17  ;;  %8099 = vmatprep.subr.bf16.mxu1 %v9755_v21  ;;  %v1399_v17 = vrot.slane %v12101_v12, %v11082_v56  ;;  %v1407_v21 = vrot.slane %v12101_v12, %v11103_v63 }
 0x1a4   : > { %8059 = vmatpush2.bf16.msra.mxu0 %v9626_v25  ;;  %8100 = vmatpush2.bf16.msra.mxu1 %v9754_v26 }
 0x1a5   : > { %8060 = vmatprep.subr.bf16.mxu0 %v9619_v27  ;;  %8101 = vmatprep.subr.bf16.mxu1 %v9747_v28 }
 0x1a8   : > { %8061 = vmatpush2.bf16.msra.mxu0 %v9618_v32  ;;  %8102 = vmatpush2.bf16.msra.mxu1 %v9746_v33 }
 0x1a9   : > { %8062 = vmatprep.subr.bf16.mxu0 %v9611_v34  ;;  %8103 = vmatprep.subr.bf16.mxu1 %v9739_v35 }
 0x1ac   : > { %8063 = vmatpush2.bf16.msra.mxu0 %v9610_v40  ;;  %8104 = vmatpush2.bf16.msra.mxu1 %v9738_v41  ;;  %v1415_v41 = vrot.slane %v12101_v12, %v11297_v7 }
 0x1ad   : > { %8064 = vmatprep.subr.bf16.mxu0 %v9603_v42  ;;  %8105 = vmatprep.subr.bf16.mxu1 %v9731_v43  ;;  %v1423_v42 = vrot.slane %v12101_v12, %v11315_v13  ;;  %v2160_v43 = vld [vmem:[%s15268_s6 + $0x9a0] sm:$0xff] }
 0x1ae   : > { %v9827_v62 = vcombine.high %v2156_v38, %v2160_v43 }
 0x1b0   : > { %8065 = vmatpush2.bf16.msra.mxu0 %v9602_v52  ;;  %8106 = vmatpush2.bf16.msra.mxu1 %v9730_v53 }
 0x1b1   : > { %8066 = vmatprep.subr.bf16.mxu0 %v9595_v54  ;;  %8107 = vmatprep.subr.bf16.mxu1 %v9723_v55 }
 0x1b4   : > { %8067 = vmatpush2.bf16.msra.mxu0 %v9594_v3  ;;  %8108 = vmatpush2.bf16.msra.mxu1 %v9722_v4 }
 0x1b5   : > { %8068 = vmatprep.subr.bf16.mxu0 %v9587_v5  ;;  %8109 = vmatprep.subr.bf16.mxu1 %v9715_v6  ;;  %v2148_v5 = vld [vmem:[%s15268_s6 + $0x940] sm:$0xff] }
 0x1b6   : > { %v2152_v6 = vld [vmem:[%s15268_s6 + $0x960] sm:$0xff] }
 0x1b8   : > { %8069 = vmatpush2.bf16.msra.mxu0 %v9586_v8  ;;  %8110 = vmatpush2.bf16.msra.mxu1 %v9714_v9 }
 0x1b9   : > { %8120 = vmatprep.subr.bf16.mxu0 %v9835_v1  ;;  %8161 = vmatprep.subr.bf16.mxu1 %v9963_v11  ;;  %v2276_v1 = vld [vmem:[%s15268_s6 + $0xd40] sm:$0xff] }
 0x1ba   : > { %v2280_v11 = vld [vmem:[%s15268_s6 + $0xd60] sm:$0xff] }
 0x223   : > { %v1510_v19 = vpop.f32.mrf.mxu0  ;;  %v1551_v20 = vpop.f32.mrf.mxu1 }
 0x224   : > { %v1511_v22 = vadd.f32 %v1510_v19, %v1395_v14  ;;  %v1552_v23 = vadd.f32 %v1551_v20, %v1403_v15  ;;  %v9954_v20 = vcombine.low %v2284_v44, %v2288_v45 }
 0x225   : > { %v1512_v25 = vpop.f32.mrf.mxu0  ;;  %v1553_v26 = vpop.f32.mrf.mxu1 }
 0x226   : > { %v1804_v27 = vmul.f32 0.01, %v1511_v22  ;;  %v1806_v28 = vmul.f32 0.01, %v1552_v23  ;;  %v1513_v59 = vadd.f32 %v1512_v25, %v1399_v17  ;;  %v1554_v29 = vadd.f32 %v1553_v26, %v1407_v21 }
 0x227   : > { %v1514_v30 = vpop.f32.mrf.mxu0  ;;  %v1555_v31 = vpop.f32.mrf.mxu1  ;;  %v9826_v17 = vcombine.low %v2156_v38, %v2160_v43  ;;  %v9947_v26 = vcombine.high %v2276_v1, %v2280_v11 }
 0x228   : > { %v1805_v32 = vmul.f32 0.01, %v1513_v59  ;;  %v1807_v33 = vmul.f32 0.01, %v1554_v29  ;;  %v1820_v34 = vmax.f32 %v1511_v22, %v1804_v27  ;;  %v1822_v35 = vmax.f32 %v1552_v23, %v1806_v28  ;;  %v2140_v27 = vld [vmem:[%s15268_s6 + $0x900] sm:$0xff] }
 0x229   : > { %v1515_v36 = vpop.f32.mrf.mxu0  ;;  %v1556_v37 = vpop.f32.mrf.mxu1  ;;  %v9819_v22 = vcombine.high %v2148_v5, %v2152_v6  ;;  %v9946_v31 = vcombine.low %v2276_v1, %v2280_v11  ;;  %v2256_v1 = vld [vmem:[%s15268_s6 + $0xca0] sm:$0xff] }
 0x22a   : > { %v1821_v39 = vmax.f32 %v1513_v59, %v1805_v32  ;;  %v1823_v40 = vmax.f32 %v1554_v29, %v1807_v33  ;;  %v12135_v54 = vpack.c.bf16 %v1820_v34, %v1820_v34  ;;  %v12137_v55 = vpack.c.bf16 %v1822_v35, %v1822_v35  ;;  %v2132_v34 = vld [vmem:[%s15268_s6 + $0x8c0] sm:$0xff]  ;;  %v12195_v36 = vld [vmem:[%s15267_s5 + $0x8] sm:$0xff] }
 0x22b   : > { %v12127_v46 = vpop.f32.mrf.mxu0  ;;  %v12129_v48 = vpop.f32.mrf.mxu1  ;;  %v9818_v59 = vcombine.low %v2148_v5, %v2152_v6  ;;  %v9811_v32 = vcombine.high %v2140_v27, %v2144_v49  ;;  %v2136_v35 = vld [vmem:[%s15268_s6 + $0x8e0] sm:$0xff]  ;;  %v1451_v43 = vrot.slane %v12195_v36, %v11324_v16 }
 0x22c   : > { %v12131_v52 = vpack.c.bf16 %v1821_v39, %v1821_v39  ;;  %v12133_v53 = vpack.c.bf16 %v1823_v40, %v1823_v40  ;;  %v2260_v39 = vld [vmem:[%s15268_s6 + $0xcc0] sm:$0xff] }
 0x22d   : > { %v1594_v57 = vpop.f32.mrf.mxu0  ;;  %v1635_v61 = vpop.f32.mrf.mxu1  ;;  %v2264_v40 = vld [vmem:[%s15268_s6 + $0xce0] sm:$0xff] }
 0x22e   : > { %v1595_v3 = vadd.f32 %v1594_v57, %v1415_v41  ;;  %v1636_v4 = vadd.f32 %v1635_v61, %v1423_v42  ;;  %8070 = vmatprep.mubr.bf16.mxu0 %v12131_v52  ;;  %8111 = vmatprep.mubr.bf16.mxu1 %v12133_v53  ;;  %v9810_v41 = vcombine.low %v2140_v27, %v2144_v49  ;;  %v2128_v5 = vld [vmem:[%s15268_s6 + $0x8a0] sm:$0xff] }
 0x22f   : > { %v1596_v8 = vpop.f32.mrf.mxu0  ;;  %v1637_v9 = vpop.f32.mrf.mxu1  ;;  %8071 = vmatmul.mubr.bf16.vlgmr.msra.gmra.mxu0 %v12135_v54  ;;  %8112 = vmatmul.mubr.bf16.vlgmr.msra.gmra.mxu1 %v12137_v55  ;;  %v1443_v42 = vrot.slane %v12195_v36, %v11306_v10  ;;  %v9803_v61 = vcombine.high %v2132_v34, %v2136_v35  ;;  %v2120_v27 = vld [vmem:[%s15268_s6 + $0x860] sm:$0xff] }
 0x230   : > { %v1809_v14 = vmul.f32 0.01, %v1595_v3  ;;  %v1811_v15 = vmul.f32 0.01, %v1636_v4  ;;  %8121 = vmatpush1.bf16.msra.mxu0 %v9834_v18  ;;  %8162 = vmatpush1.bf16.msra.mxu1 %v9962_v58  ;;  %v2272_v18 = vld [vmem:[%s15268_s6 + $0xd20] sm:$0xff] }
 0x231   : > { %v1597_v21 = vpop.f32.mrf.mxu0  ;;  %v1638_v19 = vpop.f32.mrf.mxu1  ;;  %8122 = vmatprep.subr.bf16.mxu0 %v9827_v62  ;;  %8163 = vmatprep.subr.bf16.mxu1 %v9955_v0  ;;  %v9939_v33 = vcombine.high %v2268_v24, %v2272_v18  ;;  %v9938_v57 = vcombine.low %v2268_v24, %v2272_v18  ;;  %v1447_v62 = vrot.slane %v12195_v36, %v11297_v7  ;;  %v2252_v9 = vld [vmem:[%s15268_s6 + $0xc80] sm:$0xff] }
 0x232   : > { %v1825_v23 = vmax.f32 %v1595_v3, %v1809_v14  ;;  %v1827_v25 = vmax.f32 %v1636_v4, %v1811_v15  ;;  %v1455_v0 = vrot.slane %v12195_v36, %v11315_v13  ;;  %v9931_v3 = vcombine.high %v2260_v39, %v2264_v40  ;;  %v2124_v4 = vld [vmem:[%s15268_s6 + $0x880] sm:$0xff] }
 0x233   : > { %v12167_v50 = vpop.f32.mrf.mxu0  ;;  %v12169_v51 = vpop.f32.mrf.mxu1  ;;  %v9802_v15 = vcombine.low %v2132_v34, %v2136_v35  ;;  %v9930_v19 = vcombine.low %v2260_v39, %v2264_v40  ;;  %v2244_v18 = vld [vmem:[%s15268_s6 + $0xc40] sm:$0xff]  ;;  %v9922_v34 = vcombine.low %v2252_v9, %v2256_v1 }
 0x234   : > { %v12177_v58 = vpack.c.bf16 %v1825_v23, %v1825_v23  ;;  %v12179_v28 = vpack.c.bf16 %v1827_v25, %v1827_v25  ;;  %8123 = vmatpush1.bf16.msra.mxu0 %v9826_v17  ;;  %8164 = vmatpush1.bf16.msra.mxu1 %v9954_v20  ;;  %v9795_v20 = vcombine.high %v2124_v4, %v2128_v5  ;;  %v2112_v39 = vld [vmem:[%s15268_s6 + $0x820] sm:$0xff] }
 0x235   : > { %v12181_v29 = vpop.f32.mrf.mxu0  ;;  %v12183_v30 = vpop.f32.mrf.mxu1  ;;  %8124 = vmatprep.subr.bf16.mxu0 %v9819_v22  ;;  %8165 = vmatprep.subr.bf16.mxu1 %v9947_v26  ;;  %v9923_v25 = vcombine.high %v2252_v9, %v2256_v1  ;;  %v2116_v26 = vld [vmem:[%s15268_s6 + $0x840] sm:$0xff] }
 0x236   : > { %8152 = vmatprep.mubr.bf16.mxu0 %v12177_v58  ;;  %8193 = vmatprep.mubr.bf16.mxu1 %v12179_v28  ;;  %v9787_v35 = vcombine.high %v2116_v26, %v2120_v27  ;;  %v2236_v40 = vld [vmem:[%s15268_s6 + $0xc00] sm:$0xff] }
 0x237   : > { %v1678_v37 = vpop.f32.mrf.mxu0  ;;  %v1719_v38 = vpop.f32.mrf.mxu1  ;;  %v2224_v9 = vld [vmem:[%s15268_s6 + $0xba0] sm:$0xff] }
 0x238   : > { %8125 = vmatpush1.bf16.msra.mxu0 %v9818_v59  ;;  %8166 = vmatpush1.bf16.msra.mxu1 %v9946_v31  ;;  %v2248_v59 = vld [vmem:[%s15268_s6 + $0xc60] sm:$0xff]  ;;  %v9794_v31 = vcombine.low %v2124_v4, %v2128_v5 }
 0x239   : > { %v1679_v44 = vpop.f32.mrf.mxu0  ;;  %v1720_v45 = vpop.f32.mrf.mxu1  ;;  %8126 = vmatprep.subr.bf16.mxu0 %v9811_v32  ;;  %8167 = vmatprep.subr.bf16.mxu1 %v9939_v33  ;;  %v9915_v37 = vcombine.high %v2244_v18, %v2248_v59  ;;  %v2108_v38 = vld [vmem:[%s15268_s6 + $0x800] sm:$0xff] }
 0x23a   : > { %v9779_v44 = vcombine.high %v2108_v38, %v2112_v39  ;;  %v2348_v1 = vld [vmem:[%s15268_s6 + $0xf80] sm:$0xff] }
 0x23b   : > { %v1756_v6 = vpop.f32.mrf.mxu0  ;;  %v1797_v8 = vpop.f32.mrf.mxu1 }
 0x23c   : > { %v12224_v11 = vadd.f32 %v1756_v6, %v1443_v42  ;;  %v12226_v14 = vadd.f32 %v1797_v8, %v1451_v43  ;;  %8127 = vmatpush1.bf16.msra.mxu0 %v9810_v41  ;;  %8168 = vmatpush1.bf16.msra.mxu1 %v9938_v57  ;;  %v2240_v41 = vld [vmem:[%s15268_s6 + $0xc20] sm:$0xff]  ;;  %v9786_v42 = vcombine.low %v2116_v26, %v2120_v27 }
 0x23d   : > { %v1758_v17 = vpop.f32.mrf.mxu0  ;;  %v1799_v21 = vpop.f32.mrf.mxu1  ;;  %8128 = vmatprep.subr.bf16.mxu0 %v9803_v61  ;;  %8169 = vmatprep.subr.bf16.mxu1 %v9931_v3  ;;  %v9914_v43 = vcombine.low %v2244_v18, %v2248_v59  ;;  %v9907_v45 = vcombine.high %v2236_v40, %v2240_v41  ;;  %v2228_v57 = vld [vmem:[%s15268_s6 + $0xbc0] sm:$0xff]  ;;  %v9778_v3 = vcombine.low %v2108_v38, %v2112_v39 }
 0x23e   : > { %v12228_v22 = vadd.f32 %v1758_v17, %v1447_v62  ;;  %v12230_v23 = vadd.f32 %v1799_v21, %v1455_v0  ;;  %v2232_v61 = vld [vmem:[%s15268_s6 + $0xbe0] sm:$0xff]  ;;  %v9906_v4 = vcombine.low %v2236_v40, %v2240_v41 }
 0x23f   : > { %v1760_v49 = vpop.f32.mrf.mxu0  ;;  %v1801_v24 = vpop.f32.mrf.mxu1  ;;  %v2356_v62 = vld [vmem:[%s15268_s6 + $0xfc0] sm:$0xff]  ;;  %v9899_v5 = vcombine.high %v2228_v57, %v2232_v61  ;;  %v9898_v17 = vcombine.low %v2228_v57, %v2232_v61 }
 0x240   : > { %8129 = vmatpush1.bf16.msra.mxu0 %v9802_v15  ;;  %8170 = vmatpush1.bf16.msra.mxu1 %v9930_v19  ;;  %v2360_v0 = vld [vmem:[%s15268_s6 + $0xfe0] sm:$0xff] }
 0x241   : > { %v1761_v32 = vpop.f32.mrf.mxu0  ;;  %v1802_v33 = vpop.f32.mrf.mxu1  ;;  %8130 = vmatprep.subr.bf16.mxu0 %v9795_v20  ;;  %8171 = vmatprep.subr.bf16.mxu1 %v9923_v25  ;;  %v10027_v6 = vcombine.high %v2356_v62, %v2360_v0  ;;  %v2220_v8 = vld [vmem:[%s15268_s6 + $0xb80] sm:$0xff]  ;;  %v10026_v21 = vcombine.low %v2356_v62, %v2360_v0 }
 0x242   : > { %v2352_v15 = vld [vmem:[%s15268_s6 + $0xfa0] sm:$0xff]  ;;  %v9891_v19 = vcombine.high %v2220_v8, %v2224_v9  ;;  %v9890_v24 = vcombine.low %v2220_v8, %v2224_v9  ;;  %v1411_v8 = vrot.slane %v12101_v12, %v11306_v10 }
 0x243   : > { %v10019_v20 = vcombine.high %v2348_v1, %v2352_v15  ;;  %v2212_v25 = vld [vmem:[%s15268_s6 + $0xb40] sm:$0xff]  ;;  %v10018_v18 = vcombine.low %v2348_v1, %v2352_v15  ;;  %v1419_v15 = vrot.slane %v12101_v12, %v11324_v16 }
 0x244   : > { %8131 = vmatpush1.bf16.msra.mxu0 %v9794_v31  ;;  %8172 = vmatpush1.bf16.msra.mxu1 %v9922_v34  ;;  %v2216_v26 = vld [vmem:[%s15268_s6 + $0xb60] sm:$0xff] }
 0x245   : > { %8132 = vmatprep.subr.bf16.mxu0 %v9787_v35  ;;  %8173 = vmatprep.subr.bf16.mxu1 %v9915_v37  ;;  %v2340_v27 = vld [vmem:[%s15268_s6 + $0xf40] sm:$0xff]  ;;  %v9883_v59 = vcombine.high %v2212_v25, %v2216_v26  ;;  %v9882_v37 = vcombine.low %v2212_v25, %v2216_v26  ;;  %v1439_v26 = vrot.slane %v12195_v36, %v11103_v63 }
 0x246   : > { %v2344_v49 = vld [vmem:[%s15268_s6 + $0xf60] sm:$0xff] }
 0x247   : > { %v10011_v31 = vcombine.high %v2340_v27, %v2344_v49  ;;  %v2204_v32 = vld [vmem:[%s15268_s6 + $0xb00] sm:$0xff]  ;;  %v10010_v38 = vcombine.low %v2340_v27, %v2344_v49  ;;  %v1593_v49 = vadd.f32 %v12127_v46, %v1411_v8 }
 0x248   : > { %8133 = vmatpush1.bf16.msra.mxu0 %v9786_v42  ;;  %8174 = vmatpush1.bf16.msra.mxu1 %v9914_v43  ;;  %v2208_v33 = vld [vmem:[%s15268_s6 + $0xb20] sm:$0xff] }
 0x249   : > { %8134 = vmatprep.subr.bf16.mxu0 %v9779_v44  ;;  %8175 = vmatprep.subr.bf16.mxu1 %v9907_v45  ;;  %v2332_v34 = vld [vmem:[%s15268_s6 + $0xf00] sm:$0xff]  ;;  %v9875_v39 = vcombine.high %v2204_v32, %v2208_v33  ;;  %v9874_v45 = vcombine.low %v2204_v32, %v2208_v33 }
 0x24a   : > { %v2336_v35 = vld [vmem:[%s15268_s6 + $0xf20] sm:$0xff] }
 0x24b   : > { %v10003_v40 = vcombine.high %v2332_v34, %v2336_v35  ;;  %v2196_v41 = vld [vmem:[%s15268_s6 + $0xac0] sm:$0xff]  ;;  %v10002_v57 = vcombine.low %v2332_v34, %v2336_v35  ;;  %v1718_v35 = vadd.f32 %v12183_v30, %v1439_v26 }
 0x24c   : > { %8135 = vmatpush1.bf16.msra.mxu0 %v9778_v3  ;;  %8176 = vmatpush1.bf16.msra.mxu1 %v9906_v4  ;;  %v2200_v42 = vld [vmem:[%s15268_s6 + $0xae0] sm:$0xff] }
 0x24d   : > { %8136 = vmatprep.subr.bf16.mxu0 %v9899_v5  ;;  %8177 = vmatprep.subr.bf16.mxu1 %v10027_v6  ;;  %v2324_v43 = vld [vmem:[%s15268_s6 + $0xec0] sm:$0xff]  ;;  %v9867_v61 = vcombine.high %v2196_v41, %v2200_v42  ;;  %v9866_v6 = vcombine.low %v2196_v41, %v2200_v42 }
 0x24e   : > { %v2328_v44 = vld [vmem:[%s15268_s6 + $0xee0] sm:$0xff] }
 0x24f   : > { %v9995_v62 = vcombine.high %v2324_v43, %v2328_v44  ;;  %v2188_v0 = vld [vmem:[%s15268_s6 + $0xa80] sm:$0xff]  ;;  %v9994_v9 = vcombine.low %v2324_v43, %v2328_v44 }
 0x250   : > { %8137 = vmatpush2.bf16.msra.mxu0 %v9898_v17  ;;  %8178 = vmatpush2.bf16.msra.mxu1 %v10026_v21  ;;  %v2192_v3 = vld [vmem:[%s15268_s6 + $0xaa0] sm:$0xff] }
 0x251   : > { %8138 = vmatprep.subr.bf16.mxu0 %v9891_v19  ;;  %8179 = vmatprep.subr.bf16.mxu1 %v10019_v20  ;;  %v2316_v4 = vld [vmem:[%s15268_s6 + $0xe80] sm:$0xff]  ;;  %v9859_v1 = vcombine.high %v2188_v0, %v2192_v3  ;;  %v1431_v20 = vrot.slane %v12195_v36, %v11082_v56  ;;  %v9858_v27 = vcombine.low %v2188_v0, %v2192_v3 }
 0x252   : > { %v2320_v5 = vld [vmem:[%s15268_s6 + $0xea0] sm:$0xff] }
 0x253   : > { %v9987_v17 = vcombine.high %v2316_v4, %v2320_v5  ;;  %v2180_v21 = vld [vmem:[%s15268_s6 + $0xa40] sm:$0xff]  ;;  %v1677_v34 = vadd.f32 %v12181_v29, %v1431_v20 }
 0x254   : > { %8139 = vmatpush2.bf16.msra.mxu0 %v9890_v24  ;;  %8180 = vmatpush2.bf16.msra.mxu1 %v10018_v18  ;;  %v2184_v19 = vld [vmem:[%s15268_s6 + $0xa60] sm:$0xff]  ;;  %v9986_v24 = vcombine.low %v2316_v4, %v2320_v5 }
 0x255   : > { %8140 = vmatprep.subr.bf16.mxu0 %v9883_v59  ;;  %8181 = vmatprep.subr.bf16.mxu1 %v10011_v31  ;;  %v2308_v25 = vld [vmem:[%s15268_s6 + $0xe40] sm:$0xff]  ;;  %v9851_v18 = vcombine.high %v2180_v21, %v2184_v19  ;;  %v1634_v59 = vadd.f32 %v12129_v48, %v1419_v15  ;;  %v1813_v44 = vmul.f32 0.01, %v1677_v34 }
 0x256   : > { %v2312_v12 = vld [vmem:[%s15268_s6 + $0xe60] sm:$0xff] }
 0x257   : > { %v9979_v31 = vcombine.high %v2308_v25, %v2312_v12  ;;  %v2172_v32 = vld [vmem:[%s15268_s6 + $0xa00] sm:$0xff]  ;;  %v1810_v41 = vmul.f32 0.01, %v1634_v59 }
 0x258   : > { %8141 = vmatpush2.bf16.msra.mxu0 %v9882_v37  ;;  %8182 = vmatpush2.bf16.msra.mxu1 %v10010_v38  ;;  %v2176_v33 = vld [vmem:[%s15268_s6 + $0xa20] sm:$0xff]  ;;  %v9850_v37 = vcombine.low %v2180_v21, %v2184_v19  ;;  %v1808_v38 = vmul.f32 0.01, %v1593_v49 }
 0x259   : > { %8142 = vmatprep.subr.bf16.mxu0 %v9875_v39  ;;  %8183 = vmatprep.subr.bf16.mxu1 %v10003_v40  ;;  %v2300_v46 = vld [vmem:[%s15268_s6 + $0xe00] sm:$0xff]  ;;  %v9978_v39 = vcombine.low %v2308_v25, %v2312_v12  ;;  %v9843_v40 = vcombine.high %v2172_v32, %v2176_v33  ;;  %v1826_v4 = vmax.f32 %v1634_v59, %v1810_v41 }
 0x25a   : > { %v2304_v48 = vld [vmem:[%s15268_s6 + $0xe20] sm:$0xff] }
 0x25b   : > { %v9971_v29 = vcombine.high %v2300_v46, %v2304_v48  ;;  %v2420_v42 = vld [vmem:[%s15268_s6 + $0x11c0] sm:$0xff]  ;;  %v9970_v0 = vcombine.low %v2300_v46, %v2304_v48  ;;  %v12390_v25 = vpack.c.bf16 %v1826_v4, %v1826_v4 }
 0x25c   : > { %8143 = vmatpush2.bf16.msra.mxu0 %v9874_v45  ;;  %8184 = vmatpush2.bf16.msra.mxu1 %v10002_v57  ;;  %v2424_v43 = vld [vmem:[%s15268_s6 + $0x11e0] sm:$0xff]  ;;  %v1815_v57 = vmul.f32 0.01, %v1718_v35 }
 0x25d   : > { %8144 = vmatprep.subr.bf16.mxu0 %v9867_v61  ;;  %8185 = vmatprep.subr.bf16.mxu1 %v9995_v62  ;;  %v2548_v30 = vld [vmem:[%s15268_s6 + $0x15c0] sm:$0xff]  ;;  %v9842_v61 = vcombine.low %v2172_v32, %v2176_v33  ;;  %v1824_v62 = vmax.f32 %v1593_v49, %v1808_v38  ;;  %v10091_v3 = vcombine.high %v2420_v42, %v2424_v43 }
 0x25e   : > { %v2552_v45 = vld [vmem:[%s15268_s6 + $0x15e0] sm:$0xff]  ;;  %v10090_v15 = vcombine.low %v2420_v42, %v2424_v43 }
 0x25f   : > { %v10219_v5 = vcombine.high %v2548_v30, %v2552_v45  ;;  %v2412_v8 = vld [vmem:[%s15268_s6 + $0x1180] sm:$0xff]  ;;  %v12388_v19 = vpack.c.bf16 %v1824_v62, %v1824_v62  ;;  %v10218_v20 = vcombine.low %v2548_v30, %v2552_v45 }
 0x260   : > { %8145 = vmatpush2.bf16.msra.mxu0 %v9866_v6  ;;  %8186 = vmatpush2.bf16.msra.mxu1 %v9994_v9  ;;  %v1829_v6 = vmax.f32 %v1677_v34, %v1813_v44  ;;  %v2416_v9 = vld [vmem:[%s15268_s6 + $0x11a0] sm:$0xff] }
 0x261   : > { %8146 = vmatprep.subr.bf16.mxu0 %v9859_v1  ;;  %8187 = vmatprep.subr.bf16.mxu1 %v9987_v17  ;;  %v1831_v1 = vmax.f32 %v1718_v35, %v1815_v57  ;;  %v2540_v17 = vld [vmem:[%s15268_s6 + $0x1580] sm:$0xff]  ;;  %v10083_v12 = vcombine.high %v2412_v8, %v2416_v9  ;;  %v10082_v32 = vcombine.low %v2412_v8, %v2416_v9 }
 0x262   : > { %v2544_v21 = vld [vmem:[%s15268_s6 + $0x15a0] sm:$0xff]  ;;  %v12398_v49 = vpack.c.bf16 %v1829_v6, %v1829_v6 }
 0x263   : > { %v2404_v26 = vld [vmem:[%s15268_s6 + $0x1140] sm:$0xff]  ;;  %v10210_v33 = vcombine.low %v2540_v17, %v2544_v21 }
 0x264   : > { %8147 = vmatpush2.bf16.msra.mxu0 %v9858_v27  ;;  %8188 = vmatpush2.bf16.msra.mxu1 %v9986_v24  ;;  %v2408_v27 = vld [vmem:[%s15268_s6 + $0x1160] sm:$0xff]  ;;  %v10211_v24 = vcombine.high %v2540_v17, %v2544_v21 }
 0x265   : > { %8148 = vmatprep.subr.bf16.mxu0 %v9851_v18  ;;  %8189 = vmatprep.subr.bf16.mxu1 %v9979_v31  ;;  %v2532_v18 = vld [vmem:[%s15268_s6 + $0x1540] sm:$0xff]  ;;  %v12407_v31 = vpack.c.bf16 %v1831_v1, %v1831_v1  ;;  %v10075_v34 = vcombine.high %v2404_v26, %v2408_v27 }
 0x266   : > { %v2536_v59 = vld [vmem:[%s15268_s6 + $0x1560] sm:$0xff] }
 0x267   : > { %v10203_v46 = vcombine.high %v2532_v18, %v2536_v59  ;;  %v2396_v48 = vld [vmem:[%s15268_s6 + $0x1100] sm:$0xff] }
 0x268   : > { %8149 = vmatpush2.bf16.msra.mxu0 %v9850_v37  ;;  %8190 = vmatpush2.bf16.msra.mxu1 %v9978_v39  ;;  %v2400_v35 = vld [vmem:[%s15268_s6 + $0x1120] sm:$0xff]  ;;  %v10074_v39 = vcombine.low %v2404_v26, %v2408_v27 }
 0x269   : > { %8150 = vmatprep.subr.bf16.mxu0 %v9843_v40  ;;  %8191 = vmatprep.subr.bf16.mxu1 %v9971_v29  ;;  %v2524_v37 = vld [vmem:[%s15268_s6 + $0x1500] sm:$0xff]  ;;  %v10202_v40 = vcombine.low %v2532_v18, %v2536_v59  ;;  %v10067_v41 = vcombine.high %v2396_v48, %v2400_v35  ;;  %v10066_v45 = vcombine.low %v2396_v48, %v2400_v35 }
 0x26a   : > { %v2528_v38 = vld [vmem:[%s15268_s6 + $0x1520] sm:$0xff] }
 0x26b   : > { %v10195_v29 = vcombine.high %v2524_v37, %v2528_v38  ;;  %v2388_v42 = vld [vmem:[%s15268_s6 + $0x10c0] sm:$0xff]  ;;  %v10194_v57 = vcombine.low %v2524_v37, %v2528_v38 }
 0x26c   : > { %8151 = vmatpush2.bf16.msra.mxu0 %v9842_v61  ;;  %8192 = vmatpush2.bf16.msra.mxu1 %v9970_v0  ;;  %v2392_v43 = vld [vmem:[%s15268_s6 + $0x10e0] sm:$0xff] }
 0x26d   : > { %8202 = vmatprep.subr.bf16.mxu0 %v10091_v3  ;;  %8243 = vmatprep.subr.bf16.mxu1 %v10219_v5  ;;  %v2516_v44 = vld [vmem:[%s15268_s6 + $0x14c0] sm:$0xff]  ;;  %v10059_v61 = vcombine.high %v2388_v42, %v2392_v43  ;;  %v10058_v6 = vcombine.low %v2388_v42, %v2392_v43 }
 0x26e   : > { %v2520_v30 = vld [vmem:[%s15268_s6 + $0x14e0] sm:$0xff] }
 0x26f   : > { %8153 = vmatmul.mubr.bf16.vlgmr.msra.gmra.mxu0 %v12388_v19  ;;  %8194 = vmatmul.mubr.bf16.vlgmr.msra.gmra.mxu1 %v12390_v25  ;;  %v10187_v62 = vcombine.high %v2516_v44, %v2520_v30  ;;  %v2380_v0 = vld [vmem:[%s15268_s6 + $0x1080] sm:$0xff]  ;;  %v10186_v8 = vcombine.low %v2516_v44, %v2520_v30 }
 0x270   : > { %8203 = vmatpush1.bf16.msra.mxu0 %v10090_v15  ;;  %8234 = vmatprep.mubr.bf16.mxu0 %v12398_v49  ;;  %v2384_v3 = vld [vmem:[%s15268_s6 + $0x10a0] sm:$0xff] }
 0x271   : > { %8244 = vmatpush1.bf16.msra.mxu1 %v10218_v20  ;;  %8275 = vmatprep.mubr.bf16.mxu1 %v12407_v31  ;;  %v2508_v4 = vld [vmem:[%s15268_s6 + $0x1480] sm:$0xff]  ;;  %v10051_v9 = vcombine.high %v2380_v0, %v2384_v3 }
 0x272   : > { %8204 = vmatprep.subr.bf16.mxu0 %v10083_v12  ;;  %8245 = vmatprep.subr.bf16.mxu1 %v10211_v24  ;;  %v2512_v5 = vld [vmem:[%s15268_s6 + $0x14a0] sm:$0xff]  ;;  %v10050_v12 = vcombine.low %v2380_v0, %v2384_v3 }
 0x273   : > { %v10179_v1 = vcombine.high %v2508_v4, %v2512_v5  ;;  %v2372_v15 = vld [vmem:[%s15268_s6 + $0x1040] sm:$0xff]  ;;  %v10178_v26 = vcombine.low %v2508_v4, %v2512_v5 }
 0x274   : > { %8205 = vmatpush1.bf16.msra.mxu0 %v10082_v32  ;;  %v2376_v17 = vld [vmem:[%s15268_s6 + $0x1060] sm:$0xff] }
 0x275   : > { %8246 = vmatpush1.bf16.msra.mxu1 %v10210_v33  ;;  %8206 = vmatprep.subr.bf16.mxu0 %v10075_v34  ;;  %v2500_v21 = vld [vmem:[%s15268_s6 + $0x1440] sm:$0xff]  ;;  %v10043_v27 = vcombine.high %v2372_v15, %v2376_v17  ;;  %v10042_v34 = vcombine.low %v2372_v15, %v2376_v17 }
 0x276   : > { %8247 = vmatprep.subr.bf16.mxu1 %v10203_v46  ;;  %v2504_v20 = vld [vmem:[%s15268_s6 + $0x1460] sm:$0xff] }
 0x277   : > { %v10171_v24 = vcombine.high %v2500_v21, %v2504_v20  ;;  %v2364_v18 = vld [vmem:[%s15268_s6 + $0x1000] sm:$0xff]  ;;  %v10170_v46 = vcombine.low %v2500_v21, %v2504_v20 }
 0x278   : > { %8207 = vmatpush1.bf16.msra.mxu0 %v10074_v39  ;;  %v2368_v59 = vld [vmem:[%s15268_s6 + $0x1020] sm:$0xff] }
 0x279   : > { %8248 = vmatpush1.bf16.msra.mxu1 %v10202_v40  ;;  %8208 = vmatprep.subr.bf16.mxu0 %v10067_v41  ;;  %v2492_v32 = vld [vmem:[%s15268_s6 + $0x1400] sm:$0xff]  ;;  %v10035_v48 = vcombine.high %v2364_v18, %v2368_v59  ;;  %v10034_v41 = vcombine.low %v2364_v18, %v2368_v59 }
 0x27a   : > { %8249 = vmatprep.subr.bf16.mxu1 %v10195_v29  ;;  %v2496_v33 = vld [vmem:[%s15268_s6 + $0x1420] sm:$0xff] }
 0x27b   : > { %v10163_v35 = vcombine.high %v2492_v32, %v2496_v33  ;;  %v2484_v37 = vld [vmem:[%s15268_s6 + $0x13c0] sm:$0xff]  ;;  %v10162_v29 = vcombine.low %v2492_v32, %v2496_v33 }
 0x27c   : > { %8209 = vmatpush1.bf16.msra.mxu0 %v10066_v45  ;;  %v2488_v38 = vld [vmem:[%s15268_s6 + $0x13e0] sm:$0xff] }
 0x27d   : > { %8250 = vmatpush1.bf16.msra.mxu1 %v10194_v57  ;;  %8210 = vmatprep.subr.bf16.mxu0 %v10059_v61  ;;  %v2612_v39 = vld [vmem:[%s15268_s6 + $0x17c0] sm:$0xff]  ;;  %v10155_v42 = vcombine.high %v2484_v37, %v2488_v38  ;;  %v10154_v61 = vcombine.low %v2484_v37, %v2488_v38 }
 0x27e   : > { %8251 = vmatprep.subr.bf16.mxu1 %v10187_v62  ;;  %v2616_v40 = vld [vmem:[%s15268_s6 + $0x17e0] sm:$0xff] }
 0x27f   : > { %v10283_v43 = vcombine.high %v2612_v39, %v2616_v40  ;;  %v2476_v44 = vld [vmem:[%s15268_s6 + $0x1380] sm:$0xff]  ;;  %v10282_v62 = vcombine.low %v2612_v39, %v2616_v40 }
 0x280   : > { %8211 = vmatpush1.bf16.msra.mxu0 %v10058_v6  ;;  %v2480_v30 = vld [vmem:[%s15268_s6 + $0x13a0] sm:$0xff] }
 0x281   : > { %8252 = vmatpush1.bf16.msra.mxu1 %v10186_v8  ;;  %8212 = vmatprep.subr.bf16.mxu0 %v10051_v9  ;;  %v2604_v45 = vld [vmem:[%s15268_s6 + $0x1780] sm:$0xff]  ;;  %v10147_v0 = vcombine.high %v2476_v44, %v2480_v30  ;;  %v10146_v9 = vcombine.low %v2476_v44, %v2480_v30 }
 0x282   : > { %8253 = vmatprep.subr.bf16.mxu1 %v10179_v1  ;;  %v2608_v57 = vld [vmem:[%s15268_s6 + $0x17a0] sm:$0xff] }
 0x283   : > { %v10275_v3 = vcombine.high %v2604_v45, %v2608_v57  ;;  %v2468_v4 = vld [vmem:[%s15268_s6 + $0x1340] sm:$0xff]  ;;  %v10274_v1 = vcombine.low %v2604_v45, %v2608_v57  ;;  %v1435_v45 = vrot.slane %v12195_v36, %v11112_v2 }
 0x284   : > { %8213 = vmatpush1.bf16.msra.mxu0 %v10050_v12  ;;  %v2472_v5 = vld [vmem:[%s15268_s6 + $0x1360] sm:$0xff] }
 0x285   : > { %8254 = vmatpush1.bf16.msra.mxu1 %v10178_v26  ;;  %8214 = vmatprep.subr.bf16.mxu0 %v10043_v27  ;;  %v2596_v6 = vld [vmem:[%s15268_s6 + $0x1740] sm:$0xff]  ;;  %v10139_v15 = vcombine.high %v2468_v4, %v2472_v5  ;;  %v10138_v27 = vcombine.low %v2468_v4, %v2472_v5 }
 0x286   : > { %8255 = vmatprep.subr.bf16.mxu1 %v10171_v24  ;;  %v2600_v8 = vld [vmem:[%s15268_s6 + $0x1760] sm:$0xff] }
 0x287   : > { %v10267_v17 = vcombine.high %v2596_v6, %v2600_v8  ;;  %v2460_v21 = vld [vmem:[%s15268_s6 + $0x1300] sm:$0xff]  ;;  %v10266_v24 = vcombine.low %v2596_v6, %v2600_v8  ;;  %v1716_v8 = vadd.f32 %v12169_v51, %v1435_v45 }
 0x288   : > { %8215 = vmatpush1.bf16.msra.mxu0 %v10042_v34  ;;  %v2464_v20 = vld [vmem:[%s15268_s6 + $0x1320] sm:$0xff] }
 0x289   : > { %8256 = vmatpush1.bf16.msra.mxu1 %v10170_v46  ;;  %8216 = vmatprep.subr.bf16.mxu0 %v10035_v48  ;;  %v2588_v12 = vld [vmem:[%s15268_s6 + $0x1700] sm:$0xff]  ;;  %v10131_v18 = vcombine.high %v2460_v21, %v2464_v20  ;;  %v10130_v48 = vcombine.low %v2460_v21, %v2464_v20 }
 0x28a   : > { %8257 = vmatprep.subr.bf16.mxu1 %v10163_v35  ;;  %v2592_v26 = vld [vmem:[%s15268_s6 + $0x1720] sm:$0xff] }
 0x28b   : > { %v10259_v59 = vcombine.high %v2588_v12, %v2592_v26  ;;  %v2452_v32 = vld [vmem:[%s15268_s6 + $0x12c0] sm:$0xff]  ;;  %v10258_v35 = vcombine.low %v2588_v12, %v2592_v26  ;;  %v1814_v26 = vmul.f32 0.01, %v1716_v8 }
 0x28c   : > { %8217 = vmatpush1.bf16.msra.mxu0 %v10034_v41  ;;  %v2456_v33 = vld [vmem:[%s15268_s6 + $0x12e0] sm:$0xff] }
 0x28d   : > { %8258 = vmatpush1.bf16.msra.mxu1 %v10162_v29  ;;  %8218 = vmatprep.subr.bf16.mxu0 %v10155_v42  ;;  %v2580_v34 = vld [vmem:[%s15268_s6 + $0x16c0] sm:$0xff]  ;;  %v10123_v37 = vcombine.high %v2452_v32, %v2456_v33  ;;  %v10122_v42 = vcombine.low %v2452_v32, %v2456_v33 }
 0x28e   : > { %8259 = vmatprep.subr.bf16.mxu1 %v10283_v43  ;;  %v2584_v46 = vld [vmem:[%s15268_s6 + $0x16e0] sm:$0xff]  ;;  %v1427_v43 = vrot.slane %v12195_v36, %v11094_v60 }
 0x28f   : > { %v10251_v38 = vcombine.high %v2580_v34, %v2584_v46  ;;  %v2444_v39 = vld [vmem:[%s15268_s6 + $0x1280] sm:$0xff]  ;;  %v10250_v44 = vcombine.low %v2580_v34, %v2584_v46  ;;  %v1819_v34 = vmul.f32 0.01, %v12230_v23 }
 0x290   : > { %8219 = vmatpush2.bf16.msra.mxu0 %v10154_v61  ;;  %v2448_v40 = vld [vmem:[%s15268_s6 + $0x12a0] sm:$0xff]  ;;  %v1675_v4 = vadd.f32 %v12167_v50, %v1427_v43 }
 0x291   : > { %8260 = vmatpush2.bf16.msra.mxu1 %v10282_v62  ;;  %8220 = vmatprep.subr.bf16.mxu0 %v10147_v0  ;;  %v2572_v41 = vld [vmem:[%s15268_s6 + $0x1680] sm:$0xff]  ;;  %v10115_v30 = vcombine.high %v2444_v39, %v2448_v40  ;;  %v10114_v36 = vcombine.low %v2444_v39, %v2448_v40 }
 0x292   : > { %8261 = vmatprep.subr.bf16.mxu1 %v10275_v3  ;;  %v2576_v29 = vld [vmem:[%s15268_s6 + $0x16a0] sm:$0xff]  ;;  %v1812_v21 = vmul.f32 0.01, %v1675_v4 }
 0x293   : > { %v10243_v57 = vcombine.high %v2572_v41, %v2576_v29  ;;  %v2436_v61 = vld [vmem:[%s15268_s6 + $0x1240] sm:$0xff]  ;;  %v10242_v5 = vcombine.low %v2572_v41, %v2576_v29 }
 0x294   : > { %8221 = vmatpush2.bf16.msra.mxu0 %v10146_v9  ;;  %v2440_v62 = vld [vmem:[%s15268_s6 + $0x1260] sm:$0xff] }
 0x295   : > { %8262 = vmatpush2.bf16.msra.mxu1 %v10274_v1  ;;  %8222 = vmatprep.subr.bf16.mxu0 %v10139_v15  ;;  %v2564_v0 = vld [vmem:[%s15268_s6 + $0x1640] sm:$0xff]  ;;  %v10107_v6 = vcombine.high %v2436_v61, %v2440_v62  ;;  %v10106_v51 = vcombine.low %v2436_v61, %v2440_v62 }
 0x296   : > { %8263 = vmatprep.subr.bf16.mxu1 %v10267_v17  ;;  %v2568_v3 = vld [vmem:[%s15268_s6 + $0x1660] sm:$0xff] }
 0x297   : > { %v10235_v9 = vcombine.high %v2564_v0, %v2568_v3  ;;  %v2428_v1 = vld [vmem:[%s15268_s6 + $0x1200] sm:$0xff]  ;;  %v10234_v20 = vcombine.low %v2564_v0, %v2568_v3 }
 0x298   : > { %8223 = vmatpush2.bf16.msra.mxu0 %v10138_v27  ;;  %v2432_v15 = vld [vmem:[%s15268_s6 + $0x1220] sm:$0xff] }
 0x299   : > { %8264 = vmatpush2.bf16.msra.mxu1 %v10266_v24  ;;  %8224 = vmatprep.subr.bf16.mxu0 %v10131_v18  ;;  %v2556_v50 = vld [vmem:[%s15268_s6 + $0x1600] sm:$0xff]  ;;  %v10099_v12 = vcombine.high %v2428_v1, %v2432_v15  ;;  %v10098_v46 = vcombine.low %v2428_v1, %v2432_v15 }
 0x29a   : > { %8265 = vmatprep.subr.bf16.mxu1 %v10259_v59  ;;  %v2560_v17 = vld [vmem:[%s15268_s6 + $0x1620] sm:$0xff]  ;;  %v1817_v59 = vmul.f32 0.01, %v12228_v22 }
 0x29b   : > { %v10227_v27 = vcombine.high %v2556_v50, %v2560_v17  ;;  %v2676_v24 = vld [vmem:[%s15268_s6 + $0x19c0] sm:$0xff] }
 0x29c   : > { %8225 = vmatpush2.bf16.msra.mxu0 %v10130_v48  ;;  %v2680_v18 = vld [vmem:[%s15268_s6 + $0x19e0] sm:$0xff]  ;;  %v1828_v48 = vmax.f32 %v1675_v4, %v1812_v21  ;;  %v1833_v40 = vmax.f32 %v12228_v22, %v1817_v59 }
 0x29d   : > { %8266 = vmatpush2.bf16.msra.mxu1 %v10258_v35  ;;  %8226 = vmatprep.subr.bf16.mxu0 %v10123_v37  ;;  %v2804_v32 = vld [vmem:[%s15268_s6 + $0x1dc0] sm:$0xff]  ;;  %v10226_v35 = vcombine.low %v2556_v50, %v2560_v17  ;;  %v10347_v37 = vcombine.high %v2676_v24, %v2680_v18  ;;  %v10346_v43 = vcombine.low %v2676_v24, %v2680_v18 }
 0x29e   : > { %8267 = vmatprep.subr.bf16.mxu1 %v10251_v38  ;;  %v2808_v33 = vld [vmem:[%s15268_s6 + $0x1de0] sm:$0xff]  ;;  %v1830_v38 = vmax.f32 %v1716_v8, %v1814_v26  ;;  %v12612_v0 = vpack.c.bf16 %v1833_v40, %v1833_v40 }
 0x29f   : > { %v10475_v39 = vcombine.high %v2804_v32, %v2808_v33  ;;  %v2668_v41 = vld [vmem:[%s15268_s6 + $0x1980] sm:$0xff]  ;;  %v10474_v45 = vcombine.low %v2804_v32, %v2808_v33 }
 0x2a0   : > { %8227 = vmatpush2.bf16.msra.mxu0 %v10122_v42  ;;  %v2672_v29 = vld [vmem:[%s15268_s6 + $0x19a0] sm:$0xff]  ;;  %v1835_v42 = vmax.f32 %v12230_v23, %v1819_v34 }
 0x2a1   : > { %8268 = vmatpush2.bf16.msra.mxu1 %v10250_v44  ;;  %8228 = vmatprep.subr.bf16.mxu0 %v10115_v30  ;;  %v2796_v44 = vld [vmem:[%s15268_s6 + $0x1d80] sm:$0xff]  ;;  %v12602_v30 = vpack.c.bf16 %v1828_v48, %v1828_v48  ;;  %v10339_v61 = vcombine.high %v2668_v41, %v2672_v29 }
 0x2a2   : > { %8269 = vmatprep.subr.bf16.mxu1 %v10243_v57  ;;  %v2800_v22 = vld [vmem:[%s15268_s6 + $0x1da0] sm:$0xff]  ;;  %v12604_v57 = vpack.c.bf16 %v1830_v38, %v1830_v38 }
 0x2a3   : > { %v2660_v23 = vld [vmem:[%s15268_s6 + $0x1940] sm:$0xff]  ;;  %v10467_v3 = vcombine.high %v2796_v44, %v2800_v22  ;;  %v10466_v8 = vcombine.low %v2796_v44, %v2800_v22 }
 0x2a4   : > { %8229 = vmatpush2.bf16.msra.mxu0 %v10114_v36  ;;  %v2664_v62 = vld [vmem:[%s15268_s6 + $0x1960] sm:$0xff] }
 0x2a5   : > { %8270 = vmatpush2.bf16.msra.mxu1 %v10242_v5  ;;  %8230 = vmatprep.subr.bf16.mxu0 %v10107_v6  ;;  %v2788_v36 = vld [vmem:[%s15268_s6 + $0x1d40] sm:$0xff]  ;;  %v12621_v5 = vpack.c.bf16 %v1835_v42, %v1835_v42  ;;  %v10338_v6 = vcombine.low %v2668_v41, %v2672_v29  ;;  %v10330_v21 = vcombine.low %v2660_v23, %v2664_v62 }
 0x2a6   : > { %8271 = vmatprep.subr.bf16.mxu1 %v10235_v9  ;;  %v2792_v4 = vld [vmem:[%s15268_s6 + $0x1d60] sm:$0xff]  ;;  %v10331_v9 = vcombine.high %v2660_v23, %v2664_v62 }
 0x2a7   : > { %v10459_v1 = vcombine.high %v2788_v36, %v2792_v4  ;;  %v2652_v15 = vld [vmem:[%s15268_s6 + $0x1900] sm:$0xff] }
 0x2a8   : > { %8231 = vmatpush2.bf16.msra.mxu0 %v10106_v51  ;;  %v2656_v50 = vld [vmem:[%s15268_s6 + $0x1920] sm:$0xff] }
 0x2a9   : > { %8272 = vmatpush2.bf16.msra.mxu1 %v10234_v20  ;;  %8232 = vmatprep.subr.bf16.mxu0 %v10099_v12  ;;  %v2780_v17 = vld [vmem:[%s15268_s6 + $0x1d00] sm:$0xff]  ;;  %v10458_v20 = vcombine.low %v2788_v36, %v2792_v4  ;;  %v10323_v12 = vcombine.high %v2652_v15, %v2656_v50  ;;  %v10322_v32 = vcombine.low %v2652_v15, %v2656_v50 }
 0x2aa   : > { %8273 = vmatprep.subr.bf16.mxu1 %v10227_v27  ;;  %v2784_v51 = vld [vmem:[%s15268_s6 + $0x1d20] sm:$0xff] }
 0x2ab   : > { %v10451_v26 = vcombine.high %v2780_v17, %v2784_v51  ;;  %v2644_v27 = vld [vmem:[%s15268_s6 + $0x18c0] sm:$0xff]  ;;  %v10450_v33 = vcombine.low %v2780_v17, %v2784_v51 }
 0x2ac   : > { %8233 = vmatpush2.bf16.msra.mxu0 %v10098_v46  ;;  %v2648_v24 = vld [vmem:[%s15268_s6 + $0x18e0] sm:$0xff] }
 0x2ad   : > { %8274 = vmatpush2.bf16.msra.mxu1 %v10226_v35  ;;  %8284 = vmatprep.subr.bf16.mxu0 %v10347_v37  ;;  %v2772_v18 = vld [vmem:[%s15268_s6 + $0x1cc0] sm:$0xff]  ;;  %v10315_v34 = vcombine.high %v2644_v27, %v2648_v24 }
 0x2ae   : > { %8325 = vmatprep.subr.bf16.mxu1 %v10475_v39  ;;  %v2776_v59 = vld [vmem:[%s15268_s6 + $0x1ce0] sm:$0xff]  ;;  %v10314_v39 = vcombine.low %v2644_v27, %v2648_v24 }
 0x2af   : > { %8235 = vmatmul.mubr.bf16.vlgmr.msra.gmra.mxu0 %v12602_v30  ;;  %v10443_v46 = vcombine.high %v2772_v18, %v2776_v59  ;;  %v2636_v48 = vld [vmem:[%s15268_s6 + $0x1880] sm:$0xff]  ;;  %v10442_v40 = vcombine.low %v2772_v18, %v2776_v59 }
 0x2b0   : > { %8276 = vmatmul.mubr.bf16.vlgmr.msra.gmra.mxu1 %v12604_v57  ;;  %8285 = vmatpush1.bf16.msra.mxu0 %v10346_v43  ;;  %v2640_v35 = vld [vmem:[%s15268_s6 + $0x18a0] sm:$0xff] }
 0x2b1   : > { %8316 = vmatprep.mubr.bf16.mxu0 %v12612_v0  ;;  %8326 = vmatpush1.bf16.msra.mxu1 %v10474_v45  ;;  %v2764_v37 = vld [vmem:[%s15268_s6 + $0x1c80] sm:$0xff]  ;;  %v10307_v41 = vcombine.high %v2636_v48, %v2640_v35  ;;  %v10306_v45 = vcombine.low %v2636_v48, %v2640_v35 }
 0x2b2   : > { %8357 = vmatprep.mubr.bf16.mxu1 %v12621_v5  ;;  %8286 = vmatprep.subr.bf16.mxu0 %v10339_v61  ;;  %v2768_v38 = vld [vmem:[%s15268_s6 + $0x1ca0] sm:$0xff] }
 0x2b3   : > { %8327 = vmatprep.subr.bf16.mxu1 %v10467_v3  ;;  %v10435_v29 = vcombine.high %v2764_v37, %v2768_v38  ;;  %v2628_v42 = vld [vmem:[%s15268_s6 + $0x1840] sm:$0xff]  ;;  %v10434_v61 = vcombine.low %v2764_v37, %v2768_v38 }
 0x2b4   : > { %8287 = vmatpush1.bf16.msra.mxu0 %v10338_v6  ;;  %v2632_v43 = vld [vmem:[%s15268_s6 + $0x1860] sm:$0xff] }
 0x2b5   : > { %8328 = vmatpush1.bf16.msra.mxu1 %v10466_v8  ;;  %8288 = vmatprep.subr.bf16.mxu0 %v10331_v9  ;;  %v2756_v44 = vld [vmem:[%s15268_s6 + $0x1c40] sm:$0xff]  ;;  %v10299_v23 = vcombine.high %v2628_v42, %v2632_v43  ;;  %v10298_v8 = vcombine.low %v2628_v42, %v2632_v43 }
 0x2b6   : > { %8329 = vmatprep.subr.bf16.mxu1 %v10459_v1  ;;  %v2760_v22 = vld [vmem:[%s15268_s6 + $0x1c60] sm:$0xff] }
 0x2b7   : > { %v10427_v62 = vcombine.high %v2756_v44, %v2760_v22  ;;  %v2620_v3 = vld [vmem:[%s15268_s6 + $0x1800] sm:$0xff]  ;;  %v10426_v9 = vcombine.low %v2756_v44, %v2760_v22 }
 0x2b8   : > { %8289 = vmatpush1.bf16.msra.mxu0 %v10330_v21  ;;  %v2624_v36 = vld [vmem:[%s15268_s6 + $0x1820] sm:$0xff] }
 0x2b9   : > { %8330 = vmatpush1.bf16.msra.mxu1 %v10458_v20  ;;  %8290 = vmatprep.subr.bf16.mxu0 %v10323_v12  ;;  %v2748_v4 = vld [vmem:[%s15268_s6 + $0x1c00] sm:$0xff]  ;;  %v10291_v1 = vcombine.high %v2620_v3, %v2624_v36  ;;  %v10290_v20 = vcombine.low %v2620_v3, %v2624_v36 }
 0x2ba   : > { %8331 = vmatprep.subr.bf16.mxu1 %v10451_v26  ;;  %v2752_v6 = vld [vmem:[%s15268_s6 + $0x1c20] sm:$0xff] }
 0x2bb   : > { %v10419_v15 = vcombine.high %v2748_v4, %v2752_v6  ;;  %v2740_v50 = vld [vmem:[%s15268_s6 + $0x1bc0] sm:$0xff]  ;;  %v10418_v12 = vcombine.low %v2748_v4, %v2752_v6 }
 0x2bc   : > { %8291 = vmatpush1.bf16.msra.mxu0 %v10322_v32  ;;  %v2744_v17 = vld [vmem:[%s15268_s6 + $0x1be0] sm:$0xff] }
 0x2bd   : > { %8332 = vmatpush1.bf16.msra.mxu1 %v10450_v33  ;;  %8292 = vmatprep.subr.bf16.mxu0 %v10315_v34  ;;  %v2868_v51 = vld [vmem:[%s15268_s6 + $0x1fc0] sm:$0xff]  ;;  %v10411_v26 = vcombine.high %v2740_v50, %v2744_v17  ;;  %v10410_v33 = vcombine.low %v2740_v50, %v2744_v17 }
 0x2be   : > { %8333 = vmatprep.subr.bf16.mxu1 %v10443_v46  ;;  %v2872_v21 = vld [vmem:[%s15268_s6 + $0x1fe0] sm:$0xff] }
 0x2bf   : > { %v10539_v27 = vcombine.high %v2868_v51, %v2872_v21  ;;  %v2732_v24 = vld [vmem:[%s15268_s6 + $0x1b80] sm:$0xff]  ;;  %v10538_v34 = vcombine.low %v2868_v51, %v2872_v21 }
 0x2c0   : > { %8293 = vmatpush1.bf16.msra.mxu0 %v10314_v39  ;;  %v2736_v18 = vld [vmem:[%s15268_s6 + $0x1ba0] sm:$0xff] }
 0x2c1   : > { %8334 = vmatpush1.bf16.msra.mxu1 %v10442_v40  ;;  %8294 = vmatprep.subr.bf16.mxu0 %v10307_v41  ;;  %v2860_v59 = vld [vmem:[%s15268_s6 + $0x1f80] sm:$0xff]  ;;  %v10403_v46 = vcombine.high %v2732_v24, %v2736_v18  ;;  %v10402_v40 = vcombine.low %v2732_v24, %v2736_v18 }
 0x2c2   : > { %8335 = vmatprep.subr.bf16.mxu1 %v10435_v29  ;;  %v2864_v32 = vld [vmem:[%s15268_s6 + $0x1fa0] sm:$0xff] }
 0x2c3   : > { %v10531_v48 = vcombine.high %v2860_v59, %v2864_v32  ;;  %v2724_v35 = vld [vmem:[%s15268_s6 + $0x1b40] sm:$0xff]  ;;  %v10530_v41 = vcombine.low %v2860_v59, %v2864_v32 }
 0x2c4   : > { %8295 = vmatpush1.bf16.msra.mxu0 %v10306_v45  ;;  %v2728_v37 = vld [vmem:[%s15268_s6 + $0x1b60] sm:$0xff] }
 0x2c5   : > { %8336 = vmatpush1.bf16.msra.mxu1 %v10434_v61  ;;  %8296 = vmatprep.subr.bf16.mxu0 %v10299_v23  ;;  %v2852_v38 = vld [vmem:[%s15268_s6 + $0x1f40] sm:$0xff]  ;;  %v10395_v29 = vcombine.high %v2724_v35, %v2728_v37  ;;  %v10394_v61 = vcombine.low %v2724_v35, %v2728_v37 }
 0x2c6   : > { %8337 = vmatprep.subr.bf16.mxu1 %v10427_v62  ;;  %v2856_v39 = vld [vmem:[%s15268_s6 + $0x1f60] sm:$0xff] }
 0x2c7   : > { %v10523_v42 = vcombine.high %v2852_v38, %v2856_v39  ;;  %v2716_v43 = vld [vmem:[%s15268_s6 + $0x1b00] sm:$0xff]  ;;  %v10522_v23 = vcombine.low %v2852_v38, %v2856_v39 }
 0x2c8   : > { %8297 = vmatpush1.bf16.msra.mxu0 %v10298_v8  ;;  %v2720_v44 = vld [vmem:[%s15268_s6 + $0x1b20] sm:$0xff] }
 0x2c9   : > { %8338 = vmatpush1.bf16.msra.mxu1 %v10426_v9  ;;  %8298 = vmatprep.subr.bf16.mxu0 %v10291_v1  ;;  %v2844_v22 = vld [vmem:[%s15268_s6 + $0x1f00] sm:$0xff]  ;;  %v10387_v62 = vcombine.high %v2716_v43, %v2720_v44  ;;  %v10386_v9 = vcombine.low %v2716_v43, %v2720_v44  ;;  %v1818_v44 = vmul.f32 0.01, %v12226_v14 }
 0x2ca   : > { %8339 = vmatprep.subr.bf16.mxu1 %v10419_v15  ;;  %v2848_v45 = vld [vmem:[%s15268_s6 + $0x1f20] sm:$0xff] }
 0x2cb   : > { %v10515_v3 = vcombine.high %v2844_v22, %v2848_v45  ;;  %v2708_v36 = vld [vmem:[%s15268_s6 + $0x1ac0] sm:$0xff]  ;;  %v10514_v1 = vcombine.low %v2844_v22, %v2848_v45  ;;  %v1909_v45 = vld [vmem:[%s15268_s6 + $0x1c8] sm:$0xff] }
 0x2cc   : > { %8299 = vmatpush1.bf16.msra.mxu0 %v10290_v20  ;;  %v2712_v4 = vld [vmem:[%s15268_s6 + $0x1ae0] sm:$0xff] }
 0x2cd   : > { %8340 = vmatpush1.bf16.msra.mxu1 %v10418_v12  ;;  %8300 = vmatprep.subr.bf16.mxu0 %v10411_v26  ;;  %v2836_v6 = vld [vmem:[%s15268_s6 + $0x1ec0] sm:$0xff]  ;;  %v10379_v15 = vcombine.high %v2708_v36, %v2712_v4  ;;  %v10378_v12 = vcombine.low %v2708_v36, %v2712_v4 }
 0x2ce   : > { %8341 = vmatprep.subr.bf16.mxu1 %v10539_v27  ;;  %v2840_v8 = vld [vmem:[%s15268_s6 + $0x1ee0] sm:$0xff] }
 0x2cf   : > { %v10507_v50 = vcombine.high %v2836_v6, %v2840_v8  ;;  %v2700_v17 = vld [vmem:[%s15268_s6 + $0x1a80] sm:$0xff]  ;;  %v10506_v26 = vcombine.low %v2836_v6, %v2840_v8 }
 0x2d0   : > { %8301 = vmatpush2.bf16.msra.mxu0 %v10410_v33  ;;  %v2704_v51 = vld [vmem:[%s15268_s6 + $0x1aa0] sm:$0xff] }
 0x2d1   : > { %8342 = vmatpush2.bf16.msra.mxu1 %v10538_v34  ;;  %8302 = vmatprep.subr.bf16.mxu0 %v10403_v46  ;;  %v2828_v21 = vld [vmem:[%s15268_s6 + $0x1e80] sm:$0xff]  ;;  %v10371_v27 = vcombine.high %v2700_v17, %v2704_v51  ;;  %v10370_v34 = vcombine.low %v2700_v17, %v2704_v51  ;;  %v2029_v51 = vld [vmem:[%s15268_s6 + $0x588] sm:$0xff] }
 0x2d2   : > { %8343 = vmatprep.subr.bf16.mxu1 %v10531_v48  ;;  %v2832_v20 = vld [vmem:[%s15268_s6 + $0x1ea0] sm:$0xff] }
 0x2d3   : > { %v10499_v24 = vcombine.high %v2828_v21, %v2832_v20  ;;  %v2692_v18 = vld [vmem:[%s15268_s6 + $0x1a40] sm:$0xff]  ;;  %v10498_v46 = vcombine.low %v2828_v21, %v2832_v20 }
 0x2d4   : > { %8303 = vmatpush2.bf16.msra.mxu0 %v10402_v40  ;;  %v2696_v59 = vld [vmem:[%s15268_s6 + $0x1a60] sm:$0xff] }
 0x2d5   : > { %8344 = vmatpush2.bf16.msra.mxu1 %v10530_v41  ;;  %8304 = vmatprep.subr.bf16.mxu0 %v10395_v29  ;;  %v2820_v32 = vld [vmem:[%s15268_s6 + $0x1e40] sm:$0xff]  ;;  %v10363_v48 = vcombine.high %v2692_v18, %v2696_v59  ;;  %v10362_v41 = vcombine.low %v2692_v18, %v2696_v59  ;;  %v1816_v29 = vmul.f32 0.01, %v12224_v11 }
 0x2d6   : > { %8345 = vmatprep.subr.bf16.mxu1 %v10523_v42  ;;  %v2824_v33 = vld [vmem:[%s15268_s6 + $0x1e60] sm:$0xff] }
 0x2d7   : > { %v10491_v35 = vcombine.high %v2820_v32, %v2824_v33  ;;  %v2684_v37 = vld [vmem:[%s15268_s6 + $0x1a00] sm:$0xff]  ;;  %v10490_v42 = vcombine.low %v2820_v32, %v2824_v33  ;;  %v1832_v36 = vmax.f32 %v12224_v11, %v1816_v29  ;;  %v2021_v33 = vld [vmem:[%s15268_s6 + $0x548] sm:$0xff] }
 0x2d8   : > { %8305 = vmatpush2.bf16.msra.mxu0 %v10394_v61  ;;  %v2688_v38 = vld [vmem:[%s15268_s6 + $0x1a20] sm:$0xff]  ;;  %v1913_v61 = vld [vmem:[%s15268_s6 + $0x1e8] sm:$0xff] }
 0x2d9   : > { %8346 = vmatpush2.bf16.msra.mxu1 %v10522_v23  ;;  %8306 = vmatprep.subr.bf16.mxu0 %v10387_v62  ;;  %v2812_v39 = vld [vmem:[%s15268_s6 + $0x1e00] sm:$0xff]  ;;  %v10355_v43 = vcombine.high %v2684_v37, %v2688_v38  ;;  %v2037_v23 = vld [vmem:[%s15268_s6 + $0x5c8] sm:$0xff]  ;;  %v9581_v6 = vcombine.high %v1909_v45, %v1913_v61  ;;  %v9580_v17 = vcombine.low %v1909_v45, %v1913_v61 }
 0x2da   : > { %8347 = vmatprep.subr.bf16.mxu1 %v10515_v3  ;;  %v2816_v40 = vld [vmem:[%s15268_s6 + $0x1e20] sm:$0xff]  ;;  %v2041_v62 = vld [vmem:[%s15268_s6 + $0x5e8] sm:$0xff]  ;;  %v10354_v3 = vcombine.low %v2684_v37, %v2688_v38  ;;  %v12820_v21 = vpack.c.bf16 %v1832_v36, %v1832_v36 }
 0x2db   : > { %v10483_v22 = vcombine.high %v2812_v39, %v2816_v40  ;;  %v10482_v4 = vcombine.low %v2812_v39, %v2816_v40  ;;  %v2876_v8 = vld [vmem:[%s12796_s10] sm:$0xff]  ;;  %v9708_v20 = vcombine.low %v2037_v23, %v2041_v62  ;;  %v1885_v29 = vld [vmem:[%s15268_s6 + $0x108] sm:$0xff] }
 0x2dc   : > { %8307 = vmatpush2.bf16.msra.mxu0 %v10386_v9  ;;  %v1834_v9 = vmax.f32 %v12226_v14, %v1818_v44  ;;  %v8001_v11 = vrot.slane %v2876_v8, %v11094_v60  ;;  %v2033_v14 = vld [vmem:[%s15268_s6 + $0x5a8] sm:$0xff] }
 0x2dd   : > { %8348 = vmatpush2.bf16.msra.mxu1 %v10514_v1  ;;  %8308 = vmatprep.subr.bf16.mxu0 %v10379_v15  ;;  %v9709_v1 = vcombine.high %v2037_v23, %v2041_v62  ;;  %v1901_v15 = vld [vmem:[%s15268_s6 + $0x188] sm:$0xff]  ;;  %v9701_v32 = vcombine.high %v2029_v51, %v2033_v14  ;;  %v9700_v37 = vcombine.low %v2029_v51, %v2033_v14 }
 0x2de   : > { %8349 = vmatprep.subr.bf16.mxu1 %v10507_v50  ;;  %v1905_v50 = vld [vmem:[%s15268_s6 + $0x1a8] sm:$0xff] }
 0x2df   : > { %v1893_v60 = vld [vmem:[%s15268_s6 + $0x148] sm:$0xff] }
 0x2e0   : > { %8309 = vmatpush2.bf16.msra.mxu0 %v10378_v12  ;;  %v12822_v12 = vpack.c.bf16 %v1834_v9, %v1834_v9  ;;  %v2017_v45 = vld [vmem:[%s15268_s6 + $0x528] sm:$0xff] }
 0x2e1   : > { %8350 = vmatpush2.bf16.msra.mxu1 %v10506_v26  ;;  %8310 = vmatprep.subr.bf16.mxu0 %v10371_v27  ;;  %v8005_v26 = vrot.slane %v2876_v8, %v11082_v56  ;;  %v9573_v27 = vcombine.high %v1901_v15, %v1905_v50  ;;  %v2025_v56 = vld [vmem:[%s15268_s6 + $0x568] sm:$0xff] }
 0x2e2   : > { %8351 = vmatprep.subr.bf16.mxu1 %v10499_v24  ;;  %v1897_v24 = vld [vmem:[%s15268_s6 + $0x168] sm:$0xff]  ;;  %v9692_v36 = vcombine.low %v2021_v33, %v2025_v56 }
 0x2e3   : > { %v9565_v38 = vcombine.high %v1893_v60, %v1897_v24  ;;  %v9564_v23 = vcombine.low %v1893_v60, %v1897_v24  ;;  %v1877_v8 = vld [vmem:[%s15268_s6 + $0xc8] sm:$0xff] }
 0x2e4   : > { %8311 = vmatpush2.bf16.msra.mxu0 %v10370_v34  ;;  %v1881_v9 = vld [vmem:[%s15268_s6 + $0xe8] sm:$0xff] }
 0x2e5   : > { %8352 = vmatpush2.bf16.msra.mxu1 %v10498_v46  ;;  %8312 = vmatprep.subr.bf16.mxu0 %v10363_v48  ;;  %v9572_v46 = vcombine.low %v1901_v15, %v1905_v50  ;;  %v2009_v15 = vld [vmem:[%s15268_s6 + $0x4e8] sm:$0xff]  ;;  %v9548_v60 = vcombine.low %v1877_v8, %v1881_v9 }
 0x2e6   : > { %8353 = vmatprep.subr.bf16.mxu1 %v10491_v35  ;;  %v1869_v14 = vld [vmem:[%s15268_s6 + $0x88] sm:$0xff] }
 0x2e8   : > { %8313 = vmatpush2.bf16.msra.mxu0 %v10362_v41  ;;  %v9693_v41 = vcombine.high %v2021_v33, %v2025_v56  ;;  %v1865_v33 = vld [vmem:[%s15268_s6 + $0x68] sm:$0xff] }
 0x2e9   : > { %8354 = vmatpush2.bf16.msra.mxu1 %v10490_v42  ;;  %8314 = vmatprep.subr.bf16.mxu0 %v10355_v43  ;;  %v1889_v42 = vld [vmem:[%s15268_s6 + $0x128] sm:$0xff] }
 0x2ea   : > { %8355 = vmatprep.subr.bf16.mxu1 %v10483_v22  ;;  %v2013_v22 = vld [vmem:[%s15268_s6 + $0x508] sm:$0xff]  ;;  %v9556_v50 = vcombine.low %v1885_v29, %v1889_v42 }
 0x2eb   : > { %v1989_v56 = vld [vmem:[%s15268_s6 + $0x448] sm:$0xff] }
 0x2ec   : > { %8315 = vmatpush2.bf16.msra.mxu0 %v10354_v3 }
 0x2ed   : > { %8356 = vmatpush2.bf16.msra.mxu1 %v10482_v4  ;;  %8366 = vmatprep.subr.bf16.mxu0 %v9581_v6  ;;  %v9557_v4 = vcombine.high %v1885_v29, %v1889_v42  ;;  %v9685_v6 = vcombine.high %v2013_v22, %v2017_v45  ;;  %v1985_v29 = vld [vmem:[%s15268_s6 + $0x428] sm:$0xff] }
 0x2ee   : > { %8407 = vmatprep.subr.bf16.mxu1 %v9709_v1  ;;  %v2005_v1 = vld [vmem:[%s15268_s6 + $0x4c8] sm:$0xff] }
 0x2ef   : > { %8317 = vmatmul.mubr.bf16.vlgmr.msra.gmra.mxu0 %v12820_v21  ;;  %v8072_v18 = vpop.f32.mrf.mxu0  ;;  %v8113_v59 = vpop.f32.mrf.mxu1  ;;  %v9677_v51 = vcombine.high %v2005_v1, %v2009_v15  ;;  %v9676_v24 = vcombine.low %v2005_v1, %v2009_v15  ;;  %v1969_v1 = vld [vmem:[%s15268_s6 + $0x3a8] sm:$0xff] }
 0x2f0   : > { %8358 = vmatmul.mubr.bf16.vlgmr.msra.gmra.mxu1 %v12822_v12  ;;  %v8073_v34 = vadd.f32 %v8072_v18, %v8001_v11  ;;  %8367 = vmatpush1.bf16.msra.mxu0 %v9580_v17  ;;  %v9684_v17 = vcombine.low %v2013_v22, %v2017_v45  ;;  %v9549_v11 = vcombine.high %v1877_v8, %v1881_v9  ;;  %v1973_v45 = vld [vmem:[%s15268_s6 + $0x3c8] sm:$0xff] }
 0x2f1   : > { %8398 = vmatprep.mubr.bf16.mxu0 %v12131_v52  ;;  %8408 = vmatpush1.bf16.msra.mxu1 %v9708_v20  ;;  %v8074_v48 = vpop.f32.mrf.mxu0  ;;  %v8115_v35 = vpop.f32.mrf.mxu1  ;;  %v1873_v20 = vld [vmem:[%s15268_s6 + $0xa8] sm:$0xff] }
 0x2f2   : > { %v12840_v39 = vadd.f32 %v8113_v59, %v8073_v34  ;;  %8439 = vmatprep.mubr.bf16.mxu1 %v12133_v53  ;;  %v8075_v40 = vadd.f32 %v8074_v48, %v8005_v26  ;;  %8368 = vmatprep.subr.bf16.mxu0 %v9573_v27  ;;  %v1997_v26 = vld [vmem:[%s15268_s6 + $0x488] sm:$0xff]  ;;  %v9541_v18 = vcombine.high %v1869_v14, %v1873_v20 }
 0x2f3   : > { %8409 = vmatprep.subr.bf16.mxu1 %v9701_v32  ;;  %v8076_v43 = vpop.f32.mrf.mxu0  ;;  %v8117_v44 = vpop.f32.mrf.mxu1  ;;  %v2001_v27 = vld [vmem:[%s15268_s6 + $0x4a8] sm:$0xff] }
 0x2f4   : > { %v12855_v61 = vadd.f32 %v8115_v35, %v8075_v40  ;;  %8369 = vmatpush1.bf16.msra.mxu0 %v9572_v46  ;;  %v9669_v59 = vcombine.high %v1997_v26, %v2001_v27  ;;  %v1861_v32 = vld [vmem:[%s15268_s6 + $0x48] sm:$0xff]  ;;  %v9540_v46 = vcombine.low %v1869_v14, %v1873_v20  ;;  %v9668_v48 = vcombine.low %v1997_v26, %v2001_v27 }
 0x2f5   : > { %8410 = vmatpush1.bf16.msra.mxu1 %v9700_v37  ;;  %v8077_v62 = vpop.f32.mrf.mxu0  ;;  %v8118_v3 = vpop.f32.mrf.mxu1  ;;  %8370 = vmatprep.subr.bf16.mxu0 %v9565_v38  ;;  %v1993_v34 = vld [vmem:[%s15268_s6 + $0x468] sm:$0xff]  ;;  %v9533_v35 = vcombine.high %v1861_v32, %v1865_v33  ;;  %v9532_v42 = vcombine.low %v1861_v32, %v1865_v33 }
 0x2f6   : > { %8411 = vmatprep.subr.bf16.mxu1 %v9693_v41  ;;  %v9661_v37 = vcombine.high %v1989_v56, %v1993_v34  ;;  %v1853_v38 = vld [vmem:[%s15268_s6 + $0x8] sm:$0xff]  ;;  %v9660_v43 = vcombine.low %v1989_v56, %v1993_v34 }
 0x2f7   : > { %v1857_v40 = vld [vmem:[%s15268_s6 + $0x28] sm:$0xff] }
 0x2f8   : > { %8371 = vmatpush1.bf16.msra.mxu0 %v9564_v23  ;;  %v1981_v41 = vld [vmem:[%s15268_s6 + $0x408] sm:$0xff]  ;;  %v9525_v44 = vcombine.high %v1853_v38, %v1857_v40 }
 0x2f9   : > { %8412 = vmatpush1.bf16.msra.mxu1 %v9692_v36  ;;  %8372 = vmatprep.subr.bf16.mxu0 %v9557_v4  ;;  %v9653_v22 = vcombine.high %v1981_v41, %v1985_v29  ;;  %v1977_v23 = vld [vmem:[%s15268_s6 + $0x3e8] sm:$0xff]  ;;  %v9524_v36 = vcombine.low %v1853_v38, %v1857_v40  ;;  %v9652_v4 = vcombine.low %v1981_v41, %v1985_v29 }
 0x2fa   : > { %8413 = vmatprep.subr.bf16.mxu1 %v9685_v6  ;;  %v2101_v62 = vld [vmem:[%s15268_s6 + $0x7c8] sm:$0xff]  ;;  %v9645_v6 = vcombine.high %v1973_v45, %v1977_v23 }
 0x2fb   : > { %v2105_v3 = vld [vmem:[%s15268_s6 + $0x7e8] sm:$0xff] }
 0x2fc   : > { %8373 = vmatpush1.bf16.msra.mxu0 %v9556_v50  ;;  %v9773_v8 = vcombine.high %v2101_v62, %v2105_v3  ;;  %v1965_v9 = vld [vmem:[%s15268_s6 + $0x388] sm:$0xff] }
 0x2fd   : > { %8414 = vmatpush1.bf16.msra.mxu1 %v9684_v17  ;;  %8374 = vmatprep.subr.bf16.mxu0 %v9549_v11  ;;  %v2093_v15 = vld [vmem:[%s15268_s6 + $0x788] sm:$0xff]  ;;  %v9644_v17 = vcombine.low %v1973_v45, %v1977_v23  ;;  %v9772_v11 = vcombine.low %v2101_v62, %v2105_v3 }
 0x2fe   : > { %8415 = vmatprep.subr.bf16.mxu1 %v9677_v51  ;;  %v2097_v50 = vld [vmem:[%s15268_s6 + $0x7a8] sm:$0xff]  ;;  %v9637_v51 = vcombine.high %v1965_v9, %v1969_v1 }
 0x2ff   : > { %v9765_v14 = vcombine.high %v2093_v15, %v2097_v50  ;;  %v1957_v20 = vld [vmem:[%s15268_s6 + $0x348] sm:$0xff] }
 0x300   : > { %8375 = vmatpush1.bf16.msra.mxu0 %v9548_v60  ;;  %v1961_v26 = vld [vmem:[%s15268_s6 + $0x368] sm:$0xff] }
 0x301   : > { %8416 = vmatpush1.bf16.msra.mxu1 %v9676_v24  ;;  %8376 = vmatprep.subr.bf16.mxu0 %v9541_v18  ;;  %v2085_v27 = vld [vmem:[%s15268_s6 + $0x748] sm:$0xff]  ;;  %v9636_v24 = vcombine.low %v1965_v9, %v1969_v1  ;;  %v9764_v18 = vcombine.low %v2093_v15, %v2097_v50 }
 0x302   : > { %8417 = vmatprep.subr.bf16.mxu1 %v9669_v59  ;;  %v2089_v60 = vld [vmem:[%s15268_s6 + $0x768] sm:$0xff]  ;;  %v9629_v59 = vcombine.high %v1957_v20, %v1961_v26 }
 0x303   : > { %v9757_v32 = vcombine.high %v2085_v27, %v2089_v60  ;;  %v1949_v33 = vld [vmem:[%s15268_s6 + $0x308] sm:$0xff] }
 0x304   : > { %8377 = vmatpush1.bf16.msra.mxu0 %v9540_v46  ;;  %v1953_v56 = vld [vmem:[%s15268_s6 + $0x328] sm:$0xff] }
 0x305   : > { %8418 = vmatpush1.bf16.msra.mxu1 %v9668_v48  ;;  %8378 = vmatprep.subr.bf16.mxu0 %v9533_v35  ;;  %v2077_v34 = vld [vmem:[%s15268_s6 + $0x708] sm:$0xff]  ;;  %v9628_v48 = vcombine.low %v1957_v20, %v1961_v26  ;;  %v9756_v35 = vcombine.low %v2085_v27, %v2089_v60 }
 0x306   : > { %8419 = vmatprep.subr.bf16.mxu1 %v9661_v37  ;;  %v2081_v46 = vld [vmem:[%s15268_s6 + $0x728] sm:$0xff]  ;;  %v9621_v37 = vcombine.high %v1949_v33, %v1953_v56 }
 0x307   : > { %v9749_v38 = vcombine.high %v2077_v34, %v2081_v46  ;;  %v1941_v40 = vld [vmem:[%s15268_s6 + $0x2c8] sm:$0xff] }
 0x308   : > { %8379 = vmatpush1.bf16.msra.mxu0 %v9532_v42  ;;  %v1945_v41 = vld [vmem:[%s15268_s6 + $0x2e8] sm:$0xff] }
 0x309   : > { %8420 = vmatpush1.bf16.msra.mxu1 %v9660_v43  ;;  %8380 = vmatprep.subr.bf16.mxu0 %v9525_v44  ;;  %v2069_v29 = vld [vmem:[%s15268_s6 + $0x6c8] sm:$0xff]  ;;  %v9620_v43 = vcombine.low %v1949_v33, %v1953_v56  ;;  %v9748_v44 = vcombine.low %v2077_v34, %v2081_v46 }
 0x30a   : > { %8421 = vmatprep.subr.bf16.mxu1 %v9653_v22  ;;  %v2073_v42 = vld [vmem:[%s15268_s6 + $0x6e8] sm:$0xff]  ;;  %v9613_v22 = vcombine.high %v1941_v40, %v1945_v41 }
 0x30b   : > { %v9741_v45 = vcombine.high %v2069_v29, %v2073_v42  ;;  %v1933_v23 = vld [vmem:[%s15268_s6 + $0x288] sm:$0xff] }
 0x30c   : > { %8381 = vmatpush1.bf16.msra.mxu0 %v9524_v36  ;;  %v1937_v62 = vld [vmem:[%s15268_s6 + $0x2a8] sm:$0xff] }
 0x30d   : > { %8422 = vmatpush1.bf16.msra.mxu1 %v9652_v4  ;;  %8382 = vmatprep.subr.bf16.mxu0 %v9645_v6  ;;  %v2061_v3 = vld [vmem:[%s15268_s6 + $0x688] sm:$0xff]  ;;  %v9612_v4 = vcombine.low %v1941_v40, %v1945_v41  ;;  %v9740_v6 = vcombine.low %v2069_v29, %v2073_v42 }
 0x30e   : > { %8423 = vmatprep.subr.bf16.mxu1 %v9773_v8  ;;  %v2065_v36 = vld [vmem:[%s15268_s6 + $0x6a8] sm:$0xff]  ;;  %v9605_v8 = vcombine.high %v1933_v23, %v1937_v62 }
 0x30f   : > { %v9733_v9 = vcombine.high %v2061_v3, %v2065_v36  ;;  %v1925_v1 = vld [vmem:[%s15268_s6 + $0x248] sm:$0xff] }
 0x310   : > { %8383 = vmatpush2.bf16.msra.mxu0 %v9644_v17  ;;  %v1929_v15 = vld [vmem:[%s15268_s6 + $0x268] sm:$0xff] }
 0x311   : > { %8424 = vmatpush2.bf16.msra.mxu1 %v9772_v11  ;;  %8384 = vmatprep.subr.bf16.mxu0 %v9637_v51  ;;  %v2053_v50 = vld [vmem:[%s15268_s6 + $0x648] sm:$0xff]  ;;  %v9604_v11 = vcombine.low %v1933_v23, %v1937_v62  ;;  %v9732_v51 = vcombine.low %v2061_v3, %v2065_v36 }
 0x312   : > { %8425 = vmatprep.subr.bf16.mxu1 %v9765_v14  ;;  %v2057_v17 = vld [vmem:[%s15268_s6 + $0x668] sm:$0xff]  ;;  %v9597_v14 = vcombine.high %v1925_v1, %v1929_v15 }
 0x313   : > { %v9725_v20 = vcombine.high %v2053_v50, %v2057_v17  ;;  %v1917_v26 = vld [vmem:[%s15268_s6 + $0x208] sm:$0xff] }
 0x314   : > { %8385 = vmatpush2.bf16.msra.mxu0 %v9636_v24  ;;  %v1921_v27 = vld [vmem:[%s15268_s6 + $0x228] sm:$0xff] }
 0x315   : > { %8426 = vmatpush2.bf16.msra.mxu1 %v9764_v18  ;;  %8386 = vmatprep.subr.bf16.mxu0 %v9629_v59  ;;  %v2045_v60 = vld [vmem:[%s15268_s6 + $0x608] sm:$0xff]  ;;  %v9596_v18 = vcombine.low %v1925_v1, %v1929_v15  ;;  %v9724_v59 = vcombine.low %v2053_v50, %v2057_v17 }
 0x316   : > { %8427 = vmatprep.subr.bf16.mxu1 %v9757_v32  ;;  %v2049_v24 = vld [vmem:[%s15268_s6 + $0x628] sm:$0xff]  ;;  %v9589_v32 = vcombine.high %v1917_v26, %v1921_v27 }
 0x317   : > { %v9717_v33 = vcombine.high %v2045_v60, %v2049_v24  ;;  %v2165_v56 = vld [vmem:[%s15268_s6 + $0x9c8] sm:$0xff] }
 0x318   : > { %8387 = vmatpush2.bf16.msra.mxu0 %v9628_v48  ;;  %v2169_v34 = vld [vmem:[%s15268_s6 + $0x9e8] sm:$0xff] }
 0x319   : > { %8428 = vmatpush2.bf16.msra.mxu1 %v9756_v35  ;;  %8388 = vmatprep.subr.bf16.mxu0 %v9621_v37  ;;  %v2293_v46 = vld [vmem:[%s15268_s6 + $0xdc8] sm:$0xff]  ;;  %v9588_v35 = vcombine.low %v1917_v26, %v1921_v27  ;;  %v9716_v37 = vcombine.low %v2045_v60, %v2049_v24  ;;  %v9836_v42 = vcombine.low %v2165_v56, %v2169_v34 }
 0x31a   : > { %8429 = vmatprep.subr.bf16.mxu1 %v9749_v38  ;;  %v2297_v48 = vld [vmem:[%s15268_s6 + $0xde8] sm:$0xff]  ;;  %v9837_v38 = vcombine.high %v2165_v56, %v2169_v34 }
 0x31b   : > { %v9965_v40 = vcombine.high %v2293_v46, %v2297_v48  ;;  %v2157_v41 = vld [vmem:[%s15268_s6 + $0x988] sm:$0xff] }
 0x31c   : > { %8389 = vmatpush2.bf16.msra.mxu0 %v9620_v43  ;;  %v2161_v29 = vld [vmem:[%s15268_s6 + $0x9a8] sm:$0xff] }
 0x31d   : > { %8430 = vmatpush2.bf16.msra.mxu1 %v9748_v44  ;;  %8390 = vmatprep.subr.bf16.mxu0 %v9613_v22  ;;  %v2285_v43 = vld [vmem:[%s15268_s6 + $0xd88] sm:$0xff]  ;;  %v9964_v22 = vcombine.low %v2293_v46, %v2297_v48  ;;  %v9828_v1 = vcombine.low %v2157_v41, %v2161_v29 }
 0x31e   : > { %8431 = vmatprep.subr.bf16.mxu1 %v9741_v45  ;;  %v2289_v44 = vld [vmem:[%s15268_s6 + $0xda8] sm:$0xff]  ;;  %v9829_v45 = vcombine.high %v2157_v41, %v2161_v29 }
 0x31f   : > { %v2149_v23 = vld [vmem:[%s15268_s6 + $0x948] sm:$0xff]  ;;  %v9957_v36 = vcombine.high %v2285_v43, %v2289_v44  ;;  %v9956_v50 = vcombine.low %v2285_v43, %v2289_v44 }
 0x320   : > { %8391 = vmatpush2.bf16.msra.mxu0 %v9612_v4  ;;  %v2153_v62 = vld [vmem:[%s15268_s6 + $0x968] sm:$0xff] }
 0x321   : > { %8432 = vmatpush2.bf16.msra.mxu1 %v9740_v6  ;;  %8392 = vmatprep.subr.bf16.mxu0 %v9605_v8  ;;  %v2277_v4 = vld [vmem:[%s15268_s6 + $0xd48] sm:$0xff]  ;;  %v9821_v17 = vcombine.high %v2149_v23, %v2153_v62 }
 0x322   : > { %8433 = vmatprep.subr.bf16.mxu1 %v9733_v9  ;;  %v2281_v6 = vld [vmem:[%s15268_s6 + $0xd68] sm:$0xff] }
 0x323   : > { %v2145_v26 = vld [vmem:[%s15268_s6 + $0x928] sm:$0xff] }
 0x324   : > { %8393 = vmatpush2.bf16.msra.mxu0 %v9604_v11  ;;  %v2269_v60 = vld [vmem:[%s15268_s6 + $0xd08] sm:$0xff] }
 0x325   : > { %8434 = vmatpush2.bf16.msra.mxu1 %v9732_v51  ;;  %8394 = vmatprep.subr.bf16.mxu0 %v9597_v14  ;;  %v2133_v48 = vld [vmem:[%s15268_s6 + $0x8c8] sm:$0xff] }
 0x326   : > { %8435 = vmatprep.subr.bf16.mxu1 %v9725_v20  ;;  %v2141_v20 = vld [vmem:[%s15268_s6 + $0x908] sm:$0xff] }
 0x327   : > { %v9813_v56 = vcombine.high %v2141_v20, %v2145_v26  ;;  %v2125_v43 = vld [vmem:[%s15268_s6 + $0x888] sm:$0xff] }
 0x328   : > { %8395 = vmatpush2.bf16.msra.mxu0 %v9596_v18  ;;  %v2129_v44 = vld [vmem:[%s15268_s6 + $0x8a8] sm:$0xff] }
 0x329   : > { %8436 = vmatpush2.bf16.msra.mxu1 %v9724_v59  ;;  %8396 = vmatprep.subr.bf16.mxu0 %v9589_v32  ;;  %v9820_v59 = vcombine.low %v2149_v23, %v2153_v62 }
 0x32a   : > { %8437 = vmatprep.subr.bf16.mxu1 %v9717_v33  ;;  %v9948_v33 = vcombine.low %v2277_v4, %v2281_v6 }
 0x32c   : > { %8397 = vmatpush2.bf16.msra.mxu0 %v9588_v35  ;;  %v2137_v35 = vld [vmem:[%s15268_s6 + $0x8e8] sm:$0xff] }
 0x32d   : > { %8438 = vmatpush2.bf16.msra.mxu1 %v9716_v37  ;;  %8448 = vmatprep.subr.bf16.mxu0 %v9837_v38  ;;  %v2261_v37 = vld [vmem:[%s15268_s6 + $0xcc8] sm:$0xff]  ;;  %v9805_v29 = vcombine.high %v2133_v48, %v2137_v35  ;;  %v9804_v23 = vcombine.low %v2133_v48, %v2137_v35 }
 0x32e   : > { %8489 = vmatprep.subr.bf16.mxu1 %v9965_v40  ;;  %v2265_v38 = vld [vmem:[%s15268_s6 + $0xce8] sm:$0xff]  ;;  %v9812_v40 = vcombine.low %v2141_v20, %v2145_v26 }
 0x32f   : > { %v8154_v3 = vpop.f32.mrf.mxu0  ;;  %8399 = vmatmul.mubr.bf16.vlgmr.msra.gmra.mxu0 %v12135_v54  ;;  %v8195_v9 = vpop.f32.mrf.mxu1  ;;  %v9932_v62 = vcombine.low %v2261_v37, %v2265_v38  ;;  %v2241_v20 = vld [vmem:[%s15268_s6 + $0xc28] sm:$0xff] }
 0x330   : > { %v8155_v8 = vadd.f32 %v8154_v3, %v12840_v39  ;;  %8440 = vmatmul.mubr.bf16.vlgmr.msra.gmra.mxu1 %v12137_v55  ;;  %8449 = vmatpush1.bf16.msra.mxu0 %v9836_v42  ;;  %v9949_v39 = vcombine.high %v2277_v4, %v2281_v6  ;;  %v9933_v42 = vcombine.high %v2261_v37, %v2265_v38  ;;  %v2117_v4 = vld [vmem:[%s15268_s6 + $0x848] sm:$0xff] }
 0x331   : > { %8480 = vmatprep.mubr.bf16.mxu0 %v12177_v58  ;;  %8490 = vmatpush1.bf16.msra.mxu1 %v9964_v22  ;;  %v8156_v15 = vpop.f32.mrf.mxu0  ;;  %v8197_v14 = vpop.f32.mrf.mxu1  ;;  %v2253_v22 = vld [vmem:[%s15268_s6 + $0xc88] sm:$0xff]  ;;  %v9797_v3 = vcombine.high %v2125_v43, %v2129_v44 }
 0x332   : > { %v13041_v11 = vadd.f32 %v8195_v9, %v8155_v8  ;;  %8521 = vmatprep.mubr.bf16.mxu1 %v12179_v28  ;;  %v8157_v51 = vadd.f32 %v8156_v15, %v12855_v61  ;;  %8450 = vmatprep.subr.bf16.mxu0 %v9829_v45  ;;  %v2273_v61 = vld [vmem:[%s15268_s6 + $0xd28] sm:$0xff] }
 0x333   : > { %v8158_v27 = vpop.f32.mrf.mxu0  ;;  %8491 = vmatprep.subr.bf16.mxu1 %v9957_v36  ;;  %v8199_v18 = vpop.f32.mrf.mxu1  ;;  %v9941_v46 = vcombine.high %v2269_v60, %v2273_v61  ;;  %v9940_v41 = vcombine.low %v2269_v60, %v2273_v61  ;;  %v2257_v45 = vld [vmem:[%s15268_s6 + $0xca8] sm:$0xff] }
 0x334   : > { %v13057_v24 = vadd.f32 %v8197_v14, %v8157_v51  ;;  %8451 = vmatpush1.bf16.msra.mxu0 %v9828_v1  ;;  %v9925_v36 = vcombine.high %v2253_v22, %v2257_v45  ;;  %v2121_v6 = vld [vmem:[%s15268_s6 + $0x868] sm:$0xff]  ;;  %v9796_v1 = vcombine.low %v2125_v43, %v2129_v44  ;;  %v9924_v15 = vcombine.low %v2253_v22, %v2257_v45 }
 0x335   : > { %8492 = vmatpush1.bf16.msra.mxu1 %v9956_v50  ;;  %v8159_v32 = vpop.f32.mrf.mxu0  ;;  %8452 = vmatprep.subr.bf16.mxu0 %v9821_v17  ;;  %v8200_v34 = vpop.f32.mrf.mxu1  ;;  %v2245_v8 = vld [vmem:[%s15268_s6 + $0xc48] sm:$0xff]  ;;  %v9789_v50 = vcombine.high %v2117_v4, %v2121_v6  ;;  %v9788_v26 = vcombine.low %v2117_v4, %v2121_v6 }
 0x336   : > { %8493 = vmatprep.subr.bf16.mxu1 %v9949_v39  ;;  %v2249_v9 = vld [vmem:[%s15268_s6 + $0xc68] sm:$0xff] }
 0x337   : > { %v9917_v17 = vcombine.high %v2245_v8, %v2249_v9  ;;  %v2109_v51 = vld [vmem:[%s15268_s6 + $0x808] sm:$0xff]  ;;  %v9916_v27 = vcombine.low %v2245_v8, %v2249_v9 }
 0x338   : > { %8453 = vmatpush1.bf16.msra.mxu0 %v9820_v59  ;;  %v2113_v14 = vld [vmem:[%s15268_s6 + $0x828] sm:$0xff] }
 0x339   : > { %8494 = vmatpush1.bf16.msra.mxu1 %v9948_v33  ;;  %8454 = vmatprep.subr.bf16.mxu0 %v9813_v56  ;;  %v2237_v39 = vld [vmem:[%s15268_s6 + $0xc08] sm:$0xff]  ;;  %v9781_v60 = vcombine.high %v2109_v51, %v2113_v14  ;;  %v9780_v56 = vcombine.low %v2109_v51, %v2113_v14 }
 0x33a   : > { %8495 = vmatprep.subr.bf16.mxu1 %v9941_v46  ;;  %v9909_v61 = vcombine.high %v2237_v39, %v2241_v20  ;;  %v2229_v18 = vld [vmem:[%s15268_s6 + $0xbc8] sm:$0xff]  ;;  %v9908_v34 = vcombine.low %v2237_v39, %v2241_v20 }
 0x33b   : > { %v2233_v59 = vld [vmem:[%s15268_s6 + $0xbe8] sm:$0xff] }
 0x33c   : > { %8455 = vmatpush1.bf16.msra.mxu0 %v9812_v40  ;;  %v2357_v32 = vld [vmem:[%s15268_s6 + $0xfc8] sm:$0xff]  ;;  %v9901_v46 = vcombine.high %v2229_v18, %v2233_v59 }
 0x33d   : > { %8496 = vmatpush1.bf16.msra.mxu1 %v9940_v41  ;;  %8456 = vmatprep.subr.bf16.mxu0 %v9805_v29  ;;  %v2361_v33 = vld [vmem:[%s15268_s6 + $0xfe8] sm:$0xff]  ;;  %v9900_v41 = vcombine.low %v2229_v18, %v2233_v59 }
 0x33e   : > { %8497 = vmatprep.subr.bf16.mxu1 %v9933_v42  ;;  %v10029_v48 = vcombine.high %v2357_v32, %v2361_v33  ;;  %v2221_v35 = vld [vmem:[%s15268_s6 + $0xb88] sm:$0xff]  ;;  %v10028_v29 = vcombine.low %v2357_v32, %v2361_v33 }
 0x33f   : > { %v2225_v37 = vld [vmem:[%s15268_s6 + $0xba8] sm:$0xff] }
 0x340   : > { %8457 = vmatpush1.bf16.msra.mxu0 %v9804_v23  ;;  %v2349_v38 = vld [vmem:[%s15268_s6 + $0xf88] sm:$0xff]  ;;  %v9893_v42 = vcombine.high %v2221_v35, %v2225_v37 }
 0x341   : > { %8498 = vmatpush1.bf16.msra.mxu1 %v9932_v62  ;;  %8458 = vmatprep.subr.bf16.mxu0 %v9797_v3  ;;  %v2353_v40 = vld [vmem:[%s15268_s6 + $0xfa8] sm:$0xff]  ;;  %v9892_v62 = vcombine.low %v2221_v35, %v2225_v37 }
 0x342   : > { %8499 = vmatprep.subr.bf16.mxu1 %v9925_v36  ;;  %v10021_v43 = vcombine.high %v2349_v38, %v2353_v40  ;;  %v2213_v44 = vld [vmem:[%s15268_s6 + $0xb48] sm:$0xff]  ;;  %v10020_v3 = vcombine.low %v2349_v38, %v2353_v40 }
 0x343   : > { %v2217_v22 = vld [vmem:[%s15268_s6 + $0xb68] sm:$0xff] }
 0x344   : > { %8459 = vmatpush1.bf16.msra.mxu0 %v9796_v1  ;;  %v2341_v45 = vld [vmem:[%s15268_s6 + $0xf48] sm:$0xff]  ;;  %v9885_v36 = vcombine.high %v2213_v44, %v2217_v22 }
 0x345   : > { %8500 = vmatpush1.bf16.msra.mxu1 %v9924_v15  ;;  %8460 = vmatprep.subr.bf16.mxu0 %v9789_v50  ;;  %v2345_v23 = vld [vmem:[%s15268_s6 + $0xf68] sm:$0xff]  ;;  %v9884_v15 = vcombine.low %v2213_v44, %v2217_v22 }
 0x346   : > { %8501 = vmatprep.subr.bf16.mxu1 %v9917_v17  ;;  %v10013_v4 = vcombine.high %v2341_v45, %v2345_v23  ;;  %v2205_v6 = vld [vmem:[%s15268_s6 + $0xb08] sm:$0xff]  ;;  %v10012_v50 = vcombine.low %v2341_v45, %v2345_v23 }
 0x347   : > { %v2209_v8 = vld [vmem:[%s15268_s6 + $0xb28] sm:$0xff] }
 0x348   : > { %8461 = vmatpush1.bf16.msra.mxu0 %v9788_v26  ;;  %v2333_v9 = vld [vmem:[%s15268_s6 + $0xf08] sm:$0xff]  ;;  %v9877_v17 = vcombine.high %v2205_v6, %v2209_v8 }
 0x349   : > { %8502 = vmatpush1.bf16.msra.mxu1 %v9916_v27  ;;  %8462 = vmatprep.subr.bf16.mxu0 %v9781_v60  ;;  %v2337_v1 = vld [vmem:[%s15268_s6 + $0xf28] sm:$0xff]  ;;  %v9876_v27 = vcombine.low %v2205_v6, %v2209_v8 }
 0x34a   : > { %8503 = vmatprep.subr.bf16.mxu1 %v9909_v61  ;;  %v10005_v51 = vcombine.high %v2333_v9, %v2337_v1  ;;  %v2197_v14 = vld [vmem:[%s15268_s6 + $0xac8] sm:$0xff]  ;;  %v10004_v60 = vcombine.low %v2333_v9, %v2337_v1 }
 0x34b   : > { %v2201_v39 = vld [vmem:[%s15268_s6 + $0xae8] sm:$0xff] }
 0x34c   : > { %8463 = vmatpush1.bf16.msra.mxu0 %v9780_v56  ;;  %v2325_v20 = vld [vmem:[%s15268_s6 + $0xec8] sm:$0xff]  ;;  %v9869_v61 = vcombine.high %v2197_v14, %v2201_v39 }
 0x34d   : > { %8504 = vmatpush1.bf16.msra.mxu1 %v9908_v34  ;;  %8464 = vmatprep.subr.bf16.mxu0 %v9901_v46  ;;  %v2329_v26 = vld [vmem:[%s15268_s6 + $0xee8] sm:$0xff]  ;;  %v9868_v34 = vcombine.low %v2197_v14, %v2201_v39 }
 0x34e   : > { %8505 = vmatprep.subr.bf16.mxu1 %v10029_v48  ;;  %v9997_v18 = vcombine.high %v2325_v20, %v2329_v26  ;;  %v2189_v59 = vld [vmem:[%s15268_s6 + $0xa88] sm:$0xff]  ;;  %v9996_v46 = vcombine.low %v2325_v20, %v2329_v26 }
 0x34f   : > { %v2193_v32 = vld [vmem:[%s15268_s6 + $0xaa8] sm:$0xff] }
 0x350   : > { %8465 = vmatpush2.bf16.msra.mxu0 %v9900_v41  ;;  %v2317_v33 = vld [vmem:[%s15268_s6 + $0xe88] sm:$0xff]  ;;  %v9861_v48 = vcombine.high %v2189_v59, %v2193_v32 }
 0x351   : > { %8506 = vmatpush2.bf16.msra.mxu1 %v10028_v29  ;;  %8466 = vmatprep.subr.bf16.mxu0 %v9893_v42  ;;  %v2321_v56 = vld [vmem:[%s15268_s6 + $0xea8] sm:$0xff]  ;;  %v9860_v29 = vcombine.low %v2189_v59, %v2193_v32 }
 0x352   : > { %8507 = vmatprep.subr.bf16.mxu1 %v10021_v43  ;;  %v9989_v35 = vcombine.high %v2317_v33, %v2321_v56  ;;  %v2181_v37 = vld [vmem:[%s15268_s6 + $0xa48] sm:$0xff]  ;;  %v9988_v42 = vcombine.low %v2317_v33, %v2321_v56 }
 0x353   : > { %v2185_v38 = vld [vmem:[%s15268_s6 + $0xa68] sm:$0xff] }
 0x354   : > { %8467 = vmatpush2.bf16.msra.mxu0 %v9892_v62  ;;  %v2309_v40 = vld [vmem:[%s15268_s6 + $0xe48] sm:$0xff]  ;;  %v9853_v43 = vcombine.high %v2181_v37, %v2185_v38 }
 0x355   : > { %8508 = vmatpush2.bf16.msra.mxu1 %v10020_v3  ;;  %8468 = vmatprep.subr.bf16.mxu0 %v9885_v36  ;;  %v2313_v41 = vld [vmem:[%s15268_s6 + $0xe68] sm:$0xff]  ;;  %v9852_v3 = vcombine.low %v2181_v37, %v2185_v38 }
 0x356   : > { %8509 = vmatprep.subr.bf16.mxu1 %v10013_v4  ;;  %v9981_v44 = vcombine.high %v2309_v40, %v2313_v41  ;;  %v2173_v22 = vld [vmem:[%s15268_s6 + $0xa08] sm:$0xff]  ;;  %v9980_v36 = vcombine.low %v2309_v40, %v2313_v41 }
 0x357   : > { %v2177_v45 = vld [vmem:[%s15268_s6 + $0xa28] sm:$0xff] }
 0x358   : > { %8469 = vmatpush2.bf16.msra.mxu0 %v9884_v15  ;;  %v2301_v23 = vld [vmem:[%s15268_s6 + $0xe08] sm:$0xff]  ;;  %v9845_v4 = vcombine.high %v2173_v22, %v2177_v45 }
 0x359   : > { %8510 = vmatpush2.bf16.msra.mxu1 %v10012_v50  ;;  %8470 = vmatprep.subr.bf16.mxu0 %v9877_v17  ;;  %v2305_v62 = vld [vmem:[%s15268_s6 + $0xe28] sm:$0xff]  ;;  %v9844_v50 = vcombine.low %v2173_v22, %v2177_v45 }
 0x35a   : > { %8511 = vmatprep.subr.bf16.mxu1 %v10005_v51  ;;  %v9973_v6 = vcombine.high %v2301_v23, %v2305_v62  ;;  %v2421_v8 = vld [vmem:[%s15268_s6 + $0x11c8] sm:$0xff]  ;;  %v9972_v17 = vcombine.low %v2301_v23, %v2305_v62 }
 0x35b   : > { %v2425_v9 = vld [vmem:[%s15268_s6 + $0x11e8] sm:$0xff] }
 0x35c   : > { %8471 = vmatpush2.bf16.msra.mxu0 %v9876_v27  ;;  %v2549_v1 = vld [vmem:[%s15268_s6 + $0x15c8] sm:$0xff]  ;;  %v10093_v51 = vcombine.high %v2421_v8, %v2425_v9  ;;  %v10092_v26 = vcombine.low %v2421_v8, %v2425_v9 }
 0x35d   : > { %8512 = vmatpush2.bf16.msra.mxu1 %v10004_v60  ;;  %8472 = vmatprep.subr.bf16.mxu0 %v9869_v61  ;;  %v2553_v15 = vld [vmem:[%s15268_s6 + $0x15e8] sm:$0xff] }
 0x35e   : > { %8513 = vmatprep.subr.bf16.mxu1 %v9997_v18  ;;  %v10221_v14 = vcombine.high %v2549_v1, %v2553_v15  ;;  %v2413_v39 = vld [vmem:[%s15268_s6 + $0x1188] sm:$0xff]  ;;  %v10220_v61 = vcombine.low %v2549_v1, %v2553_v15 }
 0x35f   : > { %v2417_v20 = vld [vmem:[%s15268_s6 + $0x11a8] sm:$0xff] }
 0x360   : > { %8473 = vmatpush2.bf16.msra.mxu0 %v9868_v34  ;;  %v2541_v27 = vld [vmem:[%s15268_s6 + $0x1588] sm:$0xff]  ;;  %v10085_v18 = vcombine.high %v2413_v39, %v2417_v20  ;;  %v10084_v37 = vcombine.low %v2413_v39, %v2417_v20 }
 0x361   : > { %8514 = vmatpush2.bf16.msra.mxu1 %v9996_v46  ;;  %8474 = vmatprep.subr.bf16.mxu0 %v9861_v48  ;;  %v2545_v60 = vld [vmem:[%s15268_s6 + $0x15a8] sm:$0xff] }
 0x362   : > { %8515 = vmatprep.subr.bf16.mxu1 %v9989_v35  ;;  %v2405_v59 = vld [vmem:[%s15268_s6 + $0x1148] sm:$0xff]  ;;  %v10213_v56 = vcombine.high %v2541_v27, %v2545_v60  ;;  %v10212_v40 = vcombine.low %v2541_v27, %v2545_v60 }
 0x363   : > { %v2409_v32 = vld [vmem:[%s15268_s6 + $0x1168] sm:$0xff] }
 0x364   : > { %8475 = vmatpush2.bf16.msra.mxu0 %v9860_v29  ;;  %v2533_v34 = vld [vmem:[%s15268_s6 + $0x1548] sm:$0xff]  ;;  %v10077_v41 = vcombine.high %v2405_v59, %v2409_v32 }
 0x365   : > { %8516 = vmatpush2.bf16.msra.mxu1 %v9988_v42  ;;  %8476 = vmatprep.subr.bf16.mxu0 %v9853_v43  ;;  %v2537_v46 = vld [vmem:[%s15268_s6 + $0x1568] sm:$0xff] }
 0x366   : > { %8517 = vmatprep.subr.bf16.mxu1 %v9981_v44  ;;  %v2397_v44 = vld [vmem:[%s15268_s6 + $0x1108] sm:$0xff] }
 0x367   : > { %v2401_v22 = vld [vmem:[%s15268_s6 + $0x1128] sm:$0xff] }
 0x368   : > { %8477 = vmatpush2.bf16.msra.mxu0 %v9852_v3  ;;  %v2525_v23 = vld [vmem:[%s15268_s6 + $0x1508] sm:$0xff]  ;;  %v10069_v8 = vcombine.high %v2397_v44, %v2401_v22 }
 0x369   : > { %8518 = vmatpush2.bf16.msra.mxu1 %v9980_v36  ;;  %8478 = vmatprep.subr.bf16.mxu0 %v9845_v4  ;;  %v10076_v36 = vcombine.low %v2405_v59, %v2409_v32  ;;  %v2389_v15 = vld [vmem:[%s15268_s6 + $0x10c8] sm:$0xff] }
 0x36a   : > { %8519 = vmatprep.subr.bf16.mxu1 %v9973_v6  ;;  %v10204_v6 = vcombine.low %v2533_v34, %v2537_v46  ;;  %v2381_v27 = vld [vmem:[%s15268_s6 + $0x1088] sm:$0xff] }
 0x36b   : > { %v2385_v60 = vld [vmem:[%s15268_s6 + $0x10a8] sm:$0xff] }
 0x36c   : > { %8479 = vmatpush2.bf16.msra.mxu0 %v9844_v50  ;;  %v2393_v50 = vld [vmem:[%s15268_s6 + $0x10e8] sm:$0xff] }
 0x36d   : > { %8520 = vmatpush2.bf16.msra.mxu1 %v9972_v17  ;;  %8530 = vmatprep.subr.bf16.mxu0 %v10093_v51  ;;  %v2517_v17 = vld [vmem:[%s15268_s6 + $0x14c8] sm:$0xff]  ;;  %v10061_v20 = vcombine.high %v2389_v15, %v2393_v50  ;;  %v10060_v59 = vcombine.low %v2389_v15, %v2393_v50 }
 0x36e   : > { %8571 = vmatprep.subr.bf16.mxu1 %v10221_v14  ;;  %v2521_v51 = vld [vmem:[%s15268_s6 + $0x14e8] sm:$0xff]  ;;  %v10068_v14 = vcombine.low %v2397_v44, %v2401_v22 }
 0x36f   : > { %v8236_v33 = vpop.f32.mrf.mxu0  ;;  %8481 = vmatmul.mubr.bf16.vlgmr.msra.gmra.mxu0 %v12388_v19  ;;  %v10188_v32 = vcombine.low %v2517_v17, %v2521_v51  ;;  %v2497_v44 = vld [vmem:[%s15268_s6 + $0x1428] sm:$0xff] }
 0x370   : > { %v8237_v48 = vadd.f32 %v8236_v33, %v13041_v11  ;;  %v8277_v35 = vpop.f32.mrf.mxu1  ;;  %8522 = vmatmul.mubr.bf16.vlgmr.msra.gmra.mxu1 %v12390_v25  ;;  %8531 = vmatpush1.bf16.msra.mxu0 %v10092_v26  ;;  %v10205_v11 = vcombine.high %v2533_v34, %v2537_v46  ;;  %v10189_v26 = vcombine.high %v2517_v17, %v2521_v51  ;;  %v2373_v34 = vld [vmem:[%s15268_s6 + $0x1048] sm:$0xff] }
 0x371   : > { %8562 = vmatprep.mubr.bf16.mxu0 %v12398_v49  ;;  %8572 = vmatpush1.bf16.msra.mxu1 %v10220_v61  ;;  %v8238_v38 = vpop.f32.mrf.mxu0  ;;  %v2509_v61 = vld [vmem:[%s15268_s6 + $0x1488] sm:$0xff]  ;;  %v10053_v33 = vcombine.high %v2381_v27, %v2385_v60 }
 0x372   : > { %v13243_v29 = vadd.f32 %v8277_v35, %v8237_v48  ;;  %8603 = vmatprep.mubr.bf16.mxu1 %v12407_v31  ;;  %v8239_v42 = vadd.f32 %v8238_v38, %v13057_v24  ;;  %v8279_v43 = vpop.f32.mrf.mxu1  ;;  %8532 = vmatprep.subr.bf16.mxu0 %v10085_v18  ;;  %v2529_v24 = vld [vmem:[%s15268_s6 + $0x1528] sm:$0xff] }
 0x373   : > { %v8240_v45 = vpop.f32.mrf.mxu0  ;;  %8573 = vmatprep.subr.bf16.mxu1 %v10213_v56  ;;  %v10197_v1 = vcombine.high %v2525_v23, %v2529_v24  ;;  %v10196_v39 = vcombine.low %v2525_v23, %v2529_v24  ;;  %v2513_v18 = vld [vmem:[%s15268_s6 + $0x14a8] sm:$0xff] }
 0x374   : > { %v13259_v62 = vadd.f32 %v8279_v43, %v8239_v42  ;;  %v8281_v3 = vpop.f32.mrf.mxu1  ;;  %8533 = vmatpush1.bf16.msra.mxu0 %v10084_v37  ;;  %v10181_v56 = vcombine.high %v2509_v61, %v2513_v18  ;;  %v2377_v46 = vld [vmem:[%s15268_s6 + $0x1068] sm:$0xff]  ;;  %v10052_v37 = vcombine.low %v2381_v27, %v2385_v60  ;;  %v10180_v38 = vcombine.low %v2509_v61, %v2513_v18 }
 0x375   : > { %8574 = vmatpush1.bf16.msra.mxu1 %v10212_v40  ;;  %v8241_v4 = vpop.f32.mrf.mxu0  ;;  %8534 = vmatprep.subr.bf16.mxu0 %v10077_v41  ;;  %v2501_v48 = vld [vmem:[%s15268_s6 + $0x1448] sm:$0xff]  ;;  %v10045_v40 = vcombine.high %v2373_v34, %v2377_v46  ;;  %v10044_v22 = vcombine.low %v2373_v34, %v2377_v46 }
 0x376   : > { %v8282_v9 = vpop.f32.mrf.mxu1  ;;  %8575 = vmatprep.subr.bf16.mxu1 %v10205_v11  ;;  %v2505_v35 = vld [vmem:[%s15268_s6 + $0x1468] sm:$0xff] }
 0x377   : > { %v10173_v41 = vcombine.high %v2501_v48, %v2505_v35  ;;  %v2365_v42 = vld [vmem:[%s15268_s6 + $0x1008] sm:$0xff]  ;;  %v10172_v45 = vcombine.low %v2501_v48, %v2505_v35 }
 0x378   : > { %8535 = vmatpush1.bf16.msra.mxu0 %v10076_v36  ;;  %v2369_v43 = vld [vmem:[%s15268_s6 + $0x1028] sm:$0xff] }
 0x379   : > { %8576 = vmatpush1.bf16.msra.mxu1 %v10204_v6  ;;  %8536 = vmatprep.subr.bf16.mxu0 %v10069_v8  ;;  %v2493_v11 = vld [vmem:[%s15268_s6 + $0x1408] sm:$0xff]  ;;  %v10037_v23 = vcombine.high %v2365_v42, %v2369_v43  ;;  %v10036_v8 = vcombine.low %v2365_v42, %v2369_v43 }
 0x37a   : > { %8577 = vmatprep.subr.bf16.mxu1 %v10197_v1  ;;  %v10165_v24 = vcombine.high %v2493_v11, %v2497_v44  ;;  %v2485_v3 = vld [vmem:[%s15268_s6 + $0x13c8] sm:$0xff]  ;;  %v10164_v9 = vcombine.low %v2493_v11, %v2497_v44 }
 0x37b   : > { %v2489_v36 = vld [vmem:[%s15268_s6 + $0x13e8] sm:$0xff] }
 0x37c   : > { %8537 = vmatpush1.bf16.msra.mxu0 %v10068_v14  ;;  %v2613_v4 = vld [vmem:[%s15268_s6 + $0x17c8] sm:$0xff]  ;;  %v10157_v1 = vcombine.high %v2485_v3, %v2489_v36 }
 0x37d   : > { %8578 = vmatpush1.bf16.msra.mxu1 %v10196_v39  ;;  %8538 = vmatprep.subr.bf16.mxu0 %v10061_v20  ;;  %v2617_v6 = vld [vmem:[%s15268_s6 + $0x17e8] sm:$0xff]  ;;  %v10156_v39 = vcombine.low %v2485_v3, %v2489_v36 }
 0x37e   : > { %8579 = vmatprep.subr.bf16.mxu1 %v10189_v26  ;;  %v10285_v15 = vcombine.high %v2613_v4, %v2617_v6  ;;  %v2477_v50 = vld [vmem:[%s15268_s6 + $0x1388] sm:$0xff]  ;;  %v10284_v20 = vcombine.low %v2613_v4, %v2617_v6 }
 0x37f   : > { %v2481_v17 = vld [vmem:[%s15268_s6 + $0x13a8] sm:$0xff] }
 0x380   : > { %8539 = vmatpush1.bf16.msra.mxu0 %v10060_v59  ;;  %v2605_v51 = vld [vmem:[%s15268_s6 + $0x1788] sm:$0xff]  ;;  %v10149_v26 = vcombine.high %v2477_v50, %v2481_v17 }
 0x381   : > { %8580 = vmatpush1.bf16.msra.mxu1 %v10188_v32  ;;  %8540 = vmatprep.subr.bf16.mxu0 %v10053_v33  ;;  %v2609_v14 = vld [vmem:[%s15268_s6 + $0x17a8] sm:$0xff]  ;;  %v10148_v32 = vcombine.low %v2477_v50, %v2481_v17 }
 0x382   : > { %8581 = vmatprep.subr.bf16.mxu1 %v10181_v56  ;;  %v10277_v27 = vcombine.high %v2605_v51, %v2609_v14  ;;  %v2469_v60 = vld [vmem:[%s15268_s6 + $0x1348] sm:$0xff]  ;;  %v10276_v33 = vcombine.low %v2605_v51, %v2609_v14 }
 0x383   : > { %v2473_v61 = vld [vmem:[%s15268_s6 + $0x1368] sm:$0xff] }
 0x384   : > { %8541 = vmatpush1.bf16.msra.mxu0 %v10052_v37  ;;  %v2597_v18 = vld [vmem:[%s15268_s6 + $0x1748] sm:$0xff]  ;;  %v10141_v56 = vcombine.high %v2469_v60, %v2473_v61 }
 0x385   : > { %8582 = vmatpush1.bf16.msra.mxu1 %v10180_v38  ;;  %8542 = vmatprep.subr.bf16.mxu0 %v10045_v40  ;;  %v2601_v59 = vld [vmem:[%s15268_s6 + $0x1768] sm:$0xff]  ;;  %v10140_v38 = vcombine.low %v2469_v60, %v2473_v61 }
 0x386   : > { %8583 = vmatprep.subr.bf16.mxu1 %v10173_v41  ;;  %v10269_v34 = vcombine.high %v2597_v18, %v2601_v59  ;;  %v2461_v46 = vld [vmem:[%s15268_s6 + $0x1308] sm:$0xff]  ;;  %v10268_v40 = vcombine.low %v2597_v18, %v2601_v59 }
 0x387   : > { %v2465_v48 = vld [vmem:[%s15268_s6 + $0x1328] sm:$0xff] }
 0x388   : > { %8543 = vmatpush1.bf16.msra.mxu0 %v10044_v22  ;;  %v2589_v35 = vld [vmem:[%s15268_s6 + $0x1708] sm:$0xff]  ;;  %v10133_v41 = vcombine.high %v2461_v46, %v2465_v48 }
 0x389   : > { %8584 = vmatpush1.bf16.msra.mxu1 %v10172_v45  ;;  %8544 = vmatprep.subr.bf16.mxu0 %v10037_v23  ;;  %v2593_v37 = vld [vmem:[%s15268_s6 + $0x1728] sm:$0xff]  ;;  %v10132_v45 = vcombine.low %v2461_v46, %v2465_v48 }
 0x38a   : > { %8585 = vmatprep.subr.bf16.mxu1 %v10165_v24  ;;  %v10261_v42 = vcombine.high %v2589_v35, %v2593_v37  ;;  %v2453_v43 = vld [vmem:[%s15268_s6 + $0x12c8] sm:$0xff]  ;;  %v10260_v23 = vcombine.low %v2589_v35, %v2593_v37 }
 0x38b   : > { %v2457_v11 = vld [vmem:[%s15268_s6 + $0x12e8] sm:$0xff] }
 0x38c   : > { %8545 = vmatpush1.bf16.msra.mxu0 %v10036_v8  ;;  %v2581_v44 = vld [vmem:[%s15268_s6 + $0x16c8] sm:$0xff]  ;;  %v10125_v24 = vcombine.high %v2453_v43, %v2457_v11 }
 0x38d   : > { %8586 = vmatpush1.bf16.msra.mxu1 %v10164_v9  ;;  %8546 = vmatprep.subr.bf16.mxu0 %v10157_v1  ;;  %v2585_v22 = vld [vmem:[%s15268_s6 + $0x16e8] sm:$0xff]  ;;  %v10124_v9 = vcombine.low %v2453_v43, %v2457_v11 }
 0x38e   : > { %8587 = vmatprep.subr.bf16.mxu1 %v10285_v15  ;;  %v10253_v3 = vcombine.high %v2581_v44, %v2585_v22  ;;  %v2445_v36 = vld [vmem:[%s15268_s6 + $0x1288] sm:$0xff]  ;;  %v10252_v1 = vcombine.low %v2581_v44, %v2585_v22 }
 0x38f   : > { %v2449_v4 = vld [vmem:[%s15268_s6 + $0x12a8] sm:$0xff] }
 0x390   : > { %8547 = vmatpush2.bf16.msra.mxu0 %v10156_v39  ;;  %v2573_v6 = vld [vmem:[%s15268_s6 + $0x1688] sm:$0xff]  ;;  %v10117_v15 = vcombine.high %v2445_v36, %v2449_v4 }
 0x391   : > { %8588 = vmatpush2.bf16.msra.mxu1 %v10284_v20  ;;  %8548 = vmatprep.subr.bf16.mxu0 %v10149_v26  ;;  %v2577_v8 = vld [vmem:[%s15268_s6 + $0x16a8] sm:$0xff]  ;;  %v10116_v20 = vcombine.low %v2445_v36, %v2449_v4 }
 0x392   : > { %8589 = vmatprep.subr.bf16.mxu1 %v10277_v27  ;;  %v10245_v50 = vcombine.high %v2573_v6, %v2577_v8  ;;  %v2437_v17 = vld [vmem:[%s15268_s6 + $0x1248] sm:$0xff]  ;;  %v10244_v26 = vcombine.low %v2573_v6, %v2577_v8 }
 0x393   : > { %v2441_v51 = vld [vmem:[%s15268_s6 + $0x1268] sm:$0xff] }
 0x394   : > { %8549 = vmatpush2.bf16.msra.mxu0 %v10148_v32  ;;  %v2565_v14 = vld [vmem:[%s15268_s6 + $0x1648] sm:$0xff]  ;;  %v10109_v27 = vcombine.high %v2437_v17, %v2441_v51 }
 0x395   : > { %8590 = vmatpush2.bf16.msra.mxu1 %v10276_v33  ;;  %8550 = vmatprep.subr.bf16.mxu0 %v10141_v56  ;;  %v2569_v39 = vld [vmem:[%s15268_s6 + $0x1668] sm:$0xff]  ;;  %v10108_v33 = vcombine.low %v2437_v17, %v2441_v51 }
 0x396   : > { %8591 = vmatprep.subr.bf16.mxu1 %v10269_v34  ;;  %v10237_v60 = vcombine.high %v2565_v14, %v2569_v39  ;;  %v2429_v61 = vld [vmem:[%s15268_s6 + $0x1208] sm:$0xff]  ;;  %v10236_v56 = vcombine.low %v2565_v14, %v2569_v39 }
 0x397   : > { %v2433_v18 = vld [vmem:[%s15268_s6 + $0x1228] sm:$0xff] }
 0x398   : > { %8551 = vmatpush2.bf16.msra.mxu0 %v10140_v38  ;;  %v2557_v59 = vld [vmem:[%s15268_s6 + $0x1608] sm:$0xff]  ;;  %v10101_v34 = vcombine.high %v2429_v61, %v2433_v18 }
 0x399   : > { %8592 = vmatpush2.bf16.msra.mxu1 %v10268_v40  ;;  %8552 = vmatprep.subr.bf16.mxu0 %v10133_v41  ;;  %v2561_v32 = vld [vmem:[%s15268_s6 + $0x1628] sm:$0xff]  ;;  %v10100_v40 = vcombine.low %v2429_v61, %v2433_v18 }
 0x39a   : > { %8593 = vmatprep.subr.bf16.mxu1 %v10261_v42  ;;  %v10229_v46 = vcombine.high %v2557_v59, %v2561_v32  ;;  %v2677_v48 = vld [vmem:[%s15268_s6 + $0x19c8] sm:$0xff]  ;;  %v10228_v41 = vcombine.low %v2557_v59, %v2561_v32 }
 0x39b   : > { %v2681_v35 = vld [vmem:[%s15268_s6 + $0x19e8] sm:$0xff] }
 0x39c   : > { %8553 = vmatpush2.bf16.msra.mxu0 %v10132_v45  ;;  %v2805_v37 = vld [vmem:[%s15268_s6 + $0x1dc8] sm:$0xff]  ;;  %v10349_v42 = vcombine.high %v2677_v48, %v2681_v35  ;;  %v10348_v22 = vcombine.low %v2677_v48, %v2681_v35 }
 0x39d   : > { %8594 = vmatpush2.bf16.msra.mxu1 %v10260_v23  ;;  %8554 = vmatprep.subr.bf16.mxu0 %v10125_v24  ;;  %v2809_v38 = vld [vmem:[%s15268_s6 + $0x1de8] sm:$0xff] }
 0x39e   : > { %8595 = vmatprep.subr.bf16.mxu1 %v10253_v3  ;;  %v10477_v43 = vcombine.high %v2805_v37, %v2809_v38  ;;  %v2669_v11 = vld [vmem:[%s15268_s6 + $0x1988] sm:$0xff]  ;;  %v10476_v24 = vcombine.low %v2805_v37, %v2809_v38 }
 0x39f   : > { %v2673_v44 = vld [vmem:[%s15268_s6 + $0x19a8] sm:$0xff] }
 0x3a0   : > { %8555 = vmatpush2.bf16.msra.mxu0 %v10124_v9  ;;  %v2797_v45 = vld [vmem:[%s15268_s6 + $0x1d88] sm:$0xff]  ;;  %v10341_v3 = vcombine.high %v2669_v11, %v2673_v44  ;;  %v10340_v17 = vcombine.low %v2669_v11, %v2673_v44 }
 0x3a1   : > { %8596 = vmatpush2.bf16.msra.mxu1 %v10252_v1  ;;  %8556 = vmatprep.subr.bf16.mxu0 %v10117_v15  ;;  %v2801_v23 = vld [vmem:[%s15268_s6 + $0x1da8] sm:$0xff] }
 0x3a2   : > { %8597 = vmatprep.subr.bf16.mxu1 %v10245_v50  ;;  %v2661_v36 = vld [vmem:[%s15268_s6 + $0x1948] sm:$0xff]  ;;  %v10469_v8 = vcombine.high %v2797_v45, %v2801_v23  ;;  %v10468_v14 = vcombine.low %v2797_v45, %v2801_v23 }
 0x3a3   : > { %v2665_v4 = vld [vmem:[%s15268_s6 + $0x1968] sm:$0xff] }
 0x3a4   : > { %8557 = vmatpush2.bf16.msra.mxu0 %v10116_v20  ;;  %v2789_v9 = vld [vmem:[%s15268_s6 + $0x1d48] sm:$0xff]  ;;  %v10333_v39 = vcombine.high %v2661_v36, %v2665_v4 }
 0x3a5   : > { %8598 = vmatpush2.bf16.msra.mxu1 %v10244_v26  ;;  %8558 = vmatprep.subr.bf16.mxu0 %v10109_v27  ;;  %v2793_v1 = vld [vmem:[%s15268_s6 + $0x1d68] sm:$0xff] }
 0x3a6   : > { %8599 = vmatprep.subr.bf16.mxu1 %v10237_v60  ;;  %v2653_v60 = vld [vmem:[%s15268_s6 + $0x1908] sm:$0xff] }
 0x3a7   : > { %v2657_v61 = vld [vmem:[%s15268_s6 + $0x1928] sm:$0xff] }
 0x3a8   : > { %8559 = vmatpush2.bf16.msra.mxu0 %v10108_v33  ;;  %v2781_v59 = vld [vmem:[%s15268_s6 + $0x1d08] sm:$0xff]  ;;  %v10325_v48 = vcombine.high %v2653_v60, %v2657_v61  ;;  %v10324_v11 = vcombine.low %v2653_v60, %v2657_v61 }
 0x3a9   : > { %8600 = vmatpush2.bf16.msra.mxu1 %v10236_v56  ;;  %8560 = vmatprep.subr.bf16.mxu0 %v10101_v34  ;;  %v10332_v56 = vcombine.low %v2661_v36, %v2665_v4  ;;  %v2637_v23 = vld [vmem:[%s15268_s6 + $0x1888] sm:$0xff] }
 0x3aa   : > { %8601 = vmatprep.subr.bf16.mxu1 %v10229_v46  ;;  %v10460_v46 = vcombine.low %v2789_v9, %v2793_v1  ;;  %v2769_v36 = vld [vmem:[%s15268_s6 + $0x1ca8] sm:$0xff] }
 0x3ab   : > { %v2749_v60 = vld [vmem:[%s15268_s6 + $0x1c08] sm:$0xff] }
 0x3ac   : > { %8561 = vmatpush2.bf16.msra.mxu0 %v10100_v40  ;;  %v2645_v40 = vld [vmem:[%s15268_s6 + $0x18c8] sm:$0xff] }
 0x3ad   : > { %8602 = vmatpush2.bf16.msra.mxu1 %v10228_v41  ;;  %8612 = vmatprep.subr.bf16.mxu0 %v10349_v42  ;;  %v2649_v41 = vld [vmem:[%s15268_s6 + $0x18e8] sm:$0xff] }
 0x3ae   : > { %8653 = vmatprep.subr.bf16.mxu1 %v10477_v43  ;;  %v2773_v42 = vld [vmem:[%s15268_s6 + $0x1cc8] sm:$0xff]  ;;  %v10316_v4 = vcombine.low %v2645_v40, %v2649_v41 }
 0x3af   : > { %v8318_v6 = vpop.f32.mrf.mxu0  ;;  %8563 = vmatmul.mubr.bf16.vlgmr.msra.gmra.mxu0 %v12602_v30  ;;  %v2777_v43 = vld [vmem:[%s15268_s6 + $0x1ce8] sm:$0xff] }
 0x3b0   : > { %v8319_v15 = vadd.f32 %v8318_v6, %v13243_v29  ;;  %v8359_v50 = vpop.f32.mrf.mxu1  ;;  %8604 = vmatmul.mubr.bf16.vlgmr.msra.gmra.mxu1 %v12604_v57  ;;  %8613 = vmatpush1.bf16.msra.mxu0 %v10348_v22  ;;  %v10461_v29 = vcombine.high %v2789_v9, %v2793_v1  ;;  %v10317_v22 = vcombine.high %v2645_v40, %v2649_v41  ;;  %v2629_v1 = vld [vmem:[%s15268_s6 + $0x1848] sm:$0xff] }
 0x3b1   : > { %8644 = vmatprep.mubr.bf16.mxu0 %v12612_v0  ;;  %8654 = vmatpush1.bf16.msra.mxu1 %v10476_v24  ;;  %v8320_v51 = vpop.f32.mrf.mxu0  ;;  %v10445_v45 = vcombine.high %v2773_v42, %v2777_v43  ;;  %v2641_v24 = vld [vmem:[%s15268_s6 + $0x18a8] sm:$0xff]  ;;  %v10444_v6 = vcombine.low %v2773_v42, %v2777_v43 }
 0x3b2   : > { %v13445_v20 = vadd.f32 %v8359_v50, %v8319_v15  ;;  %8685 = vmatprep.mubr.bf16.mxu1 %v12621_v5  ;;  %v8321_v26 = vadd.f32 %v8320_v51, %v13259_v62  ;;  %v8361_v27 = vpop.f32.mrf.mxu1  ;;  %8614 = vmatprep.subr.bf16.mxu0 %v10341_v3  ;;  %v2785_v62 = vld [vmem:[%s15268_s6 + $0x1d28] sm:$0xff]  ;;  %v10308_v51 = vcombine.low %v2637_v23, %v2641_v24 }
 0x3b3   : > { %v8322_v18 = vpop.f32.mrf.mxu0  ;;  %8655 = vmatprep.subr.bf16.mxu1 %v10469_v8  ;;  %v10453_v38 = vcombine.high %v2781_v59, %v2785_v62  ;;  %v10452_v44 = vcombine.low %v2781_v59, %v2785_v62  ;;  %v2765_v3 = vld [vmem:[%s15268_s6 + $0x1c88] sm:$0xff]  ;;  %v10309_v8 = vcombine.high %v2637_v23, %v2641_v24 }
 0x3b4   : > { %v13461_v32 = vadd.f32 %v8361_v27, %v8321_v26  ;;  %v8363_v33 = vpop.f32.mrf.mxu1  ;;  %8615 = vmatpush1.bf16.msra.mxu0 %v10340_v17  ;;  %v10437_v9 = vcombine.high %v2765_v3, %v2769_v36  ;;  %v2633_v15 = vld [vmem:[%s15268_s6 + $0x1868] sm:$0xff] }
 0x3b5   : > { %8656 = vmatpush1.bf16.msra.mxu1 %v10468_v14  ;;  %v8323_v34 = vpop.f32.mrf.mxu0  ;;  %8616 = vmatprep.subr.bf16.mxu0 %v10333_v39  ;;  %v2757_v50 = vld [vmem:[%s15268_s6 + $0x1c48] sm:$0xff]  ;;  %v10436_v14 = vcombine.low %v2765_v3, %v2769_v36  ;;  %v10301_v39 = vcombine.high %v2629_v1, %v2633_v15  ;;  %v10300_v18 = vcombine.low %v2629_v1, %v2633_v15 }
 0x3b6   : > { %v9358_v35 = vcombine.low %v13445_v20, %v13461_v32  ;;  %v8364_v37 = vpop.f32.mrf.mxu1  ;;  %8657 = vmatprep.subr.bf16.mxu1 %v10461_v29  ;;  %v2761_v17 = vld [vmem:[%s15268_s6 + $0x1c68] sm:$0xff]  ;;  %v2638_v20 = vld [vmem:[%s15268_s6 + $0x1890] sm:$0xff] }
 0x3b7   : > { %v10429_v26 = vcombine.high %v2757_v50, %v2761_v17  ;;  %v2621_v27 = vld [vmem:[%s15268_s6 + $0x1808] sm:$0xff]  ;;  %v10428_v59 = vcombine.low %v2757_v50, %v2761_v17  ;;  %v2642_v32 = vld [vmem:[%s15268_s6 + $0x18b0] sm:$0xff] }
 0x3b8   : > { %8617 = vmatpush1.bf16.msra.mxu0 %v10332_v56  ;;  %v2625_v29 = vld [vmem:[%s15268_s6 + $0x1828] sm:$0xff] }
 0x3b9   : > { %8658 = vmatpush1.bf16.msra.mxu1 %v10460_v46  ;;  %8618 = vmatprep.subr.bf16.mxu0 %v10325_v48  ;;  %v2753_v61 = vld [vmem:[%s15268_s6 + $0x1c28] sm:$0xff]  ;;  %v10293_v62 = vcombine.high %v2621_v27, %v2625_v29  ;;  %v10292_v37 = vcombine.low %v2621_v27, %v2625_v29 }
 0x3ba   : > { %8659 = vmatprep.subr.bf16.mxu1 %v10453_v38  ;;  %v10421_v33 = vcombine.high %v2749_v60, %v2753_v61  ;;  %v2741_v56 = vld [vmem:[%s15268_s6 + $0x1bc8] sm:$0xff]  ;;  %v10420_v38 = vcombine.low %v2749_v60, %v2753_v61 }
 0x3bb   : > { %v2745_v34 = vld [vmem:[%s15268_s6 + $0x1be8] sm:$0xff] }
 0x3bc   : > { %8619 = vmatpush1.bf16.msra.mxu0 %v10324_v11  ;;  %v2869_v46 = vld [vmem:[%s15268_s6 + $0x1fc8] sm:$0xff]  ;;  %v10413_v40 = vcombine.high %v2741_v56, %v2745_v34 }
 0x3bd   : > { %8660 = vmatpush1.bf16.msra.mxu1 %v10452_v44  ;;  %8620 = vmatprep.subr.bf16.mxu0 %v10317_v22  ;;  %v2873_v48 = vld [vmem:[%s15268_s6 + $0x1fe8] sm:$0xff]  ;;  %v10412_v22 = vcombine.low %v2741_v56, %v2745_v34 }
 0x3be   : > { %8661 = vmatprep.subr.bf16.mxu1 %v10445_v45  ;;  %v10541_v41 = vcombine.high %v2869_v46, %v2873_v48  ;;  %v2733_v42 = vld [vmem:[%s15268_s6 + $0x1b88] sm:$0xff]  ;;  %v10540_v45 = vcombine.low %v2869_v46, %v2873_v48 }
 0x3bf   : > { %v2737_v43 = vld [vmem:[%s15268_s6 + $0x1ba8] sm:$0xff] }
 0x3c0   : > { %8621 = vmatpush1.bf16.msra.mxu0 %v10316_v4  ;;  %v2861_v11 = vld [vmem:[%s15268_s6 + $0x1f88] sm:$0xff]  ;;  %v10405_v23 = vcombine.high %v2733_v42, %v2737_v43 }
 0x3c1   : > { %8662 = vmatpush1.bf16.msra.mxu1 %v10444_v6  ;;  %8622 = vmatprep.subr.bf16.mxu0 %v10309_v8  ;;  %v2865_v44 = vld [vmem:[%s15268_s6 + $0x1fa8] sm:$0xff]  ;;  %v10404_v8 = vcombine.low %v2733_v42, %v2737_v43 }
 0x3c2   : > { %8663 = vmatprep.subr.bf16.mxu1 %v10437_v9  ;;  %v10533_v24 = vcombine.high %v2861_v11, %v2865_v44  ;;  %v2725_v3 = vld [vmem:[%s15268_s6 + $0x1b48] sm:$0xff]  ;;  %v10532_v9 = vcombine.low %v2861_v11, %v2865_v44 }
 0x3c3   : > { %v2729_v36 = vld [vmem:[%s15268_s6 + $0x1b68] sm:$0xff] }
 0x3c4   : > { %8623 = vmatpush1.bf16.msra.mxu0 %v10308_v51  ;;  %v2853_v4 = vld [vmem:[%s15268_s6 + $0x1f48] sm:$0xff]  ;;  %v10397_v1 = vcombine.high %v2725_v3, %v2729_v36 }
 0x3c5   : > { %8664 = vmatpush1.bf16.msra.mxu1 %v10436_v14  ;;  %8624 = vmatprep.subr.bf16.mxu0 %v10301_v39  ;;  %v2857_v6 = vld [vmem:[%s15268_s6 + $0x1f68] sm:$0xff]  ;;  %v10396_v39 = vcombine.low %v2725_v3, %v2729_v36 }
 0x3c6   : > { %8665 = vmatprep.subr.bf16.mxu1 %v10429_v26  ;;  %v10525_v15 = vcombine.high %v2853_v4, %v2857_v6  ;;  %v2717_v50 = vld [vmem:[%s15268_s6 + $0x1b08] sm:$0xff]  ;;  %v10524_v26 = vcombine.low %v2853_v4, %v2857_v6 }
 0x3c7   : > { %v2721_v17 = vld [vmem:[%s15268_s6 + $0x1b28] sm:$0xff] }
 0x3c8   : > { %8625 = vmatpush1.bf16.msra.mxu0 %v10300_v18  ;;  %v2845_v51 = vld [vmem:[%s15268_s6 + $0x1f08] sm:$0xff]  ;;  %v10389_v27 = vcombine.high %v2717_v50, %v2721_v17 }
 0x3c9   : > { %8666 = vmatpush1.bf16.msra.mxu1 %v10428_v59  ;;  %8626 = vmatprep.subr.bf16.mxu0 %v10293_v62  ;;  %v2849_v14 = vld [vmem:[%s15268_s6 + $0x1f28] sm:$0xff]  ;;  %v10388_v62 = vcombine.low %v2717_v50, %v2721_v17 }
 0x3ca   : > { %8667 = vmatprep.subr.bf16.mxu1 %v10421_v33  ;;  %v10517_v29 = vcombine.high %v2845_v51, %v2849_v14  ;;  %v2709_v60 = vld [vmem:[%s15268_s6 + $0x1ac8] sm:$0xff]  ;;  %v10516_v33 = vcombine.low %v2845_v51, %v2849_v14  ;;  %v1910_v51 = vld [vmem:[%s15268_s6 + $0x1d0] sm:$0xff] }
 0x3cb   : > { %v2713_v61 = vld [vmem:[%s15268_s6 + $0x1ae8] sm:$0xff]  ;;  %v1914_v14 = vld [vmem:[%s15268_s6 + $0x1f0] sm:$0xff] }
 0x3cc   : > { %8627 = vmatpush1.bf16.msra.mxu0 %v10292_v37  ;;  %v2837_v18 = vld [vmem:[%s15268_s6 + $0x1ec8] sm:$0xff]  ;;  %v10381_v56 = vcombine.high %v2709_v60, %v2713_v61 }
 0x3cd   : > { %8668 = vmatpush1.bf16.msra.mxu1 %v10420_v38  ;;  %8628 = vmatprep.subr.bf16.mxu0 %v10413_v40  ;;  %v2841_v59 = vld [vmem:[%s15268_s6 + $0x1ee8] sm:$0xff]  ;;  %v10380_v40 = vcombine.low %v2709_v60, %v2713_v61  ;;  %v9583_v60 = vcombine.high %v1910_v51, %v1914_v14 }
 0x3ce   : > { %8669 = vmatprep.subr.bf16.mxu1 %v10541_v41  ;;  %v10509_v34 = vcombine.high %v2837_v18, %v2841_v59  ;;  %v2701_v46 = vld [vmem:[%s15268_s6 + $0x1a88] sm:$0xff]  ;;  %v10508_v41 = vcombine.low %v2837_v18, %v2841_v59  ;;  %v1902_v18 = vld [vmem:[%s15268_s6 + $0x190] sm:$0xff] }
 0x3cf   : > { %v2705_v48 = vld [vmem:[%s15268_s6 + $0x1aa8] sm:$0xff]  ;;  %v1906_v59 = vld [vmem:[%s15268_s6 + $0x1b0] sm:$0xff] }
 0x3d0   : > { %8629 = vmatpush2.bf16.msra.mxu0 %v10412_v22  ;;  %v2829_v37 = vld [vmem:[%s15268_s6 + $0x1e88] sm:$0xff]  ;;  %v10373_v42 = vcombine.high %v2701_v46, %v2705_v48 }
 0x3d1   : > { %8670 = vmatpush2.bf16.msra.mxu1 %v10540_v45  ;;  %8630 = vmatprep.subr.bf16.mxu0 %v10405_v23  ;;  %v2833_v38 = vld [vmem:[%s15268_s6 + $0x1ea8] sm:$0xff]  ;;  %v10372_v23 = vcombine.low %v2701_v46, %v2705_v48  ;;  %v2034_v46 = vld [vmem:[%s15268_s6 + $0x5b0] sm:$0xff] }
 0x3d2   : > { %8671 = vmatprep.subr.bf16.mxu1 %v10533_v24  ;;  %v10501_v43 = vcombine.high %v2829_v37, %v2833_v38  ;;  %v2693_v11 = vld [vmem:[%s15268_s6 + $0x1a48] sm:$0xff]  ;;  %v10500_v24 = vcombine.low %v2829_v37, %v2833_v38  ;;  %v9575_v38 = vcombine.high %v1902_v18, %v1906_v59 }
 0x3d3   : > { %v2697_v44 = vld [vmem:[%s15268_s6 + $0x1a68] sm:$0xff] }
 0x3d4   : > { %8631 = vmatpush2.bf16.msra.mxu0 %v10404_v8  ;;  %v2821_v22 = vld [vmem:[%s15268_s6 + $0x1e48] sm:$0xff]  ;;  %v10365_v3 = vcombine.high %v2693_v11, %v2697_v44 }
 0x3d5   : > { %8672 = vmatpush2.bf16.msra.mxu1 %v10532_v9  ;;  %8632 = vmatprep.subr.bf16.mxu0 %v10397_v1  ;;  %v2825_v45 = vld [vmem:[%s15268_s6 + $0x1e68] sm:$0xff]  ;;  %v10364_v1 = vcombine.low %v2693_v11, %v2697_v44 }
 0x3d6   : > { %8673 = vmatprep.subr.bf16.mxu1 %v10525_v15  ;;  %v10493_v36 = vcombine.high %v2821_v22, %v2825_v45  ;;  %v2685_v4 = vld [vmem:[%s15268_s6 + $0x1a08] sm:$0xff]  ;;  %v10492_v15 = vcombine.low %v2821_v22, %v2825_v45  ;;  %v9574_v22 = vcombine.low %v1902_v18, %v1906_v59  ;;  %v1882_v18 = vld [vmem:[%s15268_s6 + $0xf0] sm:$0xff] }
 0x3d7   : > { %v2689_v6 = vld [vmem:[%s15268_s6 + $0x1a28] sm:$0xff]  ;;  %v2006_v59 = vld [vmem:[%s15268_s6 + $0x4d0] sm:$0xff] }
 0x3d8   : > { %8633 = vmatpush2.bf16.msra.mxu0 %v10396_v39  ;;  %v2813_v8 = vld [vmem:[%s15268_s6 + $0x1e08] sm:$0xff]  ;;  %v10357_v50 = vcombine.high %v2685_v4, %v2689_v6  ;;  %v2038_v39 = vld [vmem:[%s15268_s6 + $0x5d0] sm:$0xff] }
 0x3d9   : > { %8674 = vmatpush2.bf16.msra.mxu1 %v10524_v26  ;;  %8634 = vmatprep.subr.bf16.mxu0 %v10389_v27  ;;  %v2817_v9 = vld [vmem:[%s15268_s6 + $0x1e28] sm:$0xff]  ;;  %v2042_v26 = vld [vmem:[%s15268_s6 + $0x5f0] sm:$0xff]  ;;  %v10356_v27 = vcombine.low %v2685_v4, %v2689_v6 }
 0x3da   : > { %8675 = vmatprep.subr.bf16.mxu1 %v10517_v29  ;;  %v10485_v17 = vcombine.high %v2813_v8, %v2817_v9  ;;  %v10484_v29 = vcombine.low %v2813_v8, %v2817_v9  ;;  %v9711_v61 = vcombine.high %v2038_v39, %v2042_v26  ;;  %v9710_v48 = vcombine.low %v2038_v39, %v2042_v26  ;;  %v1886_v8 = vld [vmem:[%s15268_s6 + $0x110] sm:$0xff] }
 0x3db   : > { %v1890_v9 = vld [vmem:[%s15268_s6 + $0x130] sm:$0xff] }
 0x3dc   : > { %8635 = vmatpush2.bf16.msra.mxu0 %v10388_v62  ;;  %v10838_v62 = vld [vmem:[%s12796_s10] sm:$0xff] }
 0x3dd   : > { %8676 = vmatpush2.bf16.msra.mxu1 %v10516_v33  ;;  %8636 = vmatprep.subr.bf16.mxu0 %v10381_v56  ;;  %v8009_v33 = vrot.slane %v10838_v62, %v11112_v2  ;;  %v9582_v56 = vcombine.low %v1910_v51, %v1914_v14  ;;  %v8013_v37 = vrot.slane %v10838_v62, %v11103_v63  ;;  %v1894_v2 = vld [vmem:[%s15268_s6 + $0x150] sm:$0xff] }
 0x3de   : > { %8677 = vmatprep.subr.bf16.mxu1 %v10509_v34  ;;  %v2030_v34 = vld [vmem:[%s15268_s6 + $0x590] sm:$0xff] }
 0x3df   : > { %v2026_v63 = vld [vmem:[%s15268_s6 + $0x570] sm:$0xff] }
 0x3e0   : > { %8637 = vmatpush2.bf16.msra.mxu0 %v10380_v40  ;;  %v1898_v40 = vld [vmem:[%s15268_s6 + $0x170] sm:$0xff] }
 0x3e1   : > { %8678 = vmatpush2.bf16.msra.mxu1 %v10508_v41  ;;  %8638 = vmatprep.subr.bf16.mxu0 %v10373_v42  ;;  %v9703_v42 = vcombine.high %v2030_v34, %v2034_v46  ;;  %v9566_v14 = vcombine.low %v1894_v2, %v1898_v40  ;;  %v2010_v62 = vld [vmem:[%s15268_s6 + $0x4f0] sm:$0xff] }
 0x3e2   : > { %8679 = vmatprep.subr.bf16.mxu1 %v10501_v43  ;;  %v2022_v43 = vld [vmem:[%s15268_s6 + $0x550] sm:$0xff] }
 0x3e3   : > { %v9695_v6 = vcombine.high %v2022_v43, %v2026_v63  ;;  %v9694_v26 = vcombine.low %v2022_v43, %v2026_v63  ;;  %v1862_v63 = vld [vmem:[%s15268_s6 + $0x50] sm:$0xff] }
 0x3e4   : > { %8639 = vmatpush2.bf16.msra.mxu0 %v10372_v23  ;;  %v9702_v23 = vcombine.low %v2030_v34, %v2034_v46  ;;  %v9679_v46 = vcombine.high %v2006_v59, %v2010_v62 }
 0x3e5   : > { %8680 = vmatpush2.bf16.msra.mxu1 %v10500_v24  ;;  %8640 = vmatprep.subr.bf16.mxu0 %v10365_v3  ;;  %v9567_v24 = vcombine.high %v1894_v2, %v1898_v40  ;;  %v2002_v2 = vld [vmem:[%s15268_s6 + $0x4b0] sm:$0xff] }
 0x3e6   : > { %8681 = vmatprep.subr.bf16.mxu1 %v10493_v36 }
 0x3e8   : > { %8641 = vmatpush2.bf16.msra.mxu0 %v10364_v1 }
 0x3e9   : > { %8682 = vmatpush2.bf16.msra.mxu1 %v10492_v15  ;;  %8642 = vmatprep.subr.bf16.mxu0 %v10357_v50  ;;  %v2014_v15 = vld [vmem:[%s15268_s6 + $0x510] sm:$0xff] }
 0x3ea   : > { %8683 = vmatprep.subr.bf16.mxu1 %v10485_v17  ;;  %v2018_v50 = vld [vmem:[%s15268_s6 + $0x530] sm:$0xff] }
 0x3ec   : > { %8643 = vmatpush2.bf16.msra.mxu0 %v10356_v27  ;;  %v9559_v27 = vcombine.high %v1886_v8, %v1890_v9 }
 0x3ed   : > { %8684 = vmatpush2.bf16.msra.mxu1 %v10484_v29  ;;  %8694 = vmatprep.subr.bf16.mxu0 %v9583_v60  ;;  %v9687_v60 = vcombine.high %v2014_v15, %v2018_v50 }
 0x3ee   : > { %8735 = vmatprep.subr.bf16.mxu1 %v9711_v61  ;;  %v1878_v61 = vld [vmem:[%s15268_s6 + $0xd0] sm:$0xff] }
 0x3ef   : > { %v8400_v41 = vpop.f32.mrf.mxu0  ;;  %8645 = vmatmul.mubr.bf16.vlgmr.msra.gmra.mxu0 %v12820_v21  ;;  %v9551_v34 = vcombine.high %v1878_v61, %v1882_v18  ;;  %v9550_v40 = vcombine.low %v1878_v61, %v1882_v18 }
 0x3f0   : > { %v8401_v11 = vadd.f32 %v8400_v41, %v8009_v33  ;;  %v8441_v44 = vpop.f32.mrf.mxu1  ;;  %8686 = vmatmul.mubr.bf16.vlgmr.msra.gmra.mxu1 %v12822_v12  ;;  %8695 = vmatpush1.bf16.msra.mxu0 %v9582_v56  ;;  %v9558_v33 = vcombine.low %v1886_v8, %v1890_v9  ;;  %v9686_v56 = vcombine.low %v2014_v15, %v2018_v50  ;;  %v1982_v8 = vld [vmem:[%s15268_s6 + $0x410] sm:$0xff] }
 0x3f1   : > { %8726 = vmatprep.mubr.bf16.mxu0 %v12131_v52  ;;  %8736 = vmatpush1.bf16.msra.mxu1 %v9710_v48  ;;  %v8402_v45 = vpop.f32.mrf.mxu0  ;;  %v1870_v48 = vld [vmem:[%s15268_s6 + $0x90] sm:$0xff]  ;;  %v9678_v41 = vcombine.low %v2006_v59, %v2010_v62 }
 0x3f2   : > { %v13651_v3 = vadd.f32 %v8441_v44, %v8401_v11  ;;  %8767 = vmatprep.mubr.bf16.mxu1 %v12133_v53  ;;  %v8403_v36 = vadd.f32 %v8402_v45, %v8013_v37  ;;  %v8443_v4 = vpop.f32.mrf.mxu1  ;;  %8696 = vmatprep.subr.bf16.mxu0 %v9575_v38  ;;  %v1874_v37 = vld [vmem:[%s15268_s6 + $0xb0] sm:$0xff] }
 0x3f3   : > { %v8404_v1 = vpop.f32.mrf.mxu0  ;;  %8737 = vmatprep.subr.bf16.mxu1 %v9703_v42  ;;  %v1998_v38 = vld [vmem:[%s15268_s6 + $0x490] sm:$0xff]  ;;  %v9543_v42 = vcombine.high %v1870_v48, %v1874_v37  ;;  %v9542_v45 = vcombine.low %v1870_v48, %v1874_v37 }
 0x3f4   : > { %v13666_v17 = vadd.f32 %v8443_v4, %v8403_v36  ;;  %v8445_v51 = vpop.f32.mrf.mxu1  ;;  %8697 = vmatpush1.bf16.msra.mxu0 %v9574_v22  ;;  %v9671_v43 = vcombine.high %v1998_v38, %v2002_v2  ;;  %v1866_v11 = vld [vmem:[%s15268_s6 + $0x70] sm:$0xff] }
 0x3f5   : > { %8738 = vmatpush1.bf16.msra.mxu1 %v9702_v23  ;;  %v8405_v39 = vpop.f32.mrf.mxu0  ;;  %8698 = vmatprep.subr.bf16.mxu0 %v9567_v24  ;;  %v1990_v44 = vld [vmem:[%s15268_s6 + $0x450] sm:$0xff]  ;;  %v9670_v23 = vcombine.low %v1998_v38, %v2002_v2  ;;  %v9535_v24 = vcombine.high %v1862_v63, %v1866_v11  ;;  %v9534_v1 = vcombine.low %v1862_v63, %v1866_v11 }
 0x3f6   : > { %v8446_v29 = vpop.f32.mrf.mxu1  ;;  %8739 = vmatprep.subr.bf16.mxu1 %v9695_v6  ;;  %v1994_v22 = vld [vmem:[%s15268_s6 + $0x470] sm:$0xff] }
 0x3f7   : > { %v9663_v36 = vcombine.high %v1990_v44, %v1994_v22  ;;  %v1854_v4 = vld [vmem:[%s15268_s6 + $0x10] sm:$0xff]  ;;  %v9662_v15 = vcombine.low %v1990_v44, %v1994_v22 }
 0x3f8   : > { %8699 = vmatpush1.bf16.msra.mxu0 %v9566_v14  ;;  %v1858_v6 = vld [vmem:[%s15268_s6 + $0x30] sm:$0xff] }
 0x3f9   : > { %8740 = vmatpush1.bf16.msra.mxu1 %v9694_v26  ;;  %8700 = vmatprep.subr.bf16.mxu0 %v9559_v27  ;;  %v1986_v9 = vld [vmem:[%s15268_s6 + $0x430] sm:$0xff]  ;;  %v9527_v50 = vcombine.high %v1854_v4, %v1858_v6  ;;  %v9526_v29 = vcombine.low %v1854_v4, %v1858_v6 }
 0x3fa   : > { %8741 = vmatprep.subr.bf16.mxu1 %v9687_v60  ;;  %v9655_v51 = vcombine.high %v1982_v8, %v1986_v9  ;;  %v1974_v14 = vld [vmem:[%s15268_s6 + $0x3d0] sm:$0xff]  ;;  %v9654_v60 = vcombine.low %v1982_v8, %v1986_v9 }
 0x3fb   : > { %v1978_v39 = vld [vmem:[%s15268_s6 + $0x3f0] sm:$0xff] }
 0x3fc   : > { %8701 = vmatpush1.bf16.msra.mxu0 %v9558_v33  ;;  %v2102_v26 = vld [vmem:[%s15268_s6 + $0x7d0] sm:$0xff]  ;;  %v9647_v61 = vcombine.high %v1974_v14, %v1978_v39 }
 0x3fd   : > { %8742 = vmatpush1.bf16.msra.mxu1 %v9686_v56  ;;  %8702 = vmatprep.subr.bf16.mxu0 %v9551_v34  ;;  %v2106_v27 = vld [vmem:[%s15268_s6 + $0x7f0] sm:$0xff]  ;;  %v9646_v34 = vcombine.low %v1974_v14, %v1978_v39 }
 0x3fe   : > { %8743 = vmatprep.subr.bf16.mxu1 %v9679_v46  ;;  %v9775_v18 = vcombine.high %v2102_v26, %v2106_v27  ;;  %v1966_v59 = vld [vmem:[%s15268_s6 + $0x390] sm:$0xff]  ;;  %v9774_v46 = vcombine.low %v2102_v26, %v2106_v27 }
 0x3ff   : > { %v1970_v62 = vld [vmem:[%s15268_s6 + $0x3b0] sm:$0xff] }
 0x400   : > { %8703 = vmatpush1.bf16.msra.mxu0 %v9550_v40  ;;  %v2094_v33 = vld [vmem:[%s15268_s6 + $0x790] sm:$0xff]  ;;  %v9639_v48 = vcombine.high %v1966_v59, %v1970_v62 }
 0x401   : > { %8744 = vmatpush1.bf16.msra.mxu1 %v9678_v41  ;;  %8704 = vmatprep.subr.bf16.mxu0 %v9543_v42  ;;  %v2098_v56 = vld [vmem:[%s15268_s6 + $0x7b0] sm:$0xff]  ;;  %v9638_v42 = vcombine.low %v1966_v59, %v1970_v62 }
 0x402   : > { %8745 = vmatprep.subr.bf16.mxu1 %v9671_v43  ;;  %v9767_v37 = vcombine.high %v2094_v33, %v2098_v56  ;;  %v1958_v38 = vld [vmem:[%s15268_s6 + $0x350] sm:$0xff]  ;;  %v9766_v43 = vcombine.low %v2094_v33, %v2098_v56 }
 0x403   : > { %v1962_v2 = vld [vmem:[%s15268_s6 + $0x370] sm:$0xff] }
 0x404   : > { %8705 = vmatpush1.bf16.msra.mxu0 %v9542_v45  ;;  %v2086_v40 = vld [vmem:[%s15268_s6 + $0x750] sm:$0xff]  ;;  %v9631_v63 = vcombine.high %v1958_v38, %v1962_v2 }
 0x405   : > { %8746 = vmatpush1.bf16.msra.mxu1 %v9670_v23  ;;  %8706 = vmatprep.subr.bf16.mxu0 %v9535_v24  ;;  %v2090_v41 = vld [vmem:[%s15268_s6 + $0x770] sm:$0xff]  ;;  %v9630_v24 = vcombine.low %v1958_v38, %v1962_v2 }
 0x406   : > { %8747 = vmatprep.subr.bf16.mxu1 %v9663_v36  ;;  %v9759_v11 = vcombine.high %v2086_v40, %v2090_v41  ;;  %v1950_v44 = vld [vmem:[%s15268_s6 + $0x310] sm:$0xff]  ;;  %v9758_v36 = vcombine.low %v2086_v40, %v2090_v41 }
 0x407   : > { %v1954_v22 = vld [vmem:[%s15268_s6 + $0x330] sm:$0xff] }
 0x408   : > { %8707 = vmatpush1.bf16.msra.mxu0 %v9534_v1  ;;  %v2078_v45 = vld [vmem:[%s15268_s6 + $0x710] sm:$0xff]  ;;  %v9623_v4 = vcombine.high %v1950_v44, %v1954_v22 }
 0x409   : > { %8748 = vmatpush1.bf16.msra.mxu1 %v9662_v15  ;;  %8708 = vmatprep.subr.bf16.mxu0 %v9527_v50  ;;  %v2082_v23 = vld [vmem:[%s15268_s6 + $0x730] sm:$0xff]  ;;  %v9622_v50 = vcombine.low %v1950_v44, %v1954_v22 }
 0x40a   : > { %8749 = vmatprep.subr.bf16.mxu1 %v9655_v51  ;;  %v9751_v6 = vcombine.high %v2078_v45, %v2082_v23  ;;  %v1942_v8 = vld [vmem:[%s15268_s6 + $0x2d0] sm:$0xff]  ;;  %v9750_v51 = vcombine.low %v2078_v45, %v2082_v23 }
 0x40b   : > { %v1946_v9 = vld [vmem:[%s15268_s6 + $0x2f0] sm:$0xff] }
 0x40c   : > { %8709 = vmatpush1.bf16.msra.mxu0 %v9526_v29  ;;  %v2070_v1 = vld [vmem:[%s15268_s6 + $0x6d0] sm:$0xff]  ;;  %v9615_v14 = vcombine.high %v1942_v8, %v1946_v9 }
 0x40d   : > { %8750 = vmatpush1.bf16.msra.mxu1 %v9654_v60  ;;  %8710 = vmatprep.subr.bf16.mxu0 %v9647_v61  ;;  %v2074_v15 = vld [vmem:[%s15268_s6 + $0x6f0] sm:$0xff]  ;;  %v9614_v61 = vcombine.low %v1942_v8, %v1946_v9 }
 0x40e   : > { %8751 = vmatprep.subr.bf16.mxu1 %v9775_v18  ;;  %v9743_v39 = vcombine.high %v2070_v1, %v2074_v15  ;;  %v1934_v26 = vld [vmem:[%s15268_s6 + $0x290] sm:$0xff]  ;;  %v9742_v18 = vcombine.low %v2070_v1, %v2074_v15 }
 0x40f   : > { %v1938_v27 = vld [vmem:[%s15268_s6 + $0x2b0] sm:$0xff] }
 0x410   : > { %8711 = vmatpush2.bf16.msra.mxu0 %v9646_v34  ;;  %v2062_v29 = vld [vmem:[%s15268_s6 + $0x690] sm:$0xff]  ;;  %v9607_v59 = vcombine.high %v1934_v26, %v1938_v27 }
 0x411   : > { %8752 = vmatpush2.bf16.msra.mxu1 %v9774_v46  ;;  %8712 = vmatprep.subr.bf16.mxu0 %v9639_v48  ;;  %v2066_v60 = vld [vmem:[%s15268_s6 + $0x6b0] sm:$0xff]  ;;  %v9606_v48 = vcombine.low %v1934_v26, %v1938_v27 }
 0x412   : > { %8753 = vmatprep.subr.bf16.mxu1 %v9767_v37  ;;  %v9735_v62 = vcombine.high %v2062_v29, %v2066_v60  ;;  %v1926_v33 = vld [vmem:[%s15268_s6 + $0x250] sm:$0xff]  ;;  %v9734_v37 = vcombine.low %v2062_v29, %v2066_v60 }
 0x413   : > { %v1930_v56 = vld [vmem:[%s15268_s6 + $0x270] sm:$0xff] }
 0x414   : > { %8713 = vmatpush2.bf16.msra.mxu0 %v9638_v42  ;;  %v2054_v34 = vld [vmem:[%s15268_s6 + $0x650] sm:$0xff]  ;;  %v9599_v38 = vcombine.high %v1926_v33, %v1930_v56 }
 0x415   : > { %8754 = vmatpush2.bf16.msra.mxu1 %v9766_v43  ;;  %8714 = vmatprep.subr.bf16.mxu0 %v9631_v63  ;;  %v2058_v46 = vld [vmem:[%s15268_s6 + $0x670] sm:$0xff]  ;;  %v9598_v63 = vcombine.low %v1926_v33, %v1930_v56 }
 0x416   : > { %8755 = vmatprep.subr.bf16.mxu1 %v9759_v11  ;;  %v9727_v2 = vcombine.high %v2054_v34, %v2058_v46  ;;  %v1918_v40 = vld [vmem:[%s15268_s6 + $0x210] sm:$0xff]  ;;  %v9726_v11 = vcombine.low %v2054_v34, %v2058_v46 }
 0x417   : > { %v1922_v41 = vld [vmem:[%s15268_s6 + $0x230] sm:$0xff] }
 0x418   : > { %8715 = vmatpush2.bf16.msra.mxu0 %v9630_v24  ;;  %v2046_v42 = vld [vmem:[%s15268_s6 + $0x610] sm:$0xff]  ;;  %v9591_v44 = vcombine.high %v1918_v40, %v1922_v41 }
 0x419   : > { %8756 = vmatpush2.bf16.msra.mxu1 %v9758_v36  ;;  %8716 = vmatprep.subr.bf16.mxu0 %v9623_v4  ;;  %v2050_v43 = vld [vmem:[%s15268_s6 + $0x630] sm:$0xff]  ;;  %v9590_v4 = vcombine.low %v1918_v40, %v1922_v41 }
 0x41a   : > { %8757 = vmatprep.subr.bf16.mxu1 %v9751_v6  ;;  %v9719_v22 = vcombine.high %v2046_v42, %v2050_v43  ;;  %v2166_v45 = vld [vmem:[%s15268_s6 + $0x9d0] sm:$0xff]  ;;  %v9718_v6 = vcombine.low %v2046_v42, %v2050_v43 }
 0x41b   : > { %v2170_v23 = vld [vmem:[%s15268_s6 + $0x9f0] sm:$0xff] }
 0x41c   : > { %8717 = vmatpush2.bf16.msra.mxu0 %v9622_v50  ;;  %v2294_v24 = vld [vmem:[%s15268_s6 + $0xdd0] sm:$0xff]  ;;  %v9839_v8 = vcombine.high %v2166_v45, %v2170_v23  ;;  %v9838_v50 = vcombine.low %v2166_v45, %v2170_v23 }
 0x41d   : > { %8758 = vmatpush2.bf16.msra.mxu1 %v9750_v51  ;;  %8718 = vmatprep.subr.bf16.mxu0 %v9615_v14  ;;  %v2298_v36 = vld [vmem:[%s15268_s6 + $0xdf0] sm:$0xff] }
 0x41e   : > { %8759 = vmatprep.subr.bf16.mxu1 %v9743_v39  ;;  %v9967_v9 = vcombine.high %v2294_v24, %v2298_v36  ;;  %v2158_v1 = vld [vmem:[%s15268_s6 + $0x990] sm:$0xff]  ;;  %v9966_v39 = vcombine.low %v2294_v24, %v2298_v36 }
 0x41f   : > { %v2162_v15 = vld [vmem:[%s15268_s6 + $0x9b0] sm:$0xff] }
 0x420   : > { %8719 = vmatpush2.bf16.msra.mxu0 %v9614_v61  ;;  %v2286_v51 = vld [vmem:[%s15268_s6 + $0xd90] sm:$0xff]  ;;  %v9831_v26 = vcombine.high %v2158_v1, %v2162_v15  ;;  %v9830_v56 = vcombine.low %v2158_v1, %v2162_v15 }
 0x421   : > { %8760 = vmatpush2.bf16.msra.mxu1 %v9742_v18  ;;  %8720 = vmatprep.subr.bf16.mxu0 %v9607_v59  ;;  %v2290_v14 = vld [vmem:[%s15268_s6 + $0xdb0] sm:$0xff] }
 0x422   : > { %8761 = vmatprep.subr.bf16.mxu1 %v9735_v62  ;;  %v2150_v27 = vld [vmem:[%s15268_s6 + $0x950] sm:$0xff]  ;;  %v9959_v61 = vcombine.high %v2286_v51, %v2290_v14  ;;  %v9958_v46 = vcombine.low %v2286_v51, %v2290_v14 }
 0x423   : > { %v2154_v29 = vld [vmem:[%s15268_s6 + $0x970] sm:$0xff] }
 0x424   : > { %8721 = vmatpush2.bf16.msra.mxu0 %v9606_v48  ;;  %v2278_v18 = vld [vmem:[%s15268_s6 + $0xd50] sm:$0xff]  ;;  %v9823_v48 = vcombine.high %v2150_v27, %v2154_v29 }
 0x425   : > { %8762 = vmatpush2.bf16.msra.mxu1 %v9734_v37  ;;  %8722 = vmatprep.subr.bf16.mxu0 %v9599_v38  ;;  %v2282_v59 = vld [vmem:[%s15268_s6 + $0xd70] sm:$0xff] }
 0x426   : > { %8763 = vmatprep.subr.bf16.mxu1 %v9727_v2  ;;  %v2142_v40 = vld [vmem:[%s15268_s6 + $0x910] sm:$0xff]  ;;  %v9950_v45 = vcombine.low %v2278_v18, %v2282_v59 }
 0x427   : > { %v2146_v41 = vld [vmem:[%s15268_s6 + $0x930] sm:$0xff] }
 0x428   : > { %8723 = vmatpush2.bf16.msra.mxu0 %v9598_v63  ;;  %v2270_v43 = vld [vmem:[%s15268_s6 + $0xd10] sm:$0xff]  ;;  %v9815_v23 = vcombine.high %v2142_v40, %v2146_v41  ;;  %v9814_v1 = vcombine.low %v2142_v40, %v2146_v41 }
 0x429   : > { %8764 = vmatpush2.bf16.msra.mxu1 %v9726_v11  ;;  %8724 = vmatprep.subr.bf16.mxu0 %v9591_v44  ;;  %v9822_v44 = vcombine.low %v2150_v27, %v2154_v29  ;;  %v2126_v14 = vld [vmem:[%s15268_s6 + $0x890] sm:$0xff] }
 0x42a   : > { %8765 = vmatprep.subr.bf16.mxu1 %v9719_v22  ;;  %v2258_v27 = vld [vmem:[%s15268_s6 + $0xcb0] sm:$0xff] }
 0x42b   : > { %v2238_v40 = vld [vmem:[%s15268_s6 + $0xc10] sm:$0xff] }
 0x42c   : > { %8725 = vmatpush2.bf16.msra.mxu0 %v9590_v4  ;;  %v2134_v4 = vld [vmem:[%s15268_s6 + $0x8d0] sm:$0xff] }
 0x42d   : > { %8766 = vmatpush2.bf16.msra.mxu1 %v9718_v6  ;;  %8776 = vmatprep.subr.bf16.mxu0 %v9839_v8  ;;  %v2138_v6 = vld [vmem:[%s15268_s6 + $0x8f0] sm:$0xff] }
 0x42e   : > { %8817 = vmatprep.subr.bf16.mxu1 %v9967_v9  ;;  %v2262_v8 = vld [vmem:[%s15268_s6 + $0xcd0] sm:$0xff]  ;;  %v9806_v29 = vcombine.low %v2134_v4, %v2138_v6 }
 0x42f   : > { %v8482_v60 = vpop.f32.mrf.mxu0  ;;  %8727 = vmatmul.mubr.bf16.vlgmr.msra.gmra.mxu0 %v12135_v54  ;;  %v2266_v9 = vld [vmem:[%s15268_s6 + $0xcf0] sm:$0xff] }
 0x430   : > { %v8483_v62 = vadd.f32 %v8482_v60, %v13651_v3  ;;  %v8523_v33 = vpop.f32.mrf.mxu1  ;;  %8768 = vmatmul.mubr.bf16.vlgmr.msra.gmra.mxu1 %v12137_v55  ;;  %8777 = vmatpush1.bf16.msra.mxu0 %v9838_v50  ;;  %v9951_v3 = vcombine.high %v2278_v18, %v2282_v59  ;;  %v9807_v50 = vcombine.high %v2134_v4, %v2138_v6  ;;  %v2118_v59 = vld [vmem:[%s15268_s6 + $0x850] sm:$0xff] }
 0x431   : > { %8808 = vmatprep.mubr.bf16.mxu0 %v12177_v58  ;;  %8818 = vmatpush1.bf16.msra.mxu1 %v9966_v39  ;;  %v8484_v34 = vpop.f32.mrf.mxu0  ;;  %v9935_v51 = vcombine.high %v2262_v8, %v2266_v9  ;;  %v2130_v39 = vld [vmem:[%s15268_s6 + $0x8b0] sm:$0xff]  ;;  %v9934_v60 = vcombine.low %v2262_v8, %v2266_v9 }
 0x432   : > { %v13852_v37 = vadd.f32 %v8523_v33, %v8483_v62  ;;  %8849 = vmatprep.mubr.bf16.mxu1 %v12179_v28  ;;  %v8485_v38 = vadd.f32 %v8484_v34, %v13666_v17  ;;  %v8525_v2 = vpop.f32.mrf.mxu1  ;;  %8778 = vmatprep.subr.bf16.mxu0 %v9831_v26  ;;  %v2274_v17 = vld [vmem:[%s15268_s6 + $0xd30] sm:$0xff]  ;;  %v9798_v34 = vcombine.low %v2126_v14, %v2130_v39 }
 0x433   : > { %v8486_v42 = vpop.f32.mrf.mxu0  ;;  %8819 = vmatprep.subr.bf16.mxu1 %v9959_v61  ;;  %v9943_v36 = vcombine.high %v2270_v43, %v2274_v17  ;;  %v9942_v15 = vcombine.low %v2270_v43, %v2274_v17  ;;  %v2254_v26 = vld [vmem:[%s15268_s6 + $0xc90] sm:$0xff]  ;;  %v9799_v61 = vcombine.high %v2126_v14, %v2130_v39 }
 0x434   : > { %v13868_v63 = vadd.f32 %v8525_v2, %v8485_v38  ;;  %v8527_v11 = vpop.f32.mrf.mxu1  ;;  %8779 = vmatpush1.bf16.msra.mxu0 %v9830_v56  ;;  %v9927_v18 = vcombine.high %v2254_v26, %v2258_v27  ;;  %v2122_v62 = vld [vmem:[%s15268_s6 + $0x870] sm:$0xff] }
 0x435   : > { %8820 = vmatpush1.bf16.msra.mxu1 %v9958_v46  ;;  %v8487_v22 = vpop.f32.mrf.mxu0  ;;  %8780 = vmatprep.subr.bf16.mxu0 %v9823_v48  ;;  %v2246_v33 = vld [vmem:[%s15268_s6 + $0xc50] sm:$0xff]  ;;  %v9926_v46 = vcombine.low %v2254_v26, %v2258_v27  ;;  %v9791_v48 = vcombine.high %v2118_v59, %v2122_v62  ;;  %v9790_v42 = vcombine.low %v2118_v59, %v2122_v62 }
 0x436   : > { %v8528_v24 = vpop.f32.mrf.mxu1  ;;  %8821 = vmatprep.subr.bf16.mxu1 %v9951_v3  ;;  %v2250_v56 = vld [vmem:[%s15268_s6 + $0xc70] sm:$0xff] }
 0x437   : > { %v9919_v38 = vcombine.high %v2246_v33, %v2250_v56  ;;  %v2110_v2 = vld [vmem:[%s15268_s6 + $0x810] sm:$0xff]  ;;  %v9918_v43 = vcombine.low %v2246_v33, %v2250_v56 }
 0x438   : > { %8781 = vmatpush1.bf16.msra.mxu0 %v9822_v44  ;;  %v2114_v3 = vld [vmem:[%s15268_s6 + $0x830] sm:$0xff] }
 0x439   : > { %8822 = vmatpush1.bf16.msra.mxu1 %v9950_v45  ;;  %8782 = vmatprep.subr.bf16.mxu0 %v9815_v23  ;;  %v2242_v41 = vld [vmem:[%s15268_s6 + $0xc30] sm:$0xff]  ;;  %v9783_v17 = vcombine.high %v2110_v2, %v2114_v3  ;;  %v9782_v24 = vcombine.low %v2110_v2, %v2114_v3 }
 0x43a   : > { %8823 = vmatprep.subr.bf16.mxu1 %v9943_v36  ;;  %v9911_v11 = vcombine.high %v2238_v40, %v2242_v41  ;;  %v2230_v44 = vld [vmem:[%s15268_s6 + $0xbd0] sm:$0xff]  ;;  %v9910_v36 = vcombine.low %v2238_v40, %v2242_v41 }
 0x43b   : > { %v2234_v22 = vld [vmem:[%s15268_s6 + $0xbf0] sm:$0xff] }
 0x43c   : > { %8783 = vmatpush1.bf16.msra.mxu0 %v9814_v1  ;;  %v2358_v45 = vld [vmem:[%s15268_s6 + $0xfd0] sm:$0xff]  ;;  %v9903_v4 = vcombine.high %v2230_v44, %v2234_v22 }
 0x43d   : > { %8824 = vmatpush1.bf16.msra.mxu1 %v9942_v15  ;;  %8784 = vmatprep.subr.bf16.mxu0 %v9807_v50  ;;  %v2362_v23 = vld [vmem:[%s15268_s6 + $0xff0] sm:$0xff]  ;;  %v9902_v50 = vcombine.low %v2230_v44, %v2234_v22 }
 0x43e   : > { %8825 = vmatprep.subr.bf16.mxu1 %v9935_v51  ;;  %v10031_v6 = vcombine.high %v2358_v45, %v2362_v23  ;;  %v2222_v8 = vld [vmem:[%s15268_s6 + $0xb90] sm:$0xff]  ;;  %v10030_v51 = vcombine.low %v2358_v45, %v2362_v23 }
 0x43f   : > { %v2226_v9 = vld [vmem:[%s15268_s6 + $0xbb0] sm:$0xff] }
 0x440   : > { %8785 = vmatpush1.bf16.msra.mxu0 %v9806_v29  ;;  %v2350_v1 = vld [vmem:[%s15268_s6 + $0xf90] sm:$0xff]  ;;  %v9895_v14 = vcombine.high %v2222_v8, %v2226_v9 }
 0x441   : > { %8826 = vmatpush1.bf16.msra.mxu1 %v9934_v60  ;;  %8786 = vmatprep.subr.bf16.mxu0 %v9799_v61  ;;  %v2354_v15 = vld [vmem:[%s15268_s6 + $0xfb0] sm:$0xff]  ;;  %v9894_v61 = vcombine.low %v2222_v8, %v2226_v9 }
 0x442   : > { %8827 = vmatprep.subr.bf16.mxu1 %v9927_v18  ;;  %v10023_v39 = vcombine.high %v2350_v1, %v2354_v15  ;;  %v2214_v26 = vld [vmem:[%s15268_s6 + $0xb50] sm:$0xff]  ;;  %v10022_v18 = vcombine.low %v2350_v1, %v2354_v15 }
 0x443   : > { %v2218_v27 = vld [vmem:[%s15268_s6 + $0xb70] sm:$0xff] }
 0x444   : > { %8787 = vmatpush1.bf16.msra.mxu0 %v9798_v34  ;;  %v2342_v29 = vld [vmem:[%s15268_s6 + $0xf50] sm:$0xff]  ;;  %v9887_v59 = vcombine.high %v2214_v26, %v2218_v27 }
 0x445   : > { %8828 = vmatpush1.bf16.msra.mxu1 %v9926_v46  ;;  %8788 = vmatprep.subr.bf16.mxu0 %v9791_v48  ;;  %v2346_v60 = vld [vmem:[%s15268_s6 + $0xf70] sm:$0xff]  ;;  %v9886_v48 = vcombine.low %v2214_v26, %v2218_v27 }
 0x446   : > { %8829 = vmatprep.subr.bf16.mxu1 %v9919_v38  ;;  %v10015_v62 = vcombine.high %v2342_v29, %v2346_v60  ;;  %v2206_v33 = vld [vmem:[%s15268_s6 + $0xb10] sm:$0xff]  ;;  %v10014_v38 = vcombine.low %v2342_v29, %v2346_v60 }
 0x447   : > { %v2210_v56 = vld [vmem:[%s15268_s6 + $0xb30] sm:$0xff] }
 0x448   : > { %8789 = vmatpush1.bf16.msra.mxu0 %v9790_v42  ;;  %v2334_v34 = vld [vmem:[%s15268_s6 + $0xf10] sm:$0xff]  ;;  %v9879_v2 = vcombine.high %v2206_v33, %v2210_v56 }
 0x449   : > { %8830 = vmatpush1.bf16.msra.mxu1 %v9918_v43  ;;  %8790 = vmatprep.subr.bf16.mxu0 %v9783_v17  ;;  %v2338_v46 = vld [vmem:[%s15268_s6 + $0xf30] sm:$0xff]  ;;  %v9878_v17 = vcombine.low %v2206_v33, %v2210_v56 }
 0x44a   : > { %8831 = vmatprep.subr.bf16.mxu1 %v9911_v11  ;;  %v10007_v3 = vcombine.high %v2334_v34, %v2338_v46  ;;  %v2198_v40 = vld [vmem:[%s15268_s6 + $0xad0] sm:$0xff]  ;;  %v10006_v11 = vcombine.low %v2334_v34, %v2338_v46 }
 0x44b   : > { %v2202_v41 = vld [vmem:[%s15268_s6 + $0xaf0] sm:$0xff] }
 0x44c   : > { %8791 = vmatpush1.bf16.msra.mxu0 %v9782_v24  ;;  %v2326_v42 = vld [vmem:[%s15268_s6 + $0xed0] sm:$0xff]  ;;  %v9871_v44 = vcombine.high %v2198_v40, %v2202_v41 }
 0x44d   : > { %8832 = vmatpush1.bf16.msra.mxu1 %v9910_v36  ;;  %8792 = vmatprep.subr.bf16.mxu0 %v9903_v4  ;;  %v2330_v43 = vld [vmem:[%s15268_s6 + $0xef0] sm:$0xff]  ;;  %v9870_v4 = vcombine.low %v2198_v40, %v2202_v41 }
 0x44e   : > { %8833 = vmatprep.subr.bf16.mxu1 %v10031_v6  ;;  %v9999_v22 = vcombine.high %v2326_v42, %v2330_v43  ;;  %v2190_v45 = vld [vmem:[%s15268_s6 + $0xa90] sm:$0xff]  ;;  %v9998_v6 = vcombine.low %v2326_v42, %v2330_v43 }
 0x44f   : > { %v2194_v23 = vld [vmem:[%s15268_s6 + $0xab0] sm:$0xff] }
 0x450   : > { %8793 = vmatpush2.bf16.msra.mxu0 %v9902_v50  ;;  %v2318_v24 = vld [vmem:[%s15268_s6 + $0xe90] sm:$0xff]  ;;  %v9863_v8 = vcombine.high %v2190_v45, %v2194_v23 }
 0x451   : > { %8834 = vmatpush2.bf16.msra.mxu1 %v10030_v51  ;;  %8794 = vmatprep.subr.bf16.mxu0 %v9895_v14  ;;  %v2322_v36 = vld [vmem:[%s15268_s6 + $0xeb0] sm:$0xff]  ;;  %v9862_v14 = vcombine.low %v2190_v45, %v2194_v23 }
 0x452   : > { %8835 = vmatprep.subr.bf16.mxu1 %v10023_v39  ;;  %v9991_v9 = vcombine.high %v2318_v24, %v2322_v36  ;;  %v2182_v1 = vld [vmem:[%s15268_s6 + $0xa50] sm:$0xff]  ;;  %v9990_v39 = vcombine.low %v2318_v24, %v2322_v36 }
 0x453   : > { %v2186_v15 = vld [vmem:[%s15268_s6 + $0xa70] sm:$0xff] }
 0x454   : > { %8795 = vmatpush2.bf16.msra.mxu0 %v9894_v61  ;;  %v2310_v50 = vld [vmem:[%s15268_s6 + $0xe50] sm:$0xff]  ;;  %v9855_v26 = vcombine.high %v2182_v1, %v2186_v15 }
 0x455   : > { %8836 = vmatpush2.bf16.msra.mxu1 %v10022_v18  ;;  %8796 = vmatprep.subr.bf16.mxu0 %v9887_v59  ;;  %v2314_v51 = vld [vmem:[%s15268_s6 + $0xe70] sm:$0xff]  ;;  %v9854_v59 = vcombine.low %v2182_v1, %v2186_v15 }
 0x456   : > { %8837 = vmatprep.subr.bf16.mxu1 %v10015_v62  ;;  %v9983_v27 = vcombine.high %v2310_v50, %v2314_v51  ;;  %v2174_v29 = vld [vmem:[%s15268_s6 + $0xa10] sm:$0xff]  ;;  %v9982_v62 = vcombine.low %v2310_v50, %v2314_v51 }
 0x457   : > { %v2178_v60 = vld [vmem:[%s15268_s6 + $0xa30] sm:$0xff] }
 0x458   : > { %8797 = vmatpush2.bf16.msra.mxu0 %v9886_v48  ;;  %v2302_v61 = vld [vmem:[%s15268_s6 + $0xe10] sm:$0xff]  ;;  %v9847_v33 = vcombine.high %v2174_v29, %v2178_v60 }
 0x459   : > { %8838 = vmatpush2.bf16.msra.mxu1 %v10014_v38  ;;  %8798 = vmatprep.subr.bf16.mxu0 %v9879_v2  ;;  %v2306_v18 = vld [vmem:[%s15268_s6 + $0xe30] sm:$0xff]  ;;  %v9846_v2 = vcombine.low %v2174_v29, %v2178_v60 }
 0x45a   : > { %8839 = vmatprep.subr.bf16.mxu1 %v10007_v3  ;;  %v9975_v56 = vcombine.high %v2302_v61, %v2306_v18  ;;  %v2422_v34 = vld [vmem:[%s15268_s6 + $0x11d0] sm:$0xff]  ;;  %v9974_v3 = vcombine.low %v2302_v61, %v2306_v18 }
 0x45b   : > { %v2426_v46 = vld [vmem:[%s15268_s6 + $0x11f0] sm:$0xff] }
 0x45c   : > { %8799 = vmatpush2.bf16.msra.mxu0 %v9878_v17  ;;  %v2550_v48 = vld [vmem:[%s15268_s6 + $0x15d0] sm:$0xff]  ;;  %v10095_v40 = vcombine.high %v2422_v34, %v2426_v46  ;;  %v10094_v17 = vcombine.low %v2422_v34, %v2426_v46 }
 0x45d   : > { %8840 = vmatpush2.bf16.msra.mxu1 %v10006_v11  ;;  %8800 = vmatprep.subr.bf16.mxu0 %v9871_v44  ;;  %v2554_v38 = vld [vmem:[%s15268_s6 + $0x15f0] sm:$0xff] }
 0x45e   : > { %8841 = vmatprep.subr.bf16.mxu1 %v9999_v22  ;;  %v10223_v41 = vcombine.high %v2550_v48, %v2554_v38  ;;  %v2414_v42 = vld [vmem:[%s15268_s6 + $0x1190] sm:$0xff]  ;;  %v10222_v22 = vcombine.low %v2550_v48, %v2554_v38 }
 0x45f   : > { %v2418_v43 = vld [vmem:[%s15268_s6 + $0x11b0] sm:$0xff] }
 0x460   : > { %8801 = vmatpush2.bf16.msra.mxu0 %v9870_v4  ;;  %v2542_v11 = vld [vmem:[%s15268_s6 + $0x1590] sm:$0xff]  ;;  %v10087_v45 = vcombine.high %v2414_v42, %v2418_v43  ;;  %v10086_v15 = vcombine.low %v2414_v42, %v2418_v43 }
 0x461   : > { %8842 = vmatpush2.bf16.msra.mxu1 %v9998_v6  ;;  %8802 = vmatprep.subr.bf16.mxu0 %v9863_v8  ;;  %v2546_v44 = vld [vmem:[%s15268_s6 + $0x15b0] sm:$0xff] }
 0x462   : > { %8843 = vmatprep.subr.bf16.mxu1 %v9991_v9  ;;  %v2406_v23 = vld [vmem:[%s15268_s6 + $0x1150] sm:$0xff]  ;;  %v10215_v4 = vcombine.high %v2542_v11, %v2546_v44  ;;  %v10214_v51 = vcombine.low %v2542_v11, %v2546_v44 }
 0x463   : > { %v2410_v24 = vld [vmem:[%s15268_s6 + $0x1170] sm:$0xff] }
 0x464   : > { %8803 = vmatpush2.bf16.msra.mxu0 %v9862_v14  ;;  %v2534_v6 = vld [vmem:[%s15268_s6 + $0x1550] sm:$0xff]  ;;  %v10079_v14 = vcombine.high %v2406_v23, %v2410_v24 }
 0x465   : > { %8844 = vmatpush2.bf16.msra.mxu1 %v9990_v39  ;;  %8804 = vmatprep.subr.bf16.mxu0 %v9855_v26  ;;  %v2538_v8 = vld [vmem:[%s15268_s6 + $0x1570] sm:$0xff] }
 0x466   : > { %8845 = vmatprep.subr.bf16.mxu1 %v9983_v27  ;;  %v2398_v29 = vld [vmem:[%s15268_s6 + $0x1110] sm:$0xff]  ;;  %v10206_v34 = vcombine.low %v2534_v6, %v2538_v8 }
 0x467   : > { %v2402_v60 = vld [vmem:[%s15268_s6 + $0x1130] sm:$0xff] }
 0x468   : > { %8805 = vmatpush2.bf16.msra.mxu0 %v9854_v59  ;;  %v2526_v18 = vld [vmem:[%s15268_s6 + $0x1510] sm:$0xff]  ;;  %v10071_v46 = vcombine.high %v2398_v29, %v2402_v60  ;;  %v10070_v42 = vcombine.low %v2398_v29, %v2402_v60 }
 0x469   : > { %8846 = vmatpush2.bf16.msra.mxu1 %v9982_v62  ;;  %8806 = vmatprep.subr.bf16.mxu0 %v9847_v33  ;;  %v10078_v33 = vcombine.low %v2406_v23, %v2410_v24  ;;  %v2382_v44 = vld [vmem:[%s15268_s6 + $0x1090] sm:$0xff] }
 0x46a   : > { %8847 = vmatprep.subr.bf16.mxu1 %v9975_v56  ;;  %v2514_v23 = vld [vmem:[%s15268_s6 + $0x14b0] sm:$0xff] }
 0x46b   : > { %v2494_v29 = vld [vmem:[%s15268_s6 + $0x1410] sm:$0xff] }
 0x46c   : > { %8807 = vmatpush2.bf16.msra.mxu0 %v9846_v2  ;;  %v2390_v2 = vld [vmem:[%s15268_s6 + $0x10d0] sm:$0xff] }
 0x46d   : > { %8848 = vmatpush2.bf16.msra.mxu1 %v9974_v3  ;;  %8858 = vmatprep.subr.bf16.mxu0 %v10095_v40  ;;  %v2394_v3 = vld [vmem:[%s15268_s6 + $0x10f0] sm:$0xff] }
 0x46e   : > { %8899 = vmatprep.subr.bf16.mxu1 %v10223_v41  ;;  %v2518_v40 = vld [vmem:[%s15268_s6 + $0x14d0] sm:$0xff]  ;;  %v10062_v24 = vcombine.low %v2390_v2, %v2394_v3 }
 0x46f   : > { %v8564_v36 = vpop.f32.mrf.mxu0  ;;  %8809 = vmatmul.mubr.bf16.vlgmr.msra.gmra.mxu0 %v12388_v19  ;;  %v2522_v41 = vld [vmem:[%s15268_s6 + $0x14f0] sm:$0xff] }
 0x470   : > { %v8565_v9 = vadd.f32 %v8564_v36, %v13852_v37  ;;  %v8605_v1 = vpop.f32.mrf.mxu1  ;;  %8850 = vmatmul.mubr.bf16.vlgmr.msra.gmra.mxu1 %v12390_v25  ;;  %8859 = vmatpush1.bf16.msra.mxu0 %v10094_v17  ;;  %v10207_v37 = vcombine.high %v2534_v6, %v2538_v8  ;;  %v10063_v17 = vcombine.high %v2390_v2, %v2394_v3  ;;  %v2374_v8 = vld [vmem:[%s15268_s6 + $0x1050] sm:$0xff] }
 0x471   : > { %8890 = vmatprep.mubr.bf16.mxu0 %v12398_v49  ;;  %8900 = vmatpush1.bf16.msra.mxu1 %v10222_v22  ;;  %v8566_v50 = vpop.f32.mrf.mxu0  ;;  %v10191_v11 = vcombine.high %v2518_v40, %v2522_v41  ;;  %v2386_v22 = vld [vmem:[%s15268_s6 + $0x10b0] sm:$0xff]  ;;  %v10190_v36 = vcombine.low %v2518_v40, %v2522_v41 }
 0x472   : > { %v14054_v39 = vadd.f32 %v8605_v1, %v8565_v9  ;;  %8931 = vmatprep.mubr.bf16.mxu1 %v12407_v31  ;;  %v8567_v26 = vadd.f32 %v8566_v50, %v13868_v63  ;;  %v8607_v27 = vpop.f32.mrf.mxu1  ;;  %8860 = vmatprep.subr.bf16.mxu0 %v10087_v45  ;;  %v2530_v63 = vld [vmem:[%s15268_s6 + $0x1530] sm:$0xff]  ;;  %v10054_v50 = vcombine.low %v2382_v44, %v2386_v22 }
 0x473   : > { %v8568_v61 = vpop.f32.mrf.mxu0  ;;  %8901 = vmatprep.subr.bf16.mxu1 %v10215_v4  ;;  %v10199_v38 = vcombine.high %v2526_v18, %v2530_v63  ;;  %v10198_v43 = vcombine.low %v2526_v18, %v2530_v63  ;;  %v2510_v45 = vld [vmem:[%s15268_s6 + $0x1490] sm:$0xff]  ;;  %v10055_v4 = vcombine.high %v2382_v44, %v2386_v22 }
 0x474   : > { %v14070_v59 = vadd.f32 %v8607_v27, %v8567_v26  ;;  %v8609_v62 = vpop.f32.mrf.mxu1  ;;  %8861 = vmatpush1.bf16.msra.mxu0 %v10086_v15  ;;  %v10183_v6 = vcombine.high %v2510_v45, %v2514_v23  ;;  %v2378_v9 = vld [vmem:[%s15268_s6 + $0x1070] sm:$0xff] }
 0x475   : > { %8902 = vmatpush1.bf16.msra.mxu1 %v10214_v51  ;;  %v8569_v56 = vpop.f32.mrf.mxu0  ;;  %8862 = vmatprep.subr.bf16.mxu0 %v10079_v14  ;;  %v2502_v1 = vld [vmem:[%s15268_s6 + $0x1450] sm:$0xff]  ;;  %v10182_v51 = vcombine.low %v2510_v45, %v2514_v23  ;;  %v10047_v14 = vcombine.high %v2374_v8, %v2378_v9  ;;  %v10046_v61 = vcombine.low %v2374_v8, %v2378_v9 }
 0x476   : > { %v8610_v48 = vpop.f32.mrf.mxu1  ;;  %8903 = vmatprep.subr.bf16.mxu1 %v10207_v37  ;;  %v2506_v15 = vld [vmem:[%s15268_s6 + $0x1470] sm:$0xff] }
 0x477   : > { %v10175_v26 = vcombine.high %v2502_v1, %v2506_v15  ;;  %v2366_v27 = vld [vmem:[%s15268_s6 + $0x1010] sm:$0xff]  ;;  %v10174_v18 = vcombine.low %v2502_v1, %v2506_v15 }
 0x478   : > { %8863 = vmatpush1.bf16.msra.mxu0 %v10078_v33  ;;  %v2370_v37 = vld [vmem:[%s15268_s6 + $0x1030] sm:$0xff] }
 0x479   : > { %8904 = vmatpush1.bf16.msra.mxu1 %v10206_v34  ;;  %8864 = vmatprep.subr.bf16.mxu0 %v10071_v46  ;;  %v2498_v60 = vld [vmem:[%s15268_s6 + $0x1430] sm:$0xff]  ;;  %v10039_v63 = vcombine.high %v2366_v27, %v2370_v37  ;;  %v10038_v48 = vcombine.low %v2366_v27, %v2370_v37 }
 0x47a   : > { %8905 = vmatprep.subr.bf16.mxu1 %v10199_v38  ;;  %v10167_v62 = vcombine.high %v2494_v29, %v2498_v60  ;;  %v2486_v33 = vld [vmem:[%s15268_s6 + $0x13d0] sm:$0xff]  ;;  %v10166_v38 = vcombine.low %v2494_v29, %v2498_v60 }
 0x47b   : > { %v2490_v56 = vld [vmem:[%s15268_s6 + $0x13f0] sm:$0xff] }
 0x47c   : > { %8865 = vmatpush1.bf16.msra.mxu0 %v10070_v42  ;;  %v2614_v34 = vld [vmem:[%s15268_s6 + $0x17d0] sm:$0xff]  ;;  %v10159_v2 = vcombine.high %v2486_v33, %v2490_v56 }
 0x47d   : > { %8906 = vmatpush1.bf16.msra.mxu1 %v10198_v43  ;;  %8866 = vmatprep.subr.bf16.mxu0 %v10063_v17  ;;  %v2618_v46 = vld [vmem:[%s15268_s6 + $0x17f0] sm:$0xff]  ;;  %v10158_v17 = vcombine.low %v2486_v33, %v2490_v56 }
 0x47e   : > { %8907 = vmatprep.subr.bf16.mxu1 %v10191_v11  ;;  %v10287_v3 = vcombine.high %v2614_v34, %v2618_v46  ;;  %v2478_v40 = vld [vmem:[%s15268_s6 + $0x1390] sm:$0xff]  ;;  %v10286_v11 = vcombine.low %v2614_v34, %v2618_v46 }
 0x47f   : > { %v2482_v41 = vld [vmem:[%s15268_s6 + $0x13b0] sm:$0xff] }
 0x480   : > { %8867 = vmatpush1.bf16.msra.mxu0 %v10062_v24  ;;  %v2606_v42 = vld [vmem:[%s15268_s6 + $0x1790] sm:$0xff]  ;;  %v10151_v44 = vcombine.high %v2478_v40, %v2482_v41 }
 0x481   : > { %8908 = vmatpush1.bf16.msra.mxu1 %v10190_v36  ;;  %8868 = vmatprep.subr.bf16.mxu0 %v10055_v4  ;;  %v2610_v43 = vld [vmem:[%s15268_s6 + $0x17b0] sm:$0xff]  ;;  %v10150_v4 = vcombine.low %v2478_v40, %v2482_v41 }
 0x482   : > { %8909 = vmatprep.subr.bf16.mxu1 %v10183_v6  ;;  %v10279_v22 = vcombine.high %v2606_v42, %v2610_v43  ;;  %v2470_v45 = vld [vmem:[%s15268_s6 + $0x1350] sm:$0xff]  ;;  %v10278_v6 = vcombine.low %v2606_v42, %v2610_v43 }
 0x483   : > { %v2474_v23 = vld [vmem:[%s15268_s6 + $0x1370] sm:$0xff] }
 0x484   : > { %8869 = vmatpush1.bf16.msra.mxu0 %v10054_v50  ;;  %v2598_v24 = vld [vmem:[%s15268_s6 + $0x1750] sm:$0xff]  ;;  %v10143_v8 = vcombine.high %v2470_v45, %v2474_v23 }
 0x485   : > { %8910 = vmatpush1.bf16.msra.mxu1 %v10182_v51  ;;  %8870 = vmatprep.subr.bf16.mxu0 %v10047_v14  ;;  %v2602_v36 = vld [vmem:[%s15268_s6 + $0x1770] sm:$0xff]  ;;  %v10142_v14 = vcombine.low %v2470_v45, %v2474_v23 }
 0x486   : > { %8911 = vmatprep.subr.bf16.mxu1 %v10175_v26  ;;  %v10271_v9 = vcombine.high %v2598_v24, %v2602_v36  ;;  %v2462_v1 = vld [vmem:[%s15268_s6 + $0x1310] sm:$0xff]  ;;  %v10270_v26 = vcombine.low %v2598_v24, %v2602_v36 }
 0x487   : > { %v2466_v15 = vld [vmem:[%s15268_s6 + $0x1330] sm:$0xff] }
 0x488   : > { %8871 = vmatpush1.bf16.msra.mxu0 %v10046_v61  ;;  %v2590_v50 = vld [vmem:[%s15268_s6 + $0x1710] sm:$0xff]  ;;  %v10135_v27 = vcombine.high %v2462_v1, %v2466_v15 }
 0x489   : > { %8912 = vmatpush1.bf16.msra.mxu1 %v10174_v18  ;;  %8872 = vmatprep.subr.bf16.mxu0 %v10039_v63  ;;  %v2594_v51 = vld [vmem:[%s15268_s6 + $0x1730] sm:$0xff]  ;;  %v10134_v63 = vcombine.low %v2462_v1, %v2466_v15 }
 0x48a   : > { %8913 = vmatprep.subr.bf16.mxu1 %v10167_v62  ;;  %v10263_v37 = vcombine.high %v2590_v50, %v2594_v51  ;;  %v2454_v29 = vld [vmem:[%s15268_s6 + $0x12d0] sm:$0xff]  ;;  %v10262_v62 = vcombine.low %v2590_v50, %v2594_v51 }
 0x48b   : > { %v2458_v60 = vld [vmem:[%s15268_s6 + $0x12f0] sm:$0xff] }
 0x48c   : > { %8873 = vmatpush1.bf16.msra.mxu0 %v10038_v48  ;;  %v2582_v61 = vld [vmem:[%s15268_s6 + $0x16d0] sm:$0xff]  ;;  %v10127_v33 = vcombine.high %v2454_v29, %v2458_v60 }
 0x48d   : > { %8914 = vmatpush1.bf16.msra.mxu1 %v10166_v38  ;;  %8874 = vmatprep.subr.bf16.mxu0 %v10159_v2  ;;  %v2586_v18 = vld [vmem:[%s15268_s6 + $0x16f0] sm:$0xff]  ;;  %v10126_v2 = vcombine.low %v2454_v29, %v2458_v60 }
 0x48e   : > { %8915 = vmatprep.subr.bf16.mxu1 %v10287_v3  ;;  %v10255_v56 = vcombine.high %v2582_v61, %v2586_v18  ;;  %v2446_v34 = vld [vmem:[%s15268_s6 + $0x1290] sm:$0xff]  ;;  %v10254_v3 = vcombine.low %v2582_v61, %v2586_v18 }
 0x48f   : > { %v2450_v46 = vld [vmem:[%s15268_s6 + $0x12b0] sm:$0xff] }
 0x490   : > { %8875 = vmatpush2.bf16.msra.mxu0 %v10158_v17  ;;  %v2574_v48 = vld [vmem:[%s15268_s6 + $0x1690] sm:$0xff]  ;;  %v10119_v40 = vcombine.high %v2446_v34, %v2450_v46 }
 0x491   : > { %8916 = vmatpush2.bf16.msra.mxu1 %v10286_v11  ;;  %8876 = vmatprep.subr.bf16.mxu0 %v10151_v44  ;;  %v2578_v38 = vld [vmem:[%s15268_s6 + $0x16b0] sm:$0xff]  ;;  %v10118_v44 = vcombine.low %v2446_v34, %v2450_v46 }
 0x492   : > { %8917 = vmatprep.subr.bf16.mxu1 %v10279_v22  ;;  %v10247_v41 = vcombine.high %v2574_v48, %v2578_v38  ;;  %v2438_v42 = vld [vmem:[%s15268_s6 + $0x1250] sm:$0xff]  ;;  %v10246_v22 = vcombine.low %v2574_v48, %v2578_v38 }
 0x493   : > { %v2442_v43 = vld [vmem:[%s15268_s6 + $0x1270] sm:$0xff] }
 0x494   : > { %8877 = vmatpush2.bf16.msra.mxu0 %v10150_v4  ;;  %v2566_v17 = vld [vmem:[%s15268_s6 + $0x1650] sm:$0xff]  ;;  %v10111_v45 = vcombine.high %v2438_v42, %v2442_v43 }
 0x495   : > { %8918 = vmatpush2.bf16.msra.mxu1 %v10278_v6  ;;  %8878 = vmatprep.subr.bf16.mxu0 %v10143_v8  ;;  %v2570_v11 = vld [vmem:[%s15268_s6 + $0x1670] sm:$0xff]  ;;  %v10110_v8 = vcombine.low %v2438_v42, %v2442_v43 }
 0x496   : > { %8919 = vmatprep.subr.bf16.mxu1 %v10271_v9  ;;  %v10239_v23 = vcombine.high %v2566_v17, %v2570_v11  ;;  %v2430_v24 = vld [vmem:[%s15268_s6 + $0x1210] sm:$0xff]  ;;  %v10238_v9 = vcombine.low %v2566_v17, %v2570_v11 }
 0x497   : > { %v2434_v36 = vld [vmem:[%s15268_s6 + $0x1230] sm:$0xff] }
 0x498   : > { %8879 = vmatpush2.bf16.msra.mxu0 %v10142_v14  ;;  %v2558_v4 = vld [vmem:[%s15268_s6 + $0x1610] sm:$0xff]  ;;  %v10103_v1 = vcombine.high %v2430_v24, %v2434_v36 }
 0x499   : > { %8920 = vmatpush2.bf16.msra.mxu1 %v10270_v26  ;;  %8880 = vmatprep.subr.bf16.mxu0 %v10135_v27  ;;  %v2562_v6 = vld [vmem:[%s15268_s6 + $0x1630] sm:$0xff]  ;;  %v10102_v27 = vcombine.low %v2430_v24, %v2434_v36 }
 0x49a   : > { %8921 = vmatprep.subr.bf16.mxu1 %v10263_v37  ;;  %v10231_v15 = vcombine.high %v2558_v4, %v2562_v6  ;;  %v2678_v50 = vld [vmem:[%s15268_s6 + $0x19d0] sm:$0xff]  ;;  %v10230_v37 = vcombine.low %v2558_v4, %v2562_v6 }
 0x49b   : > { %v2682_v51 = vld [vmem:[%s15268_s6 + $0x19f0] sm:$0xff] }
 0x49c   : > { %8881 = vmatpush2.bf16.msra.mxu0 %v10134_v63  ;;  %v2806_v14 = vld [vmem:[%s15268_s6 + $0x1dd0] sm:$0xff]  ;;  %v10351_v29 = vcombine.high %v2678_v50, %v2682_v51  ;;  %v10850_v63 = vmov 1966171168  }
 0x49d   : > { %8922 = vmatpush2.bf16.msra.mxu1 %v10262_v62  ;;  %8882 = vmatprep.subr.bf16.mxu0 %v10127_v33  ;;  %v2810_v26 = vld [vmem:[%s15268_s6 + $0x1df0] sm:$0xff]  ;;  %v9363_v62 = vunpack.c.l.s4 %v10850_v63  ;;  %v10350_v33 = vcombine.low %v2678_v50, %v2682_v51 }
 0x49e   : > { %8923 = vmatprep.subr.bf16.mxu1 %v10255_v56  ;;  %v10479_v60 = vcombine.high %v2806_v14, %v2810_v26  ;;  %v2670_v61 = vld [vmem:[%s15268_s6 + $0x1990] sm:$0xff]  ;;  %v10478_v46 = vcombine.low %v2806_v14, %v2810_v26 }
 0x49f   : > { %v2674_v18 = vld [vmem:[%s15268_s6 + $0x19b0] sm:$0xff]  ;;  %v9364_v43 = vunpack.c.0.s8 %v9363_v62 }
 0x4a0   : > { %8883 = vmatpush2.bf16.msra.mxu0 %v10126_v2  ;;  %v2798_v56 = vld [vmem:[%s15268_s6 + $0x1d90] sm:$0xff]  ;;  %v10343_v48 = vcombine.high %v2670_v61, %v2674_v18 }
 0x4a1   : > { %8924 = vmatpush2.bf16.msra.mxu1 %v10254_v3  ;;  %8884 = vmatprep.subr.bf16.mxu0 %v10119_v40  ;;  %v2802_v34 = vld [vmem:[%s15268_s6 + $0x1db0] sm:$0xff] }
 0x4a2   : > { %8925 = vmatprep.subr.bf16.mxu1 %v10247_v41  ;;  %v2662_v38 = vld [vmem:[%s15268_s6 + $0x1950] sm:$0xff]  ;;  %v10471_v40 = vcombine.high %v2798_v56, %v2802_v34 }
 0x4a3   : > { %v2666_v2 = vld [vmem:[%s15268_s6 + $0x1970] sm:$0xff] }
 0x4a4   : > { %8885 = vmatpush2.bf16.msra.mxu0 %v10118_v44  ;;  %v2790_v41 = vld [vmem:[%s15268_s6 + $0x1d50] sm:$0xff]  ;;  %v10342_v44 = vcombine.low %v2670_v61, %v2674_v18  ;;  %v10334_v14 = vcombine.low %v2662_v38, %v2666_v2 }
 0x4a5   : > { %8926 = vmatpush2.bf16.msra.mxu1 %v10246_v22  ;;  %8886 = vmatprep.subr.bf16.mxu0 %v10111_v45  ;;  %v2794_v42 = vld [vmem:[%s15268_s6 + $0x1d70] sm:$0xff]  ;;  %v10470_v45 = vcombine.low %v2798_v56, %v2802_v34 }
 0x4a6   : > { %8927 = vmatprep.subr.bf16.mxu1 %v10239_v23  ;;  %v10335_v23 = vcombine.high %v2662_v38, %v2666_v2  ;;  %v10463_v6 = vcombine.high %v2790_v41, %v2794_v42  ;;  %v2646_v18 = vld [vmem:[%s15268_s6 + $0x18d0] sm:$0xff] }
 0x4a7   : > { %v2774_v63 = vld [vmem:[%s15268_s6 + $0x1cd0] sm:$0xff] }
 0x4a8   : > { %8887 = vmatpush2.bf16.msra.mxu0 %v10110_v8  ;;  %v2658_v8 = vld [vmem:[%s15268_s6 + $0x1930] sm:$0xff] }
 0x4a9   : > { %8928 = vmatpush2.bf16.msra.mxu1 %v10238_v9  ;;  %8888 = vmatprep.subr.bf16.mxu0 %v10103_v1  ;;  %v2782_v1 = vld [vmem:[%s15268_s6 + $0x1d10] sm:$0xff] }
 0x4aa   : > { %8929 = vmatprep.subr.bf16.mxu1 %v10231_v15  ;;  %v14271_v15 = vsub.s32 %v9364_v43, %v11050_v47  ;;  %v2650_v47 = vld [vmem:[%s15268_s6 + $0x18f0] sm:$0xff] }
 0x4ab   : > { %v2778_v62 = vld [vmem:[%s15268_s6 + $0x1cf0] sm:$0xff] }
 0x4ac   : > { %8889 = vmatpush2.bf16.msra.mxu0 %v10102_v27  ;;  %v10462_v27 = vcombine.low %v2790_v41, %v2794_v42  ;;  %v10447_v2 = vcombine.high %v2774_v63, %v2778_v62  ;;  %v10446_v41 = vcombine.low %v2774_v63, %v2778_v62  ;;  %v10311_v42 = vcombine.high %v2638_v20, %v2642_v32  ;;  %v2862_v63 = vld [vmem:[%s15268_s6 + $0x1f90] sm:$0xff] }
 0x4ad   : > { %8930 = vmatpush2.bf16.msra.mxu1 %v10230_v37  ;;  %8940 = vmatprep.subr.bf16.mxu0 %v10351_v29  ;;  %v2866_v62 = vld [vmem:[%s15268_s6 + $0x1fb0] sm:$0xff] }
 0x4ae   : > { %8981 = vmatprep.subr.bf16.mxu1 %v10479_v60 }
 0x4af   : > { %v8646_v3 = vpop.f32.mrf.mxu0  ;;  %8891 = vmatmul.mubr.bf16.vlgmr.msra.gmra.mxu0 %v12602_v30 }
 0x4b0   : > { %v8647_v17 = vadd.f32 %v8646_v3, %v14054_v39  ;;  %v8687_v11 = vpop.f32.mrf.mxu1  ;;  %8932 = vmatmul.mubr.bf16.vlgmr.msra.gmra.mxu1 %v12604_v57  ;;  %8941 = vmatpush1.bf16.msra.mxu0 %v10350_v33  ;;  %v2654_v39 = vld [vmem:[%s15268_s6 + $0x1910] sm:$0xff]  ;;  %v14289_v33 = vrot.slane %v9358_v35, %v14271_v15 }
 0x4b1   : > { %8972 = vmatprep.mubr.bf16.mxu0 %v12612_v0  ;;  %8982 = vmatpush1.bf16.msra.mxu1 %v10478_v46  ;;  %v8648_v22 = vpop.f32.mrf.mxu0  ;;  %v10327_v37 = vcombine.high %v2654_v39, %v2658_v8  ;;  %v10326_v34 = vcombine.low %v2654_v39, %v2658_v8  ;;  %v2766_v35 = vld [vmem:[%s15268_s6 + $0x1c90] sm:$0xff] }
 0x4b2   : > { %v8688_v24 = vadd.f32 %v8687_v11, %v8647_v17  ;;  %9013 = vmatprep.mubr.bf16.mxu1 %v12621_v5  ;;  %v8649_v36 = vadd.f32 %v8648_v22, %v14070_v59  ;;  %v8689_v4 = vpop.f32.mrf.mxu1  ;;  %8942 = vmatprep.subr.bf16.mxu0 %v10343_v48  ;;  %v2786_v59 = vld [vmem:[%s15268_s6 + $0x1d30] sm:$0xff]  ;;  %v10319_v48 = vcombine.high %v2646_v18, %v2650_v47 }
 0x4b3   : > { %v8650_v9 = vpop.f32.mrf.mxu0  ;;  %8983 = vmatprep.subr.bf16.mxu1 %v10471_v40  ;;  %v10455_v61 = vcombine.high %v2782_v1, %v2786_v59  ;;  %v10454_v46 = vcombine.low %v2782_v1, %v2786_v59  ;;  %v2770_v3 = vld [vmem:[%s15268_s6 + $0x1cb0] sm:$0xff]  ;;  %v10318_v40 = vcombine.low %v2646_v18, %v2650_v47 }
 0x4b4   : > { %v8690_v50 = vadd.f32 %v8689_v4, %v8649_v36  ;;  %v8691_v51 = vpop.f32.mrf.mxu1  ;;  %8943 = vmatpush1.bf16.msra.mxu0 %v10342_v44  ;;  %v10439_v43 = vcombine.high %v2766_v35, %v2770_v3  ;;  %v2630_v17 = vld [vmem:[%s15268_s6 + $0x1850] sm:$0xff] }
 0x4b5   : > { %8984 = vmatpush1.bf16.msra.mxu1 %v10470_v45  ;;  %v8651_v26 = vpop.f32.mrf.mxu0  ;;  %8944 = vmatprep.subr.bf16.mxu0 %v10335_v23  ;;  %v2634_v11 = vld [vmem:[%s15268_s6 + $0x1870] sm:$0xff]  ;;  %v10310_v45 = vcombine.low %v2638_v20, %v2642_v32  ;;  %v10438_v23 = vcombine.low %v2766_v35, %v2770_v3 }
 0x4b6   : > { %v9359_v29 = vcombine.low %v8688_v24, %v8690_v50  ;;  %v8692_v60 = vpop.f32.mrf.mxu1  ;;  %8985 = vmatprep.subr.bf16.mxu1 %v10463_v6  ;;  %v2758_v44 = vld [vmem:[%s15268_s6 + $0x1c50] sm:$0xff]  ;;  %v10303_v24 = vcombine.high %v2630_v17, %v2634_v11  ;;  %v10302_v9 = vcombine.low %v2630_v17, %v2634_v11 }
 0x4b7   : > { %v2762_v22 = vld [vmem:[%s15268_s6 + $0x1c70] sm:$0xff] }
 0x4b8   : > { %v14292_v56 = vrot.slane %v9359_v29, %v14271_v15  ;;  %8945 = vmatpush1.bf16.msra.mxu0 %v10334_v14  ;;  %v10431_v36 = vcombine.high %v2758_v44, %v2762_v22  ;;  %v2622_v4 = vld [vmem:[%s15268_s6 + $0x1810] sm:$0xff]  ;;  %v10430_v1 = vcombine.low %v2758_v44, %v2762_v22 }
 0x4b9   : > { %8986 = vmatpush1.bf16.msra.mxu1 %v10462_v27  ;;  %8946 = vmatprep.subr.bf16.mxu0 %v10327_v37  ;;  %v2626_v6 = vld [vmem:[%s15268_s6 + $0x1830] sm:$0xff] }
 0x4ba   : > { %v9390_v38 = vcombine.low %v14289_v33, %v14292_v56  ;;  %8987 = vmatprep.subr.bf16.mxu1 %v10455_v61  ;;  %v2750_v39 = vld [vmem:[%s15268_s6 + $0x1c10] sm:$0xff]  ;;  %v10295_v59 = vcombine.high %v2622_v4, %v2626_v6  ;;  %v10294_v37 = vcombine.low %v2622_v4, %v2626_v6 }
 0x4bb   : > { %v2754_v8 = vld [vmem:[%s15268_s6 + $0x1c30] sm:$0xff] }
 0x4bc   : > { %8947 = vmatpush1.bf16.msra.mxu0 %v10326_v34  ;;  %v10423_v50 = vcombine.high %v2750_v39, %v2754_v8  ;;  %v2742_v51 = vld [vmem:[%s15268_s6 + $0x1bd0] sm:$0xff]  ;;  %v10422_v29 = vcombine.low %v2750_v39, %v2754_v8 }
 0x4bd   : > { %8988 = vmatpush1.bf16.msra.mxu1 %v10454_v46  ;;  %8948 = vmatprep.subr.bf16.mxu0 %v10319_v48  ;;  %v2746_v14 = vld [vmem:[%s15268_s6 + $0x1bf0] sm:$0xff] }
 0x4be   : > { %8989 = vmatprep.subr.bf16.mxu1 %v10447_v2  ;;  %v2870_v26 = vld [vmem:[%s15268_s6 + $0x1fd0] sm:$0xff]  ;;  %v10415_v60 = vcombine.high %v2742_v51, %v2746_v14  ;;  %v10414_v34 = vcombine.low %v2742_v51, %v2746_v14  ;;  %v10535_v2 = vcombine.high %v2862_v63, %v2866_v62 }
 0x4bf   : > { %v2874_v27 = vld [vmem:[%s15268_s6 + $0x1ff0] sm:$0xff] }
 0x4c0   : > { %8949 = vmatpush1.bf16.msra.mxu0 %v10318_v40  ;;  %v10543_v61 = vcombine.high %v2870_v26, %v2874_v27  ;;  %v2734_v18 = vld [vmem:[%s15268_s6 + $0x1b90] sm:$0xff]  ;;  %v10542_v46 = vcombine.low %v2870_v26, %v2874_v27 }
 0x4c1   : > { %8990 = vmatpush1.bf16.msra.mxu1 %v10446_v41  ;;  %8950 = vmatprep.subr.bf16.mxu0 %v10311_v42  ;;  %v2738_v47 = vld [vmem:[%s15268_s6 + $0x1bb0] sm:$0xff]  ;;  %v10534_v41 = vcombine.low %v2862_v63, %v2866_v62 }
 0x4c2   : > { %8991 = vmatprep.subr.bf16.mxu1 %v10439_v43  ;;  %v10407_v48 = vcombine.high %v2734_v18, %v2738_v47  ;;  %v2726_v20 = vld [vmem:[%s15268_s6 + $0x1b50] sm:$0xff]  ;;  %v10406_v40 = vcombine.low %v2734_v18, %v2738_v47 }
 0x4c3   : > { %v2730_v32 = vld [vmem:[%s15268_s6 + $0x1b70] sm:$0xff] }
 0x4c4   : > { %8951 = vmatpush1.bf16.msra.mxu0 %v10310_v45  ;;  %v2854_v35 = vld [vmem:[%s15268_s6 + $0x1f50] sm:$0xff]  ;;  %v10399_v42 = vcombine.high %v2726_v20, %v2730_v32  ;;  %v10398_v45 = vcombine.low %v2726_v20, %v2730_v32 }
 0x4c5   : > { %8992 = vmatpush1.bf16.msra.mxu1 %v10438_v23  ;;  %8952 = vmatprep.subr.bf16.mxu0 %v10303_v24  ;;  %v2858_v3 = vld [vmem:[%s15268_s6 + $0x1f70] sm:$0xff] }
 0x4c6   : > { %8993 = vmatprep.subr.bf16.mxu1 %v10431_v36  ;;  %v10527_v43 = vcombine.high %v2854_v35, %v2858_v3  ;;  %v2718_v17 = vld [vmem:[%s15268_s6 + $0x1b10] sm:$0xff]  ;;  %v10526_v23 = vcombine.low %v2854_v35, %v2858_v3 }
 0x4c7   : > { %v2722_v11 = vld [vmem:[%s15268_s6 + $0x1b30] sm:$0xff] }
 0x4c8   : > { %8953 = vmatpush1.bf16.msra.mxu0 %v10302_v9  ;;  %v2846_v44 = vld [vmem:[%s15268_s6 + $0x1f10] sm:$0xff]  ;;  %v10391_v24 = vcombine.high %v2718_v17, %v2722_v11  ;;  %v10390_v9 = vcombine.low %v2718_v17, %v2722_v11  ;;  %v1911_v17 = vld [vmem:[%s15268_s6 + $0x1d8] sm:$0xff] }
 0x4c9   : > { %8994 = vmatpush1.bf16.msra.mxu1 %v10430_v1  ;;  %8954 = vmatprep.subr.bf16.mxu0 %v10295_v59  ;;  %v2850_v22 = vld [vmem:[%s15268_s6 + $0x1f30] sm:$0xff]  ;;  %v1915_v11 = vld [vmem:[%s15268_s6 + $0x1f8] sm:$0xff] }
 0x4ca   : > { %8995 = vmatprep.subr.bf16.mxu1 %v10423_v50  ;;  %v10519_v36 = vcombine.high %v2846_v44, %v2850_v22  ;;  %v2710_v4 = vld [vmem:[%s15268_s6 + $0x1ad0] sm:$0xff]  ;;  %v10518_v1 = vcombine.low %v2846_v44, %v2850_v22  ;;  %v2039_v44 = vld [vmem:[%s15268_s6 + $0x5d8] sm:$0xff] }
 0x4cb   : > { %v2714_v6 = vld [vmem:[%s15268_s6 + $0x1af0] sm:$0xff]  ;;  %v2043_v22 = vld [vmem:[%s15268_s6 + $0x5f8] sm:$0xff] }
 0x4cc   : > { %8955 = vmatpush1.bf16.msra.mxu0 %v10294_v37  ;;  %v2838_v39 = vld [vmem:[%s15268_s6 + $0x1ed0] sm:$0xff]  ;;  %v10383_v59 = vcombine.high %v2710_v4, %v2714_v6  ;;  %v10382_v37 = vcombine.low %v2710_v4, %v2714_v6  ;;  %v1903_v4 = vld [vmem:[%s15268_s6 + $0x198] sm:$0xff] }
 0x4cd   : > { %8996 = vmatpush1.bf16.msra.mxu1 %v10422_v29  ;;  %8956 = vmatprep.subr.bf16.mxu0 %v10415_v60  ;;  %v2842_v8 = vld [vmem:[%s15268_s6 + $0x1ef0] sm:$0xff]  ;;  %v1907_v6 = vld [vmem:[%s15268_s6 + $0x1b8] sm:$0xff] }
 0x4ce   : > { %8997 = vmatprep.subr.bf16.mxu1 %v10543_v61  ;;  %v10511_v50 = vcombine.high %v2838_v39, %v2842_v8  ;;  %v2702_v51 = vld [vmem:[%s15268_s6 + $0x1a90] sm:$0xff]  ;;  %v10510_v29 = vcombine.low %v2838_v39, %v2842_v8  ;;  %v10839_v39 = vld [vmem:[%s12796_s10] sm:$0xff] }
 0x4cf   : > { %v2706_v14 = vld [vmem:[%s15268_s6 + $0x1ab0] sm:$0xff]  ;;  %v8017_v8 = vrot.slane %v10839_v39, %v11306_v10  ;;  %v1895_v10 = vld [vmem:[%s15268_s6 + $0x158] sm:$0xff] }
 0x4d0   : > { %8957 = vmatpush2.bf16.msra.mxu0 %v10414_v34  ;;  %v2830_v26 = vld [vmem:[%s15268_s6 + $0x1e90] sm:$0xff]  ;;  %v10375_v60 = vcombine.high %v2702_v51, %v2706_v14  ;;  %v10374_v34 = vcombine.low %v2702_v51, %v2706_v14  ;;  %v8021_v51 = vrot.slane %v10839_v39, %v11297_v7  ;;  %v9577_v14 = vcombine.high %v1903_v4, %v1907_v6  ;;  %v2027_v7 = vld [vmem:[%s15268_s6 + $0x578] sm:$0xff] }
 0x4d1   : > { %8998 = vmatpush2.bf16.msra.mxu1 %v10542_v46  ;;  %8958 = vmatprep.subr.bf16.mxu0 %v10407_v48  ;;  %v2834_v27 = vld [vmem:[%s15268_s6 + $0x1eb0] sm:$0xff] }
 0x4d2   : > { %8999 = vmatprep.subr.bf16.mxu1 %v10535_v2  ;;  %v10503_v61 = vcombine.high %v2830_v26, %v2834_v27  ;;  %v2694_v18 = vld [vmem:[%s15268_s6 + $0x1a50] sm:$0xff]  ;;  %v10502_v46 = vcombine.low %v2830_v26, %v2834_v27  ;;  %v1899_v26 = vld [vmem:[%s15268_s6 + $0x178] sm:$0xff] }
 0x4d3   : > { %v2698_v47 = vld [vmem:[%s15268_s6 + $0x1a70] sm:$0xff] }
 0x4d4   : > { %8959 = vmatpush2.bf16.msra.mxu0 %v10406_v40  ;;  %v2822_v63 = vld [vmem:[%s15268_s6 + $0x1e50] sm:$0xff]  ;;  %v10367_v48 = vcombine.high %v2694_v18, %v2698_v47  ;;  %v10366_v40 = vcombine.low %v2694_v18, %v2698_v47  ;;  %v9576_v18 = vcombine.low %v1903_v4, %v1907_v6 }
 0x4d5   : > { %9000 = vmatpush2.bf16.msra.mxu1 %v10534_v41  ;;  %8960 = vmatprep.subr.bf16.mxu0 %v10399_v42  ;;  %v2826_v62 = vld [vmem:[%s15268_s6 + $0x1e70] sm:$0xff] }
 0x4d6   : > { %9001 = vmatprep.subr.bf16.mxu1 %v10527_v43  ;;  %v10495_v2 = vcombine.high %v2822_v63, %v2826_v62  ;;  %v2686_v20 = vld [vmem:[%s15268_s6 + $0x1a10] sm:$0xff]  ;;  %v10494_v41 = vcombine.low %v2822_v63, %v2826_v62  ;;  %v9569_v62 = vcombine.high %v1895_v10, %v1899_v26 }
 0x4d7   : > { %v2690_v32 = vld [vmem:[%s15268_s6 + $0x1a30] sm:$0xff] }
 0x4d8   : > { %8961 = vmatpush2.bf16.msra.mxu0 %v10398_v45  ;;  %v2814_v35 = vld [vmem:[%s15268_s6 + $0x1e10] sm:$0xff]  ;;  %v10359_v42 = vcombine.high %v2686_v20, %v2690_v32  ;;  %v10358_v45 = vcombine.low %v2686_v20, %v2690_v32  ;;  %v1887_v20 = vld [vmem:[%s15268_s6 + $0x118] sm:$0xff] }
 0x4d9   : > { %9002 = vmatpush2.bf16.msra.mxu1 %v10526_v23  ;;  %8962 = vmatprep.subr.bf16.mxu0 %v10391_v24  ;;  %v2818_v3 = vld [vmem:[%s15268_s6 + $0x1e30] sm:$0xff]  ;;  %v9585_v24 = vcombine.high %v1911_v17, %v1915_v11 }
 0x4da   : > { %9003 = vmatprep.subr.bf16.mxu1 %v10519_v36  ;;  %v10487_v43 = vcombine.high %v2814_v35, %v2818_v3  ;;  %v10486_v23 = vcombine.low %v2814_v35, %v2818_v3  ;;  %v9713_v36 = vcombine.high %v2039_v44, %v2043_v22  ;;  %v2015_v35 = vld [vmem:[%s15268_s6 + $0x518] sm:$0xff] }
 0x4dc   : > { %8963 = vmatpush2.bf16.msra.mxu0 %v10390_v9  ;;  %v9584_v9 = vcombine.low %v1911_v17, %v1915_v11 }
 0x4dd   : > { %9004 = vmatpush2.bf16.msra.mxu1 %v10518_v1  ;;  %8964 = vmatprep.subr.bf16.mxu0 %v10383_v59  ;;  %v2031_v1 = vld [vmem:[%s15268_s6 + $0x598] sm:$0xff] }
 0x4de   : > { %9005 = vmatprep.subr.bf16.mxu1 %v10511_v50  ;;  %v2035_v59 = vld [vmem:[%s15268_s6 + $0x5b8] sm:$0xff]  ;;  %v9712_v50 = vcombine.low %v2039_v44, %v2043_v22 }
 0x4df   : > { %v9704_v63 = vcombine.low %v2031_v1, %v2035_v59  ;;  %v1879_v22 = vld [vmem:[%s15268_s6 + $0xd8] sm:$0xff] }
 0x4e0   : > { %8965 = vmatpush2.bf16.msra.mxu0 %v10382_v37  ;;  %v9705_v37 = vcombine.high %v2031_v1, %v2035_v59  ;;  %v1999_v1 = vld [vmem:[%s15268_s6 + $0x498] sm:$0xff] }
 0x4e1   : > { %9006 = vmatpush2.bf16.msra.mxu1 %v10510_v29  ;;  %8966 = vmatprep.subr.bf16.mxu0 %v10375_v60  ;;  %v2023_v29 = vld [vmem:[%s15268_s6 + $0x558] sm:$0xff] }
 0x4e2   : > { %9007 = vmatprep.subr.bf16.mxu1 %v10503_v61  ;;  %v2003_v59 = vld [vmem:[%s15268_s6 + $0x4b8] sm:$0xff] }
 0x4e4   : > { %8967 = vmatpush2.bf16.msra.mxu0 %v10374_v34 }
 0x4e5   : > { %9008 = vmatpush2.bf16.msra.mxu1 %v10502_v46  ;;  %8968 = vmatprep.subr.bf16.mxu0 %v10367_v48 }
 0x4e6   : > { %9009 = vmatprep.subr.bf16.mxu1 %v10495_v2  ;;  %v9697_v2 = vcombine.high %v2023_v29, %v2027_v7 }
 0x4e8   : > { %8969 = vmatpush2.bf16.msra.mxu0 %v10366_v40 }
 0x4e9   : > { %9010 = vmatpush2.bf16.msra.mxu1 %v10494_v41  ;;  %8970 = vmatprep.subr.bf16.mxu0 %v10359_v42  ;;  %v9568_v41 = vcombine.low %v1895_v10, %v1899_v26  ;;  %v9673_v10 = vcombine.high %v1999_v1, %v2003_v59  ;;  %v1863_v26 = vld [vmem:[%s15268_s6 + $0x58] sm:$0xff] }
 0x4ea   : > { %9011 = vmatprep.subr.bf16.mxu1 %v10487_v43  ;;  %v9696_v43 = vcombine.low %v2023_v29, %v2027_v7  ;;  %v1995_v29 = vld [vmem:[%s15268_s6 + $0x478] sm:$0xff] }
 0x4ec   : > { %8971 = vmatpush2.bf16.msra.mxu0 %v10358_v45  ;;  %v1883_v45 = vld [vmem:[%s15268_s6 + $0xf8] sm:$0xff] }
 0x4ed   : > { %9012 = vmatpush2.bf16.msra.mxu1 %v10486_v23  ;;  %9022 = vmatprep.subr.bf16.mxu0 %v9585_v24  ;;  %v2007_v23 = vld [vmem:[%s15268_s6 + $0x4d8] sm:$0xff]  ;;  %v9553_v6 = vcombine.high %v1879_v22, %v1883_v45 }
 0x4ee   : > { %9063 = vmatprep.subr.bf16.mxu1 %v9713_v36  ;;  %v2011_v24 = vld [vmem:[%s15268_s6 + $0x4f8] sm:$0xff] }
 0x4ef   : > { %v8728_v27 = vpop.f32.mrf.mxu0  ;;  %8973 = vmatmul.mubr.bf16.vlgmr.msra.gmra.mxu0 %v12820_v21  ;;  %v9681_v39 = vcombine.high %v2007_v23, %v2011_v24 }
 0x4f0   : > { %v8729_v60 = vadd.f32 %v8728_v27, %v8017_v8  ;;  %v8769_v61 = vpop.f32.mrf.mxu1  ;;  %9014 = vmatmul.mubr.bf16.vlgmr.msra.gmra.mxu1 %v12822_v12  ;;  %9023 = vmatpush1.bf16.msra.mxu0 %v9584_v9  ;;  %v1871_v8 = vld [vmem:[%s15268_s6 + $0x98] sm:$0xff] }
 0x4f1   : > { %9054 = vmatprep.mubr.bf16.mxu0 %v12131_v52  ;;  %9064 = vmatpush1.bf16.msra.mxu1 %v9712_v50  ;;  %v8730_v47 = vpop.f32.mrf.mxu0  ;;  %v1891_v52 = vld [vmem:[%s15268_s6 + $0x138] sm:$0xff]  ;;  %v9552_v50 = vcombine.low %v1879_v22, %v1883_v45 }
 0x4f2   : > { %v14470_v34 = vadd.f32 %v8769_v61, %v8729_v60  ;;  %9095 = vmatprep.mubr.bf16.mxu1 %v12133_v53  ;;  %v8731_v46 = vadd.f32 %v8730_v47, %v8021_v51  ;;  %v8771_v48 = vpop.f32.mrf.mxu1  ;;  %9024 = vmatprep.subr.bf16.mxu0 %v9577_v14  ;;  %v2019_v53 = vld [vmem:[%s15268_s6 + $0x538] sm:$0xff]  ;;  %v9561_v17 = vcombine.high %v1887_v20, %v1891_v52 }
 0x4f3   : > { %v8732_v32 = vpop.f32.mrf.mxu0  ;;  %9065 = vmatprep.subr.bf16.mxu1 %v9705_v37  ;;  %v9689_v44 = vcombine.high %v2015_v35, %v2019_v53  ;;  %v9560_v36 = vcombine.low %v1887_v20, %v1891_v52  ;;  %v9688_v4 = vcombine.low %v2015_v35, %v2019_v53  ;;  %v1875_v9 = vld [vmem:[%s15268_s6 + $0xb8] sm:$0xff]  ;;  %v9680_v51 = vcombine.low %v2007_v23, %v2011_v24 }
 0x4f4   : > { %v14485_v3 = vadd.f32 %v8771_v48, %v8731_v46  ;;  %v8773_v40 = vpop.f32.mrf.mxu1  ;;  %9025 = vmatpush1.bf16.msra.mxu0 %v9576_v18  ;;  %v9545_v14 = vcombine.high %v1871_v8, %v1875_v9  ;;  %v1867_v27 = vld [vmem:[%s15268_s6 + $0x78] sm:$0xff]  ;;  %v9544_v7 = vcombine.low %v1871_v8, %v1875_v9  ;;  %v9672_v60 = vcombine.low %v1999_v1, %v2003_v59 }
 0x4f5   : > { %9066 = vmatpush1.bf16.msra.mxu1 %v9704_v63  ;;  %v8733_v42 = vpop.f32.mrf.mxu0  ;;  %9026 = vmatprep.subr.bf16.mxu0 %v9569_v62  ;;  %v1991_v37 = vld [vmem:[%s15268_s6 + $0x458] sm:$0xff]  ;;  %v9537_v61 = vcombine.high %v1863_v26, %v1867_v27  ;;  %v9536_v48 = vcombine.low %v1863_v26, %v1867_v27 }
 0x4f6   : > { %v8774_v11 = vpop.f32.mrf.mxu1  ;;  %9067 = vmatprep.subr.bf16.mxu1 %v9697_v2  ;;  %v9665_v18 = vcombine.high %v1991_v37, %v1995_v29  ;;  %v1855_v47 = vld [vmem:[%s15268_s6 + $0x18] sm:$0xff]  ;;  %v9664_v2 = vcombine.low %v1991_v37, %v1995_v29 }
 0x4f7   : > { %v1859_v63 = vld [vmem:[%s15268_s6 + $0x38] sm:$0xff] }
 0x4f8   : > { %9027 = vmatpush1.bf16.msra.mxu0 %v9568_v41  ;;  %v1983_v62 = vld [vmem:[%s15268_s6 + $0x418] sm:$0xff]  ;;  %v9529_v20 = vcombine.high %v1855_v47, %v1859_v63  ;;  %v9528_v41 = vcombine.low %v1855_v47, %v1859_v63 }
 0x4f9   : > { %9068 = vmatpush1.bf16.msra.mxu1 %v9696_v43  ;;  %9028 = vmatprep.subr.bf16.mxu0 %v9561_v17  ;;  %v1987_v46 = vld [vmem:[%s15268_s6 + $0x438] sm:$0xff] }
 0x4fa   : > { %9069 = vmatprep.subr.bf16.mxu1 %v9689_v44  ;;  %v9657_v52 = vcombine.high %v1983_v62, %v1987_v46  ;;  %v1975_v32 = vld [vmem:[%s15268_s6 + $0x3d8] sm:$0xff]  ;;  %v9656_v42 = vcombine.low %v1983_v62, %v1987_v46 }
 0x4fb   : > { %v1979_v35 = vld [vmem:[%s15268_s6 + $0x3f8] sm:$0xff] }
 0x4fc   : > { %9029 = vmatpush1.bf16.msra.mxu0 %v9560_v36  ;;  %v2103_v53 = vld [vmem:[%s15268_s6 + $0x7d8] sm:$0xff]  ;;  %v9649_v43 = vcombine.high %v1975_v32, %v1979_v35  ;;  %v9648_v23 = vcombine.low %v1975_v32, %v1979_v35 }
 0x4fd   : > { %9070 = vmatpush1.bf16.msra.mxu1 %v9688_v4  ;;  %9030 = vmatprep.subr.bf16.mxu0 %v9553_v6  ;;  %v2107_v40 = vld [vmem:[%s15268_s6 + $0x7f8] sm:$0xff] }
 0x4fe   : > { %9071 = vmatprep.subr.bf16.mxu1 %v9681_v39  ;;  %v9777_v17 = vcombine.high %v2103_v53, %v2107_v40  ;;  %v1967_v11 = vld [vmem:[%s15268_s6 + $0x398] sm:$0xff]  ;;  %v9776_v24 = vcombine.low %v2103_v53, %v2107_v40 }
 0x4ff   : > { %v1971_v44 = vld [vmem:[%s15268_s6 + $0x3b8] sm:$0xff] }
 0x500   : > { %9031 = vmatpush1.bf16.msra.mxu0 %v9552_v50  ;;  %v2095_v22 = vld [vmem:[%s15268_s6 + $0x798] sm:$0xff]  ;;  %v9641_v36 = vcombine.high %v1967_v11, %v1971_v44  ;;  %v9640_v1 = vcombine.low %v1967_v11, %v1971_v44 }
 0x501   : > { %9072 = vmatpush1.bf16.msra.mxu1 %v9680_v51  ;;  %9032 = vmatprep.subr.bf16.mxu0 %v9545_v14  ;;  %v2099_v45 = vld [vmem:[%s15268_s6 + $0x7b8] sm:$0xff] }
 0x502   : > { %9073 = vmatprep.subr.bf16.mxu1 %v9673_v10  ;;  %v9769_v4 = vcombine.high %v2095_v22, %v2099_v45  ;;  %v1959_v6 = vld [vmem:[%s15268_s6 + $0x358] sm:$0xff]  ;;  %v9768_v59 = vcombine.low %v2095_v22, %v2099_v45 }
 0x503   : > { %v1963_v39 = vld [vmem:[%s15268_s6 + $0x378] sm:$0xff] }
 0x504   : > { %9033 = vmatpush1.bf16.msra.mxu0 %v9544_v7  ;;  %v2087_v8 = vld [vmem:[%s15268_s6 + $0x758] sm:$0xff]  ;;  %v9633_v50 = vcombine.high %v1959_v6, %v1963_v39  ;;  %v9632_v37 = vcombine.low %v1959_v6, %v1963_v39 }
 0x505   : > { %9074 = vmatpush1.bf16.msra.mxu1 %v9672_v60  ;;  %9034 = vmatprep.subr.bf16.mxu0 %v9537_v61  ;;  %v2091_v9 = vld [vmem:[%s15268_s6 + $0x778] sm:$0xff] }
 0x506   : > { %9075 = vmatprep.subr.bf16.mxu1 %v9665_v18  ;;  %v9761_v51 = vcombine.high %v2087_v8, %v2091_v9  ;;  %v1951_v14 = vld [vmem:[%s15268_s6 + $0x318] sm:$0xff]  ;;  %v9760_v29 = vcombine.low %v2087_v8, %v2091_v9 }
 0x507   : > { %v1955_v10 = vld [vmem:[%s15268_s6 + $0x338] sm:$0xff] }
 0x508   : > { %9035 = vmatpush1.bf16.msra.mxu0 %v9536_v48  ;;  %v2079_v26 = vld [vmem:[%s15268_s6 + $0x718] sm:$0xff]  ;;  %v9625_v7 = vcombine.high %v1951_v14, %v1955_v10  ;;  %v9624_v62 = vcombine.low %v1951_v14, %v1955_v10 }
 0x509   : > { %9076 = vmatpush1.bf16.msra.mxu1 %v9664_v2  ;;  %9036 = vmatprep.subr.bf16.mxu0 %v9529_v20  ;;  %v2083_v27 = vld [vmem:[%s15268_s6 + $0x738] sm:$0xff] }
 0x50a   : > { %9077 = vmatprep.subr.bf16.mxu1 %v9657_v52  ;;  %v9753_v60 = vcombine.high %v2079_v26, %v2083_v27  ;;  %v1943_v61 = vld [vmem:[%s15268_s6 + $0x2d8] sm:$0xff]  ;;  %v9752_v46 = vcombine.low %v2079_v26, %v2083_v27 }
 0x50b   : > { %v1947_v18 = vld [vmem:[%s15268_s6 + $0x2f8] sm:$0xff] }
 0x50c   : > { %9037 = vmatpush1.bf16.msra.mxu0 %v9528_v41  ;;  %v2071_v47 = vld [vmem:[%s15268_s6 + $0x6d8] sm:$0xff]  ;;  %v9617_v48 = vcombine.high %v1943_v61, %v1947_v18  ;;  %v9616_v53 = vcombine.low %v1943_v61, %v1947_v18 }
 0x50d   : > { %9078 = vmatpush1.bf16.msra.mxu1 %v9656_v42  ;;  %9038 = vmatprep.subr.bf16.mxu0 %v9649_v43  ;;  %v2075_v63 = vld [vmem:[%s15268_s6 + $0x6f8] sm:$0xff] }
 0x50e   : > { %9079 = vmatprep.subr.bf16.mxu1 %v9777_v17  ;;  %v9745_v2 = vcombine.high %v2071_v47, %v2075_v63  ;;  %v1935_v20 = vld [vmem:[%s15268_s6 + $0x298] sm:$0xff]  ;;  %v9744_v40 = vcombine.low %v2071_v47, %v2075_v63 }
 0x50f   : > { %v1939_v52 = vld [vmem:[%s15268_s6 + $0x2b8] sm:$0xff] }
 0x510   : > { %9039 = vmatpush2.bf16.msra.mxu0 %v9648_v23  ;;  %v2063_v32 = vld [vmem:[%s15268_s6 + $0x698] sm:$0xff]  ;;  %v9609_v41 = vcombine.high %v1935_v20, %v1939_v52  ;;  %v9608_v22 = vcombine.low %v1935_v20, %v1939_v52 }
 0x511   : > { %9080 = vmatpush2.bf16.msra.mxu1 %v9776_v24  ;;  %9040 = vmatprep.subr.bf16.mxu0 %v9641_v36  ;;  %v2067_v35 = vld [vmem:[%s15268_s6 + $0x6b8] sm:$0xff] }
 0x512   : > { %9081 = vmatprep.subr.bf16.mxu1 %v9769_v4  ;;  %v9737_v42 = vcombine.high %v2063_v32, %v2067_v35  ;;  %v1927_v43 = vld [vmem:[%s15268_s6 + $0x258] sm:$0xff]  ;;  %v9736_v45 = vcombine.low %v2063_v32, %v2067_v35 }
 0x513   : > { %v1931_v17 = vld [vmem:[%s15268_s6 + $0x278] sm:$0xff] }
 0x514   : > { %9041 = vmatpush2.bf16.msra.mxu0 %v9640_v1  ;;  %v2055_v11 = vld [vmem:[%s15268_s6 + $0x658] sm:$0xff]  ;;  %v9601_v23 = vcombine.high %v1927_v43, %v1931_v17  ;;  %v9600_v8 = vcombine.low %v1927_v43, %v1931_v17 }
 0x515   : > { %9082 = vmatpush2.bf16.msra.mxu1 %v9768_v59  ;;  %9042 = vmatprep.subr.bf16.mxu0 %v9633_v50  ;;  %v2059_v44 = vld [vmem:[%s15268_s6 + $0x678] sm:$0xff] }
 0x516   : > { %9083 = vmatprep.subr.bf16.mxu1 %v9761_v51  ;;  %v9729_v24 = vcombine.high %v2055_v11, %v2059_v44  ;;  %v1919_v36 = vld [vmem:[%s15268_s6 + $0x218] sm:$0xff]  ;;  %v9728_v9 = vcombine.low %v2055_v11, %v2059_v44 }
 0x517   : > { %v1923_v4 = vld [vmem:[%s15268_s6 + $0x238] sm:$0xff] }
 0x518   : > { %9043 = vmatpush2.bf16.msra.mxu0 %v9632_v37  ;;  %v2047_v6 = vld [vmem:[%s15268_s6 + $0x618] sm:$0xff]  ;;  %v9593_v1 = vcombine.high %v1919_v36, %v1923_v4  ;;  %v9592_v26 = vcombine.low %v1919_v36, %v1923_v4 }
 0x519   : > { %9084 = vmatpush2.bf16.msra.mxu1 %v9760_v29  ;;  %9044 = vmatprep.subr.bf16.mxu0 %v9625_v7  ;;  %v2051_v39 = vld [vmem:[%s15268_s6 + $0x638] sm:$0xff] }
 0x51a   : > { %9085 = vmatprep.subr.bf16.mxu1 %v9753_v60  ;;  %v9721_v59 = vcombine.high %v2047_v6, %v2051_v39  ;;  %v2167_v50 = vld [vmem:[%s15268_s6 + $0x9d8] sm:$0xff]  ;;  %v9720_v27 = vcombine.low %v2047_v6, %v2051_v39 }
 0x51b   : > { %v2171_v51 = vld [vmem:[%s15268_s6 + $0x9f8] sm:$0xff] }
 0x51c   : > { %9045 = vmatpush2.bf16.msra.mxu0 %v9624_v62  ;;  %v2295_v14 = vld [vmem:[%s15268_s6 + $0xdd8] sm:$0xff]  ;;  %v9841_v37 = vcombine.high %v2167_v50, %v2171_v51  ;;  %v9840_v61 = vcombine.low %v2167_v50, %v2171_v51 }
 0x51d   : > { %9086 = vmatpush2.bf16.msra.mxu1 %v9752_v46  ;;  %9046 = vmatprep.subr.bf16.mxu0 %v9617_v48  ;;  %v2299_v10 = vld [vmem:[%s15268_s6 + $0xdf8] sm:$0xff] }
 0x51e   : > { %9087 = vmatprep.subr.bf16.mxu1 %v9745_v2  ;;  %v9969_v29 = vcombine.high %v2295_v14, %v2299_v10  ;;  %v2159_v7 = vld [vmem:[%s15268_s6 + $0x998] sm:$0xff]  ;;  %v9968_v63 = vcombine.low %v2295_v14, %v2299_v10 }
 0x51f   : > { %v2163_v60 = vld [vmem:[%s15268_s6 + $0x9b8] sm:$0xff] }
 0x520   : > { %9047 = vmatpush2.bf16.msra.mxu0 %v9616_v53  ;;  %v2287_v18 = vld [vmem:[%s15268_s6 + $0xd98] sm:$0xff]  ;;  %v9833_v62 = vcombine.high %v2159_v7, %v2163_v60 }
 0x521   : > { %9088 = vmatpush2.bf16.msra.mxu1 %v9744_v40  ;;  %9048 = vmatprep.subr.bf16.mxu0 %v9609_v41  ;;  %v2291_v47 = vld [vmem:[%s15268_s6 + $0xdb8] sm:$0xff]  ;;  %v9832_v40 = vcombine.low %v2159_v7, %v2163_v60 }
 0x522   : > { %9089 = vmatprep.subr.bf16.mxu1 %v9737_v42  ;;  %v2151_v46 = vld [vmem:[%s15268_s6 + $0x958] sm:$0xff]  ;;  %v9961_v20 = vcombine.high %v2287_v18, %v2291_v47  ;;  %v9960_v41 = vcombine.low %v2287_v18, %v2291_v47 }
 0x523   : > { %v2155_v48 = vld [vmem:[%s15268_s6 + $0x978] sm:$0xff] }
 0x524   : > { %9049 = vmatpush2.bf16.msra.mxu0 %v9608_v22  ;;  %v2279_v52 = vld [vmem:[%s15268_s6 + $0xd58] sm:$0xff]  ;;  %v9825_v42 = vcombine.high %v2151_v46, %v2155_v48 }
 0x525   : > { %9090 = vmatpush2.bf16.msra.mxu1 %v9736_v45  ;;  %9050 = vmatprep.subr.bf16.mxu0 %v9601_v23  ;;  %v2283_v32 = vld [vmem:[%s15268_s6 + $0xd78] sm:$0xff]  ;;  %v9824_v23 = vcombine.low %v2151_v46, %v2155_v48 }
 0x526   : > { %9091 = vmatprep.subr.bf16.mxu1 %v9729_v24  ;;  %v2271_v22 = vld [vmem:[%s15268_s6 + $0xd18] sm:$0xff]  ;;  %v9952_v36 = vcombine.low %v2279_v52, %v2283_v32 }
 0x527   : > { %v2119_v47 = vld [vmem:[%s15268_s6 + $0x858] sm:$0xff] }
 0x528   : > { %9051 = vmatpush2.bf16.msra.mxu0 %v9600_v8  ;;  %v2135_v8 = vld [vmem:[%s15268_s6 + $0x8d8] sm:$0xff] }
 0x529   : > { %9092 = vmatpush2.bf16.msra.mxu1 %v9728_v9  ;;  %9052 = vmatprep.subr.bf16.mxu0 %v9593_v1  ;;  %v2139_v9 = vld [vmem:[%s15268_s6 + $0x8f8] sm:$0xff] }
 0x52a   : > { %9093 = vmatprep.subr.bf16.mxu1 %v9721_v59  ;;  %v2263_v1 = vld [vmem:[%s15268_s6 + $0xcd8] sm:$0xff]  ;;  %v9809_v14 = vcombine.high %v2135_v8, %v2139_v9  ;;  %v9808_v7 = vcombine.low %v2135_v8, %v2139_v9 }
 0x52b   : > { %v2267_v59 = vld [vmem:[%s15268_s6 + $0xcf8] sm:$0xff] }
 0x52c   : > { %9053 = vmatpush2.bf16.msra.mxu0 %v9592_v26  ;;  %v9937_v10 = vcombine.high %v2263_v1, %v2267_v59  ;;  %v2127_v26 = vld [vmem:[%s15268_s6 + $0x898] sm:$0xff]  ;;  %v9936_v60 = vcombine.low %v2263_v1, %v2267_v59 }
 0x52d   : > { %9094 = vmatpush2.bf16.msra.mxu1 %v9720_v27  ;;  %9104 = vmatprep.subr.bf16.mxu0 %v9841_v37  ;;  %v2131_v27 = vld [vmem:[%s15268_s6 + $0x8b8] sm:$0xff] }
 0x52e   : > { %9145 = vmatprep.subr.bf16.mxu1 %v9969_v29  ;;  %v2255_v37 = vld [vmem:[%s15268_s6 + $0xc98] sm:$0xff]  ;;  %v9800_v48 = vcombine.low %v2127_v26, %v2131_v27 }
 0x52f   : > { %v8810_v2 = vpop.f32.mrf.mxu0  ;;  %9055 = vmatmul.mubr.bf16.vlgmr.msra.gmra.mxu0 %v12135_v54  ;;  %v2259_v29 = vld [vmem:[%s15268_s6 + $0xcb8] sm:$0xff] }
 0x530   : > { %v8811_v35 = vadd.f32 %v8810_v2, %v14470_v34  ;;  %v8851_v53 = vpop.f32.mrf.mxu1  ;;  %9096 = vmatmul.mubr.bf16.vlgmr.msra.gmra.mxu1 %v12137_v55  ;;  %9105 = vmatpush1.bf16.msra.mxu0 %v9840_v61  ;;  %v9953_v34 = vcombine.high %v2279_v52, %v2283_v32  ;;  %v2143_v55 = vld [vmem:[%s15268_s6 + $0x918] sm:$0xff]  ;;  %v9801_v61 = vcombine.high %v2127_v26, %v2131_v27 }
 0x531   : > { %9136 = vmatprep.mubr.bf16.mxu0 %v12177_v58  ;;  %9146 = vmatpush1.bf16.msra.mxu1 %v9968_v63  ;;  %v8812_v54 = vpop.f32.mrf.mxu0  ;;  %v2147_v58 = vld [vmem:[%s15268_s6 + $0x938] sm:$0xff]  ;;  %v9929_v18 = vcombine.high %v2255_v37, %v2259_v29  ;;  %v9928_v2 = vcombine.low %v2255_v37, %v2259_v29 }
 0x532   : > { %v14671_v43 = vadd.f32 %v8851_v53, %v8811_v35  ;;  %9177 = vmatprep.mubr.bf16.mxu1 %v12179_v28  ;;  %v8813_v17 = vadd.f32 %v8812_v54, %v14485_v3  ;;  %v8853_v11 = vpop.f32.mrf.mxu1  ;;  %9106 = vmatprep.subr.bf16.mxu0 %v9833_v62  ;;  %v2275_v28 = vld [vmem:[%s15268_s6 + $0xd38] sm:$0xff]  ;;  %v9817_v4 = vcombine.high %v2143_v55, %v2147_v58 }
 0x533   : > { %v8814_v44 = vpop.f32.mrf.mxu0  ;;  %9147 = vmatprep.subr.bf16.mxu1 %v9961_v20  ;;  %v9945_v39 = vcombine.high %v2271_v22, %v2275_v28  ;;  %v9816_v50 = vcombine.low %v2143_v55, %v2147_v58  ;;  %v9944_v51 = vcombine.low %v2271_v22, %v2275_v28  ;;  %v2123_v63 = vld [vmem:[%s15268_s6 + $0x878] sm:$0xff] }
 0x534   : > { %v14687_v3 = vadd.f32 %v8853_v11, %v8813_v17  ;;  %v8855_v45 = vpop.f32.mrf.mxu1  ;;  %9107 = vmatpush1.bf16.msra.mxu0 %v9832_v40  ;;  %v2247_v62 = vld [vmem:[%s15268_s6 + $0xc58] sm:$0xff]  ;;  %v9793_v20 = vcombine.high %v2119_v47, %v2123_v63  ;;  %v9792_v54 = vcombine.low %v2119_v47, %v2123_v63 }
 0x535   : > { %9148 = vmatpush1.bf16.msra.mxu1 %v9960_v41  ;;  %v8815_v24 = vpop.f32.mrf.mxu0  ;;  %9108 = vmatprep.subr.bf16.mxu0 %v9825_v42  ;;  %v2251_v46 = vld [vmem:[%s15268_s6 + $0xc78] sm:$0xff] }
 0x536   : > { %v8856_v6 = vpop.f32.mrf.mxu1  ;;  %9149 = vmatprep.subr.bf16.mxu1 %v9953_v34  ;;  %v9921_v52 = vcombine.high %v2247_v62, %v2251_v46  ;;  %v2111_v32 = vld [vmem:[%s15268_s6 + $0x818] sm:$0xff]  ;;  %v9920_v41 = vcombine.low %v2247_v62, %v2251_v46 }
 0x537   : > { %v2115_v35 = vld [vmem:[%s15268_s6 + $0x838] sm:$0xff] }
 0x538   : > { %9109 = vmatpush1.bf16.msra.mxu0 %v9824_v23  ;;  %v2239_v53 = vld [vmem:[%s15268_s6 + $0xc18] sm:$0xff]  ;;  %v9785_v42 = vcombine.high %v2111_v32, %v2115_v35  ;;  %v9784_v44 = vcombine.low %v2111_v32, %v2115_v35 }
 0x539   : > { %9150 = vmatpush1.bf16.msra.mxu1 %v9952_v36  ;;  %9110 = vmatprep.subr.bf16.mxu0 %v9817_v4  ;;  %v2243_v40 = vld [vmem:[%s15268_s6 + $0xc38] sm:$0xff] }
 0x53a   : > { %9151 = vmatprep.subr.bf16.mxu1 %v9945_v39  ;;  %v9913_v17 = vcombine.high %v2239_v53, %v2243_v40  ;;  %v2231_v11 = vld [vmem:[%s15268_s6 + $0xbd8] sm:$0xff]  ;;  %v9912_v22 = vcombine.low %v2239_v53, %v2243_v40 }
 0x53b   : > { %v2235_v34 = vld [vmem:[%s15268_s6 + $0xbf8] sm:$0xff] }
 0x53c   : > { %9111 = vmatpush1.bf16.msra.mxu0 %v9816_v50  ;;  %v2359_v55 = vld [vmem:[%s15268_s6 + $0xfd8] sm:$0xff]  ;;  %v9905_v28 = vcombine.high %v2231_v11, %v2235_v34  ;;  %v9904_v6 = vcombine.low %v2231_v11, %v2235_v34 }
 0x53d   : > { %9152 = vmatpush1.bf16.msra.mxu1 %v9944_v51  ;;  %9112 = vmatprep.subr.bf16.mxu0 %v9809_v14  ;;  %v2363_v58 = vld [vmem:[%s15268_s6 + $0xff8] sm:$0xff] }
 0x53e   : > { %9153 = vmatprep.subr.bf16.mxu1 %v9937_v10  ;;  %v10033_v45 = vcombine.high %v2359_v55, %v2363_v58  ;;  %v2223_v23 = vld [vmem:[%s15268_s6 + $0xb98] sm:$0xff]  ;;  %v10032_v39 = vcombine.low %v2359_v55, %v2363_v58 }
 0x53f   : > { %v2227_v24 = vld [vmem:[%s15268_s6 + $0xbb8] sm:$0xff] }
 0x540   : > { %9113 = vmatpush1.bf16.msra.mxu0 %v9808_v7  ;;  %v2351_v36 = vld [vmem:[%s15268_s6 + $0xf98] sm:$0xff]  ;;  %v9897_v8 = vcombine.high %v2223_v23, %v2227_v24  ;;  %v9896_v14 = vcombine.low %v2223_v23, %v2227_v24 }
 0x541   : > { %9154 = vmatpush1.bf16.msra.mxu1 %v9936_v60  ;;  %9114 = vmatprep.subr.bf16.mxu0 %v9801_v61  ;;  %v2355_v4 = vld [vmem:[%s15268_s6 + $0xfb8] sm:$0xff] }
 0x542   : > { %9155 = vmatprep.subr.bf16.mxu1 %v9929_v18  ;;  %v10025_v9 = vcombine.high %v2351_v36, %v2355_v4  ;;  %v2215_v1 = vld [vmem:[%s15268_s6 + $0xb58] sm:$0xff]  ;;  %v10024_v10 = vcombine.low %v2351_v36, %v2355_v4 }
 0x543   : > { %v2219_v59 = vld [vmem:[%s15268_s6 + $0xb78] sm:$0xff] }
 0x544   : > { %9115 = vmatpush1.bf16.msra.mxu0 %v9800_v48  ;;  %v2343_v50 = vld [vmem:[%s15268_s6 + $0xf58] sm:$0xff]  ;;  %v9889_v26 = vcombine.high %v2215_v1, %v2219_v59  ;;  %v9888_v61 = vcombine.low %v2215_v1, %v2219_v59 }
 0x545   : > { %9156 = vmatpush1.bf16.msra.mxu1 %v9928_v2  ;;  %9116 = vmatprep.subr.bf16.mxu0 %v9793_v20  ;;  %v2347_v51 = vld [vmem:[%s15268_s6 + $0xf78] sm:$0xff] }
 0x546   : > { %9157 = vmatprep.subr.bf16.mxu1 %v9921_v52  ;;  %v10017_v27 = vcombine.high %v2343_v50, %v2347_v51  ;;  %v2207_v37 = vld [vmem:[%s15268_s6 + $0xb18] sm:$0xff]  ;;  %v10016_v18 = vcombine.low %v2343_v50, %v2347_v51 }
 0x547   : > { %v2211_v29 = vld [vmem:[%s15268_s6 + $0xb38] sm:$0xff] }
 0x548   : > { %9117 = vmatpush1.bf16.msra.mxu0 %v9792_v54  ;;  %v2335_v7 = vld [vmem:[%s15268_s6 + $0xf18] sm:$0xff]  ;;  %v9881_v47 = vcombine.high %v2207_v37, %v2211_v29  ;;  %v9880_v20 = vcombine.low %v2207_v37, %v2211_v29 }
 0x549   : > { %9158 = vmatpush1.bf16.msra.mxu1 %v9920_v41  ;;  %9118 = vmatprep.subr.bf16.mxu0 %v9785_v42  ;;  %v2339_v60 = vld [vmem:[%s15268_s6 + $0xf38] sm:$0xff] }
 0x54a   : > { %9159 = vmatprep.subr.bf16.mxu1 %v9913_v17  ;;  %v10009_v63 = vcombine.high %v2335_v7, %v2339_v60  ;;  %v2199_v62 = vld [vmem:[%s15268_s6 + $0xad8] sm:$0xff]  ;;  %v10008_v52 = vcombine.low %v2335_v7, %v2339_v60 }
 0x54b   : > { %v2203_v46 = vld [vmem:[%s15268_s6 + $0xaf8] sm:$0xff] }
 0x54c   : > { %9119 = vmatpush1.bf16.msra.mxu0 %v9784_v44  ;;  %v2327_v48 = vld [vmem:[%s15268_s6 + $0xed8] sm:$0xff]  ;;  %v9873_v32 = vcombine.high %v2199_v62, %v2203_v46  ;;  %v9872_v42 = vcombine.low %v2199_v62, %v2203_v46 }
 0x54d   : > { %9160 = vmatpush1.bf16.msra.mxu1 %v9912_v22  ;;  %9120 = vmatprep.subr.bf16.mxu0 %v9905_v28  ;;  %v2331_v2 = vld [vmem:[%s15268_s6 + $0xef8] sm:$0xff] }
 0x54e   : > { %9161 = vmatprep.subr.bf16.mxu1 %v10033_v45  ;;  %v10001_v35 = vcombine.high %v2327_v48, %v2331_v2  ;;  %v2191_v53 = vld [vmem:[%s15268_s6 + $0xa98] sm:$0xff]  ;;  %v10000_v17 = vcombine.low %v2327_v48, %v2331_v2 }
 0x54f   : > { %v2195_v40 = vld [vmem:[%s15268_s6 + $0xab8] sm:$0xff] }
 0x550   : > { %9121 = vmatpush2.bf16.msra.mxu0 %v9904_v6  ;;  %v2319_v54 = vld [vmem:[%s15268_s6 + $0xe98] sm:$0xff]  ;;  %v9865_v11 = vcombine.high %v2191_v53, %v2195_v40  ;;  %v9864_v28 = vcombine.low %v2191_v53, %v2195_v40 }
 0x551   : > { %9162 = vmatpush2.bf16.msra.mxu1 %v10032_v39  ;;  %9122 = vmatprep.subr.bf16.mxu0 %v9897_v8  ;;  %v2323_v41 = vld [vmem:[%s15268_s6 + $0xeb8] sm:$0xff] }
 0x552   : > { %9163 = vmatprep.subr.bf16.mxu1 %v10025_v9  ;;  %v9993_v34 = vcombine.high %v2319_v54, %v2323_v41  ;;  %v2183_v55 = vld [vmem:[%s15268_s6 + $0xa58] sm:$0xff]  ;;  %v9992_v45 = vcombine.low %v2319_v54, %v2323_v41 }
 0x553   : > { %v2187_v58 = vld [vmem:[%s15268_s6 + $0xa78] sm:$0xff] }
 0x554   : > { %9123 = vmatpush2.bf16.msra.mxu0 %v9896_v14  ;;  %v2311_v44 = vld [vmem:[%s15268_s6 + $0xe58] sm:$0xff]  ;;  %v9857_v23 = vcombine.high %v2183_v55, %v2187_v58  ;;  %v9856_v8 = vcombine.low %v2183_v55, %v2187_v58 }
 0x555   : > { %9164 = vmatpush2.bf16.msra.mxu1 %v10024_v10  ;;  %9124 = vmatprep.subr.bf16.mxu0 %v9889_v26  ;;  %v2315_v22 = vld [vmem:[%s15268_s6 + $0xe78] sm:$0xff] }
 0x556   : > { %9165 = vmatprep.subr.bf16.mxu1 %v10017_v27  ;;  %v9985_v24 = vcombine.high %v2311_v44, %v2315_v22  ;;  %v2175_v36 = vld [vmem:[%s15268_s6 + $0xa18] sm:$0xff]  ;;  %v9984_v9 = vcombine.low %v2311_v44, %v2315_v22 }
 0x557   : > { %v2179_v4 = vld [vmem:[%s15268_s6 + $0xa38] sm:$0xff] }
 0x558   : > { %9125 = vmatpush2.bf16.msra.mxu0 %v9888_v61  ;;  %v2303_v6 = vld [vmem:[%s15268_s6 + $0xe18] sm:$0xff]  ;;  %v9849_v1 = vcombine.high %v2175_v36, %v2179_v4  ;;  %v9848_v26 = vcombine.low %v2175_v36, %v2179_v4 }
 0x559   : > { %9166 = vmatpush2.bf16.msra.mxu1 %v10016_v18  ;;  %9126 = vmatprep.subr.bf16.mxu0 %v9881_v47  ;;  %v2307_v39 = vld [vmem:[%s15268_s6 + $0xe38] sm:$0xff] }
 0x55a   : > { %9167 = vmatprep.subr.bf16.mxu1 %v10009_v63  ;;  %v9977_v59 = vcombine.high %v2303_v6, %v2307_v39  ;;  %v2423_v50 = vld [vmem:[%s15268_s6 + $0x11d8] sm:$0xff]  ;;  %v9976_v27 = vcombine.low %v2303_v6, %v2307_v39 }
 0x55b   : > { %v2427_v51 = vld [vmem:[%s15268_s6 + $0x11f8] sm:$0xff] }
 0x55c   : > { %9127 = vmatpush2.bf16.msra.mxu0 %v9880_v20  ;;  %v2551_v14 = vld [vmem:[%s15268_s6 + $0x15d8] sm:$0xff]  ;;  %v10097_v37 = vcombine.high %v2423_v50, %v2427_v51  ;;  %v10096_v61 = vcombine.low %v2423_v50, %v2427_v51 }
 0x55d   : > { %9168 = vmatpush2.bf16.msra.mxu1 %v10008_v52  ;;  %9128 = vmatprep.subr.bf16.mxu0 %v9873_v32  ;;  %v2555_v10 = vld [vmem:[%s15268_s6 + $0x15f8] sm:$0xff] }
 0x55e   : > { %9169 = vmatprep.subr.bf16.mxu1 %v10001_v35  ;;  %v10225_v29 = vcombine.high %v2551_v14, %v2555_v10  ;;  %v2415_v7 = vld [vmem:[%s15268_s6 + $0x1198] sm:$0xff]  ;;  %v10224_v63 = vcombine.low %v2551_v14, %v2555_v10 }
 0x55f   : > { %v2419_v60 = vld [vmem:[%s15268_s6 + $0x11b8] sm:$0xff] }
 0x560   : > { %9129 = vmatpush2.bf16.msra.mxu0 %v9872_v42  ;;  %v2543_v18 = vld [vmem:[%s15268_s6 + $0x1598] sm:$0xff]  ;;  %v10089_v62 = vcombine.high %v2415_v7, %v2419_v60  ;;  %v10088_v40 = vcombine.low %v2415_v7, %v2419_v60 }
 0x561   : > { %9170 = vmatpush2.bf16.msra.mxu1 %v10000_v17  ;;  %9130 = vmatprep.subr.bf16.mxu0 %v9865_v11  ;;  %v2547_v47 = vld [vmem:[%s15268_s6 + $0x15b8] sm:$0xff] }
 0x562   : > { %9171 = vmatprep.subr.bf16.mxu1 %v9993_v34  ;;  %v2407_v46 = vld [vmem:[%s15268_s6 + $0x1158] sm:$0xff]  ;;  %v10217_v20 = vcombine.high %v2543_v18, %v2547_v47  ;;  %v10216_v54 = vcombine.low %v2543_v18, %v2547_v47 }
 0x563   : > { %v2411_v48 = vld [vmem:[%s15268_s6 + $0x1178] sm:$0xff] }
 0x564   : > { %9131 = vmatpush2.bf16.msra.mxu0 %v9864_v28  ;;  %v2535_v52 = vld [vmem:[%s15268_s6 + $0x1558] sm:$0xff]  ;;  %v10081_v41 = vcombine.high %v2407_v46, %v2411_v48  ;;  %v10080_v44 = vcombine.low %v2407_v46, %v2411_v48 }
 0x565   : > { %9172 = vmatpush2.bf16.msra.mxu1 %v9992_v45  ;;  %9132 = vmatprep.subr.bf16.mxu0 %v9857_v23  ;;  %v2539_v32 = vld [vmem:[%s15268_s6 + $0x1578] sm:$0xff] }
 0x566   : > { %9173 = vmatprep.subr.bf16.mxu1 %v9985_v24  ;;  %v2527_v55 = vld [vmem:[%s15268_s6 + $0x1518] sm:$0xff]  ;;  %v10208_v28 = vcombine.low %v2535_v52, %v2539_v32 }
 0x567   : > { %v2391_v36 = vld [vmem:[%s15268_s6 + $0x10d8] sm:$0xff] }
 0x568   : > { %9133 = vmatpush2.bf16.msra.mxu0 %v9856_v8  ;;  %v2395_v4 = vld [vmem:[%s15268_s6 + $0x10f8] sm:$0xff] }
 0x569   : > { %9174 = vmatpush2.bf16.msra.mxu1 %v9984_v9  ;;  %9134 = vmatprep.subr.bf16.mxu0 %v9849_v1  ;;  %v2519_v6 = vld [vmem:[%s15268_s6 + $0x14d8] sm:$0xff]  ;;  %v10065_v1 = vcombine.high %v2391_v36, %v2395_v4 }
 0x56a   : > { %9175 = vmatprep.subr.bf16.mxu1 %v9977_v59  ;;  %v2523_v39 = vld [vmem:[%s15268_s6 + $0x14f8] sm:$0xff] }
 0x56b   : > { %v10193_v59 = vcombine.high %v2519_v6, %v2523_v39  ;;  %v2383_v50 = vld [vmem:[%s15268_s6 + $0x1098] sm:$0xff] }
 0x56c   : > { %9135 = vmatpush2.bf16.msra.mxu0 %v9848_v26  ;;  %v2387_v51 = vld [vmem:[%s15268_s6 + $0x10b8] sm:$0xff]  ;;  %v10064_v26 = vcombine.low %v2391_v36, %v2395_v4 }
 0x56d   : > { %9176 = vmatpush2.bf16.msra.mxu1 %v9976_v27  ;;  %9186 = vmatprep.subr.bf16.mxu0 %v10097_v37  ;;  %v2511_v14 = vld [vmem:[%s15268_s6 + $0x1498] sm:$0xff]  ;;  %v10192_v27 = vcombine.low %v2519_v6, %v2523_v39  ;;  %v10057_v37 = vcombine.high %v2383_v50, %v2387_v51  ;;  %v10056_v47 = vcombine.low %v2383_v50, %v2387_v51 }
 0x56e   : > { %9227 = vmatprep.subr.bf16.mxu1 %v10225_v29  ;;  %v2515_v10 = vld [vmem:[%s15268_s6 + $0x14b8] sm:$0xff] }
 0x56f   : > { %v8892_v2 = vpop.f32.mrf.mxu0  ;;  %9137 = vmatmul.mubr.bf16.vlgmr.msra.gmra.mxu0 %v12388_v19  ;;  %v10185_v29 = vcombine.high %v2511_v14, %v2515_v10  ;;  %v2375_v7 = vld [vmem:[%s15268_s6 + $0x1058] sm:$0xff] }
 0x570   : > { %v8893_v35 = vadd.f32 %v8892_v2, %v14671_v43  ;;  %v8933_v53 = vpop.f32.mrf.mxu1  ;;  %9178 = vmatmul.mubr.bf16.vlgmr.msra.gmra.mxu1 %v12390_v25  ;;  %9187 = vmatpush1.bf16.msra.mxu0 %v10096_v61  ;;  %v10209_v43 = vcombine.high %v2535_v52, %v2539_v32  ;;  %v2399_v25 = vld [vmem:[%s15268_s6 + $0x1118] sm:$0xff] }
 0x571   : > { %9218 = vmatprep.mubr.bf16.mxu0 %v12398_v49  ;;  %9228 = vmatpush1.bf16.msra.mxu1 %v10224_v63  ;;  %v8894_v19 = vpop.f32.mrf.mxu0  ;;  %v2403_v49 = vld [vmem:[%s15268_s6 + $0x1138] sm:$0xff]  ;;  %v10184_v63 = vcombine.low %v2511_v14, %v2515_v10 }
 0x572   : > { %v14873_v42 = vadd.f32 %v8933_v53, %v8893_v35  ;;  %9259 = vmatprep.mubr.bf16.mxu1 %v12407_v31  ;;  %v8895_v17 = vadd.f32 %v8894_v19, %v14687_v3  ;;  %v8935_v11 = vpop.f32.mrf.mxu1  ;;  %9188 = vmatprep.subr.bf16.mxu0 %v10089_v62  ;;  %v2531_v31 = vld [vmem:[%s15268_s6 + $0x1538] sm:$0xff]  ;;  %v10073_v45 = vcombine.high %v2399_v25, %v2403_v49 }
 0x573   : > { %v8896_v34 = vpop.f32.mrf.mxu0  ;;  %9229 = vmatprep.subr.bf16.mxu1 %v10217_v20  ;;  %v10201_v24 = vcombine.high %v2527_v55, %v2531_v31  ;;  %v10072_v8 = vcombine.low %v2399_v25, %v2403_v49  ;;  %v10200_v9 = vcombine.low %v2527_v55, %v2531_v31  ;;  %v2379_v60 = vld [vmem:[%s15268_s6 + $0x1078] sm:$0xff] }
 0x574   : > { %v14889_v3 = vadd.f32 %v8935_v11, %v8895_v17  ;;  %v8937_v58 = vpop.f32.mrf.mxu1  ;;  %9189 = vmatpush1.bf16.msra.mxu0 %v10088_v40  ;;  %v2503_v61 = vld [vmem:[%s15268_s6 + $0x1458] sm:$0xff]  ;;  %v10049_v62 = vcombine.high %v2375_v7, %v2379_v60  ;;  %v10048_v32 = vcombine.low %v2375_v7, %v2379_v60 }
 0x575   : > { %9230 = vmatpush1.bf16.msra.mxu1 %v10216_v54  ;;  %v8897_v22 = vpop.f32.mrf.mxu0  ;;  %9190 = vmatprep.subr.bf16.mxu0 %v10081_v41  ;;  %v2507_v18 = vld [vmem:[%s15268_s6 + $0x1478] sm:$0xff] }
 0x576   : > { %v8938_v23 = vpop.f32.mrf.mxu1  ;;  %9231 = vmatprep.subr.bf16.mxu1 %v10209_v43  ;;  %v10177_v46 = vcombine.high %v2503_v61, %v2507_v18  ;;  %v2367_v48 = vld [vmem:[%s15268_s6 + $0x1018] sm:$0xff]  ;;  %v10176_v35 = vcombine.low %v2503_v61, %v2507_v18 }
 0x577   : > { %v2371_v2 = vld [vmem:[%s15268_s6 + $0x1038] sm:$0xff] }
 0x578   : > { %9191 = vmatpush1.bf16.msra.mxu0 %v10080_v44  ;;  %v2495_v20 = vld [vmem:[%s15268_s6 + $0x1418] sm:$0xff]  ;;  %v10041_v53 = vcombine.high %v2367_v48, %v2371_v2  ;;  %v10040_v11 = vcombine.low %v2367_v48, %v2371_v2 }
 0x579   : > { %9232 = vmatpush1.bf16.msra.mxu1 %v10208_v28  ;;  %9192 = vmatprep.subr.bf16.mxu0 %v10073_v45  ;;  %v2499_v52 = vld [vmem:[%s15268_s6 + $0x1438] sm:$0xff] }
 0x57a   : > { %9233 = vmatprep.subr.bf16.mxu1 %v10201_v24  ;;  %v10169_v40 = vcombine.high %v2495_v20, %v2499_v52  ;;  %v2487_v19 = vld [vmem:[%s15268_s6 + $0x13d8] sm:$0xff]  ;;  %v10168_v43 = vcombine.low %v2495_v20, %v2499_v52 }
 0x57b   : > { %v2491_v54 = vld [vmem:[%s15268_s6 + $0x13f8] sm:$0xff] }
 0x57c   : > { %9193 = vmatpush1.bf16.msra.mxu0 %v10072_v8  ;;  %v2615_v41 = vld [vmem:[%s15268_s6 + $0x17d8] sm:$0xff]  ;;  %v10161_v25 = vcombine.high %v2487_v19, %v2491_v54  ;;  %v10160_v44 = vcombine.low %v2487_v19, %v2491_v54 }
 0x57d   : > { %9234 = vmatpush1.bf16.msra.mxu1 %v10200_v9  ;;  %9194 = vmatprep.subr.bf16.mxu0 %v10065_v1  ;;  %v2619_v17 = vld [vmem:[%s15268_s6 + $0x17f8] sm:$0xff] }
 0x57e   : > { %9235 = vmatprep.subr.bf16.mxu1 %v10193_v59  ;;  %v10289_v49 = vcombine.high %v2615_v41, %v2619_v17  ;;  %v2479_v34 = vld [vmem:[%s15268_s6 + $0x1398] sm:$0xff]  ;;  %v10288_v22 = vcombine.low %v2615_v41, %v2619_v17 }
 0x57f   : > { %v2483_v55 = vld [vmem:[%s15268_s6 + $0x13b8] sm:$0xff] }
 0x580   : > { %9195 = vmatpush1.bf16.msra.mxu0 %v10064_v26  ;;  %v2607_v31 = vld [vmem:[%s15268_s6 + $0x1798] sm:$0xff]  ;;  %v10153_v28 = vcombine.high %v2479_v34, %v2483_v55  ;;  %v10152_v6 = vcombine.low %v2479_v34, %v2483_v55 }
 0x581   : > { %9236 = vmatpush1.bf16.msra.mxu1 %v10192_v27  ;;  %9196 = vmatprep.subr.bf16.mxu0 %v10057_v37  ;;  %v2611_v58 = vld [vmem:[%s15268_s6 + $0x17b8] sm:$0xff] }
 0x582   : > { %9237 = vmatprep.subr.bf16.mxu1 %v10185_v29  ;;  %v10281_v45 = vcombine.high %v2607_v31, %v2611_v58  ;;  %v2471_v23 = vld [vmem:[%s15268_s6 + $0x1358] sm:$0xff]  ;;  %v10280_v39 = vcombine.low %v2607_v31, %v2611_v58 }
 0x583   : > { %v2475_v24 = vld [vmem:[%s15268_s6 + $0x1378] sm:$0xff] }
 0x584   : > { %9197 = vmatpush1.bf16.msra.mxu0 %v10056_v47  ;;  %v2599_v36 = vld [vmem:[%s15268_s6 + $0x1758] sm:$0xff]  ;;  %v10145_v8 = vcombine.high %v2471_v23, %v2475_v24  ;;  %v10144_v14 = vcombine.low %v2471_v23, %v2475_v24 }
 0x585   : > { %9238 = vmatpush1.bf16.msra.mxu1 %v10184_v63  ;;  %9198 = vmatprep.subr.bf16.mxu0 %v10049_v62  ;;  %v2603_v4 = vld [vmem:[%s15268_s6 + $0x1778] sm:$0xff] }
 0x586   : > { %9239 = vmatprep.subr.bf16.mxu1 %v10177_v46  ;;  %v10273_v9 = vcombine.high %v2599_v36, %v2603_v4  ;;  %v2463_v1 = vld [vmem:[%s15268_s6 + $0x1318] sm:$0xff]  ;;  %v10272_v10 = vcombine.low %v2599_v36, %v2603_v4 }
 0x587   : > { %v2467_v59 = vld [vmem:[%s15268_s6 + $0x1338] sm:$0xff] }
 0x588   : > { %9199 = vmatpush1.bf16.msra.mxu0 %v10048_v32  ;;  %v2591_v50 = vld [vmem:[%s15268_s6 + $0x1718] sm:$0xff]  ;;  %v10137_v26 = vcombine.high %v2463_v1, %v2467_v59  ;;  %v10136_v61 = vcombine.low %v2463_v1, %v2467_v59 }
 0x589   : > { %9240 = vmatpush1.bf16.msra.mxu1 %v10176_v35  ;;  %9200 = vmatprep.subr.bf16.mxu0 %v10041_v53  ;;  %v2595_v51 = vld [vmem:[%s15268_s6 + $0x1738] sm:$0xff] }
 0x58a   : > { %9241 = vmatprep.subr.bf16.mxu1 %v10169_v40  ;;  %v10265_v27 = vcombine.high %v2591_v50, %v2595_v51  ;;  %v2455_v37 = vld [vmem:[%s15268_s6 + $0x12d8] sm:$0xff]  ;;  %v10264_v18 = vcombine.low %v2591_v50, %v2595_v51 }
 0x58b   : > { %v2459_v29 = vld [vmem:[%s15268_s6 + $0x12f8] sm:$0xff] }
 0x58c   : > { %9201 = vmatpush1.bf16.msra.mxu0 %v10040_v11  ;;  %v2583_v7 = vld [vmem:[%s15268_s6 + $0x16d8] sm:$0xff]  ;;  %v10129_v47 = vcombine.high %v2455_v37, %v2459_v29  ;;  %v10128_v20 = vcombine.low %v2455_v37, %v2459_v29 }
 0x58d   : > { %9242 = vmatpush1.bf16.msra.mxu1 %v10168_v43  ;;  %9202 = vmatprep.subr.bf16.mxu0 %v10161_v25  ;;  %v2587_v60 = vld [vmem:[%s15268_s6 + $0x16f8] sm:$0xff] }
 0x58e   : > { %9243 = vmatprep.subr.bf16.mxu1 %v10289_v49  ;;  %v10257_v63 = vcombine.high %v2583_v7, %v2587_v60  ;;  %v2447_v62 = vld [vmem:[%s15268_s6 + $0x1298] sm:$0xff]  ;;  %v10256_v52 = vcombine.low %v2583_v7, %v2587_v60 }
 0x58f   : > { %v2451_v46 = vld [vmem:[%s15268_s6 + $0x12b8] sm:$0xff] }
 0x590   : > { %9203 = vmatpush2.bf16.msra.mxu0 %v10160_v44  ;;  %v2575_v48 = vld [vmem:[%s15268_s6 + $0x1698] sm:$0xff]  ;;  %v10121_v32 = vcombine.high %v2447_v62, %v2451_v46  ;;  %v10120_v41 = vcombine.low %v2447_v62, %v2451_v46 }
 0x591   : > { %9244 = vmatpush2.bf16.msra.mxu1 %v10288_v22  ;;  %9204 = vmatprep.subr.bf16.mxu0 %v10153_v28  ;;  %v2579_v2 = vld [vmem:[%s15268_s6 + $0x16b8] sm:$0xff] }
 0x592   : > { %9245 = vmatprep.subr.bf16.mxu1 %v10281_v45  ;;  %v10249_v35 = vcombine.high %v2575_v48, %v2579_v2  ;;  %v2439_v53 = vld [vmem:[%s15268_s6 + $0x1258] sm:$0xff]  ;;  %v10248_v17 = vcombine.low %v2575_v48, %v2579_v2 }
 0x593   : > { %v2443_v40 = vld [vmem:[%s15268_s6 + $0x1278] sm:$0xff] }
 0x594   : > { %9205 = vmatpush2.bf16.msra.mxu0 %v10152_v6  ;;  %v2567_v19 = vld [vmem:[%s15268_s6 + $0x1658] sm:$0xff]  ;;  %v10113_v11 = vcombine.high %v2439_v53, %v2443_v40  ;;  %v10112_v31 = vcombine.low %v2439_v53, %v2443_v40 }
 0x595   : > { %9246 = vmatpush2.bf16.msra.mxu1 %v10280_v39  ;;  %9206 = vmatprep.subr.bf16.mxu0 %v10145_v8  ;;  %v2571_v54 = vld [vmem:[%s15268_s6 + $0x1678] sm:$0xff] }
 0x596   : > { %9247 = vmatprep.subr.bf16.mxu1 %v10273_v9  ;;  %v10241_v43 = vcombine.high %v2567_v19, %v2571_v54  ;;  %v2431_v25 = vld [vmem:[%s15268_s6 + $0x1218] sm:$0xff]  ;;  %v10240_v58 = vcombine.low %v2567_v19, %v2571_v54 }
 0x597   : > { %v2435_v49 = vld [vmem:[%s15268_s6 + $0x1238] sm:$0xff] }
 0x598   : > { %9207 = vmatpush2.bf16.msra.mxu0 %v10144_v14  ;;  %v2559_v34 = vld [vmem:[%s15268_s6 + $0x1618] sm:$0xff]  ;;  %v10105_v44 = vcombine.high %v2431_v25, %v2435_v49  ;;  %v10104_v36 = vcombine.low %v2431_v25, %v2435_v49 }
 0x599   : > { %9248 = vmatpush2.bf16.msra.mxu1 %v10272_v10  ;;  %9208 = vmatprep.subr.bf16.mxu0 %v10137_v26  ;;  %v2563_v55 = vld [vmem:[%s15268_s6 + $0x1638] sm:$0xff] }
 0x59a   : > { %9249 = vmatprep.subr.bf16.mxu1 %v10265_v27  ;;  %v10233_v22 = vcombine.high %v2559_v34, %v2563_v55  ;;  %v2679_v28 = vld [vmem:[%s15268_s6 + $0x19d8] sm:$0xff]  ;;  %v10232_v4 = vcombine.low %v2559_v34, %v2563_v55 }
 0x59b   : > { %v2683_v45 = vld [vmem:[%s15268_s6 + $0x19f8] sm:$0xff] }
 0x59c   : > { %9209 = vmatpush2.bf16.msra.mxu0 %v10136_v61  ;;  %v2807_v23 = vld [vmem:[%s15268_s6 + $0x1dd8] sm:$0xff]  ;;  %v10353_v6 = vcombine.high %v2679_v28, %v2683_v45  ;;  %v10352_v1 = vcombine.low %v2679_v28, %v2683_v45 }
 0x59d   : > { %9250 = vmatpush2.bf16.msra.mxu1 %v10264_v18  ;;  %9210 = vmatprep.subr.bf16.mxu0 %v10129_v47  ;;  %v2811_v24 = vld [vmem:[%s15268_s6 + $0x1df8] sm:$0xff] }
 0x59e   : > { %9251 = vmatprep.subr.bf16.mxu1 %v10257_v63  ;;  %v10481_v39 = vcombine.high %v2807_v23, %v2811_v24  ;;  %v2671_v8 = vld [vmem:[%s15268_s6 + $0x1998] sm:$0xff]  ;;  %v10480_v51 = vcombine.low %v2807_v23, %v2811_v24 }
 0x59f   : > { %v2675_v9 = vld [vmem:[%s15268_s6 + $0x19b8] sm:$0xff] }
 0x5a0   : > { %9211 = vmatpush2.bf16.msra.mxu0 %v10128_v20  ;;  %v2799_v59 = vld [vmem:[%s15268_s6 + $0x1d98] sm:$0xff]  ;;  %v10345_v14 = vcombine.high %v2671_v8, %v2675_v9  ;;  %v10344_v18 = vcombine.low %v2671_v8, %v2675_v9 }
 0x5a1   : > { %9252 = vmatpush2.bf16.msra.mxu1 %v10256_v52  ;;  %9212 = vmatprep.subr.bf16.mxu0 %v10121_v32  ;;  %v2803_v50 = vld [vmem:[%s15268_s6 + $0x1db8] sm:$0xff] }
 0x5a2   : > { %9253 = vmatprep.subr.bf16.mxu1 %v10249_v35  ;;  %v2663_v10 = vld [vmem:[%s15268_s6 + $0x1958] sm:$0xff]  ;;  %v10473_v37 = vcombine.high %v2799_v59, %v2803_v50  ;;  %v10472_v47 = vcombine.low %v2799_v59, %v2803_v50 }
 0x5a3   : > { %v2667_v26 = vld [vmem:[%s15268_s6 + $0x1978] sm:$0xff] }
 0x5a4   : > { %9213 = vmatpush2.bf16.msra.mxu0 %v10120_v41  ;;  %v2791_v29 = vld [vmem:[%s15268_s6 + $0x1d58] sm:$0xff]  ;;  %v10337_v63 = vcombine.high %v2663_v10, %v2667_v26  ;;  %v10336_v32 = vcombine.low %v2663_v10, %v2667_v26 }
 0x5a5   : > { %9254 = vmatpush2.bf16.msra.mxu1 %v10248_v17  ;;  %9214 = vmatprep.subr.bf16.mxu0 %v10113_v11  ;;  %v2795_v7 = vld [vmem:[%s15268_s6 + $0x1d78] sm:$0xff] }
 0x5a6   : > { %9255 = vmatprep.subr.bf16.mxu1 %v10241_v43  ;;  %v2783_v20 = vld [vmem:[%s15268_s6 + $0x1d18] sm:$0xff]  ;;  %v10464_v53 = vcombine.low %v2791_v29, %v2795_v7 }
 0x5a7   : > { %v2647_v17 = vld [vmem:[%s15268_s6 + $0x18d8] sm:$0xff] }
 0x5a8   : > { %9215 = vmatpush2.bf16.msra.mxu0 %v10112_v31  ;;  %v2651_v11 = vld [vmem:[%s15268_s6 + $0x18f8] sm:$0xff] }
 0x5a9   : > { %9256 = vmatpush2.bf16.msra.mxu1 %v10240_v58  ;;  %9216 = vmatprep.subr.bf16.mxu0 %v10105_v44  ;;  %v2775_v43 = vld [vmem:[%s15268_s6 + $0x1cd8] sm:$0xff]  ;;  %v10321_v55 = vcombine.high %v2647_v17, %v2651_v11  ;;  %v10320_v45 = vcombine.low %v2647_v17, %v2651_v11 }
 0x5aa   : > { %9257 = vmatprep.subr.bf16.mxu1 %v10233_v22  ;;  %v2779_v25 = vld [vmem:[%s15268_s6 + $0x1cf8] sm:$0xff] }
 0x5ab   : > { %v10449_v31 = vcombine.high %v2775_v43, %v2779_v25  ;;  %v2639_v58 = vld [vmem:[%s15268_s6 + $0x1898] sm:$0xff]  ;;  %v10448_v23 = vcombine.low %v2775_v43, %v2779_v25 }
 0x5ac   : > { %9217 = vmatpush2.bf16.msra.mxu0 %v10104_v36  ;;  %v2643_v44 = vld [vmem:[%s15268_s6 + $0x18b8] sm:$0xff] }
 0x5ad   : > { %9258 = vmatpush2.bf16.msra.mxu1 %v10232_v4  ;;  %9268 = vmatprep.subr.bf16.mxu0 %v10353_v6  ;;  %v2767_v22 = vld [vmem:[%s15268_s6 + $0x1c98] sm:$0xff]  ;;  %v10313_v24 = vcombine.high %v2639_v58, %v2643_v44  ;;  %v10312_v9 = vcombine.low %v2639_v58, %v2643_v44 }
 0x5ae   : > { %9309 = vmatprep.subr.bf16.mxu1 %v10481_v39  ;;  %v2771_v28 = vld [vmem:[%s15268_s6 + $0x1cb8] sm:$0xff] }
 0x5af   : > { %v8974_v27 = vpop.f32.mrf.mxu0  ;;  %9219 = vmatmul.mubr.bf16.vlgmr.msra.gmra.mxu0 %v12602_v30  ;;  %v10441_v36 = vcombine.high %v2767_v22, %v2771_v28  ;;  %v2631_v4 = vld [vmem:[%s15268_s6 + $0x1858] sm:$0xff] }
 0x5b0   : > { %v8975_v60 = vadd.f32 %v8974_v27, %v14873_v42  ;;  %v9015_v61 = vpop.f32.mrf.mxu1  ;;  %9260 = vmatmul.mubr.bf16.vlgmr.msra.gmra.mxu1 %v12604_v57  ;;  %9269 = vmatpush1.bf16.msra.mxu0 %v10352_v1  ;;  %v10465_v42 = vcombine.high %v2791_v29, %v2795_v7  ;;  %v2655_v57 = vld [vmem:[%s15268_s6 + $0x1918] sm:$0xff]  ;;  %v10440_v1 = vcombine.low %v2767_v22, %v2771_v28 }
 0x5b1   : > { %9300 = vmatprep.mubr.bf16.mxu0 %v12612_v0  ;;  %9310 = vmatpush1.bf16.msra.mxu1 %v10480_v51  ;;  %v8976_v30 = vpop.f32.mrf.mxu0  ;;  %v2659_v0 = vld [vmem:[%s15268_s6 + $0x1938] sm:$0xff] }
 0x5b2   : > { %v15075_v62 = vadd.f32 %v9015_v61, %v8975_v60  ;;  %9341 = vmatprep.mubr.bf16.mxu1 %v12621_v5  ;;  %v8977_v46 = vadd.f32 %v8976_v30, %v14889_v3  ;;  %v9017_v48 = vpop.f32.mrf.mxu1  ;;  %9270 = vmatprep.subr.bf16.mxu0 %v10345_v14  ;;  %v2787_v5 = vld [vmem:[%s15268_s6 + $0x1d38] sm:$0xff]  ;;  %v10329_v40 = vcombine.high %v2655_v57, %v2659_v0 }
 0x5b3   : > { %v8978_v2 = vpop.f32.mrf.mxu0  ;;  %9311 = vmatprep.subr.bf16.mxu1 %v10473_v37  ;;  %v10457_v41 = vcombine.high %v2783_v20, %v2787_v5  ;;  %v10328_v49 = vcombine.low %v2655_v57, %v2659_v0  ;;  %v10456_v34 = vcombine.low %v2783_v20, %v2787_v5  ;;  %v2635_v6 = vld [vmem:[%s15268_s6 + $0x1878] sm:$0xff] }
 0x5b4   : > { %v15091_v3 = vadd.f32 %v9017_v48, %v8977_v46  ;;  %v9019_v52 = vpop.f32.mrf.mxu1  ;;  %9271 = vmatpush1.bf16.msra.mxu0 %v10344_v18  ;;  %v2759_v39 = vld [vmem:[%s15268_s6 + $0x1c58] sm:$0xff]  ;;  %v10305_v59 = vcombine.high %v2631_v4, %v2635_v6  ;;  %v10304_v27 = vcombine.low %v2631_v4, %v2635_v6 }
 0x5b5   : > { %9312 = vmatpush1.bf16.msra.mxu1 %v10472_v47  ;;  %v8979_v35 = vpop.f32.mrf.mxu0  ;;  %9272 = vmatprep.subr.bf16.mxu0 %v10337_v63  ;;  %v2763_v8 = vld [vmem:[%s15268_s6 + $0x1c78] sm:$0xff] }
 0x5b6   : > { %v9360_v19 = vcombine.low %v15075_v62, %v15091_v3  ;;  %v9020_v54 = vpop.f32.mrf.mxu1  ;;  %9313 = vmatprep.subr.bf16.mxu1 %v10465_v42  ;;  %v10433_v50 = vcombine.high %v2759_v39, %v2763_v8  ;;  %v2623_v51 = vld [vmem:[%s15268_s6 + $0x1818] sm:$0xff]  ;;  %v10432_v37 = vcombine.low %v2759_v39, %v2763_v8 }
 0x5b7   : > { %v2627_v14 = vld [vmem:[%s15268_s6 + $0x1838] sm:$0xff] }
 0x5b8   : > { %9273 = vmatpush1.bf16.msra.mxu0 %v10336_v32  ;;  %v2751_v10 = vld [vmem:[%s15268_s6 + $0x1c18] sm:$0xff]  ;;  %v10297_v29 = vcombine.high %v2623_v51, %v2627_v14  ;;  %v10296_v47 = vcombine.low %v2623_v51, %v2627_v14 }
 0x5b9   : > { %9314 = vmatpush1.bf16.msra.mxu1 %v10464_v53  ;;  %9274 = vmatprep.subr.bf16.mxu0 %v10329_v40  ;;  %v2755_v26 = vld [vmem:[%s15268_s6 + $0x1c38] sm:$0xff] }
 0x5ba   : > { %9315 = vmatprep.subr.bf16.mxu1 %v10457_v41  ;;  %v10425_v7 = vcombine.high %v2751_v10, %v2755_v26  ;;  %v2743_v60 = vld [vmem:[%s15268_s6 + $0x1bd8] sm:$0xff]  ;;  %v10424_v63 = vcombine.low %v2751_v10, %v2755_v26 }
 0x5bb   : > { %v2747_v61 = vld [vmem:[%s15268_s6 + $0x1bf8] sm:$0xff] }
 0x5bc   : > { %9275 = vmatpush1.bf16.msra.mxu0 %v10328_v49  ;;  %v2871_v18 = vld [vmem:[%s15268_s6 + $0x1fd8] sm:$0xff]  ;;  %v10417_v46 = vcombine.high %v2743_v60, %v2747_v61  ;;  %v10416_v20 = vcombine.low %v2743_v60, %v2747_v61 }
 0x5bd   : > { %9316 = vmatpush1.bf16.msra.mxu1 %v10456_v34  ;;  %9276 = vmatprep.subr.bf16.mxu0 %v10321_v55  ;;  %v2875_v30 = vld [vmem:[%s15268_s6 + $0x1ff8] sm:$0xff] }
 0x5be   : > { %9317 = vmatprep.subr.bf16.mxu1 %v10449_v31  ;;  %v10545_v48 = vcombine.high %v2871_v18, %v2875_v30  ;;  %v2735_v42 = vld [vmem:[%s15268_s6 + $0x1b98] sm:$0xff]  ;;  %v10544_v5 = vcombine.low %v2871_v18, %v2875_v30 }
 0x5bf   : > { %v2739_v57 = vld [vmem:[%s15268_s6 + $0x1bb8] sm:$0xff] }
 0x5c0   : > { %9277 = vmatpush1.bf16.msra.mxu0 %v10320_v45  ;;  %v2863_v0 = vld [vmem:[%s15268_s6 + $0x1f98] sm:$0xff]  ;;  %v10409_v52 = vcombine.high %v2735_v42, %v2739_v57  ;;  %v10408_v41 = vcombine.low %v2735_v42, %v2739_v57 }
 0x5c1   : > { %9318 = vmatpush1.bf16.msra.mxu1 %v10448_v23  ;;  %9278 = vmatprep.subr.bf16.mxu0 %v10313_v24  ;;  %v2867_v2 = vld [vmem:[%s15268_s6 + $0x1fb8] sm:$0xff] }
 0x5c2   : > { %9319 = vmatprep.subr.bf16.mxu1 %v10441_v36  ;;  %v10537_v32 = vcombine.high %v2863_v0, %v2867_v2  ;;  %v2727_v35 = vld [vmem:[%s15268_s6 + $0x1b58] sm:$0xff]  ;;  %v10536_v17 = vcombine.low %v2863_v0, %v2867_v2 }
 0x5c3   : > { %v2731_v53 = vld [vmem:[%s15268_s6 + $0x1b78] sm:$0xff] }
 0x5c4   : > { %9279 = vmatpush1.bf16.msra.mxu0 %v10312_v9  ;;  %v2855_v40 = vld [vmem:[%s15268_s6 + $0x1f58] sm:$0xff]  ;;  %v10401_v11 = vcombine.high %v2727_v35, %v2731_v53  ;;  %v10400_v31 = vcombine.low %v2727_v35, %v2731_v53 }
 0x5c5   : > { %9320 = vmatpush1.bf16.msra.mxu1 %v10440_v1  ;;  %9280 = vmatprep.subr.bf16.mxu0 %v10305_v59  ;;  %v2859_v54 = vld [vmem:[%s15268_s6 + $0x1f78] sm:$0xff] }
 0x5c6   : > { %9321 = vmatprep.subr.bf16.mxu1 %v10433_v50  ;;  %v10529_v43 = vcombine.high %v2855_v40, %v2859_v54  ;;  %v2719_v25 = vld [vmem:[%s15268_s6 + $0x1b18] sm:$0xff]  ;;  %v10528_v58 = vcombine.low %v2855_v40, %v2859_v54 }
 0x5c7   : > { %v2723_v49 = vld [vmem:[%s15268_s6 + $0x1b38] sm:$0xff] }
 0x5c8   : > { %9281 = vmatpush1.bf16.msra.mxu0 %v10304_v27  ;;  %v2847_v34 = vld [vmem:[%s15268_s6 + $0x1f18] sm:$0xff]  ;;  %v10393_v44 = vcombine.high %v2719_v25, %v2723_v49  ;;  %v10392_v36 = vcombine.low %v2719_v25, %v2723_v49 }
 0x5c9   : > { %9322 = vmatpush1.bf16.msra.mxu1 %v10432_v37  ;;  %9282 = vmatprep.subr.bf16.mxu0 %v10297_v29  ;;  %v2851_v55 = vld [vmem:[%s15268_s6 + $0x1f38] sm:$0xff] }
 0x5ca   : > { %9323 = vmatprep.subr.bf16.mxu1 %v10425_v7  ;;  %v10521_v22 = vcombine.high %v2847_v34, %v2851_v55  ;;  %v2711_v28 = vld [vmem:[%s15268_s6 + $0x1ad8] sm:$0xff]  ;;  %v10520_v4 = vcombine.low %v2847_v34, %v2851_v55 }
 0x5cb   : > { %v2715_v45 = vld [vmem:[%s15268_s6 + $0x1af8] sm:$0xff] }
 0x5cc   : > { %9283 = vmatpush1.bf16.msra.mxu0 %v10296_v47  ;;  %v2839_v23 = vld [vmem:[%s15268_s6 + $0x1ed8] sm:$0xff]  ;;  %v10385_v6 = vcombine.high %v2711_v28, %v2715_v45  ;;  %v10384_v50 = vcombine.low %v2711_v28, %v2715_v45 }
 0x5cd   : > { %9324 = vmatpush1.bf16.msra.mxu1 %v10424_v63  ;;  %9284 = vmatprep.subr.bf16.mxu0 %v10417_v46  ;;  %v2843_v24 = vld [vmem:[%s15268_s6 + $0x1ef8] sm:$0xff] }
 0x5ce   : > { %9325 = vmatprep.subr.bf16.mxu1 %v10545_v48  ;;  %v10513_v39 = vcombine.high %v2839_v23, %v2843_v24  ;;  %v2703_v8 = vld [vmem:[%s15268_s6 + $0x1a98] sm:$0xff]  ;;  %v10512_v51 = vcombine.low %v2839_v23, %v2843_v24 }
 0x5cf   : > { %v2707_v9 = vld [vmem:[%s15268_s6 + $0x1ab8] sm:$0xff] }
 0x5d0   : > { %9285 = vmatpush2.bf16.msra.mxu0 %v10416_v20  ;;  %v2831_v1 = vld [vmem:[%s15268_s6 + $0x1e98] sm:$0xff]  ;;  %v10377_v14 = vcombine.high %v2703_v8, %v2707_v9  ;;  %v10376_v7 = vcombine.low %v2703_v8, %v2707_v9 }
 0x5d1   : > { %9326 = vmatpush2.bf16.msra.mxu1 %v10544_v5  ;;  %9286 = vmatprep.subr.bf16.mxu0 %v10409_v52  ;;  %v2835_v59 = vld [vmem:[%s15268_s6 + $0x1eb8] sm:$0xff]  ;;  %v10840_v5 = vld [vmem:[%s12796_s10] sm:$0xff] }
 0x5d2   : > { %9327 = vmatprep.subr.bf16.mxu1 %v10537_v32  ;;  %v10505_v10 = vcombine.high %v2831_v1, %v2835_v59  ;;  %v2695_v26 = vld [vmem:[%s15268_s6 + $0x1a58] sm:$0xff]  ;;  %v10504_v60 = vcombine.low %v2831_v1, %v2835_v59  ;;  %v8025_v52 = vrot.slane %v10840_v5, %v11324_v16  ;;  %v8029_v32 = vrot.slane %v10840_v5, %v11315_v13 }
 0x5d3   : > { %v2699_v27 = vld [vmem:[%s15268_s6 + $0x1a78] sm:$0xff] }
 0x5d4   : > { %9287 = vmatpush2.bf16.msra.mxu0 %v10408_v41  ;;  %v2823_v37 = vld [vmem:[%s15268_s6 + $0x1e58] sm:$0xff]  ;;  %v10369_v61 = vcombine.high %v2695_v26, %v2699_v27  ;;  %v10368_v48 = vcombine.low %v2695_v26, %v2699_v27 }
 0x5d5   : > { %9328 = vmatpush2.bf16.msra.mxu1 %v10536_v17  ;;  %9288 = vmatprep.subr.bf16.mxu0 %v10401_v11  ;;  %v2827_v29 = vld [vmem:[%s15268_s6 + $0x1e78] sm:$0xff] }
 0x5d6   : > { %9329 = vmatprep.subr.bf16.mxu1 %v10529_v43  ;;  %v10497_v18 = vcombine.high %v2823_v37, %v2827_v29  ;;  %v2687_v30 = vld [vmem:[%s15268_s6 + $0x1a18] sm:$0xff]  ;;  %v10496_v42 = vcombine.low %v2823_v37, %v2827_v29 }
 0x5d7   : > { %v2691_v47 = vld [vmem:[%s15268_s6 + $0x1a38] sm:$0xff] }
 0x5d8   : > { %9289 = vmatpush2.bf16.msra.mxu0 %v10400_v31  ;;  %v2815_v63 = vld [vmem:[%s15268_s6 + $0x1e18] sm:$0xff]  ;;  %v10361_v57 = vcombine.high %v2687_v30, %v2691_v47  ;;  %v10360_v2 = vcombine.low %v2687_v30, %v2691_v47 }
 0x5d9   : > { %9330 = vmatpush2.bf16.msra.mxu1 %v10528_v58  ;;  %9290 = vmatprep.subr.bf16.mxu0 %v10393_v44  ;;  %v2819_v46 = vld [vmem:[%s15268_s6 + $0x1e38] sm:$0xff] }
 0x5da   : > { %9331 = vmatprep.subr.bf16.mxu1 %v10521_v22  ;;  %v10489_v0 = vcombine.high %v2815_v63, %v2819_v46  ;;  %v10488_v20 = vcombine.low %v2815_v63, %v2819_v46 }
 0x5dc   : > { %9291 = vmatpush2.bf16.msra.mxu0 %v10392_v36 }
 0x5dd   : > { %9332 = vmatpush2.bf16.msra.mxu1 %v10520_v4  ;;  %9292 = vmatprep.subr.bf16.mxu0 %v10385_v6 }
 0x5de   : > { %9333 = vmatprep.subr.bf16.mxu1 %v10513_v39 }
 0x5e0   : > { %9293 = vmatpush2.bf16.msra.mxu0 %v10384_v50 }
 0x5e1   : > { %9334 = vmatpush2.bf16.msra.mxu1 %v10512_v51  ;;  %9294 = vmatprep.subr.bf16.mxu0 %v10377_v14 }
 0x5e2   : > { %9335 = vmatprep.subr.bf16.mxu1 %v10505_v10 }
 0x5e4   : > { %9295 = vmatpush2.bf16.msra.mxu0 %v10376_v7 }
 0x5e5   : > { %9336 = vmatpush2.bf16.msra.mxu1 %v10504_v60  ;;  %9296 = vmatprep.subr.bf16.mxu0 %v10369_v61 }
 0x5e6   : > { %9337 = vmatprep.subr.bf16.mxu1 %v10497_v18 }
 0x5e8   : > { %9297 = vmatpush2.bf16.msra.mxu0 %v10368_v48 }
 0x5e9   : > { %9338 = vmatpush2.bf16.msra.mxu1 %v10496_v42  ;;  %9298 = vmatprep.subr.bf16.mxu0 %v10361_v57  ;;  %v9382_v42 = vrot.slane %v9360_v19, %v14271_v15 }
 0x5ea   : > { %9339 = vmatprep.subr.bf16.mxu1 %v10489_v0 }
 0x5ec   : > { %9299 = vmatpush2.bf16.msra.mxu0 %v10360_v2  ;;  %v9398_v2 = vrot.slane %v9390_v38, %v14271_v15 }
 0x5ed   : > { %9340 = vmatpush2.bf16.msra.mxu1 %v10488_v20 }
 0x5ef   : > { %v9056_v35 = vpop.f32.mrf.mxu0  ;;  %9301 = vmatmul.mubr.bf16.vlgmr.msra.gmra.mxu0 %v12820_v21 }
 0x5f0   : > { %v9057_v53 = vadd.f32 %v9056_v35, %v8025_v52  ;;  %v9097_v40 = vpop.f32.mrf.mxu1  ;;  %9342 = vmatmul.mubr.bf16.vlgmr.msra.gmra.mxu1 %v12822_v12 }
 0x5f1   : > { %v9058_v54 = vpop.f32.mrf.mxu0 }
 0x5f2   : > { %v9098_v41 = vadd.f32 %v9097_v40, %v9057_v53  ;;  %v9059_v17 = vadd.f32 %v9058_v54, %v8029_v32  ;;  %v9099_v11 = vpop.f32.mrf.mxu1 }
 0x5f3   : > { %v9060_v43 = vpop.f32.mrf.mxu0 }
 0x5f4   : > { %v9100_v25 = vadd.f32 %v9099_v11, %v9059_v17  ;;  %v9101_v49 = vpop.f32.mrf.mxu1 }
 0x5f5   : > { %v9061_v34 = vpop.f32.mrf.mxu0 }
 0x5f6   : > { %v9102_v55 = vpop.f32.mrf.mxu1 }
 0x62f   : > { %v9138_v16 = vpop.f32.mrf.mxu0 }
 0x630   : > { %v9139_v31 = vadd.f32 %v9138_v16, %v9098_v41  ;;  %v9179_v58 = vpop.f32.mrf.mxu1 }
 0x631   : > { %v9140_v13 = vpop.f32.mrf.mxu0 }
 0x632   : > { %v9180_v44 = vadd.f32 %v9179_v58, %v9139_v31  ;;  %v9141_v22 = vadd.f32 %v9140_v13, %v9100_v25  ;;  %v9181_v21 = vpop.f32.mrf.mxu1 }
 0x633   : > { %v9142_v28 = vpop.f32.mrf.mxu0 }
 0x634   : > { %v9182_v45 = vadd.f32 %v9181_v21, %v9141_v22  ;;  %v9183_v23 = vpop.f32.mrf.mxu1 }
 0x635   : > { %v9143_v12 = vpop.f32.mrf.mxu0 }
 0x636   : > { %v9184_v24 = vpop.f32.mrf.mxu1 }
 0x66f   : > { %v9220_v36 = vpop.f32.mrf.mxu0 }
 0x670   : > { %v9261_v4 = vpop.f32.mrf.mxu1  ;;  %v9221_v50 = vadd.f32 %v9220_v36, %v9180_v44 }
 0x671   : > { %v9222_v6 = vpop.f32.mrf.mxu0 }
 0x672   : > { %v9263_v39 = vpop.f32.mrf.mxu1  ;;  %v9223_v51 = vadd.f32 %v9222_v6, %v9182_v45  ;;  %v9262_v14 = vadd.f32 %v9261_v4, %v9221_v50 }
 0x673   : > { %v9224_v8 = vpop.f32.mrf.mxu0 }
 0x674   : > { %v9265_v9 = vpop.f32.mrf.mxu1  ;;  %v9264_v26 = vadd.f32 %v9263_v39, %v9223_v51 }
 0x675   : > { %v9225_v1 = vpop.f32.mrf.mxu0 }
 0x676   : > { %v9266_v59 = vpop.f32.mrf.mxu1 }
 0x6af   : > { %v9302_v10 = vpop.f32.mrf.mxu0 }
 0x6b0   : > { %v9303_v27 = vadd.f32 %v9302_v10, %v9262_v14  ;;  %v9343_v37 = vpop.f32.mrf.mxu1 }
 0x6b1   : > { %v9304_v29 = vpop.f32.mrf.mxu0 }
 0x6b2   : > { %v9305_v7 = vadd.f32 %v9304_v29, %v9264_v26  ;;  %v9345_v60 = vpop.f32.mrf.mxu1  ;;  %v9344_v18 = vadd.f32 %v9343_v37, %v9303_v27 }
 0x6b3   : > { %v9306_v61 = vpop.f32.mrf.mxu0 }
 0x6b4   : > { %v9346_v30 = vadd.f32 %v9345_v60, %v9305_v7  ;;  %v9347_v47 = vpop.f32.mrf.mxu1 }
 0x6b5   : > { %v9307_v63 = vpop.f32.mrf.mxu0 }
 0x6b6   : > { %v9361_v46 = vcombine.low %v9344_v18, %v9346_v30  ;;  %v9348_v48 = vpop.f32.mrf.mxu1 }
 0x6b8   : > { %v9389_v57 = vrot.slane %v9361_v46, %v14271_v15 }
 0x6ba   : > { %v9391_v0 = vcombine.low %v9382_v42, %v9389_v57 }
 0x6bc   : > { %v9405_v20 = vrot.slane %v9391_v0, %v14271_v15 }
 0x6be   : > { %v9406_v5 = vcombine.low %v9398_v2, %v9405_v20 }
 0x6c0   : > { %9408 = vst [vmem:[%s290_s26] sm:$0xff] %v9406_v5 }
 0x6c1 PF: > { %s17_s24 = sadd.s32 1, %s10847_s24  }
 0x6c2   : > { %p14_p4 = scmp.ge.s32.totalorder %s17_s24, 4  }
 0x6c4   :  { %16 = sbr.rel (!%p14_p4) target bundleno = 1 (0x1), region = 81 }

</bundles_post_ra>
